<compile_context>
chip_gen: v6e
topology: v6e:2x2x1
jax: 0.10.0
libtpu: 0.0.40
codegen_flags: <defaults>
</compile_context>

<pallas_src>
import math

import jax
import jax.numpy as jnp
import numpy as np
from jax.experimental import pallas as pl
from jax.experimental.pallas import tpu as pltpu

EMB_DIM = 32
NUM_HEADS = 4
HEAD_DIM = EMB_DIM // NUM_HEADS
NUM_ITERATIONS = 2
FF_DIM = EMB_DIM * 4
LN_EPS = 1e-5


def _layernorm_t(x, gamma, beta):
    """LayerNorm over the feature axis in transposed layout: x (E, R), gamma/beta (E, 1)."""
    mu = jnp.mean(x, axis=0, keepdims=True)
    xc = x - mu
    var = jnp.mean(xc * xc, axis=0, keepdims=True)
    return xc * jax.lax.rsqrt(var + LN_EPS) * gamma + beta


def _make_kernel(B, L, S, mxu_dtype):
    E, H, DH, FF = EMB_DIM, NUM_HEADS, HEAD_DIM, FF_DIM

    def kernel(ex_ref, img_ref, wA_ref, w2_ref, b_ref, out_ref):
        f32 = jnp.float32

        # ---- constant weight/bias slabs (sublane-tile-aligned slices) ------
        wA = wA_ref[...]                         # (4E + FF, E) = (256, 32)
        wq = wA[0:E]                             # (32, 32), 1/sqrt(DH) pre-folded
        wkv = wA[E:3 * E]                        # (64, 32)  [wk; wv]
        wo = wA[3 * E:4 * E]                     # (32, 32)
        w1 = wA[4 * E:4 * E + FF]                # (128, 32)
        w2 = w2_ref[...]                         # (32, 128)

        b = b_ref[...]                           # (7E + FF, 1) = (352, 1) f32
        bq = b[0:E]
        bkv = b[E:3 * E]
        bo = b[3 * E:4 * E]
        b1 = b[4 * E:4 * E + FF]
        b2 = b[4 * E + FF:5 * E + FF]
        gamma = b[5 * E + FF:6 * E + FF]
        beta = b[6 * E + FF:7 * E + FF]

        x_t = ex_ref[...]                        # (E, B*L)  lane-dense
        img_t = img_ref[...]                     # (E, B*S)  lane-dense

        # ---- k/v projection: fused, loop-invariant, lane-dense output ------
        kv_t = jnp.dot(wkv, img_t, preferred_element_type=f32) + bkv   # (2E, B*S)
        k3 = kv_t[0:E].T.reshape(B, S, E)        # (B, S, E) f32
        v3 = kv_t[E:2 * E].T.reshape(B, S, E)
        k_heads = [k3[:, :, h * DH:(h + 1) * DH] for h in range(H)]
        v_heads = [v3[:, :, h * DH:(h + 1) * DH] for h in range(H)]

        for _ in range(NUM_ITERATIONS):
            # q projection (transposed, lane-dense output; scale pre-folded)
            q_t = jnp.dot(wq, x_t.astype(mxu_dtype),
                          preferred_element_type=f32) + bq             # (E, B*L)
            q3 = q_t.T.reshape(B, L, E)                                 # (B, L, E)

            # per-head attention, batched over all B batch elements (f32)
            ctx_rows = []
            for h in range(H):
                qh = q3[:, :, h * DH:(h + 1) * DH]                      # (B, L, DH)
                s = jnp.einsum('bld,bsd->bls', qh, k_heads[h],
                               preferred_element_type=f32)              # (B, L, S)
                s = s - jnp.max(s, axis=-1, keepdims=True)
                p = jnp.exp(s)
                p = p * pl.reciprocal(jnp.sum(p, axis=-1, keepdims=True),
                                      approx=False)
                ctx_h = jnp.einsum('bls,bsd->bld', p, v_heads[h],
                                   preferred_element_type=f32)          # (B, L, DH)
                ctx_rows.append(ctx_h.reshape(B * L, DH).T)             # (DH, B*L)
            # sublane-tile-aligned concat of heads -> single K=E out-projection
            ctx_t = jnp.concatenate(ctx_rows, axis=0)                   # (E, B*L)

            attn_t = jnp.dot(wo, ctx_t.astype(mxu_dtype),
                             preferred_element_type=f32) + bo           # (E, B*L)
            x_t = _layernorm_t(attn_t, gamma, beta)

            h1 = jnp.dot(w1, x_t.astype(mxu_dtype),
                         preferred_element_type=f32) + b1               # (FF, B*L)
            h1 = jnp.maximum(h1, 0.0)
            x_t = jnp.dot(w2, h1.astype(mxu_dtype),
                          preferred_element_type=f32) + b2              # (E, B*L)
            x_t = _layernorm_t(x_t, gamma, beta)

        # Already in the lane-dense (E, B*L) output layout: no final transpose.
        out_ref[...] = x_t.astype(out_ref.dtype)

    return kernel


def _round_up(a, b):
    return -(-a // b) * b


def _lane_block_multiple(L, S):
    """Smallest batch-block multiple m with (m*L) % 128 == 0 and (m*S) % 128 == 0."""
    nl = 128 // math.gcd(L, 128)
    ns = 128 // math.gcd(S, 128)
    return nl * ns // math.gcd(nl, ns)


def iefl_forward(exemplar_lne, image_sne, params, block_batch=None,
                 mxu_dtype=jnp.bfloat16):
    """exemplar_lne: (L, N, E), image_sne: (S, N, E) -- PyTorch (seq, batch, emb) layout."""
    L, N, E = exemplar_lne.shape
    S = image_sne.shape[0]
    assert E == EMB_DIM and image_sne.shape[1] == N and image_sne.shape[2] == E

    # ---- batch-block selection ---------------------------------------------
    m = _lane_block_multiple(L, S)
    if block_batch is None:
        rows_target = max(1, 1024 // L)            # ~1K exemplar rows per grid step
        vmem_budget = 24 * 1024 * 1024             # conservative for v7x (64 MiB physical)
        per_b = 4 * 128 * (16 * L + 10 * S)        # crude padded-intermediate bytes / batch
        b_cap = max(1, vmem_budget // per_b)
        block_batch = min(rows_target, -(-N // 2), b_cap)   # grid >= 2 -> both v7x TCs busy
    B_blk = _round_up(max(1, int(block_batch)), m)
    G = -(-N // B_blk)
    N_pad = G * B_blk

    out_dtype = exemplar_lne.dtype

    # ---- lane-dense (features, batch*seq) inputs ----------------------------
    ex_t = jnp.transpose(exemplar_lne, (2, 1, 0))          # (E, N, L)
    img_t = jnp.transpose(image_sne, (2, 1, 0))            # (E, N, S)
    if N_pad != N:
        ex_t = jnp.pad(ex_t, ((0, 0), (0, N_pad - N), (0, 0)))
        img_t = jnp.pad(img_t, ((0, 0), (0, N_pad - N), (0, 0)))
    ex_t = ex_t.reshape(E, N_pad * L).astype(mxu_dtype)
    img_t = img_t.reshape(E, N_pad * S).astype(mxu_dtype)

    # ---- pack weights (sublane-stacked, attention scale folded into q) ------
    scale = 1.0 / math.sqrt(HEAD_DIM)
    wq, wk, wv = jnp.split(params["in_proj_weight"], 3, axis=0)
    bq, bk, bv = jnp.split(params["in_proj_bias"], 3)
    wA = jnp.concatenate(
        [wq * scale, wk, wv, params["out_proj_weight"], params["ff_w1"]],
        axis=0).astype(mxu_dtype)                                       # (4E+FF, E)
    w2 = params["ff_w2"].astype(mxu_dtype)                              # (E, FF)
    bias = jnp.concatenate(
        [bq * scale, bk, bv, params["out_proj_bias"], params["ff_b1"],
         params["ff_b2"], params["norm_weight"], params["norm_bias"]],
        axis=0).astype(jnp.float32).reshape(7 * E + FF_DIM, 1)          # (352, 1)

    kernel = _make_kernel(B_blk, L, S, mxu_dtype)

    out = pl.pallas_call(
        kernel,
        out_shape=jax.ShapeDtypeStruct((E, N_pad * L), out_dtype),
        grid=(G,),
        in_specs=[
            pl.BlockSpec((E, B_blk * L), lambda n: (0, n)),
            pl.BlockSpec((E, B_blk * S), lambda n: (0, n)),
            pl.BlockSpec((4 * E + FF_DIM, E), lambda n: (0, 0)),
            pl.BlockSpec((E, FF_DIM), lambda n: (0, 0)),
            pl.BlockSpec((7 * E + FF_DIM, 1), lambda n: (0, 0)),
        ],
        out_specs=pl.BlockSpec((E, B_blk * L), lambda n: (0, n)),
        compiler_params=pltpu.CompilerParams(
            dimension_semantics=("parallel",),
            vmem_limit_bytes=48 * 1024 * 1024),
    )(ex_t, img_t, wA, w2, bias)

    # (E, N_pad*L) -> (L, N, E): single permute, only to honor the torch layout.
    out = out.reshape(E, N_pad, L)[:, :N, :]
    return jnp.transpose(out, (2, 1, 0))


def iefl_reference(exemplar_lne, image_sne, params):
    """Pure-JAX f32 reference mirroring torch semantics, for correctness check."""
    wq, wk, wv = jnp.split(params["in_proj_weight"], 3, axis=0)
    bq, bk, bv = jnp.split(params["in_proj_bias"], 3)
    wo, bo = params["out_proj_weight"], params["out_proj_bias"]
    gamma, beta = params["norm_weight"], params["norm_bias"]
    w1, b1 = params["ff_w1"], params["ff_b1"]
    w2, b2 = params["ff_w2"], params["ff_b2"]
    scale = 1.0 / math.sqrt(HEAD_DIM)

    def ln(x):
        mu = jnp.mean(x, axis=-1, keepdims=True)
        var = jnp.mean((x - mu) ** 2, axis=-1, keepdims=True)
        return (x - mu) * jax.lax.rsqrt(var + LN_EPS) * gamma + beta

    x = exemplar_lne      # (L, N, E)
    img = image_sne       # (S, N, E)
    L, N, E = x.shape
    S = img.shape[0]
    for _ in range(NUM_ITERATIONS):
        q = x @ wq.T + bq
        k = img @ wk.T + bk
        v = img @ wv.T + bv
        qh = q.reshape(L, N, NUM_HEADS, HEAD_DIM)
        kh = k.reshape(S, N, NUM_HEADS, HEAD_DIM)
        vh = v.reshape(S, N, NUM_HEADS, HEAD_DIM)
        s = jnp.einsum("lnhd,snhd->nhls", qh * scale, kh)
        p = jax.nn.softmax(s, axis=-1)
        o = jnp.einsum("nhls,snhd->lnhd", p, vh).reshape(L, N, E)
        attn = o @ wo.T + bo
        x = ln(attn)
        x = jnp.maximum(x @ w1.T + b1, 0.0) @ w2.T + b2
        x = ln(x)
    return x


def make_params(key):
    ks = jax.random.split(key, 8)
    scale = 0.1
    return {
        "in_proj_weight": scale * jax.random.normal(ks[0], (3 * EMB_DIM, EMB_DIM), jnp.float32),
        "in_proj_bias":   scale * jax.random.normal(ks[1], (3 * EMB_DIM,), jnp.float32),
        "out_proj_weight": scale * jax.random.normal(ks[2], (EMB_DIM, EMB_DIM), jnp.float32),
        "out_proj_bias":   scale * jax.random.normal(ks[3], (EMB_DIM,), jnp.float32),
        "norm_weight": jnp.ones((EMB_DIM,), jnp.float32),
        "norm_bias":   jnp.zeros((EMB_DIM,), jnp.float32),
        "ff_w1": scale * jax.random.normal(ks[4], (FF_DIM, EMB_DIM), jnp.float32),
        "ff_b1": scale * jax.random.normal(ks[5], (FF_DIM,), jnp.float32),
        "ff_w2": scale * jax.random.normal(ks[6], (EMB_DIM, FF_DIM), jnp.float32),
        "ff_b2": scale * jax.random.normal(ks[7], (EMB_DIM,), jnp.float32),
    }


if __name__ == "__main__":
    key = jax.random.PRNGKey(0)
    k_ex, k_img, k_par = jax.random.split(key, 3)

    L, S, N = 8, 16, 32   # exemplar seq, image seq, batch
    exemplar = jax.random.normal(k_ex, (L, N, EMB_DIM), jnp.float32)
    image = jax.random.normal(k_img, (S, N, EMB_DIM), jnp.float32)
    params = make_params(k_par)

    # Default block selection: B_blk=16 -> grid=(2,), 128/256-lane-dense tiles.
    out = iefl_forward(exemplar, image, params)
    out = jax.block_until_ready(out)

    ref = jax.block_until_ready(iefl_reference(exemplar, image, params))
    assert out.shape == (L, N, EMB_DIM)
    # bf16 MXU operands (f32 accumulation) -> slightly looser tolerance than pure f32.
    np.testing.assert_allclose(np.asarray(out), np.asarray(ref),
                               rtol=3e-2, atol=3e-2)
    print("KERNEL_OK")
</pallas_src>

<mosaic_0001>
module attributes {stable_mosaic.version = 11 : i64} {
  func.func @kernel(%arg0: i32, %arg1: memref<32x128xbf16, #tpu.memory_space<vmem>>, %arg2: memref<32x256xbf16, #tpu.memory_space<vmem>>, %arg3: memref<256x32xbf16, #tpu.memory_space<vmem>>, %arg4: memref<32x128xbf16, #tpu.memory_space<vmem>>, %arg5: memref<352x1xf32, #tpu.memory_space<vmem>>, %arg6: memref<32x128xf32, #tpu.memory_space<vmem>>) attributes {dimension_semantics = [#tpu.dimension_semantics<parallel>], iteration_bounds = array<i64: 2>, scalar_prefetch = 0 : i64, scratch_operands = 0 : i64, tpu.core_type = #tpu.core_type<tc>, window_params = [{transform_indices = @transform_0, window_bounds = array<i64: 32, 128>}, {transform_indices = @transform_1, window_bounds = array<i64: 32, 256>}, {pipeline_mode = #tpu.pipeline_mode<synchronous>, transform_indices = @transform_2, window_bounds = array<i64: 256, 32>}, {pipeline_mode = #tpu.pipeline_mode<synchronous>, transform_indices = @transform_3, window_bounds = array<i64: 32, 128>}, {pipeline_mode = #tpu.pipeline_mode<synchronous>, transform_indices = @transform_4, window_bounds = array<i64: 352, 1>}, {transform_indices = @transform_5, window_bounds = array<i64: 32, 128>}]} {
    %c0 = arith.constant 0 : index
    %c0_0 = arith.constant 0 : index
    %0 = vector.load %arg3[%c0, %c0_0] : memref<256x32xbf16, #tpu.memory_space<vmem>>, vector<256x32xbf16>
    %1 = vector.extract_strided_slice %0 {offsets = [0, 0], sizes = [32, 32], strides = [1, 1]} : vector<256x32xbf16> to vector<32x32xbf16>
    %2 = vector.extract_strided_slice %0 {offsets = [32, 0], sizes = [64, 32], strides = [1, 1]} : vector<256x32xbf16> to vector<64x32xbf16>
    %3 = vector.extract_strided_slice %0 {offsets = [96, 0], sizes = [32, 32], strides = [1, 1]} : vector<256x32xbf16> to vector<32x32xbf16>
    %4 = vector.extract_strided_slice %0 {offsets = [128, 0], sizes = [128, 32], strides = [1, 1]} : vector<256x32xbf16> to vector<128x32xbf16>
    %c0_1 = arith.constant 0 : index
    %c0_2 = arith.constant 0 : index
    %5 = vector.load %arg4[%c0_1, %c0_2] : memref<32x128xbf16, #tpu.memory_space<vmem>>, vector<32x128xbf16>
    %c0_3 = arith.constant 0 : index
    %c0_4 = arith.constant 0 : index
    %6 = vector.load %arg5[%c0_3, %c0_4] : memref<352x1xf32, #tpu.memory_space<vmem>>, vector<352x1xf32>
    %7 = vector.extract_strided_slice %6 {offsets = [0, 0], sizes = [32, 1], strides = [1, 1]} : vector<352x1xf32> to vector<32x1xf32>
    %8 = vector.extract_strided_slice %6 {offsets = [32, 0], sizes = [64, 1], strides = [1, 1]} : vector<352x1xf32> to vector<64x1xf32>
    %9 = vector.extract_strided_slice %6 {offsets = [96, 0], sizes = [32, 1], strides = [1, 1]} : vector<352x1xf32> to vector<32x1xf32>
    %10 = vector.extract_strided_slice %6 {offsets = [128, 0], sizes = [128, 1], strides = [1, 1]} : vector<352x1xf32> to vector<128x1xf32>
    %11 = vector.extract_strided_slice %6 {offsets = [256, 0], sizes = [32, 1], strides = [1, 1]} : vector<352x1xf32> to vector<32x1xf32>
    %12 = vector.extract_strided_slice %6 {offsets = [288, 0], sizes = [32, 1], strides = [1, 1]} : vector<352x1xf32> to vector<32x1xf32>
    %13 = vector.extract_strided_slice %6 {offsets = [320, 0], sizes = [32, 1], strides = [1, 1]} : vector<352x1xf32> to vector<32x1xf32>
    %c0_5 = arith.constant 0 : index
    %c0_6 = arith.constant 0 : index
    %14 = vector.load %arg1[%c0_5, %c0_6] : memref<32x128xbf16, #tpu.memory_space<vmem>>, vector<32x128xbf16>
    %c0_7 = arith.constant 0 : index
    %c0_8 = arith.constant 0 : index
    %15 = vector.load %arg2[%c0_7, %c0_8] : memref<32x256xbf16, #tpu.memory_space<vmem>>, vector<32x256xbf16>
    %cst = arith.constant dense<0.000000e+00> : vector<64x256xf32>
    %16 = tpu.matmul %2, %15, %cst {dimension_numbers = #tpu.dot_dimension_numbers<[1], [0], [0], [1], [0, 0, 1, 1], [], []>} : vector<64x32xbf16>, vector<32x256xbf16>, vector<64x256xf32> -> vector<64x256xf32>
    %17 = vector.broadcast %8 : vector<64x1xf32> to vector<64x256xf32>
    %18 = arith.addf %16, %17 : vector<64x256xf32>
    %19 = vector.extract_strided_slice %18 {offsets = [0, 0], sizes = [32, 256], strides = [1, 1]} : vector<64x256xf32> to vector<32x256xf32>
    %20 = tpu.transpose %19, [1, 0] : vector<32x256xf32> -> vector<256x32xf32>
    %21 = vector.shape_cast %20 : vector<256x32xf32> to vector<16x16x32xf32>
    %22 = vector.extract_strided_slice %18 {offsets = [32, 0], sizes = [32, 256], strides = [1, 1]} : vector<64x256xf32> to vector<32x256xf32>
    %23 = tpu.transpose %22, [1, 0] : vector<32x256xf32> -> vector<256x32xf32>
    %24 = vector.shape_cast %23 : vector<256x32xf32> to vector<16x16x32xf32>
    %25 = vector.extract_strided_slice %21 {offsets = [0, 0, 0], sizes = [16, 16, 8], strides = [1, 1, 1]} : vector<16x16x32xf32> to vector<16x16x8xf32>
    %26 = vector.extract_strided_slice %21 {offsets = [0, 0, 8], sizes = [16, 16, 8], strides = [1, 1, 1]} : vector<16x16x32xf32> to vector<16x16x8xf32>
    %27 = vector.extract_strided_slice %21 {offsets = [0, 0, 16], sizes = [16, 16, 8], strides = [1, 1, 1]} : vector<16x16x32xf32> to vector<16x16x8xf32>
    %28 = vector.extract_strided_slice %21 {offsets = [0, 0, 24], sizes = [16, 16, 8], strides = [1, 1, 1]} : vector<16x16x32xf32> to vector<16x16x8xf32>
    %29 = vector.extract_strided_slice %24 {offsets = [0, 0, 0], sizes = [16, 16, 8], strides = [1, 1, 1]} : vector<16x16x32xf32> to vector<16x16x8xf32>
    %30 = vector.extract_strided_slice %24 {offsets = [0, 0, 8], sizes = [16, 16, 8], strides = [1, 1, 1]} : vector<16x16x32xf32> to vector<16x16x8xf32>
    %31 = vector.extract_strided_slice %24 {offsets = [0, 0, 16], sizes = [16, 16, 8], strides = [1, 1, 1]} : vector<16x16x32xf32> to vector<16x16x8xf32>
    %32 = vector.extract_strided_slice %24 {offsets = [0, 0, 24], sizes = [16, 16, 8], strides = [1, 1, 1]} : vector<16x16x32xf32> to vector<16x16x8xf32>
    %cst_9 = arith.constant dense<0.000000e+00> : vector<32x128xf32>
    %33 = tpu.matmul %1, %14, %cst_9 {dimension_numbers = #tpu.dot_dimension_numbers<[1], [0], [0], [1], [0, 0, 1, 1], [], []>} : vector<32x32xbf16>, vector<32x128xbf16>, vector<32x128xf32> -> vector<32x128xf32>
    %34 = vector.broadcast %7 : vector<32x1xf32> to vector<32x128xf32>
    %35 = arith.addf %33, %34 : vector<32x128xf32>
    %36 = tpu.transpose %35, [1, 0] : vector<32x128xf32> -> vector<128x32xf32>
    %37 = vector.shape_cast %36 : vector<128x32xf32> to vector<16x8x32xf32>
    %38 = vector.extract_strided_slice %37 {offsets = [0, 0, 0], sizes = [16, 8, 8], strides = [1, 1, 1]} : vector<16x8x32xf32> to vector<16x8x8xf32>
    "tpu.trace_start"() <{level = 10 : i32, message = "bld,bsd->bls"}> : () -> ()
    %cst_10 = arith.constant dense<0.000000e+00> : vector<16x8x16xf32>
    %39 = tpu.matmul %38, %25, %cst_10 {dimension_numbers = #tpu.dot_dimension_numbers<[2], [2], [1], [1], [0, 0, 0, 1, 1, 1], [0], [0]>} : vector<16x8x8xf32>, vector<16x16x8xf32>, vector<16x8x16xf32> -> vector<16x8x16xf32>
    "tpu.trace_stop"() : () -> ()
    %cst_11 = arith.constant dense<0xFF800000> : vector<16x8xf32>
    %40 = vector.multi_reduction <maximumf>, %39, %cst_11 [2] : vector<16x8x16xf32> to vector<16x8xf32>
    %41 = vector.shape_cast %40 : vector<16x8xf32> to vector<16x8x1xf32>
    %42 = vector.broadcast %41 : vector<16x8x1xf32> to vector<16x8x16xf32>
    %43 = arith.subf %39, %42 : vector<16x8x16xf32>
    %44 = math.exp %43 : vector<16x8x16xf32>
    %cst_12 = arith.constant dense<0.000000e+00> : vector<16x8xf32>
    %45 = vector.multi_reduction <add>, %44, %cst_12 [2] : vector<16x8x16xf32> to vector<16x8xf32>
    %46 = vector.shape_cast %45 : vector<16x8xf32> to vector<16x8x1xf32>
    %47 = tpu.reciprocal %46 : vector<16x8x1xf32> -> vector<16x8x1xf32>
    %48 = vector.broadcast %47 : vector<16x8x1xf32> to vector<16x8x16xf32>
    %49 = arith.mulf %44, %48 : vector<16x8x16xf32>
    "tpu.trace_start"() <{level = 10 : i32, message = "bls,bsd->bld"}> : () -> ()
    %cst_13 = arith.constant dense<0.000000e+00> : vector<16x8x8xf32>
    %50 = tpu.matmul %49, %29, %cst_13 {dimension_numbers = #tpu.dot_dimension_numbers<[2], [1], [1], [2], [0, 0, 0, 1, 1, 2], [0], [0]>} : vector<16x8x16xf32>, vector<16x16x8xf32>, vector<16x8x8xf32> -> vector<16x8x8xf32>
    "tpu.trace_stop"() : () -> ()
    %51 = vector.shape_cast %50 : vector<16x8x8xf32> to vector<128x8xf32>
    %52 = tpu.transpose %51, [1, 0] : vector<128x8xf32> -> vector<8x128xf32>
    %53 = vector.extract_strided_slice %37 {offsets = [0, 0, 8], sizes = [16, 8, 8], strides = [1, 1, 1]} : vector<16x8x32xf32> to vector<16x8x8xf32>
    "tpu.trace_start"() <{level = 10 : i32, message = "bld,bsd->bls"}> : () -> ()
    %cst_14 = arith.constant dense<0.000000e+00> : vector<16x8x16xf32>
    %54 = tpu.matmul %53, %26, %cst_14 {dimension_numbers = #tpu.dot_dimension_numbers<[2], [2], [1], [1], [0, 0, 0, 1, 1, 1], [0], [0]>} : vector<16x8x8xf32>, vector<16x16x8xf32>, vector<16x8x16xf32> -> vector<16x8x16xf32>
    "tpu.trace_stop"() : () -> ()
    %cst_15 = arith.constant dense<0xFF800000> : vector<16x8xf32>
    %55 = vector.multi_reduction <maximumf>, %54, %cst_15 [2] : vector<16x8x16xf32> to vector<16x8xf32>
    %56 = vector.shape_cast %55 : vector<16x8xf32> to vector<16x8x1xf32>
    %57 = vector.broadcast %56 : vector<16x8x1xf32> to vector<16x8x16xf32>
    %58 = arith.subf %54, %57 : vector<16x8x16xf32>
    %59 = math.exp %58 : vector<16x8x16xf32>
    %cst_16 = arith.constant dense<0.000000e+00> : vector<16x8xf32>
    %60 = vector.multi_reduction <add>, %59, %cst_16 [2] : vector<16x8x16xf32> to vector<16x8xf32>
    %61 = vector.shape_cast %60 : vector<16x8xf32> to vector<16x8x1xf32>
    %62 = tpu.reciprocal %61 : vector<16x8x1xf32> -> vector<16x8x1xf32>
    %63 = vector.broadcast %62 : vector<16x8x1xf32> to vector<16x8x16xf32>
    %64 = arith.mulf %59, %63 : vector<16x8x16xf32>
    "tpu.trace_start"() <{level = 10 : i32, message = "bls,bsd->bld"}> : () -> ()
    %cst_17 = arith.constant dense<0.000000e+00> : vector<16x8x8xf32>
    %65 = tpu.matmul %64, %30, %cst_17 {dimension_numbers = #tpu.dot_dimension_numbers<[2], [1], [1], [2], [0, 0, 0, 1, 1, 2], [0], [0]>} : vector<16x8x16xf32>, vector<16x16x8xf32>, vector<16x8x8xf32> -> vector<16x8x8xf32>
    "tpu.trace_stop"() : () -> ()
    %66 = vector.shape_cast %65 : vector<16x8x8xf32> to vector<128x8xf32>
    %67 = tpu.transpose %66, [1, 0] : vector<128x8xf32> -> vector<8x128xf32>
    %68 = vector.extract_strided_slice %37 {offsets = [0, 0, 16], sizes = [16, 8, 8], strides = [1, 1, 1]} : vector<16x8x32xf32> to vector<16x8x8xf32>
    "tpu.trace_start"() <{level = 10 : i32, message = "bld,bsd->bls"}> : () -> ()
    %cst_18 = arith.constant dense<0.000000e+00> : vector<16x8x16xf32>
    %69 = tpu.matmul %68, %27, %cst_18 {dimension_numbers = #tpu.dot_dimension_numbers<[2], [2], [1], [1], [0, 0, 0, 1, 1, 1], [0], [0]>} : vector<16x8x8xf32>, vector<16x16x8xf32>, vector<16x8x16xf32> -> vector<16x8x16xf32>
    "tpu.trace_stop"() : () -> ()
    %cst_19 = arith.constant dense<0xFF800000> : vector<16x8xf32>
    %70 = vector.multi_reduction <maximumf>, %69, %cst_19 [2] : vector<16x8x16xf32> to vector<16x8xf32>
    %71 = vector.shape_cast %70 : vector<16x8xf32> to vector<16x8x1xf32>
    %72 = vector.broadcast %71 : vector<16x8x1xf32> to vector<16x8x16xf32>
    %73 = arith.subf %69, %72 : vector<16x8x16xf32>
    %74 = math.exp %73 : vector<16x8x16xf32>
    %cst_20 = arith.constant dense<0.000000e+00> : vector<16x8xf32>
    %75 = vector.multi_reduction <add>, %74, %cst_20 [2] : vector<16x8x16xf32> to vector<16x8xf32>
    %76 = vector.shape_cast %75 : vector<16x8xf32> to vector<16x8x1xf32>
    %77 = tpu.reciprocal %76 : vector<16x8x1xf32> -> vector<16x8x1xf32>
    %78 = vector.broadcast %77 : vector<16x8x1xf32> to vector<16x8x16xf32>
    %79 = arith.mulf %74, %78 : vector<16x8x16xf32>
    "tpu.trace_start"() <{level = 10 : i32, message = "bls,bsd->bld"}> : () -> ()
    %cst_21 = arith.constant dense<0.000000e+00> : vector<16x8x8xf32>
    %80 = tpu.matmul %79, %31, %cst_21 {dimension_numbers = #tpu.dot_dimension_numbers<[2], [1], [1], [2], [0, 0, 0, 1, 1, 2], [0], [0]>} : vector<16x8x16xf32>, vector<16x16x8xf32>, vector<16x8x8xf32> -> vector<16x8x8xf32>
    "tpu.trace_stop"() : () -> ()
    %81 = vector.shape_cast %80 : vector<16x8x8xf32> to vector<128x8xf32>
    %82 = tpu.transpose %81, [1, 0] : vector<128x8xf32> -> vector<8x128xf32>
    %83 = vector.extract_strided_slice %37 {offsets = [0, 0, 24], sizes = [16, 8, 8], strides = [1, 1, 1]} : vector<16x8x32xf32> to vector<16x8x8xf32>
    "tpu.trace_start"() <{level = 10 : i32, message = "bld,bsd->bls"}> : () -> ()
    %cst_22 = arith.constant dense<0.000000e+00> : vector<16x8x16xf32>
    %84 = tpu.matmul %83, %28, %cst_22 {dimension_numbers = #tpu.dot_dimension_numbers<[2], [2], [1], [1], [0, 0, 0, 1, 1, 1], [0], [0]>} : vector<16x8x8xf32>, vector<16x16x8xf32>, vector<16x8x16xf32> -> vector<16x8x16xf32>
    "tpu.trace_stop"() : () -> ()
    %cst_23 = arith.constant dense<0xFF800000> : vector<16x8xf32>
    %85 = vector.multi_reduction <maximumf>, %84, %cst_23 [2] : vector<16x8x16xf32> to vector<16x8xf32>
    %86 = vector.shape_cast %85 : vector<16x8xf32> to vector<16x8x1xf32>
    %87 = vector.broadcast %86 : vector<16x8x1xf32> to vector<16x8x16xf32>
    %88 = arith.subf %84, %87 : vector<16x8x16xf32>
    %89 = math.exp %88 : vector<16x8x16xf32>
    %cst_24 = arith.constant dense<0.000000e+00> : vector<16x8xf32>
    %90 = vector.multi_reduction <add>, %89, %cst_24 [2] : vector<16x8x16xf32> to vector<16x8xf32>
    %91 = vector.shape_cast %90 : vector<16x8xf32> to vector<16x8x1xf32>
    %92 = tpu.reciprocal %91 : vector<16x8x1xf32> -> vector<16x8x1xf32>
    %93 = vector.broadcast %92 : vector<16x8x1xf32> to vector<16x8x16xf32>
    %94 = arith.mulf %89, %93 : vector<16x8x16xf32>
    "tpu.trace_start"() <{level = 10 : i32, message = "bls,bsd->bld"}> : () -> ()
    %cst_25 = arith.constant dense<0.000000e+00> : vector<16x8x8xf32>
    %95 = tpu.matmul %94, %32, %cst_25 {dimension_numbers = #tpu.dot_dimension_numbers<[2], [1], [1], [2], [0, 0, 0, 1, 1, 2], [0], [0]>} : vector<16x8x16xf32>, vector<16x16x8xf32>, vector<16x8x8xf32> -> vector<16x8x8xf32>
    "tpu.trace_stop"() : () -> ()
    %96 = vector.shape_cast %95 : vector<16x8x8xf32> to vector<128x8xf32>
    %97 = tpu.transpose %96, [1, 0] : vector<128x8xf32> -> vector<8x128xf32>
    %98 = tpu.concatenate %52, %67, %82, %97 in 0 : vector<8x128xf32>, vector<8x128xf32>, vector<8x128xf32>, vector<8x128xf32> -> vector<32x128xf32>
    %99 = arith.truncf %98 : vector<32x128xf32> to vector<32x128xbf16>
    %cst_26 = arith.constant dense<0.000000e+00> : vector<32x128xf32>
    %100 = tpu.matmul %3, %99, %cst_26 {dimension_numbers = #tpu.dot_dimension_numbers<[1], [0], [0], [1], [0, 0, 1, 1], [], []>} : vector<32x32xbf16>, vector<32x128xbf16>, vector<32x128xf32> -> vector<32x128xf32>
    %101 = vector.broadcast %9 : vector<32x1xf32> to vector<32x128xf32>
    %102 = arith.addf %100, %101 : vector<32x128xf32>
    %cst_27 = arith.constant dense<0.000000e+00> : vector<128xf32>
    %103 = vector.multi_reduction <add>, %102, %cst_27 [0] : vector<32x128xf32> to vector<128xf32>
    %104 = vector.shape_cast %103 : vector<128xf32> to vector<1x128xf32>
    %cst_28 = arith.constant 3.200000e+01 : f32
    %105 = vector.broadcast %cst_28 : f32 to vector<1x128xf32>
    %106 = arith.divf %104, %105 : vector<1x128xf32>
    %107 = vector.broadcast %106 : vector<1x128xf32> to vector<32x128xf32>
    %108 = arith.subf %102, %107 : vector<32x128xf32>
    %109 = arith.mulf %108, %108 : vector<32x128xf32>
    %cst_29 = arith.constant dense<0.000000e+00> : vector<128xf32>
    %110 = vector.multi_reduction <add>, %109, %cst_29 [0] : vector<32x128xf32> to vector<128xf32>
    %111 = vector.shape_cast %110 : vector<128xf32> to vector<1x128xf32>
    %cst_30 = arith.constant 3.200000e+01 : f32
    %112 = vector.broadcast %cst_30 : f32 to vector<1x128xf32>
    %113 = arith.divf %111, %112 : vector<1x128xf32>
    %cst_31 = arith.constant 9.99999974E-6 : f32
    %114 = vector.broadcast %cst_31 : f32 to vector<1x128xf32>
    %115 = arith.addf %113, %114 : vector<1x128xf32>
    %116 = math.rsqrt %115 : vector<1x128xf32>
    %117 = vector.broadcast %116 : vector<1x128xf32> to vector<32x128xf32>
    %118 = arith.mulf %108, %117 : vector<32x128xf32>
    %119 = vector.broadcast %12 : vector<32x1xf32> to vector<32x128xf32>
    %120 = arith.mulf %118, %119 : vector<32x128xf32>
    %121 = vector.broadcast %13 : vector<32x1xf32> to vector<32x128xf32>
    %122 = arith.addf %120, %121 : vector<32x128xf32>
    %123 = arith.truncf %122 : vector<32x128xf32> to vector<32x128xbf16>
    %cst_32 = arith.constant dense<0.000000e+00> : vector<128x128xf32>
    %124 = tpu.matmul %4, %123, %cst_32 {dimension_numbers = #tpu.dot_dimension_numbers<[1], [0], [0], [1], [0, 0, 1, 1], [], []>} : vector<128x32xbf16>, vector<32x128xbf16>, vector<128x128xf32> -> vector<128x128xf32>
    %125 = vector.broadcast %10 : vector<128x1xf32> to vector<128x128xf32>
    %126 = arith.addf %124, %125 : vector<128x128xf32>
    %cst_33 = arith.constant 0.000000e+00 : f32
    %127 = vector.broadcast %cst_33 : f32 to vector<128x128xf32>
    %128 = arith.maximumf %126, %127 : vector<128x128xf32>
    %129 = arith.truncf %128 : vector<128x128xf32> to vector<128x128xbf16>
    %cst_34 = arith.constant dense<0.000000e+00> : vector<32x128xf32>
    %130 = tpu.matmul %5, %129, %cst_34 {dimension_numbers = #tpu.dot_dimension_numbers<[1], [0], [0], [1], [0, 0, 1, 1], [], []>} : vector<32x128xbf16>, vector<128x128xbf16>, vector<32x128xf32> -> vector<32x128xf32>
    %131 = vector.broadcast %11 : vector<32x1xf32> to vector<32x128xf32>
    %132 = arith.addf %130, %131 : vector<32x128xf32>
    %cst_35 = arith.constant dense<0.000000e+00> : vector<128xf32>
    %133 = vector.multi_reduction <add>, %132, %cst_35 [0] : vector<32x128xf32> to vector<128xf32>
    %134 = vector.shape_cast %133 : vector<128xf32> to vector<1x128xf32>
    %cst_36 = arith.constant 3.200000e+01 : f32
    %135 = vector.broadcast %cst_36 : f32 to vector<1x128xf32>
    %136 = arith.divf %134, %135 : vector<1x128xf32>
    %137 = vector.broadcast %136 : vector<1x128xf32> to vector<32x128xf32>
    %138 = arith.subf %132, %137 : vector<32x128xf32>
    %139 = arith.mulf %138, %138 : vector<32x128xf32>
    %cst_37 = arith.constant dense<0.000000e+00> : vector<128xf32>
    %140 = vector.multi_reduction <add>, %139, %cst_37 [0] : vector<32x128xf32> to vector<128xf32>
    %141 = vector.shape_cast %140 : vector<128xf32> to vector<1x128xf32>
    %cst_38 = arith.constant 3.200000e+01 : f32
    %142 = vector.broadcast %cst_38 : f32 to vector<1x128xf32>
    %143 = arith.divf %141, %142 : vector<1x128xf32>
    %cst_39 = arith.constant 9.99999974E-6 : f32
    %144 = vector.broadcast %cst_39 : f32 to vector<1x128xf32>
    %145 = arith.addf %143, %144 : vector<1x128xf32>
    %146 = math.rsqrt %145 : vector<1x128xf32>
    %147 = vector.broadcast %146 : vector<1x128xf32> to vector<32x128xf32>
    %148 = arith.mulf %138, %147 : vector<32x128xf32>
    %149 = vector.broadcast %12 : vector<32x1xf32> to vector<32x128xf32>
    %150 = arith.mulf %148, %149 : vector<32x128xf32>
    %151 = vector.broadcast %13 : vector<32x1xf32> to vector<32x128xf32>
    %152 = arith.addf %150, %151 : vector<32x128xf32>
    %153 = arith.truncf %152 : vector<32x128xf32> to vector<32x128xbf16>
    %cst_40 = arith.constant dense<0.000000e+00> : vector<32x128xf32>
    %154 = tpu.matmul %1, %153, %cst_40 {dimension_numbers = #tpu.dot_dimension_numbers<[1], [0], [0], [1], [0, 0, 1, 1], [], []>} : vector<32x32xbf16>, vector<32x128xbf16>, vector<32x128xf32> -> vector<32x128xf32>
    %155 = vector.broadcast %7 : vector<32x1xf32> to vector<32x128xf32>
    %156 = arith.addf %154, %155 : vector<32x128xf32>
    %157 = tpu.transpose %156, [1, 0] : vector<32x128xf32> -> vector<128x32xf32>
    %158 = vector.shape_cast %157 : vector<128x32xf32> to vector<16x8x32xf32>
    %159 = vector.extract_strided_slice %158 {offsets = [0, 0, 0], sizes = [16, 8, 8], strides = [1, 1, 1]} : vector<16x8x32xf32> to vector<16x8x8xf32>
    "tpu.trace_start"() <{level = 10 : i32, message = "bld,bsd->bls"}> : () -> ()
    %cst_41 = arith.constant dense<0.000000e+00> : vector<16x8x16xf32>
    %160 = tpu.matmul %159, %25, %cst_41 {dimension_numbers = #tpu.dot_dimension_numbers<[2], [2], [1], [1], [0, 0, 0, 1, 1, 1], [0], [0]>} : vector<16x8x8xf32>, vector<16x16x8xf32>, vector<16x8x16xf32> -> vector<16x8x16xf32>
    "tpu.trace_stop"() : () -> ()
    %cst_42 = arith.constant dense<0xFF800000> : vector<16x8xf32>
    %161 = vector.multi_reduction <maximumf>, %160, %cst_42 [2] : vector<16x8x16xf32> to vector<16x8xf32>
    %162 = vector.shape_cast %161 : vector<16x8xf32> to vector<16x8x1xf32>
    %163 = vector.broadcast %162 : vector<16x8x1xf32> to vector<16x8x16xf32>
    %164 = arith.subf %160, %163 : vector<16x8x16xf32>
    %165 = math.exp %164 : vector<16x8x16xf32>
    %cst_43 = arith.constant dense<0.000000e+00> : vector<16x8xf32>
    %166 = vector.multi_reduction <add>, %165, %cst_43 [2] : vector<16x8x16xf32> to vector<16x8xf32>
    %167 = vector.shape_cast %166 : vector<16x8xf32> to vector<16x8x1xf32>
    %168 = tpu.reciprocal %167 : vector<16x8x1xf32> -> vector<16x8x1xf32>
    %169 = vector.broadcast %168 : vector<16x8x1xf32> to vector<16x8x16xf32>
    %170 = arith.mulf %165, %169 : vector<16x8x16xf32>
    "tpu.trace_start"() <{level = 10 : i32, message = "bls,bsd->bld"}> : () -> ()
    %cst_44 = arith.constant dense<0.000000e+00> : vector<16x8x8xf32>
    %171 = tpu.matmul %170, %29, %cst_44 {dimension_numbers = #tpu.dot_dimension_numbers<[2], [1], [1], [2], [0, 0, 0, 1, 1, 2], [0], [0]>} : vector<16x8x16xf32>, vector<16x16x8xf32>, vector<16x8x8xf32> -> vector<16x8x8xf32>
    "tpu.trace_stop"() : () -> ()
    %172 = vector.shape_cast %171 : vector<16x8x8xf32> to vector<128x8xf32>
    %173 = tpu.transpose %172, [1, 0] : vector<128x8xf32> -> vector<8x128xf32>
    %174 = vector.extract_strided_slice %158 {offsets = [0, 0, 8], sizes = [16, 8, 8], strides = [1, 1, 1]} : vector<16x8x32xf32> to vector<16x8x8xf32>
    "tpu.trace_start"() <{level = 10 : i32, message = "bld,bsd->bls"}> : () -> ()
    %cst_45 = arith.constant dense<0.000000e+00> : vector<16x8x16xf32>
    %175 = tpu.matmul %174, %26, %cst_45 {dimension_numbers = #tpu.dot_dimension_numbers<[2], [2], [1], [1], [0, 0, 0, 1, 1, 1], [0], [0]>} : vector<16x8x8xf32>, vector<16x16x8xf32>, vector<16x8x16xf32> -> vector<16x8x16xf32>
    "tpu.trace_stop"() : () -> ()
    %cst_46 = arith.constant dense<0xFF800000> : vector<16x8xf32>
    %176 = vector.multi_reduction <maximumf>, %175, %cst_46 [2] : vector<16x8x16xf32> to vector<16x8xf32>
    %177 = vector.shape_cast %176 : vector<16x8xf32> to vector<16x8x1xf32>
    %178 = vector.broadcast %177 : vector<16x8x1xf32> to vector<16x8x16xf32>
    %179 = arith.subf %175, %178 : vector<16x8x16xf32>
    %180 = math.exp %179 : vector<16x8x16xf32>
    %cst_47 = arith.constant dense<0.000000e+00> : vector<16x8xf32>
    %181 = vector.multi_reduction <add>, %180, %cst_47 [2] : vector<16x8x16xf32> to vector<16x8xf32>
    %182 = vector.shape_cast %181 : vector<16x8xf32> to vector<16x8x1xf32>
    %183 = tpu.reciprocal %182 : vector<16x8x1xf32> -> vector<16x8x1xf32>
    %184 = vector.broadcast %183 : vector<16x8x1xf32> to vector<16x8x16xf32>
    %185 = arith.mulf %180, %184 : vector<16x8x16xf32>
    "tpu.trace_start"() <{level = 10 : i32, message = "bls,bsd->bld"}> : () -> ()
    %cst_48 = arith.constant dense<0.000000e+00> : vector<16x8x8xf32>
    %186 = tpu.matmul %185, %30, %cst_48 {dimension_numbers = #tpu.dot_dimension_numbers<[2], [1], [1], [2], [0, 0, 0, 1, 1, 2], [0], [0]>} : vector<16x8x16xf32>, vector<16x16x8xf32>, vector<16x8x8xf32> -> vector<16x8x8xf32>
    "tpu.trace_stop"() : () -> ()
    %187 = vector.shape_cast %186 : vector<16x8x8xf32> to vector<128x8xf32>
    %188 = tpu.transpose %187, [1, 0] : vector<128x8xf32> -> vector<8x128xf32>
    %189 = vector.extract_strided_slice %158 {offsets = [0, 0, 16], sizes = [16, 8, 8], strides = [1, 1, 1]} : vector<16x8x32xf32> to vector<16x8x8xf32>
    "tpu.trace_start"() <{level = 10 : i32, message = "bld,bsd->bls"}> : () -> ()
    %cst_49 = arith.constant dense<0.000000e+00> : vector<16x8x16xf32>
    %190 = tpu.matmul %189, %27, %cst_49 {dimension_numbers = #tpu.dot_dimension_numbers<[2], [2], [1], [1], [0, 0, 0, 1, 1, 1], [0], [0]>} : vector<16x8x8xf32>, vector<16x16x8xf32>, vector<16x8x16xf32> -> vector<16x8x16xf32>
    "tpu.trace_stop"() : () -> ()
    %cst_50 = arith.constant dense<0xFF800000> : vector<16x8xf32>
    %191 = vector.multi_reduction <maximumf>, %190, %cst_50 [2] : vector<16x8x16xf32> to vector<16x8xf32>
    %192 = vector.shape_cast %191 : vector<16x8xf32> to vector<16x8x1xf32>
    %193 = vector.broadcast %192 : vector<16x8x1xf32> to vector<16x8x16xf32>
    %194 = arith.subf %190, %193 : vector<16x8x16xf32>
    %195 = math.exp %194 : vector<16x8x16xf32>
    %cst_51 = arith.constant dense<0.000000e+00> : vector<16x8xf32>
    %196 = vector.multi_reduction <add>, %195, %cst_51 [2] : vector<16x8x16xf32> to vector<16x8xf32>
    %197 = vector.shape_cast %196 : vector<16x8xf32> to vector<16x8x1xf32>
    %198 = tpu.reciprocal %197 : vector<16x8x1xf32> -> vector<16x8x1xf32>
    %199 = vector.broadcast %198 : vector<16x8x1xf32> to vector<16x8x16xf32>
    %200 = arith.mulf %195, %199 : vector<16x8x16xf32>
    "tpu.trace_start"() <{level = 10 : i32, message = "bls,bsd->bld"}> : () -> ()
    %cst_52 = arith.constant dense<0.000000e+00> : vector<16x8x8xf32>
    %201 = tpu.matmul %200, %31, %cst_52 {dimension_numbers = #tpu.dot_dimension_numbers<[2], [1], [1], [2], [0, 0, 0, 1, 1, 2], [0], [0]>} : vector<16x8x16xf32>, vector<16x16x8xf32>, vector<16x8x8xf32> -> vector<16x8x8xf32>
    "tpu.trace_stop"() : () -> ()
    %202 = vector.shape_cast %201 : vector<16x8x8xf32> to vector<128x8xf32>
    %203 = tpu.transpose %202, [1, 0] : vector<128x8xf32> -> vector<8x128xf32>
    %204 = vector.extract_strided_slice %158 {offsets = [0, 0, 24], sizes = [16, 8, 8], strides = [1, 1, 1]} : vector<16x8x32xf32> to vector<16x8x8xf32>
    "tpu.trace_start"() <{level = 10 : i32, message = "bld,bsd->bls"}> : () -> ()
    %cst_53 = arith.constant dense<0.000000e+00> : vector<16x8x16xf32>
    %205 = tpu.matmul %204, %28, %cst_53 {dimension_numbers = #tpu.dot_dimension_numbers<[2], [2], [1], [1], [0, 0, 0, 1, 1, 1], [0], [0]>} : vector<16x8x8xf32>, vector<16x16x8xf32>, vector<16x8x16xf32> -> vector<16x8x16xf32>
    "tpu.trace_stop"() : () -> ()
    %cst_54 = arith.constant dense<0xFF800000> : vector<16x8xf32>
    %206 = vector.multi_reduction <maximumf>, %205, %cst_54 [2] : vector<16x8x16xf32> to vector<16x8xf32>
    %207 = vector.shape_cast %206 : vector<16x8xf32> to vector<16x8x1xf32>
    %208 = vector.broadcast %207 : vector<16x8x1xf32> to vector<16x8x16xf32>
    %209 = arith.subf %205, %208 : vector<16x8x16xf32>
    %210 = math.exp %209 : vector<16x8x16xf32>
    %cst_55 = arith.constant dense<0.000000e+00> : vector<16x8xf32>
    %211 = vector.multi_reduction <add>, %210, %cst_55 [2] : vector<16x8x16xf32> to vector<16x8xf32>
    %212 = vector.shape_cast %211 : vector<16x8xf32> to vector<16x8x1xf32>
    %213 = tpu.reciprocal %212 : vector<16x8x1xf32> -> vector<16x8x1xf32>
    %214 = vector.broadcast %213 : vector<16x8x1xf32> to vector<16x8x16xf32>
    %215 = arith.mulf %210, %214 : vector<16x8x16xf32>
    "tpu.trace_start"() <{level = 10 : i32, message = "bls,bsd->bld"}> : () -> ()
    %cst_56 = arith.constant dense<0.000000e+00> : vector<16x8x8xf32>
    %216 = tpu.matmul %215, %32, %cst_56 {dimension_numbers = #tpu.dot_dimension_numbers<[2], [1], [1], [2], [0, 0, 0, 1, 1, 2], [0], [0]>} : vector<16x8x16xf32>, vector<16x16x8xf32>, vector<16x8x8xf32> -> vector<16x8x8xf32>
    "tpu.trace_stop"() : () -> ()
    %217 = vector.shape_cast %216 : vector<16x8x8xf32> to vector<128x8xf32>
    %218 = tpu.transpose %217, [1, 0] : vector<128x8xf32> -> vector<8x128xf32>
    %219 = tpu.concatenate %173, %188, %203, %218 in 0 : vector<8x128xf32>, vector<8x128xf32>, vector<8x128xf32>, vector<8x128xf32> -> vector<32x128xf32>
    %220 = arith.truncf %219 : vector<32x128xf32> to vector<32x128xbf16>
    %cst_57 = arith.constant dense<0.000000e+00> : vector<32x128xf32>
    %221 = tpu.matmul %3, %220, %cst_57 {dimension_numbers = #tpu.dot_dimension_numbers<[1], [0], [0], [1], [0, 0, 1, 1], [], []>} : vector<32x32xbf16>, vector<32x128xbf16>, vector<32x128xf32> -> vector<32x128xf32>
    %222 = vector.broadcast %9 : vector<32x1xf32> to vector<32x128xf32>
    %223 = arith.addf %221, %222 : vector<32x128xf32>
    %cst_58 = arith.constant dense<0.000000e+00> : vector<128xf32>
    %224 = vector.multi_reduction <add>, %223, %cst_58 [0] : vector<32x128xf32> to vector<128xf32>
    %225 = vector.shape_cast %224 : vector<128xf32> to vector<1x128xf32>
    %cst_59 = arith.constant 3.200000e+01 : f32
    %226 = vector.broadcast %cst_59 : f32 to vector<1x128xf32>
    %227 = arith.divf %225, %226 : vector<1x128xf32>
    %228 = vector.broadcast %227 : vector<1x128xf32> to vector<32x128xf32>
    %229 = arith.subf %223, %228 : vector<32x128xf32>
    %230 = arith.mulf %229, %229 : vector<32x128xf32>
    %cst_60 = arith.constant dense<0.000000e+00> : vector<128xf32>
    %231 = vector.multi_reduction <add>, %230, %cst_60 [0] : vector<32x128xf32> to vector<128xf32>
    %232 = vector.shape_cast %231 : vector<128xf32> to vector<1x128xf32>
    %cst_61 = arith.constant 3.200000e+01 : f32
    %233 = vector.broadcast %cst_61 : f32 to vector<1x128xf32>
    %234 = arith.divf %232, %233 : vector<1x128xf32>
    %cst_62 = arith.constant 9.99999974E-6 : f32
    %235 = vector.broadcast %cst_62 : f32 to vector<1x128xf32>
    %236 = arith.addf %234, %235 : vector<1x128xf32>
    %237 = math.rsqrt %236 : vector<1x128xf32>
    %238 = vector.broadcast %237 : vector<1x128xf32> to vector<32x128xf32>
    %239 = arith.mulf %229, %238 : vector<32x128xf32>
    %240 = vector.broadcast %12 : vector<32x1xf32> to vector<32x128xf32>
    %241 = arith.mulf %239, %240 : vector<32x128xf32>
    %242 = vector.broadcast %13 : vector<32x1xf32> to vector<32x128xf32>
    %243 = arith.addf %241, %242 : vector<32x128xf32>
    %244 = arith.truncf %243 : vector<32x128xf32> to vector<32x128xbf16>
    %cst_63 = arith.constant dense<0.000000e+00> : vector<128x128xf32>
    %245 = tpu.matmul %4, %244, %cst_63 {dimension_numbers = #tpu.dot_dimension_numbers<[1], [0], [0], [1], [0, 0, 1, 1], [], []>} : vector<128x32xbf16>, vector<32x128xbf16>, vector<128x128xf32> -> vector<128x128xf32>
    %246 = vector.broadcast %10 : vector<128x1xf32> to vector<128x128xf32>
    %247 = arith.addf %245, %246 : vector<128x128xf32>
    %cst_64 = arith.constant 0.000000e+00 : f32
    %248 = vector.broadcast %cst_64 : f32 to vector<128x128xf32>
    %249 = arith.maximumf %247, %248 : vector<128x128xf32>
    %250 = arith.truncf %249 : vector<128x128xf32> to vector<128x128xbf16>
    %cst_65 = arith.constant dense<0.000000e+00> : vector<32x128xf32>
    %251 = tpu.matmul %5, %250, %cst_65 {dimension_numbers = #tpu.dot_dimension_numbers<[1], [0], [0], [1], [0, 0, 1, 1], [], []>} : vector<32x128xbf16>, vector<128x128xbf16>, vector<32x128xf32> -> vector<32x128xf32>
    %252 = vector.broadcast %11 : vector<32x1xf32> to vector<32x128xf32>
    %253 = arith.addf %251, %252 : vector<32x128xf32>
    %cst_66 = arith.constant dense<0.000000e+00> : vector<128xf32>
    %254 = vector.multi_reduction <add>, %253, %cst_66 [0] : vector<32x128xf32> to vector<128xf32>
    %255 = vector.shape_cast %254 : vector<128xf32> to vector<1x128xf32>
    %cst_67 = arith.constant 3.200000e+01 : f32
    %256 = vector.broadcast %cst_67 : f32 to vector<1x128xf32>
    %257 = arith.divf %255, %256 : vector<1x128xf32>
    %258 = vector.broadcast %257 : vector<1x128xf32> to vector<32x128xf32>
    %259 = arith.subf %253, %258 : vector<32x128xf32>
    %260 = arith.mulf %259, %259 : vector<32x128xf32>
    %cst_68 = arith.constant dense<0.000000e+00> : vector<128xf32>
    %261 = vector.multi_reduction <add>, %260, %cst_68 [0] : vector<32x128xf32> to vector<128xf32>
    %262 = vector.shape_cast %261 : vector<128xf32> to vector<1x128xf32>
    %cst_69 = arith.constant 3.200000e+01 : f32
    %263 = vector.broadcast %cst_69 : f32 to vector<1x128xf32>
    %264 = arith.divf %262, %263 : vector<1x128xf32>
    %cst_70 = arith.constant 9.99999974E-6 : f32
    %265 = vector.broadcast %cst_70 : f32 to vector<1x128xf32>
    %266 = arith.addf %264, %265 : vector<1x128xf32>
    %267 = math.rsqrt %266 : vector<1x128xf32>
    %268 = vector.broadcast %267 : vector<1x128xf32> to vector<32x128xf32>
    %269 = arith.mulf %259, %268 : vector<32x128xf32>
    %270 = vector.broadcast %12 : vector<32x1xf32> to vector<32x128xf32>
    %271 = arith.mulf %269, %270 : vector<32x128xf32>
    %272 = vector.broadcast %13 : vector<32x1xf32> to vector<32x128xf32>
    %273 = arith.addf %271, %272 : vector<32x128xf32>
    %c0_71 = arith.constant 0 : index
    %c0_72 = arith.constant 0 : index
    %274 = vector.load %arg6[%c0_71, %c0_72] : memref<32x128xf32, #tpu.memory_space<vmem>>, vector<32x128xf32>
    tpu.vector_store %arg6[%c0_71, %c0_72], %273 {strides = array<i32>} : memref<32x128xf32, #tpu.memory_space<vmem>>, vector<32x128xf32>,
    return
  }
  func.func @transform_0(%arg0: i32) -> (i32, i32) {
    %c0_i32 = arith.constant 0 : i32
    %c0_i32_0 = arith.constant 0 : i32
    return %c0_i32, %arg0 : i32, i32
  }
  func.func @transform_1(%arg0: i32) -> (i32, i32) {
    %c0_i32 = arith.constant 0 : i32
    %c0_i32_0 = arith.constant 0 : i32
    return %c0_i32, %arg0 : i32, i32
  }
  func.func @transform_2(%arg0: i32) -> (i32, i32) {
    %c0_i32 = arith.constant 0 : i32
    %c0_i32_0 = arith.constant 0 : i32
    %c0_i32_1 = arith.constant 0 : i32
    return %c0_i32, %c0_i32_0 : i32, i32
  }
  func.func @transform_3(%arg0: i32) -> (i32, i32) {
    %c0_i32 = arith.constant 0 : i32
    %c0_i32_0 = arith.constant 0 : i32
    %c0_i32_1 = arith.constant 0 : i32
    return %c0_i32, %c0_i32_0 : i32, i32
  }
  func.func @transform_4(%arg0: i32) -> (i32, i32) {
    %c0_i32 = arith.constant 0 : i32
    %c0_i32_0 = arith.constant 0 : i32
    %c0_i32_1 = arith.constant 0 : i32
    return %c0_i32, %c0_i32_0 : i32, i32
  }
  func.func @transform_5(%arg0: i32) -> (i32, i32) {
    %c0_i32 = arith.constant 0 : i32
    %c0_i32_0 = arith.constant 0 : i32
    return %c0_i32, %arg0 : i32, i32
  }
}

</mosaic_0001>

<bundles_post_ra>
// kernel: tpu_custom_call.1
= control target key start
LH: loop header
LB: loop body
LE: loop exit
PB: predicated region body
PF: predicated region fallthrough
CT: control target
= control target key end

     0   :  { %10 = vsyncpa [#allocation5], 0  ;;  %s32776_s0 = inlined_call_operand.vmem [shape: bf16[32,256], index: 0, kind: input, shape index: {}]   ;;  %s32777_s1 = inlined_call_operand.vmem [shape: bf16[32,512], index: 1, kind: input, shape index: {}]   ;;  %s32778_s2 = inlined_call_operand.vmem [shape: bf16[256,32], index: 2, kind: input, shape index: {}]   ;;  %s32779_s3 = inlined_call_operand.vmem [shape: bf16[32,128], index: 3, kind: input, shape index: {}]   ;;  %s32780_s4 = inlined_call_operand.vmem [shape: f32[352,1], index: 4, kind: input, shape index: {}]   ;;  %s32781_s5 = inlined_call_operand.hbm [shape: f32[32,256], index: 5, kind: output, shape index: {}]  }
   0x1   :  { %12 = vsyncpa [#allocation5 + $0x1], 0  ;;  %s27331_s18 = smov 0   ;;  %s27333_s19 = smov 0  }
   0x2   :  { %s27335_s20 = smov 0   ;;  %s27337_s21 = smov 0  }
   0x3 LB: > { %s23161_s22 = sadd.s32 4294967295, %s27289_s21   ;;  %s23162_s23 = sadd.s32 4294967294, %s27289_s21   ;;  %s27289_s21 = sphi %s27337_s21, %s34085_s21   ;;  %s27285_s20 = sphi %s27335_s20, %s34084_s20   ;;  %s27281_s19 = sphi %s27333_s19, %s34083_s19   ;;  %s27277_s18 = sphi %s27331_s18, %s34082_s18  }
   0x4   : > { %s27354_s24 = sadd.s32 1, %s27289_s21   ;;  %s25_s25 = sadd.s32 1, %s27285_s20 }
   0x5   : > { %s22_s26 = ssub.s32 %s27289_s21, %s27354_s24  ;;  %p32_p0 = scmp.ne.s32.totalorder %s27285_s20, %s27281_s19 }
   0x6   : > { %p23_p1 = scmp.eq.s32.totalorder %s22_s26, 0  ;;  %p33_p2 = scmp.eq.s32.totalorder %s27289_s21, 0 }
   0x7   : > { %p151_p3 = scmp.eq.s32.totalorder %s23161_s22, 1  ;;  %p156_p4 = scmp.ne.s32.totalorder %s27281_s19, %s27277_s18 }
   0x8   : > { %s27367_s27 = scalar_select %p23_p1, %s27285_s20, %s25_s25  }
   0x9   : > { %p27369_p5 = por %p33_p2, %p32_p0  ;;  %p27373_p6 = por %p151_p3, %p32_p0 }
   0xa   : > { %p157_p7 = scmp.eq.s32.totalorder %s23162_s23, 1  ;;  %p23164_p9 = scmp.ge.s32.totalorder %s27289_s21, 2 }
   0xc   : > { %p27377_p8 = por %p157_p7, %p156_p4  ;;  %182 = sbr.rel (%p23164_p9) target bundleno = 29 (0x1d), region = 28 }
  0x11   : > { %185 = sbr.rel (!%p27369_p5) target bundleno = 23 (0x17), region = 32  ;;  %s187_s6 = sand.u32 (%p27369_p5), 1, %s27285_s20  }
  0x12   : > { %s23166_s7 = sshll.u32 (%p27369_p5), %s27289_s21, 2  ;;  %s23165_s8 = sshll.u32 (%p27369_p5), %s187_s6, 4 }
  0x13   : > { %s191_s11 = scalar_lea.vmem (%p27369_p5), %s32776_s0, %s23166_s7  ;;  %s189_s12 = scalar_lea.vmem (%p27369_p5), [#allocation2], %s23165_s8 }
  0x14   : > { %v208_v0 = vld [vmem:[%s191_s11] sm:$0xf] (%p27369_p5)  ;;  %v210_v1 = vld [vmem:[%s191_s11 + $0x8] sm:$0xf] (%p27369_p5)  ;;  %v212_v2 = vld [vmem:[%s191_s11 + $0x10] sm:$0xf] (%p27369_p5) }
  0x15   : > { %209 = vst [vmem:[%s189_s12] sm:$0xf] (%p27369_p5), %v208_v0  ;;  %211 = vst [vmem:[%s189_s12 + $0x4] sm:$0xf] (%p27369_p5), %v210_v1  ;;  %v214_v3 = vld [vmem:[%s191_s11 + $0x18] sm:$0xf] (%p27369_p5) }
  0x16   : > { %213 = vst [vmem:[%s189_s12 + $0x8] sm:$0xf] %v212_v2  ;;  %215 = vst [vmem:[%s189_s12 + $0xc] sm:$0xf] %v214_v3 }
  0x17 PF: > { %247 = sbr.rel (!%p27369_p5) target bundleno = 29 (0x1d), region = 73  ;;  %s249_s13 = sand.u32 (%p27369_p5), 1, %s27285_s20  }
  0x18   : > { %s23742_s14 = sshll.u32 (%p27369_p5), %s27289_s21, 3  ;;  %s23167_s15 = sshll.u32 (%p27369_p5), %s249_s13, 5 }
  0x19   : > { %s254_s23 = scalar_lea.vmem (%p27369_p5), %s32777_s1, %s23742_s14  ;;  %s251_s25 = scalar_lea.vmem (%p27369_p5), [#allocation3], %s23167_s15 }
  0x1a   : > { %v289_v4 = vld [vmem:[%s254_s23] sm:$0xff] (%p27369_p5)  ;;  %v291_v5 = vld [vmem:[%s254_s23 + $0x10] sm:$0xff] (%p27369_p5) }
  0x1b   : > { %v293_v6 = vld [vmem:[%s254_s23 + $0x20] sm:$0xff] (%p27369_p5)  ;;  %290 = vst [vmem:[%s251_s25] sm:$0xff] (%p27369_p5), %v289_v4  ;;  %292 = vst [vmem:[%s251_s25 + $0x8] sm:$0xff] (%p27369_p5), %v291_v5  ;;  %v295_v7 = vld [vmem:[%s254_s23 + $0x30] sm:$0xff] (%p27369_p5) }
  0x1c   : > { %294 = vst [vmem:[%s251_s25 + $0x10] sm:$0xff] %v293_v6  ;;  %296 = vst [vmem:[%s251_s25 + $0x18] sm:$0xff] %v295_v7 }
  0x1d PF: > { %p23170_p10 = scmp.ge.s32.totalorder %s27289_s21, 1  ;;  %p301_p11 = scmp.lt.s32.totalorder %s27289_s21, 3 }
  0x1f   : > { %p302_p12 = pnand %p23170_p10, %p301_p11 }
  0x21   : > { %305 = sbr.rel (%p302_p12) target bundleno = 7719 (0x1e27), region = 111 }
  0x26   : > { %s27401_s26 = sand.u32 1, %s27281_s19   ;;  %v27291_v8 = vmov 0   ;;  %vm516_vm0 = vcmask 261120   ;;  %v26677_v9 = vld [vmem:[%s32778_s2] sm:$0xff]   ;;  %v26678_v16 = vld [vmem:[%s32778_s2 + $0x10] sm:$0xff]   ;;  %v26679_v17 = vld [vmem:[%s32778_s2 + $0x8] sm:$0xff]  }
  0x27   : > { %s23172_s28 = sshll.u32 %s27401_s26, 5  ;;  %561 = vmatprep.mubr.bf16.mxu0 %v27291_v8  ;;  %26520 = vset.pattern.permute.xlu1 %v27291_v8  ;;  %s23171_s9 = sshll.u32 %s27401_s26, 4  ;;  %v390_v18 = vld [vmem:[%s32780_s4 + $0x30] sm:$0xff]  ;;  %v388_v19 = vld [vmem:[%s32780_s4 + $0x20] sm:$0xff]  ;;  %v391_v20 = vld [vmem:[%s32780_s4 + $0x38] sm:$0xff]  ;;  %v32786_v43 = vmov 0.0  }
  0x28   : > { %26519 = vset.pattern.permute.xlu0 %v27291_v8  ;;  %s317_s8 = scalar_lea.vmem [#allocation3], %s23172_s28  ;;  %24571 = vmatprep.mubr.msk.bf16.mxu1 %vm516_vm0, %v26677_v9  ;;  %s310_s10 = scalar_lea.vmem [#allocation2], %s23171_s9  ;;  %v389_v21 = vld [vmem:[%s32780_s4 + $0x28] sm:$0xff]  ;;  %v26680_v22 = vld [vmem:[%s32778_s2 + $0x18] sm:$0xff]   ;;  %v384_v24 = vld [vmem:[%s32780_s4] sm:$0xff]  ;;  %vm27293_vm1 = vmmov 0  }
  0x29   : > { %v26669_v10 = vld [vmem:[%s317_s8 + $0x14] ss:$8 sps:$4 sm:$0xff]   ;;  %v26672_v11 = vld [vmem:[%s317_s8 + $0x10] ss:$8 sps:$4 sm:$0xff]   ;;  %v26673_v13 = vld [vmem:[%s317_s8 + $0x4] ss:$8 sps:$4 sm:$0xff]   ;;  %448 = vperm.xlu1 %26520, %v390_v18   ;;  %438 = vperm.xlu0 %26519, %v388_v19  }
  0x2a   : > { %541 = vmatprep.subr.bf16.mxu0 %v26669_v10  ;;  %v26671_v12 = vld [vmem:[%s310_s10 + $0x8] sm:$0xff]   ;;  %v26675_v14 = vld [vmem:[%s310_s10] sm:$0xff]   ;;  %vm859_vm2 = vcmask 64512   ;;  %s27294_s17 = smov 120   ;;  %vm2124_vm3 = vcmask 130048   ;;  %s27295_s23 = smov 112  }
  0x2b   : > { %542 = vmatpush1.bf16.msra.mxu0 %v26672_v11  ;;  %24567 = vmatprep.subr.bf16.mxu1 %v26671_v12  ;;  %v26676_v15 = vld [vmem:[%s317_s8] ss:$8 sps:$4 sm:$0xff]   ;;  %v387_v25 = vld [vmem:[%s32780_s4 + $0x18] sm:$0xff]  ;;  %v386_v26 = vld [vmem:[%s32780_s4 + $0x10] sm:$0xff]  ;;  %s27296_s25 = smov 104   ;;  %s345_s6 = scalar_lea.vmem [#allocation4], %s23172_s28 }
  0x2c   : > { %24568 = vmatpush3.bf16.msra.mxu1 %v26671_v12  ;;  %543 = vmatprep.subr.bf16.mxu0 %v26673_v13  ;;  %v385_v23 = vld [vmem:[%s32780_s4 + $0x8] sm:$0xff]  ;;  %v26681_v27 = vld [vmem:[%s32778_s2 + $0x20] sm:$0xff]   ;;  %v394_v29 = vld [vmem:[%s32780_s4 + $0x50] sm:$0xff]  ;;  %s23076_s7 = sshll.u32 %s345_s6, 4  ;;  %s23739_s8 = sshll.u32 %s23161_s22, 7  ;;  %s32720_s7 = int_to_ptr.vmem [resolvable:$true] %s23076_s7 }
  0x2d   : > { %24569 = vmatprep.subr.bf16.mxu1 %v26675_v14  ;;  %453 = vperm.xlu1 %26520, %v391_v20   ;;  %v393_v28 = vld [vmem:[%s32780_s4 + $0x48] sm:$0xff]  ;;  %v395_v31 = vld [vmem:[%s32780_s4 + $0x58] sm:$0xff]  ;;  %s23064_s22 = scalar_lea.sflag [#allocation5], %s27401_s26 }
  0x2e   : > { %443 = vperm.xlu0 %26519, %v389_v21   ;;  %v26682_v30 = vld [vmem:[%s32778_s2 + $0x28] sm:$0xff]  }
  0x2f   : > { %544 = vmatpush1.bf16.msra.mxu0 %v26676_v15 }
  0x30   : > { %24570 = vmatpush3.bf16.msra.mxu1 %v26675_v14  ;;  %24596 = vmatprep.subr.mxu0 %v32786_v43 }
  0x31   : > { %737 = vperm.xlu1 %26520, %v385_v23   ;;  %24575 = vmatprep.subr.mxu1 %v32786_v43 }
  0x32   : > { %23182 = vmatmul.mubr.msk.bf16.vlgmr.msra.gmra.mxu0 %vm516_vm0, %v26678_v16  ;;  %732 = vperm.xlu0 %26519, %v384_v24  }
  0x33   : > { %571 = vmatprep.mubr.bf16.mxu0 %v27291_v8  ;;  %24572 = vmatmul.mubr.msk.bf16.vlgmr.msra.gmra.mxu1 %vm516_vm0, %v26679_v17  ;;  %v392_v17 = vld [vmem:[%s32780_s4 + $0x40] sm:$0xff] }
  0x34   : > { %24579 = vmatprep.mubr.msk.f32.mxu1 %vm27293_vm1, %v32786_v43 }
  0x35   : > { %747 = vperm.xlu1 %26520, %v387_v25  }
  0x36   : > { %742 = vperm.xlu0 %26519, %v386_v26  }
  0x39   : > { %463 = vperm.xlu1 %26520, %v393_v28  }
  0x3a   : > { %23183 = vmatmul.mubr.msk.bf16.gmra.mxu0 %vm516_vm0, %v26680_v22 }
  0x3b   : > { %581 = vmatprep.mubr.bf16.mxu0 %v27291_v8 }
  0x3d   : > { %468 = vperm.xlu1 %26520, %v394_v29  }
  0x41   : > { %473 = vperm.xlu1 %26520, %v395_v31  }
  0x42   : > { %23184 = vmatmul.mubr.msk.bf16.gmra.mxu0 %vm516_vm0, %v26681_v27 }
  0x43   : > { %591 = vmatprep.mubr.bf16.mxu0 %v27291_v8 }
  0x4a   : > { %23185 = vmatmul.mubr.msk.bf16.gmra.mxu0 %vm516_vm0, %v26682_v30 }
  0x4b   : > { %24600 = vmatprep.mubr.msk.f32.mxu0 %vm27293_vm1, %v32786_v43 }
  0xa4   : > { %v439_v32 = vpop.permute.xlu0 %438  ;;  %v449_v33 = vpop.permute.xlu1 %448 }
  0xa8   : > { %v454_v36 = vpop.permute.xlu1 %453 }
  0xa9   : > { %v444_v34 = vpop.permute.xlu0 %443 }
  0xac   : > { %v27469_v48 = vpop.permute.xlu1 %737 }
  0xad   : > { %v27464_v40 = vpop.permute.xlu0 %732  ;;  %33155 = vst [vmem:[#allocation8_spill] sm:$0xff] %v27469_v48 }
  0xae   : > { %33154 = vst [vmem:[#allocation7_spill] sm:$0xff] %v27464_v40 }
  0xb0   : > { %v27479_v58 = vpop.permute.xlu1 %747 }
  0xb1   : > { %v27472_v53 = vpop.permute.xlu0 %742  ;;  %33157 = vst [vmem:[#allocation10_spill] sm:$0xff] %v27479_v58 }
  0xb2   : > { %33156 = vst [vmem:[#allocation9_spill] sm:$0xff] %v27472_v53 }
  0xb4   : > { %v27482_v1 = vpop.permute.xlu1 %463 }
  0xb8   : > { %v27484_v2 = vpop.permute.xlu1 %468 }
  0xbc   : > { %v27490_v5 = vpop.permute.xlu1 %473 }
  0xf2   : > { %v563_v35 = vpop.f32.mrf.mxu0 }
  0xf3   : > { %v564_v37 = vadd.f32 %v563_v35, %v439_v32  ;;  %v24573_v38 = vpop.f32.mrf.mxu1 }
  0xf4   : > { %v565_v39 = vpop.f32.mrf.mxu0  ;;  %v821_v56 = vadd.f32 %v24573_v38, %v27472_v53 }
  0xf5   : > { %602 = vxpose.xlu0.b32.start [1/4] (short) %v564_v37, 128  ;;  %v812_v41 = vpop.f32.mrf.mxu1  ;;  %v566_v60 = vadd.f32 %v565_v39, %v439_v32 }
  0xf6   : > { %v567_v42 = vpop.f32.mrf.mxu0  ;;  %v813_v44 = vadd.f32 %v812_v41, %v27464_v40 }
  0xf7   : > { %v568_v45 = vadd.f32 %v567_v42, %v444_v34  ;;  %v24574_v46 = vpop.f32.mrf.mxu1 }
  0xf8   : > { %v569_v47 = vpop.f32.mrf.mxu0  ;;  %827 = vxpose.xlu1.b32.start [1/4] (short) %v813_v44, 128  ;;  %v824_v59 = vadd.f32 %v24574_v46, %v27479_v58 }
  0xf9   : > { %603 = vxpose.xlu0.b32.cont [2/4] (short) %v568_v45, 128  ;;  %v815_v49 = vpop.f32.mrf.mxu1  ;;  %v570_v61 = vadd.f32 %v569_v47, %v444_v34 }
  0xfa   : > { %v573_v50 = vpop.f32.mrf.mxu0  ;;  %v816_v51 = vadd.f32 %v815_v49, %v27469_v48 }
  0xfb   : > { %v574_v52 = vadd.f32 %v573_v50, %v449_v33 }
  0xfc   : > { %v575_v54 = vpop.f32.mrf.mxu0  ;;  %828 = vxpose.xlu1.b32.cont [2/4] (short) %v816_v51, 128 }
  0xfd   : > { %604 = vxpose.xlu0.b32.cont [3/4] (short) %v574_v52, 128  ;;  %v576_v62 = vadd.f32 %v575_v54, %v449_v33 }
  0xfe   : > { %v577_v55 = vpop.f32.mrf.mxu0 }
  0xff   : > { %v578_v57 = vadd.f32 %v577_v55, %v454_v36 }
 0x100   : > { %829 = vxpose.xlu1.b32.cont [3/4] (short) %v821_v56, 128  ;;  %v579_v63 = vpop.f32.mrf.mxu0 }
 0x101   : > { %605 = vxpose.xlu0.b32.end [4/4] (short) %v578_v57, 128  ;;  %v580_v0 = vadd.f32 %v579_v63, %v454_v36 }
 0x102   : > { %v583_v57 = vpop.f32.mrf.mxu0 }
 0x104   : > { %830 = vxpose.xlu1.b32.end [4/4] (short) %v824_v59, 128  ;;  %v585_v59 = vpop.f32.mrf.mxu0 }
 0x132   : > { %634 = vxpose.xlu0.b32.start [1/4] (short) %v566_v60, 128  ;;  %v587_v60 = vpop.f32.mrf.mxu0 }
 0x133   : > { %v588_v53 = vadd.f32 %v587_v60, %v27482_v1 }
 0x136   : > { %635 = vxpose.xlu0.b32.cont [2/4] (short) %v570_v61, 128  ;;  %v589_v61 = vpop.f32.mrf.mxu0 }
 0x137   : > { %v590_v48 = vadd.f32 %v589_v61, %v27482_v1 }
 0x13a   : > { %636 = vxpose.xlu0.b32.cont [3/4] (short) %v576_v62, 128  ;;  %v593_v62 = vpop.f32.mrf.mxu0 }
 0x13c   : > { %v595_v58 = vpop.f32.mrf.mxu0 }
 0x13e   : > { %637 = vxpose.xlu0.b32.end [4/4] (short) %v580_v0, 128  ;;  %v597_v40 = vpop.f32.mrf.mxu0 }
 0x171   : > { %v27486_v3 = vpop.trf.xlu0 }
 0x172   : > { %33158 = vst [vmem:[#allocation11_spill] sm:$0xff] %v27486_v3 }
 0x174   : > { %v27499_v7 = vpop.trf.xlu1 }
 0x175   : > { %v27488_v4 = vpop.trf.xlu0  ;;  %33161 = vst [vmem:[#allocation14_spill] sm:$0xff] %v27499_v7 }
 0x176   : > { %33159 = vst [vmem:[#allocation12_spill] sm:$0xff] %v27488_v4  ;;  %24576 = vmatpush3.xpose.msk.msra.mxu1 %vm859_vm2, %v27488_v4 }
 0x177   : > { %24577 = vmatprep.subr.mxu1 %v32786_v43 }
 0x178   : > { %v27515_v10 = vpop.trf.xlu1 }
 0x179   : > { %v27495_v6 = vpop.trf.xlu0  ;;  %33164 = vst [vmem:[#allocation17_spill] sm:$0xff] %v27515_v10 }
 0x17a   : > { %33160 = vst [vmem:[#allocation13_spill] sm:$0xff] %v27495_v6  ;;  %24578 = vmatpush3.xpose.msk.msra.mxu1 %vm859_vm2, %v27486_v3 }
 0x17b   : > { %24582 = vmatprep.subr.mxu1 %v32786_v43 }
 0x17c   : > { %v27531_v13 = vpop.trf.xlu1 }
 0x17d   : > { %v27502_v8 = vpop.trf.xlu0  ;;  %24580 = vmatmul.mubr.msk.f32.vlgmr.msra.gmra.mxu1 %vm859_vm2, %v27499_v7  ;;  %33167 = vst [vmem:[#allocation20_spill] sm:$0xff] %v27531_v13 }
 0x17e   : > { %33162 = vst [vmem:[#allocation15_spill] sm:$0xff] %v27502_v8  ;;  %24583 = vmatpush3.xpose.msk.msra.mxu1 %vm859_vm2, %v27502_v8  ;;  %24586 = vmatprep.mubr.msk.f32.mxu1 %vm27293_vm1, %v32786_v43 }
 0x17f   : > { %24584 = vmatprep.subr.mxu1 %v32786_v43 }
 0x180   : > { %v27547_v16 = vpop.trf.xlu1 }
 0x181   : > { %v27511_v9 = vpop.trf.xlu0  ;;  %33170 = vst [vmem:[#allocation23_spill] sm:$0xff] %v27547_v16 }
 0x182   : > { %33163 = vst [vmem:[#allocation16_spill] sm:$0xff] %v27511_v9  ;;  %24585 = vmatpush3.xpose.msk.msra.mxu1 %vm859_vm2, %v27495_v6 }
 0x183   : > { %24589 = vmatprep.subr.mxu1 %v32786_v43 }
 0x184   : > { %v27566_v20 = vpop.trf.xlu1 }
 0x185   : > { %v27518_v11 = vpop.trf.xlu0  ;;  %24587 = vmatmul.mubr.msk.f32.vlgmr.msra.gmra.mxu1 %vm859_vm2, %v27515_v10 }
 0x186   : > { %33165 = vst [vmem:[#allocation18_spill] sm:$0xff] %v27518_v11  ;;  %24590 = vmatpush3.xpose.msk.msra.mxu1 %vm859_vm2, %v27518_v11  ;;  %24593 = vmatprep.mubr.msk.f32.mxu1 %vm27293_vm1, %v32786_v43 }
 0x187   : > { %24591 = vmatprep.subr.mxu1 %v32786_v43 }
 0x188   : > { %v27582_v23 = vpop.trf.xlu1 }
 0x189   : > { %v27527_v12 = vpop.trf.xlu0 }
 0x18a   : > { %33166 = vst [vmem:[#allocation19_spill] sm:$0xff] %v27527_v12  ;;  %24592 = vmatpush3.xpose.msk.msra.mxu1 %vm859_vm2, %v27511_v9 }
 0x18b   : > { %24603 = vmatprep.subr.mxu1 %v32786_v43 }
 0x18c   : > { %v27598_v26 = vpop.trf.xlu1 }
 0x18d   : > { %v27534_v14 = vpop.trf.xlu0  ;;  %24594 = vmatmul.mubr.msk.f32.vlgmr.msra.gmra.mxu1 %vm859_vm2, %v27531_v13 }
 0x18e   : > { %33168 = vst [vmem:[#allocation21_spill] sm:$0xff] %v27534_v14  ;;  %24597 = vmatpush3.xpose.msk.msra.mxu0 %vm859_vm2, %v27534_v14  ;;  %24607 = vmatprep.mubr.msk.f32.mxu1 %vm27293_vm1, %v32786_v43 }
 0x18f   : > { %24598 = vmatprep.subr.mxu0 %v32786_v43 }
 0x190   : > { %v27614_v29 = vpop.trf.xlu1 }
 0x191   : > { %v27543_v15 = vpop.trf.xlu0 }
 0x192   : > { %33169 = vst [vmem:[#allocation22_spill] sm:$0xff] %v27543_v15  ;;  %24599 = vmatpush3.xpose.msk.msra.mxu0 %vm859_vm2, %v27527_v12 }
 0x193   : > { %24610 = vmatprep.subr.mxu0 %v32786_v43 }
 0x194   : > { %v27630_v32 = vpop.trf.xlu1 }
 0x195   : > { %v27553_v18 = vpop.trf.xlu0  ;;  %24601 = vmatmul.mubr.msk.f32.vlgmr.msra.gmra.mxu0 %vm859_vm2, %v27547_v16 }
 0x196   : > { %33171 = vst [vmem:[#allocation24_spill] sm:$0xff] %v27553_v18  ;;  %24604 = vmatpush3.xpose.msk.msra.mxu1 %vm859_vm2, %v27553_v18  ;;  %24614 = vmatprep.mubr.msk.f32.mxu0 %vm27293_vm1, %v32786_v43 }
 0x197   : > { %458 = vperm.xlu0 %26519, %v392_v17   ;;  %24605 = vmatprep.subr.mxu1 %v32786_v43 }
 0x198   : > { %v27646_v35 = vpop.trf.xlu1 }
 0x199   : > { %v27562_v19 = vpop.trf.xlu0 }
 0x19a   : > { %33172 = vst [vmem:[#allocation25_spill] sm:$0xff] %v27562_v19  ;;  %24606 = vmatpush3.xpose.msk.msra.mxu1 %vm859_vm2, %v27543_v15 }
 0x19b   : > { %24617 = vmatprep.subr.mxu1 %v32786_v43 }
 0x19c   : > { %v27662_v38 = vpop.trf.xlu1 }
 0x19d   : > { %v27569_v21 = vpop.trf.xlu0  ;;  %24608 = vmatmul.mubr.msk.f32.vlgmr.msra.gmra.mxu1 %vm859_vm2, %v27566_v20 }
 0x19e   : > { %33173 = vst [vmem:[#allocation26_spill] sm:$0xff] %v27569_v21  ;;  %24611 = vmatpush3.xpose.msk.msra.mxu0 %vm859_vm2, %v27569_v21  ;;  %24621 = vmatprep.mubr.msk.f32.mxu1 %vm27293_vm1, %v32786_v43 }
 0x19f   : > { %24612 = vmatprep.subr.mxu0 %v32786_v43 }
 0x1a0   : > { %v27678_v42 = vpop.trf.xlu1 }
 0x1a1   : > { %v27578_v22 = vpop.trf.xlu0 }
 0x1a2   : > { %33174 = vst [vmem:[#allocation27_spill] sm:$0xff] %v27578_v22  ;;  %24613 = vmatpush3.xpose.msk.msra.mxu0 %vm859_vm2, %v27562_v19 }
 0x1a3   : > { %24624 = vmatprep.subr.mxu0 %v32786_v43 }
 0x1a4   : > { %v27694_v46 = vpop.trf.xlu1 }
 0x1a5   : > { %v27585_v24 = vpop.trf.xlu0  ;;  %24615 = vmatmul.mubr.msk.f32.vlgmr.msra.gmra.mxu0 %vm859_vm2, %v27582_v23 }
 0x1a6   : > { %33175 = vst [vmem:[#allocation28_spill] sm:$0xff] %v27585_v24  ;;  %24618 = vmatpush3.xpose.msk.msra.mxu1 %vm859_vm2, %v27585_v24  ;;  %24628 = vmatprep.mubr.msk.f32.mxu0 %vm27293_vm1, %v32786_v43 }
 0x1a7   : > { %24619 = vmatprep.subr.mxu1 %v32786_v43 }
 0x1a8   : > { %v27710_v50 = vpop.trf.xlu1 }
 0x1a9   : > { %v27594_v25 = vpop.trf.xlu0 }
 0x1aa   : > { %33176 = vst [vmem:[#allocation29_spill] sm:$0xff] %v27594_v25  ;;  %24620 = vmatpush3.xpose.msk.msra.mxu1 %vm859_vm2, %v27578_v22 }
 0x1ab   : > { %24631 = vmatprep.subr.mxu1 %v32786_v43 }
 0x1ac   : > { %v27726_v54 = vpop.trf.xlu1 }
 0x1ad   : > { %v27601_v27 = vpop.trf.xlu0  ;;  %24622 = vmatmul.mubr.msk.f32.vlgmr.msra.gmra.mxu1 %vm859_vm2, %v27598_v26  ;;  %33193 = vst [vmem:[#allocation46_spill] sm:$0xff] %v27726_v54 }
 0x1ae   : > { %33177 = vst [vmem:[#allocation30_spill] sm:$0xff] %v27601_v27  ;;  %24625 = vmatpush3.xpose.msk.msra.mxu0 %vm859_vm2, %v27601_v27  ;;  %24635 = vmatprep.mubr.msk.f32.mxu1 %vm27293_vm1, %v32786_v43 }
 0x1af   : > { %24626 = vmatprep.subr.mxu0 %v32786_v43 }
 0x1b0   : > { %v27740_v56 = vpop.trf.xlu1 }
 0x1b1   : > { %v27610_v28 = vpop.trf.xlu0  ;;  %33195 = vst [vmem:[#allocation48_spill] sm:$0xff] %v27740_v56 }
 0x1b2   : > { %33178 = vst [vmem:[#allocation31_spill] sm:$0xff] %v27610_v28  ;;  %24627 = vmatpush3.xpose.msk.msra.mxu0 %vm859_vm2, %v27594_v25 }
 0x1b3   : > { %24638 = vmatprep.subr.mxu0 %v32786_v43 }
 0x1b5   : > { %v27617_v30 = vpop.trf.xlu0  ;;  %24629 = vmatmul.mubr.msk.f32.vlgmr.msra.gmra.mxu0 %vm859_vm2, %v27614_v29 }
 0x1b6   : > { %33179 = vst [vmem:[#allocation32_spill] sm:$0xff] %v27617_v30  ;;  %24632 = vmatpush3.xpose.msk.msra.mxu1 %vm859_vm2, %v27617_v30  ;;  %24642 = vmatprep.mubr.msk.f32.mxu0 %vm27293_vm1, %v32786_v43 }
 0x1b7   : > { %24633 = vmatprep.subr.mxu1 %v32786_v43 }
 0x1b9   : > { %v27626_v31 = vpop.trf.xlu0 }
 0x1ba   : > { %33180 = vst [vmem:[#allocation33_spill] sm:$0xff] %v27626_v31  ;;  %24634 = vmatpush3.xpose.msk.msra.mxu1 %vm859_vm2, %v27610_v28 }
 0x1bb   : > { %24645 = vmatprep.subr.mxu1 %v32786_v43 }
 0x1bd   : > { %v27633_v33 = vpop.trf.xlu0  ;;  %24636 = vmatmul.mubr.msk.f32.vlgmr.msra.gmra.mxu1 %vm859_vm2, %v27630_v32 }
 0x1be   : > { %33181 = vst [vmem:[#allocation34_spill] sm:$0xff] %v27633_v33  ;;  %24639 = vmatpush3.xpose.msk.msra.mxu0 %vm859_vm2, %v27633_v33  ;;  %24649 = vmatprep.mubr.msk.f32.mxu1 %vm27293_vm1, %v32786_v43 }
 0x1bf   : > { %24640 = vmatprep.subr.mxu0 %v32786_v43 }
 0x1c1   : > { %v27642_v34 = vpop.trf.xlu0 }
 0x1c2   : > { %33182 = vst [vmem:[#allocation35_spill] sm:$0xff] %v27642_v34  ;;  %24641 = vmatpush3.xpose.msk.msra.mxu0 %vm859_vm2, %v27626_v31 }
 0x1c3   : > { %24652 = vmatprep.subr.mxu0 %v32786_v43 }
 0x1c5   : > { %v27649_v36 = vpop.trf.xlu0  ;;  %24643 = vmatmul.mubr.msk.f32.vlgmr.msra.gmra.mxu0 %vm859_vm2, %v27646_v35 }
 0x1c6   : > { %33183 = vst [vmem:[#allocation36_spill] sm:$0xff] %v27649_v36  ;;  %24646 = vmatpush3.xpose.msk.msra.mxu1 %vm859_vm2, %v27649_v36  ;;  %24656 = vmatprep.mubr.msk.f32.mxu0 %vm27293_vm1, %v32786_v43 }
 0x1c7   : > { %24647 = vmatprep.subr.mxu1 %v32786_v43 }
 0x1c9   : > { %v27658_v37 = vpop.trf.xlu0 }
 0x1ca   : > { %33184 = vst [vmem:[#allocation37_spill] sm:$0xff] %v27658_v37  ;;  %24648 = vmatpush3.xpose.msk.msra.mxu1 %vm859_vm2, %v27642_v34 }
 0x1cb   : > { %24659 = vmatprep.subr.mxu1 %v32786_v43 }
 0x1cd   : > { %v27665_v39 = vpop.trf.xlu0  ;;  %24650 = vmatmul.mubr.msk.f32.vlgmr.msra.gmra.mxu1 %vm859_vm2, %v27662_v38 }
 0x1ce   : > { %33185 = vst [vmem:[#allocation38_spill] sm:$0xff] %v27665_v39  ;;  %24653 = vmatpush3.xpose.msk.msra.mxu0 %vm859_vm2, %v27665_v39  ;;  %24663 = vmatprep.mubr.msk.f32.mxu1 %vm27293_vm1, %v32786_v43 }
 0x1cf   : > { %24654 = vmatprep.subr.mxu0 %v32786_v43 }
 0x1d1   : > { %v27674_v41 = vpop.trf.xlu0 }
 0x1d2   : > { %33186 = vst [vmem:[#allocation39_spill] sm:$0xff] %v27674_v41  ;;  %24655 = vmatpush3.xpose.msk.msra.mxu0 %vm859_vm2, %v27658_v37 }
 0x1d3   : > { %24666 = vmatprep.subr.mxu0 %v32786_v43 }
 0x1d5   : > { %v27681_v44 = vpop.trf.xlu0  ;;  %24657 = vmatmul.mubr.msk.f32.vlgmr.msra.gmra.mxu0 %vm859_vm2, %v27678_v42 }
 0x1d6   : > { %33187 = vst [vmem:[#allocation40_spill] sm:$0xff] %v27681_v44  ;;  %24660 = vmatpush3.xpose.msk.msra.mxu1 %vm859_vm2, %v27681_v44  ;;  %24670 = vmatprep.mubr.msk.f32.mxu0 %vm27293_vm1, %v32786_v43 }
 0x1d7   : > { %24661 = vmatprep.subr.mxu1 %v32786_v43 }
 0x1d9   : > { %v27690_v45 = vpop.trf.xlu0 }
 0x1da   : > { %33188 = vst [vmem:[#allocation41_spill] sm:$0xff] %v27690_v45  ;;  %24662 = vmatpush3.xpose.msk.msra.mxu1 %vm859_vm2, %v27674_v41 }
 0x1db   : > { %24673 = vmatprep.subr.mxu1 %v32786_v43 }
 0x1dd   : > { %v27697_v47 = vpop.trf.xlu0  ;;  %24664 = vmatmul.mubr.msk.f32.vlgmr.msra.gmra.mxu1 %vm859_vm2, %v27694_v46 }
 0x1de   : > { %33189 = vst [vmem:[#allocation42_spill] sm:$0xff] %v27697_v47  ;;  %24667 = vmatpush3.xpose.msk.msra.mxu0 %vm859_vm2, %v27697_v47  ;;  %24677 = vmatprep.mubr.msk.f32.mxu1 %vm27293_vm1, %v32786_v43 }
 0x1df   : > { %24668 = vmatprep.subr.mxu0 %v32786_v43 }
 0x1e1   : > { %v27706_v49 = vpop.trf.xlu0 }
 0x1e2   : > { %33190 = vst [vmem:[#allocation43_spill] sm:$0xff] %v27706_v49  ;;  %24669 = vmatpush3.xpose.msk.msra.mxu0 %vm859_vm2, %v27690_v45 }
 0x1e3   : > { %24680 = vmatprep.subr.mxu0 %v32786_v43 }
 0x1e5   : > { %v27713_v51 = vpop.trf.xlu0  ;;  %24671 = vmatmul.mubr.msk.f32.vlgmr.msra.gmra.mxu0 %vm859_vm2, %v27710_v50 }
 0x1e6   : > { %33191 = vst [vmem:[#allocation44_spill] sm:$0xff] %v27713_v51  ;;  %24674 = vmatpush3.xpose.msk.msra.mxu1 %vm859_vm2, %v27713_v51  ;;  %24684 = vmatprep.mubr.msk.f32.mxu0 %vm27293_vm1, %v32786_v43 }
 0x1e7   : > { %24675 = vmatprep.subr.mxu1 %v32786_v43 }
 0x1e9   : > { %v27722_v52 = vpop.trf.xlu0 }
 0x1ea   : > { %33192 = vst [vmem:[#allocation45_spill] sm:$0xff] %v27722_v52  ;;  %24676 = vmatpush3.xpose.msk.msra.mxu1 %vm859_vm2, %v27706_v49 }
 0x1eb   : > { %24687 = vmatprep.subr.mxu1 %v32786_v43 }
 0x1ed   : > { %v27729_v55 = vpop.trf.xlu0  ;;  %24678 = vmatmul.mubr.msk.f32.vlgmr.msra.gmra.mxu1 %vm859_vm2, %v27726_v54 }
 0x1ee   : > { %33194 = vst [vmem:[#allocation47_spill] sm:$0xff] %v27729_v55  ;;  %24681 = vmatpush3.xpose.msk.msra.mxu0 %vm859_vm2, %v27729_v55  ;;  %24691 = vmatprep.mubr.msk.f32.mxu1 %vm27293_vm1, %v32786_v43 }
 0x1ef   : > { %24682 = vmatprep.subr.mxu0 %v32786_v43 }
 0x1f2   : > { %24683 = vmatpush3.xpose.msk.msra.mxu0 %vm859_vm2, %v27722_v52  ;;  %v599_v52 = vpop.f32.mrf.mxu0 }
 0x1f3   : > { %24715 = vmatprep.subr.mxu0 %v32786_v43 }
 0x1f5   : > { %24685 = vmatmul.mubr.msk.f32.vlgmr.msra.gmra.mxu0 %vm859_vm2, %v27740_v56  ;;  %v596_v56 = vadd.f32 %v595_v58, %v27484_v2 }
 0x1f6   : > { %24719 = vmatprep.mubr.msk.f32.mxu0 %vm27293_vm1, %v32786_v43  ;;  %v594_v43 = vadd.f32 %v593_v62, %v27484_v2 }
 0x212   : > { %v459_v63 = vpop.permute.xlu0 %458 }
 0x213   : > { %v584_v0 = vadd.f32 %v583_v57, %v459_v63  ;;  %v586_v17 = vadd.f32 %v585_v59, %v459_v63  ;;  %v598_v57 = vadd.f32 %v597_v40, %v27490_v5  ;;  %v600_v59 = vadd.f32 %v599_v52, %v27490_v5 }
 0x215   : > { %666 = vxpose.xlu0.b32.start [1/4] (short) %v584_v0, 128  ;;  %698 = vxpose.xlu1.b32.start [1/4] (short) %v586_v17, 128 }
 0x219   : > { %667 = vxpose.xlu0.b32.cont [2/4] (short) %v588_v53, 128  ;;  %699 = vxpose.xlu1.b32.cont [2/4] (short) %v590_v48, 128 }
 0x21d   : > { %668 = vxpose.xlu0.b32.cont [3/4] (short) %v594_v43, 128  ;;  %700 = vxpose.xlu1.b32.cont [3/4] (short) %v596_v56, 128 }
 0x221   : > { %669 = vxpose.xlu0.b32.end [4/4] (short) %v598_v57, 128  ;;  %701 = vxpose.xlu1.b32.end [4/4] (short) %v600_v59, 128 }
 0x23d   : > { %v27753_v63 = vpop.f32.mrf.mxu1 }
 0x23f   : > { %v24581_v60 = vpop.f32.mrf.mxu1 }
 0x245   : > { %v27755_v1 = vpop.f32.mrf.mxu1 }
 0x247   : > { %v24588_v53 = vpop.f32.mrf.mxu1 }
 0x24d   : > { %v27757_v48 = vpop.f32.mrf.mxu1 }
 0x24f   : > { %v24595_v61 = vpop.f32.mrf.mxu1 }
 0x255   : > { %v27759_v62 = vpop.f32.mrf.mxu0 }
 0x257   : > { %v24602_v58 = vpop.f32.mrf.mxu0 }
 0x25d   : > { %v27761_v43 = vpop.f32.mrf.mxu1 }
 0x25f   : > { %v24609_v2 = vpop.f32.mrf.mxu1 }
 0x265   : > { %v27763_v40 = vpop.f32.mrf.mxu0 }
 0x267   : > { %v24616_v5 = vpop.f32.mrf.mxu0 }
 0x26d   : > { %v27765_v52 = vpop.f32.mrf.mxu1 }
 0x26f   : > { %3503 = vrot.lane.b32.xlu1 %v27486_v3, %s27294_s17  ;;  %v24623_v56 = vpop.f32.mrf.mxu1 }
 0x273   : > { %3585 = vrot.lane.b32.xlu1 %v27495_v6, %s27294_s17  ;;  %v2125_v6 = vsel %vm2124_vm3, %v27753_v63, -inf }
 0x275   : > { %v27771_v0 = vpop.f32.mrf.mxu0 }
 0x277   : > { %3587 = vrot.lane.b32.xlu1 %v27502_v8, %s27294_s17  ;;  %v24630_v17 = vpop.f32.mrf.mxu0 }
 0x278   : > { %v33198_v17 = vmov 0.0  }
 0x27a   : > { %3501 = vrot.lane.b32.xlu0 %v27499_v7, %s27294_s17 }
 0x27b   : > { %3669 = vrot.lane.b32.xlu1 %v27518_v11, %s27294_s17  ;;  %v2128_v11 = vsel %vm2124_vm3, %v27755_v1, -inf }
 0x27d   : > { %v27779_v57 = vpop.f32.mrf.mxu1 }
 0x27e   : > { %3505 = vrot.lane.b32.xlu0 %v27488_v4, %s27294_s17 }
 0x27f   : > { %3749 = vrot.lane.b32.xlu1 %v27527_v12, %s27294_s17  ;;  %v24637_v59 = vpop.f32.mrf.mxu1 }
 0x282   : > { %3583 = vrot.lane.b32.xlu0 %v27515_v10, %s27294_s17 }
 0x283   : > { %3751 = vrot.lane.b32.xlu1 %v27534_v14, %s27294_s17 }
 0x285   : > { %v27789_v60 = vpop.f32.mrf.mxu0 }
 0x286   : > { %3665 = vrot.lane.b32.xlu0 %v27531_v13, %s27294_s17 }
 0x287   : > { %3833 = vrot.lane.b32.xlu1 %v27553_v18, %s27294_s17  ;;  %v24644_v53 = vpop.f32.mrf.mxu0 }
 0x28a   : > { %3667 = vrot.lane.b32.xlu0 %v27511_v9, %s27294_s17 }
 0x28d   : > { %v27797_v61 = vpop.f32.mrf.mxu1 }
 0x28f   : > { %v24651_v58 = vpop.f32.mrf.mxu1 }
 0x291   : > { %v27799_v2 = vpop.trf.xlu0  ;;  %v27827_v10 = vpop.trf.xlu1 }
 0x292   : > { %33196 = vst [vmem:[#allocation49_spill] sm:$0xff] %v27799_v2  ;;  %33204 = vst [vmem:[#allocation56_spill] sm:$0xff] %v27827_v10 }
 0x295   : > { %v27801_v5 = vpop.trf.xlu0  ;;  %v27803_v56 = vpop.f32.mrf.mxu0 }
 0x296   : > { %33197 = vst [vmem:[#allocation50_spill] sm:$0xff] %v27801_v5  ;;  %24688 = vmatpush3.msra.mxu1 %v27801_v5  ;;  %v27835_v5 = vpop.trf.xlu1 }
 0x297   : > { %24689 = vmatprep.subr.mxu1 %v33198_v17  ;;  %v24658_v59 = vpop.f32.mrf.mxu0  ;;  %33207 = vst [vmem:[#allocation59_spill] sm:$0xff] %v27835_v5 }
 0x298   : > { %24690 = vmatpush3.msra.mxu1 %v27799_v2 }
 0x299   : > { %v27808_v53 = vpop.trf.xlu0  ;;  %24694 = vmatprep.subr.mxu1 %v33198_v17 }
 0x29a   : > { %33199 = vst [vmem:[#allocation51_spill] sm:$0xff] %v27808_v53 }
 0x29d   : > { %v27811_v18 = vpop.trf.xlu0  ;;  %v27813_v58 = vpop.f32.mrf.mxu1 }
 0x29e   : > { %33200 = vst [vmem:[#allocation52_spill] sm:$0xff] %v27811_v18 }
 0x29f   : > { %v24665_v12 = vpop.f32.mrf.mxu1 }
 0x2a1   : > { %v27815_v13 = vpop.trf.xlu0 }
 0x2a2   : > { %33201 = vst [vmem:[#allocation53_spill] sm:$0xff] %v27815_v13 }
 0x2a5   : > { %v27817_v14 = vpop.trf.xlu0  ;;  %v27821_v59 = vpop.f32.mrf.mxu0 }
 0x2a6   : > { %33202 = vst [vmem:[#allocation54_spill] sm:$0xff] %v27817_v14 }
 0x2a7   : > { %v24672_v8 = vpop.f32.mrf.mxu0 }
 0x2a9   : > { %2129 = vmax.xlane.f32.xlu0 %v2128_v11  ;;  %v27825_v9 = vpop.trf.xlu0 }
 0x2aa   : > { %33203 = vst [vmem:[#allocation55_spill] sm:$0xff] %v27825_v9 }
 0x2ab   : > { %2126 = vmax.xlane.f32.xlu1 %v2125_v6  ;;  %v27843_v6 = vpop.trf.xlu1 }
 0x2ac   : > { %33209 = vst [vmem:[#allocation61_spill] sm:$0xff] %v27843_v6 }
 0x2ad   : > { %v27829_v12 = vpop.trf.xlu0  ;;  %v27831_v7 = vpop.f32.mrf.mxu1 }
 0x2ae   : > { %33205 = vst [vmem:[#allocation57_spill] sm:$0xff] %v27829_v12 }
 0x2af   : > { %v24679_v3 = vpop.f32.mrf.mxu1 }
 0x2b0   : > { %v27849_v3 = vpop.trf.xlu1 }
 0x2b1   : > { %v27833_v4 = vpop.trf.xlu0  ;;  %33210 = vst [vmem:[#allocation62_spill] sm:$0xff] %v27849_v3 }
 0x2b2   : > { %33206 = vst [vmem:[#allocation58_spill] sm:$0xff] %v27833_v4 }
 0x2b4   : > { %v27853_v11 = vpop.trf.xlu1 }
 0x2b5   : > { %v27837_v55 = vpop.trf.xlu0  ;;  %v27839_v51 = vpop.f32.mrf.mxu0  ;;  %33211 = vst [vmem:[#allocation63_spill] sm:$0xff] %v27853_v11 }
 0x2b6   : > { %33208 = vst [vmem:[#allocation60_spill] sm:$0xff] %v27837_v55  ;;  %24716 = vmatpush3.msra.mxu0 %v27837_v55 }
 0x2b7   : > { %24717 = vmatprep.subr.mxu0 %v33198_v17  ;;  %v24686_v8 = vpop.f32.mrf.mxu0 }
 0x2b8   : > { %24718 = vmatpush3.msra.mxu0 %v27833_v4  ;;  %v27855_v55 = vpop.trf.xlu1  ;;  %v2131_v4 = vsel %vm2124_vm3, %v27757_v48, -inf }
 0x2b9   : > { %24729 = vmatprep.subr.mxu0 %v33198_v17  ;;  %33212 = vst [vmem:[#allocation64_spill] sm:$0xff] %v27855_v55 }
 0x2bc   : > { %3915 = vrot.lane.b32.xlu1 %v27569_v21, %s27294_s17  ;;  %v27857_v10 = vpop.trf.xlu1  ;;  %v2134_v21 = vsel %vm2124_vm3, %v27759_v62, -inf }
 0x2bd   : > { %33213 = vst [vmem:[#allocation65_spill] sm:$0xff] %v27857_v10  ;;  %v2140_v10 = vsel %vm2124_vm3, %v27763_v40, -inf }
 0x2bf   : > { %3747 = vrot.lane.b32.xlu0 %v27547_v16, %s27294_s17  ;;  %v2137_v16 = vsel %vm2124_vm3, %v27761_v43, -inf }
 0x2c0   : > { %v27859_v6 = vpop.trf.xlu1 }
 0x2c1   : > { %33214 = vst [vmem:[#allocation66_spill] sm:$0xff] %v27859_v6 }
 0x2c4   : > { %v27861_v8 = vpop.trf.xlu1 }
 0x2c5   : > { %33215 = vst [vmem:[#allocation67_spill] sm:$0xff] %v27861_v8  ;;  %v2143_v8 = vsel %vm2124_vm3, %v27765_v52, -inf }
 0x2c8   : > { %v27867_v3 = vpop.trf.xlu1 }
 0x2c9   : > { %33216 = vst [vmem:[#allocation68_spill] sm:$0xff] %v27867_v3  ;;  %v2146_v3 = vsel %vm2124_vm3, %v27771_v0, -inf }
 0x2cc   : > { %v27871_v11 = vpop.trf.xlu1 }
 0x2cd   : > { %33217 = vst [vmem:[#allocation69_spill] sm:$0xff] %v27871_v11 }
 0x2e0   : > { %2132 = vmax.xlane.f32.xlu1 %v2131_v4  ;;  %v27877_v4 = vpop.trf.xlu1 }
 0x2e1   : > { %33218 = vst [vmem:[#allocation70_spill] sm:$0xff] %v27877_v4 }
 0x2e4   : > { %2135 = vmax.xlane.f32.xlu1 %v2134_v21  ;;  %v27881_v21 = vpop.trf.xlu0  ;;  %v27883_v6 = vpop.trf.xlu1 }
 0x2e5   : > { %33219 = vst [vmem:[#allocation71_spill] sm:$0xff] %v27881_v21  ;;  %33220 = vst [vmem:[#allocation72_spill] sm:$0xff] %v27883_v6 }
 0x2e8   : > { %2138 = vmax.xlane.f32.xlu1 %v2137_v16  ;;  %v2149_v16 = vsel %vm2124_vm3, %v27779_v57, -inf  ;;  %v27887_v11 = vpop.trf.xlu0  ;;  %v27891_v55 = vpop.trf.xlu1 }
 0x2e9   : > { %33221 = vst [vmem:[#allocation73_spill] sm:$0xff] %v27887_v11  ;;  %33222 = vst [vmem:[#allocation74_spill] sm:$0xff] %v27891_v55 }
 0x2ec   : > { %2141 = vmax.xlane.f32.xlu1 %v2140_v10  ;;  %v2152_v10 = vsel %vm2124_vm3, %v27789_v60, -inf  ;;  %v27895_v4 = vpop.trf.xlu0  ;;  %v27897_v21 = vpop.trf.xlu1 }
 0x2ed   : > { %33223 = vst [vmem:[#allocation75_spill] sm:$0xff] %v27895_v4  ;;  %33224 = vst [vmem:[#allocation76_spill] sm:$0xff] %v27897_v21 }
 0x2f0   : > { %2144 = vmax.xlane.f32.xlu1 %v2143_v8  ;;  %v2155_v8 = vsel %vm2124_vm3, %v27797_v61, -inf  ;;  %v27901_v6 = vpop.trf.xlu0  ;;  %v27905_v11 = vpop.trf.xlu1 }
 0x2f1   : > { %33225 = vst [vmem:[#allocation77_spill] sm:$0xff] %v27901_v6  ;;  %33226 = vst [vmem:[#allocation78_spill] sm:$0xff] %v27905_v11 }
 0x2f4   : > { %2147 = vmax.xlane.f32.xlu1 %v2146_v3  ;;  %v2158_v3 = vsel %vm2124_vm3, %v27803_v56, -inf  ;;  %v27909_v55 = vpop.trf.xlu0  ;;  %v27911_v4 = vpop.permute.xlu1 %3503 }
 0x2f5   : > { %33227 = vst [vmem:[#allocation79_spill] sm:$0xff] %v27909_v55  ;;  %33228 = vst [vmem:[#allocation80_spill] sm:$0xff] %v27911_v4 }
 0x2f8   : > { %2150 = vmax.xlane.f32.xlu1 %v2149_v16  ;;  %v2161_v16 = vsel %vm2124_vm3, %v27813_v58, -inf  ;;  %v27915_v21 = vpop.trf.xlu0  ;;  %v27919_v5 = vpop.permute.xlu1 %3585 }
 0x2f9   : > { %33229 = vst [vmem:[#allocation81_spill] sm:$0xff] %v27915_v21  ;;  %33230 = vst [vmem:[#allocation82_spill] sm:$0xff] %v27919_v5 }
 0x2fc   : > { %2153 = vmax.xlane.f32.xlu1 %v2152_v10  ;;  %v2164_v10 = vsel %vm2124_vm3, %v27821_v59, -inf  ;;  %v27923_v11 = vpop.permute.xlu1 %3587 }
 0x2fd   : > { %33232 = vst [vmem:[#allocation84_spill] sm:$0xff] %v27923_v11 }
 0x300   : > { %2156 = vmax.xlane.f32.xlu1 %v2155_v8  ;;  %v2167_v8 = vsel %vm2124_vm3, %v27831_v7, -inf  ;;  %v27927_v4 = vpop.permute.xlu1 %3669 }
 0x301   : > { %33234 = vst [vmem:[#allocation86_spill] sm:$0xff] %v27927_v4 }
 0x304   : > { %2159 = vmax.xlane.f32.xlu1 %v2158_v3  ;;  %v2170_v3 = vsel %vm2124_vm3, %v27839_v51, -inf  ;;  %v27931_v9 = vpop.permute.xlu1 %3749 }
 0x305   : > { %33236 = vst [vmem:[#allocation88_spill] sm:$0xff] %v27931_v9 }
 0x308   : > { %2162 = vmax.xlane.f32.xlu1 %v2161_v16  ;;  %v27921_v16 = vpop.permute.xlu0 %3501  ;;  %v27937_v45 = vpop.permute.xlu1 %3751 }
 0x309   : > { %33231 = vst [vmem:[#allocation83_spill] sm:$0xff] %v27921_v16  ;;  %33238 = vst [vmem:[#allocation90_spill] sm:$0xff] %v27937_v45 }
 0x30c   : > { %2165 = vmax.xlane.f32.xlu1 %v2164_v10  ;;  %v27925_v55 = vpop.permute.xlu0 %3505  ;;  %v27941_v5 = vpop.permute.xlu1 %3833 }
 0x30d   : > { %33233 = vst [vmem:[#allocation85_spill] sm:$0xff] %v27925_v55  ;;  %33240 = vst [vmem:[#allocation92_spill] sm:$0xff] %v27941_v5 }
 0x310   : > { %2168 = vmax.xlane.f32.xlu1 %v2167_v8  ;;  %v27929_v10 = vpop.permute.xlu0 %3583 }
 0x311   : > { %33235 = vst [vmem:[#allocation87_spill] sm:$0xff] %v27929_v10 }
 0x314   : > { %2171 = vmax.xlane.f32.xlu1 %v2170_v3  ;;  %v27935_v8 = vpop.permute.xlu0 %3665 }
 0x315   : > { %33237 = vst [vmem:[#allocation89_spill] sm:$0xff] %v27935_v8 }
 0x318   : > { %v27939_v3 = vpop.permute.xlu0 %3667 }
 0x319   : > { %33239 = vst [vmem:[#allocation91_spill] sm:$0xff] %v27939_v3 }
 0x325   : > { %3913 = vrot.lane.b32.xlu1 %v27562_v19, %s27294_s17 }
 0x332   : > { %v2130_v11 = vpop.xlane.xlu0 %2129 }
 0x333   : > { %v2174_v16 = vsub.f32 %v27755_v1, %v2130_v11 }
 0x334   : > { %v2127_v55 = vpop.xlane.xlu1 %2126 }
 0x335   : > { %v2191_v4 = vmul.f32 1.442695, %v2174_v16  ;;  %v2173_v10 = vsub.f32 %v27753_v63, %v2127_v55 }
 0x337   : > { %v2189_v21 = vmul.f32 1.442695, %v2173_v10  ;;  %26695 = vpow2.f32 %v2191_v4 }
 0x338   : > { %v27955_v1 = vpop.permute.xlu1 %3915 }
 0x339   : > { %26697 = vpow2.f32 %v2189_v21  ;;  %33241 = vst [vmem:[#allocation93_spill] sm:$0xff] %v27955_v1 }
 0x344   : > { %v27945_v9 = vpop.eup %26695 }
 0x345   : > { %v2224_v5 = vsel %vm2124_vm3, %v27945_v9, 0.0 }
 0x346   : > { %v27947_v19 = vpop.eup %26697 }
 0x347   : > { %v2221_v45 = vsel %vm2124_vm3, %v27947_v19, 0.0 }
 0x348   : > { %2222 = vadd.xlane.f32.xlu0 %v2221_v45 }
 0x349   : > { %2225 = vadd.xlane.f32.xlu1 %v2224_v5 }
 0x35e   : > { %3831 = vrot.lane.b32.xlu0 %v27543_v15, %s27294_s17 }
 0x369   : > { %v2133_v55 = vpop.xlane.xlu1 %2132 }
 0x36a   : > { %v2175_v63 = vsub.f32 %v27757_v48, %v2133_v55 }
 0x36c   : > { %v2193_v11 = vmul.f32 1.442695, %v2175_v63 }
 0x36d   : > { %v2136_v4 = vpop.xlane.xlu1 %2135 }
 0x36e   : > { %26699 = vpow2.f32 %v2193_v11  ;;  %v2176_v21 = vsub.f32 %v27759_v62, %v2136_v4 }
 0x370   : > { %v2195_v16 = vmul.f32 1.442695, %v2176_v21 }
 0x371   : > { %v2139_v10 = vpop.xlane.xlu1 %2138 }
 0x372   : > { %26701 = vpow2.f32 %v2195_v16  ;;  %v2177_v45 = vsub.f32 %v27761_v43, %v2139_v10 }
 0x374   : > { %v2197_v8 = vmul.f32 1.442695, %v2177_v45 }
 0x375   : > { %v2142_v5 = vpop.xlane.xlu1 %2141 }
 0x376   : > { %26703 = vpow2.f32 %v2197_v8  ;;  %v2178_v15 = vsub.f32 %v27763_v40, %v2142_v5 }
 0x378   : > { %v2199_v3 = vmul.f32 1.442695, %v2178_v15 }
 0x379   : > { %v2145_v1 = vpop.xlane.xlu1 %2144 }
 0x37a   : > { %26705 = vpow2.f32 %v2199_v3  ;;  %v2179_v48 = vsub.f32 %v27765_v52, %v2145_v1 }
 0x37b   : > { %v27962_v55 = vpop.eup %26699 }
 0x37c   : > { %v2201_v63 = vmul.f32 1.442695, %v2179_v48  ;;  %v2227_v62 = vsel %vm2124_vm3, %v27962_v55, 0.0 }
 0x37d   : > { %2228 = vadd.xlane.f32.xlu0 %v2227_v62  ;;  %v2148_v11 = vpop.xlane.xlu1 %2147 }
 0x37e   : > { %26707 = vpow2.f32 %v2201_v63  ;;  %v2180_v43 = vsub.f32 %v27771_v0, %v2148_v11 }
 0x37f   : > { %v27967_v4 = vpop.eup %26701 }
 0x380   : > { %v2203_v8 = vmul.f32 1.442695, %v2180_v43  ;;  %v2230_v15 = vsel %vm2124_vm3, %v27967_v4, 0.0 }
 0x381   : > { %2231 = vadd.xlane.f32.xlu0 %v2230_v15  ;;  %v2151_v40 = vpop.xlane.xlu1 %2150 }
 0x382   : > { %26709 = vpow2.f32 %v2203_v8  ;;  %v2181_v52 = vsub.f32 %v27779_v57, %v2151_v40 }
 0x383   : > { %v27972_v3 = vpop.eup %26703 }
 0x384   : > { %v2205_v1 = vmul.f32 1.442695, %v2181_v52  ;;  %v2233_v21 = vsel %vm2124_vm3, %v27972_v3, 0.0 }
 0x385   : > { %2234 = vadd.xlane.f32.xlu0 %v2233_v21  ;;  %v2154_v16 = vpop.xlane.xlu1 %2153 }
 0x386   : > { %26711 = vpow2.f32 %v2205_v1  ;;  %v2182_v0 = vsub.f32 %v27789_v60, %v2154_v16 }
 0x387   : > { %v27977_v10 = vpop.eup %26705 }
 0x388   : > { %v2207_v45 = vmul.f32 1.442695, %v2182_v0  ;;  %v2236_v5 = vsel %vm2124_vm3, %v27977_v10, 0.0 }
 0x389   : > { %2237 = vadd.xlane.f32.xlu1 %v2236_v5  ;;  %v2157_v48 = vpop.xlane.xlu1 %2156 }
 0x38a   : > { %26713 = vpow2.f32 %v2207_v45  ;;  %v2183_v57 = vsub.f32 %v27797_v61, %v2157_v48 }
 0x38b   : > { %v27982_v63 = vpop.eup %26707 }
 0x38c   : > { %v2209_v62 = vmul.f32 1.442695, %v2183_v57  ;;  %v2239_v11 = vsel %vm2124_vm3, %v27982_v63, 0.0 }
 0x38d   : > { %2240 = vadd.xlane.f32.xlu0 %v2239_v11  ;;  %v2160_v43 = vpop.xlane.xlu1 %2159 }
 0x38e   : > { %26715 = vpow2.f32 %v2209_v62  ;;  %v2184_v60 = vsub.f32 %v27803_v56, %v2160_v43 }
 0x38f   : > { %v27987_v8 = vpop.eup %26709 }
 0x390   : > { %v2211_v15 = vmul.f32 1.442695, %v2184_v60  ;;  %v2242_v40 = vsel %vm2124_vm3, %v27987_v8, 0.0 }
 0x391   : > { %2243 = vadd.xlane.f32.xlu1 %v2242_v40  ;;  %v2163_v52 = vpop.xlane.xlu1 %2162 }
 0x392   : > { %26717 = vpow2.f32 %v2211_v15  ;;  %v2185_v61 = vsub.f32 %v27813_v58, %v2163_v52 }
 0x393   : > { %v27992_v1 = vpop.eup %26711 }
 0x394   : > { %v2213_v21 = vmul.f32 1.442695, %v2185_v61  ;;  %v2245_v16 = vsel %vm2124_vm3, %v27992_v1, 0.0 }
 0x395   : > { %2246 = vadd.xlane.f32.xlu0 %v2245_v16  ;;  %v2166_v0 = vpop.xlane.xlu1 %2165 }
 0x396   : > { %26719 = vpow2.f32 %v2213_v21  ;;  %v2186_v56 = vsub.f32 %v27821_v59, %v2166_v0 }
 0x397   : > { %v27997_v45 = vpop.eup %26713 }
 0x398   : > { %v2215_v5 = vmul.f32 1.442695, %v2186_v56  ;;  %v2248_v48 = vsel %vm2124_vm3, %v27997_v45, 0.0 }
 0x399   : > { %2249 = vadd.xlane.f32.xlu1 %v2248_v48  ;;  %v2169_v57 = vpop.xlane.xlu1 %2168 }
 0x39a   : > { %26721 = vpow2.f32 %v2215_v5  ;;  %v2187_v58 = vsub.f32 %v27831_v7, %v2169_v57  ;;  %v28031_v5 = vpop.permute.xlu0 %3747 }
 0x39b   : > { %v28002_v62 = vpop.eup %26715 }
 0x39c   : > { %v2217_v11 = vmul.f32 1.442695, %v2187_v58  ;;  %v2251_v43 = vsel %vm2124_vm3, %v28002_v62, 0.0 }
 0x39d   : > { %2252 = vadd.xlane.f32.xlu0 %v2251_v43  ;;  %v2172_v16 = vpop.xlane.xlu1 %2171 }
 0x39e   : > { %26723 = vpow2.f32 %v2217_v11  ;;  %v2188_v0 = vsub.f32 %v27839_v51, %v2172_v16 }
 0x39f   : > { %v28006_v59 = vpop.eup %26717 }
 0x3a0   : > { %v2254_v60 = vsel %vm2124_vm3, %v28006_v59, 0.0  ;;  %v2219_v56 = vmul.f32 1.442695, %v2188_v0 }
 0x3a1   : > { %2255 = vadd.xlane.f32.xlu1 %v2254_v60  ;;  %v28033_v48 = vpop.permute.xlu1 %3913 }
 0x3a2   : > { %26725 = vpow2.f32 %v2219_v56  ;;  %33242 = vst [vmem:[#allocation94_spill] sm:$0xff] %v28033_v48 }
 0x3a3   : > { %v28010_v15 = vpop.eup %26719 }
 0x3a4   : > { %v2257_v40 = vsel %vm2124_vm3, %v28010_v15, 0.0 }
 0x3a5   : > { %2258 = vadd.xlane.f32.xlu0 %v2257_v40 }
 0x3a7   : > { %v28014_v7 = vpop.eup %26721 }
 0x3a8   : > { %v2260_v52 = vsel %vm2124_vm3, %v28014_v7, 0.0 }
 0x3a9   : > { %2261 = vadd.xlane.f32.xlu1 %v2260_v52 }
 0x3ab   : > { %v28018_v61 = vpop.eup %26723 }
 0x3ac   : > { %v2263_v21 = vsel %vm2124_vm3, %v28018_v61, 0.0 }
 0x3ad   : > { %2264 = vadd.xlane.f32.xlu0 %v2263_v21 }
 0x3af   : > { %v28041_v51 = vpop.eup %26725 }
 0x3b0   : > { %v2266_v11 = vsel %vm2124_vm3, %v28041_v51, 0.0 }
 0x3ba   : > { %3997 = vrot.lane.b32.xlu1 %v27585_v24, %s27294_s17 }
 0x3c3   : > { %3829 = vrot.lane.b32.xlu0 %v27566_v20, %s27294_s17 }
 0x3c7   : > { %3911 = vrot.lane.b32.xlu0 %v27582_v23, %s27294_s17 }
 0x3cb   : > { %3995 = vrot.lane.b32.xlu0 %v27578_v22, %s27294_s17 }
 0x3cf   : > { %3993 = vrot.lane.b32.xlu0 %v27598_v26, %s27294_s17 }
 0x3d1   : > { %v2223_v57 = vpop.xlane.xlu0 %2222 }
 0x3d2   : > { %26727 = vrcp.f32 %v2223_v57  ;;  %v2226_v58 = vpop.xlane.xlu1 %2225 }
 0x3d3   : > { %4075 = vrot.lane.b32.xlu0 %v27614_v29, %s27294_s17  ;;  %26729 = vrcp.f32 %v2226_v58 }
 0x3d7   : > { %4159 = vrot.lane.b32.xlu0 %v27610_v28, %s27294_s17 }
 0x3db   : > { %4157 = vrot.lane.b32.xlu0 %v27630_v32, %s27294_s17 }
 0x3de   : > { %2267 = vadd.xlane.f32.xlu1 %v2266_v11  ;;  %v33244_v11 = vld [vmem:[#allocation81_spill] sm:$0xff] }
 0x3df   : > { %v26728_v43 = vpop.eup %26727  ;;  %4239 = vrot.lane.b32.xlu0 %v27646_v35, %s27294_s17 }
 0x3e0   : > { %v2285_v60 = vmul.f32 %v26728_v43, %v27947_v19  ;;  %v26730_v40 = vpop.eup %26729  ;;  %v33245_v43 = vld [vmem:[#allocation41_spill] sm:$0xff] }
 0x3e1   : > { %v2286_v52 = vmul.f32 %v26730_v40, %v27945_v9  ;;  %v28091_v9 = vpop.permute.xlu0 %3831 }
 0x3e2   : > { %24692 = vmatmul.mubr.msk.f32.vlgmr.msra.gmra.mxu1 %vm2124_vm3, %v2285_v60  ;;  %33243 = vst [vmem:[#allocation95_spill] sm:$0xff] %v28091_v9 }
 0x3e3   : > { %24695 = vmatpush3.msra.mxu1 %v27811_v18  ;;  %4323 = vrot.lane.b32.xlu0 %v27642_v34, %s27294_s17 }
 0x3e4   : > { %24696 = vmatprep.subr.mxu1 %v33198_v17  ;;  %24698 = vmatprep.mubr.msk.f32.mxu1 %vm27293_vm1, %v33198_v17 }
 0x3e5   : > { %24697 = vmatpush3.msra.mxu1 %v27808_v53 }
 0x3e6   : > { %24701 = vmatprep.subr.mxu1 %v33198_v17  ;;  %24699 = vmatmul.mubr.msk.f32.vlgmr.msra.gmra.mxu1 %vm2124_vm3, %v2286_v52  ;;  %v33246_v52 = vld [vmem:[#allocation55_spill] sm:$0xff] }
 0x3e7   : > { %24702 = vmatpush3.msra.mxu1 %v27817_v14  ;;  %4321 = vrot.lane.b32.xlu0 %v27662_v38, %s27294_s17 }
 0x3e8   : > { %24703 = vmatprep.subr.mxu1 %v33198_v17  ;;  %24705 = vmatprep.mubr.msk.f32.mxu1 %vm27293_vm1, %v33198_v17 }
 0x3e9   : > { %24704 = vmatpush3.msra.mxu1 %v27815_v13 }
 0x3ea   : > { %24708 = vmatprep.subr.mxu1 %v33198_v17 }
 0x3eb   : > { %4403 = vrot.lane.b32.xlu0 %v27678_v42, %s27294_s17 }
 0x3ef   : > { %4487 = vrot.lane.b32.xlu0 %v27674_v41, %s27294_s17  ;;  %4079 = vrot.lane.b32.xlu1 %v27601_v27, %s27294_s17 }
 0x3f3   : > { %4485 = vrot.lane.b32.xlu0 %v27694_v46, %s27294_s17  ;;  %4077 = vrot.lane.b32.xlu1 %v27594_v25, %s27294_s17 }
 0x3f7   : > { %4567 = vrot.lane.b32.xlu0 %v27710_v50, %s27294_s17  ;;  %4161 = vrot.lane.b32.xlu1 %v27617_v30, %s27294_s17 }
 0x3fb   : > { %4651 = vrot.lane.b32.xlu0 %v27706_v49, %s27294_s17  ;;  %4243 = vrot.lane.b32.xlu1 %v27633_v33, %s27294_s17 }
 0x3ff   : > { %4649 = vrot.lane.b32.xlu0 %v27726_v54, %s27294_s17  ;;  %4241 = vrot.lane.b32.xlu1 %v27626_v31, %s27294_s17 }
 0x403   : > { %4991 = vrot.lane.b32.xlu0 %v27799_v2, %s27294_s17  ;;  %4325 = vrot.lane.b32.xlu1 %v27649_v36, %s27294_s17 }
 0x406   : > { %v2229_v19 = vpop.xlane.xlu0 %2228 }
 0x407   : > { %26731 = vrcp.f32 %v2229_v19  ;;  %5072 = vrot.lane.b32.xlu0 %v27808_v53, %s27294_s17  ;;  %4407 = vrot.lane.b32.xlu1 %v27665_v39, %s27294_s17  ;;  %v33247_v19 = vld [vmem:[#allocation59_spill] sm:$0xff] }
 0x40a   : > { %v2232_v21 = vpop.xlane.xlu0 %2231 }
 0x40b   : > { %26733 = vrcp.f32 %v2232_v21  ;;  %5155 = vrot.lane.b32.xlu0 %v27817_v14, %s27294_s17  ;;  %4405 = vrot.lane.b32.xlu1 %v27658_v37, %s27294_s17  ;;  %v33263_v14 = vld [vmem:[#allocation70_spill] sm:$0xff] }
 0x40e   : > { %v2235_v16 = vpop.xlane.xlu0 %2234 }
 0x40f   : > { %26735 = vrcp.f32 %v2235_v16  ;;  %5236 = vrot.lane.b32.xlu0 %v27829_v12, %s27294_s17  ;;  %4489 = vrot.lane.b32.xlu1 %v27681_v44, %s27294_s17  ;;  %v33248_v16 = vld [vmem:[#allocation44_spill] sm:$0xff] }
 0x412   : > { %v2238_v0 = vpop.xlane.xlu1 %2237 }
 0x413   : > { %26737 = vrcp.f32 %v2238_v0  ;;  %5479 = vrot.lane.b32.xlu0 %v27901_v6, %s27294_s17  ;;  %4571 = vrot.lane.b32.xlu1 %v27697_v47, %s27294_s17 }
 0x414   : > { %v26732_v56 = vpop.eup %26731 }
 0x415   : > { %v2287_v57 = vmul.f32 %v26732_v56, %v27962_v55 }
 0x416   : > { %v2241_v58 = vpop.xlane.xlu0 %2240 }
 0x417   : > { %26739 = vrcp.f32 %v2241_v58  ;;  %5560 = vrot.lane.b32.xlu0 %v33244_v11, %s27294_s17  ;;  %4569 = vrot.lane.b32.xlu1 %v33245_v43, %s27294_s17  ;;  %v33250_v58 = vld [vmem:[#allocation71_spill] sm:$0xff] }
 0x418   : > { %v26734_v60 = vpop.eup %26733  ;;  %24706 = vmatmul.mubr.msk.f32.vlgmr.msra.gmra.mxu1 %vm2124_vm3, %v2287_v57 }
 0x419   : > { %24709 = vmatpush3.msra.mxu1 %v27829_v12  ;;  %24712 = vmatprep.mubr.msk.f32.mxu1 %vm27293_vm1, %v33198_v17  ;;  %v2288_v40 = vmul.f32 %v26734_v60, %v27967_v4  ;;  %v33249_v4 = vld [vmem:[#allocation73_spill] sm:$0xff]  ;;  %v33251_v60 = vld [vmem:[#allocation62_spill] sm:$0xff]  ;;  %v33260_v12 = vld [vmem:[#allocation68_spill] sm:$0xff] }
 0x41a   : > { %24710 = vmatprep.subr.mxu1 %v33198_v17  ;;  %v2244_v55 = vpop.xlane.xlu1 %2243 }
 0x41b   : > { %24711 = vmatpush3.msra.mxu1 %v33246_v52  ;;  %26741 = vrcp.f32 %v2244_v55  ;;  %5641 = vrot.lane.b32.xlu0 %v33247_v19, %s27294_s17 }
 0x41c   : > { %v26736_v21 = vpop.eup %26735  ;;  %24722 = vmatprep.subr.mxu1 %v33198_v17  ;;  %4653 = vrot.lane.b32.xlu1 %v33248_v16, %s27294_s17 }
 0x41d   : > { %24713 = vmatmul.mubr.msk.f32.vlgmr.msra.gmra.mxu1 %vm2124_vm3, %v2288_v40  ;;  %v2289_v0 = vmul.f32 %v26736_v21, %v27972_v3  ;;  %v33252_v3 = vld [vmem:[#allocation47_spill] sm:$0xff] }
 0x41e   : > { %24723 = vmatpush3.msra.mxu1 %v33249_v4  ;;  %v2247_v56 = vpop.xlane.xlu0 %2246  ;;  %24726 = vmatprep.mubr.msk.f32.mxu1 %vm27293_vm1, %v33198_v17  ;;  %v33253_v21 = vld [vmem:[#allocation75_spill] sm:$0xff] }
 0x41f   : > { %24724 = vmatprep.subr.mxu1 %v33198_v17  ;;  %26743 = vrcp.f32 %v2247_v56  ;;  %24720 = vmatmul.mubr.msk.f32.vlgmr.msra.gmra.mxu0 %vm2124_vm3, %v2289_v0  ;;  %v33254_v56 = vld [vmem:[#allocation64_spill] sm:$0xff] }
 0x420   : > { %v26738_v57 = vpop.eup %26737  ;;  %24725 = vmatpush3.msra.mxu1 %v33250_v58  ;;  %24730 = vmatpush3.msra.mxu0 %v27901_v6  ;;  %v33257_v6 = vld [vmem:[#allocation66_spill] sm:$0xff] }
 0x421   : > { %5722 = vrot.lane.b32.xlu0 %v33251_v60, %s27294_s17  ;;  %4735 = vrot.lane.b32.xlu1 %v33252_v3, %s27294_s17  ;;  %v2290_v40 = vmul.f32 %v26738_v57, %v27977_v10  ;;  %v33255_v10 = vld [vmem:[#allocation45_spill] sm:$0xff] }
 0x422   : > { %24731 = vmatprep.subr.mxu0 %v33198_v17  ;;  %24736 = vmatprep.subr.mxu1 %v33198_v17  ;;  %v2250_v55 = vpop.xlane.xlu1 %2249 }
 0x423   : > { %24732 = vmatpush3.msra.mxu0 %v33253_v21  ;;  %26745 = vrcp.f32 %v2250_v55  ;;  %24727 = vmatmul.mubr.msk.f32.vlgmr.msra.gmra.mxu1 %vm2124_vm3, %v2290_v40  ;;  %v33256_v40 = vld [vmem:[#allocation79_spill] sm:$0xff] }
 0x424   : > { %v26740_v0 = vpop.eup %26739  ;;  %24737 = vmatpush3.msra.mxu1 %v33244_v11  ;;  %24733 = vmatprep.mubr.msk.f32.mxu0 %vm27293_vm1, %v33198_v17 }
 0x425   : > { %5803 = vrot.lane.b32.xlu0 %v33254_v56, %s27294_s17  ;;  %4733 = vrot.lane.b32.xlu1 %v33255_v10, %s27294_s17  ;;  %v2291_v57 = vmul.f32 %v26740_v0, %v27982_v63  ;;  %v33258_v63 = vld [vmem:[#allocation48_spill] sm:$0xff] }
 0x426   : > { %24738 = vmatprep.subr.mxu1 %v33198_v17  ;;  %24743 = vmatprep.subr.mxu0 %v33198_v17  ;;  %v2253_v55 = vpop.xlane.xlu0 %2252 }
 0x427   : > { %24739 = vmatpush3.msra.mxu1 %v33256_v40  ;;  %26747 = vrcp.f32 %v2253_v55  ;;  %24734 = vmatmul.mubr.msk.f32.vlgmr.msra.gmra.mxu0 %vm2124_vm3, %v2291_v57  ;;  %v33259_v57 = vld [vmem:[#allocation56_spill] sm:$0xff] }
 0x428   : > { %v26742_v11 = vpop.eup %26741  ;;  %24744 = vmatpush3.msra.mxu0 %v33247_v19  ;;  %24740 = vmatprep.mubr.msk.f32.mxu1 %vm27293_vm1, %v33198_v17 }
 0x429   : > { %5884 = vrot.lane.b32.xlu0 %v33257_v6, %s27294_s17  ;;  %4731 = vrot.lane.b32.xlu1 %v33258_v63, %s27294_s17  ;;  %v2292_v0 = vmul.f32 %v26742_v11, %v27987_v8  ;;  %v33261_v8 = vld [vmem:[#allocation50_spill] sm:$0xff] }
 0x42a   : > { %24745 = vmatprep.subr.mxu0 %v33198_v17  ;;  %24750 = vmatprep.subr.mxu1 %v33198_v17  ;;  %v2256_v55 = vpop.xlane.xlu1 %2255 }
 0x42b   : > { %24746 = vmatpush3.msra.mxu0 %v33259_v57  ;;  %26749 = vrcp.f32 %v2256_v55  ;;  %24741 = vmatmul.mubr.msk.f32.vlgmr.msra.gmra.mxu1 %vm2124_vm3, %v2292_v0  ;;  %v33262_v0 = vld [vmem:[#allocation61_spill] sm:$0xff] }
 0x42c   : > { %v26744_v19 = vpop.eup %26743  ;;  %24751 = vmatpush3.msra.mxu1 %v33251_v60  ;;  %24747 = vmatprep.mubr.msk.f32.mxu0 %vm27293_vm1, %v33198_v17 }
 0x42d   : > { %5965 = vrot.lane.b32.xlu0 %v33260_v12, %s27294_s17  ;;  %4993 = vrot.lane.b32.xlu1 %v33261_v8, %s27294_s17  ;;  %v2293_v11 = vmul.f32 %v26744_v19, %v27992_v1 }
 0x42e   : > { %24752 = vmatprep.subr.mxu1 %v33198_v17  ;;  %24757 = vmatprep.subr.mxu0 %v33198_v17  ;;  %v2259_v55 = vpop.xlane.xlu0 %2258 }
 0x42f   : > { %24753 = vmatpush3.msra.mxu1 %v33262_v0  ;;  %26751 = vrcp.f32 %v2259_v55  ;;  %24748 = vmatmul.mubr.msk.f32.vlgmr.msra.gmra.mxu0 %vm2124_vm3, %v2293_v11  ;;  %v33264_v11 = vld [vmem:[#allocation63_spill] sm:$0xff] }
 0x430   : > { %v26746_v60 = vpop.eup %26745  ;;  %24758 = vmatpush3.msra.mxu0 %v33254_v56  ;;  %24754 = vmatprep.mubr.msk.f32.mxu1 %vm27293_vm1, %v33198_v17  ;;  %v33265_v56 = vld [vmem:[#allocation74_spill] sm:$0xff] }
 0x431   : > { %6046 = vrot.lane.b32.xlu0 %v33263_v14, %s27294_s17  ;;  %5074 = vrot.lane.b32.xlu1 %v27811_v18, %s27294_s17  ;;  %v2294_v1 = vmul.f32 %v26746_v60, %v27997_v45 }
 0x432   : > { %24759 = vmatprep.subr.mxu0 %v33198_v17  ;;  %24764 = vmatprep.subr.mxu1 %v33198_v17  ;;  %v2262_v19 = vpop.xlane.xlu1 %2261 }
 0x433   : > { %24760 = vmatpush3.msra.mxu0 %v33264_v11  ;;  %26753 = vrcp.f32 %v2262_v19  ;;  %24755 = vmatmul.mubr.msk.f32.vlgmr.msra.gmra.mxu1 %vm2124_vm3, %v2294_v1  ;;  %v33266_v1 = vld [vmem:[#allocation65_spill] sm:$0xff] }
 0x434   : > { %v26748_v55 = vpop.eup %26747  ;;  %24765 = vmatpush3.msra.mxu1 %v33257_v6  ;;  %24761 = vmatprep.mubr.msk.f32.mxu0 %vm27293_vm1, %v33198_v17  ;;  %v33267_v6 = vld [vmem:[#allocation78_spill] sm:$0xff] }
 0x435   : > { %6127 = vrot.lane.b32.xlu0 %v33265_v56, %s27294_s17  ;;  %5153 = vrot.lane.b32.xlu1 %v27815_v13, %s27294_s17  ;;  %v2295_v45 = vmul.f32 %v26748_v55, %v28002_v62  ;;  %v33268_v55 = vld [vmem:[#allocation67_spill] sm:$0xff] }
 0x436   : > { %24766 = vmatprep.subr.mxu1 %v33198_v17  ;;  %24771 = vmatprep.subr.mxu0 %v33198_v17  ;;  %v2265_v60 = vpop.xlane.xlu0 %2264 }
 0x437   : > { %24767 = vmatpush3.msra.mxu1 %v33266_v1  ;;  %26755 = vrcp.f32 %v2265_v60  ;;  %24762 = vmatmul.mubr.msk.f32.vlgmr.msra.gmra.mxu0 %vm2124_vm3, %v2295_v45  ;;  %v33269_v60 = vld [vmem:[#allocation12_spill] sm:$0xff] }
 0x438   : > { %v26750_v19 = vpop.eup %26749  ;;  %24772 = vmatpush3.msra.mxu0 %v33260_v12  ;;  %24768 = vmatprep.mubr.msk.f32.mxu1 %vm27293_vm1, %v33198_v17  ;;  %v33273_v12 = vld [vmem:[#allocation58_spill] sm:$0xff] }
 0x439   : > { %6208 = vrot.lane.b32.xlu0 %v33267_v6, %s27294_s17  ;;  %5234 = vrot.lane.b32.xlu1 %v33246_v52, %s27294_s17  ;;  %v2296_v62 = vmul.f32 %v26750_v19, %v28006_v59  ;;  %v33270_v59 = vld [vmem:[#allocation60_spill] sm:$0xff] }
 0x43a   : > { %24773 = vmatprep.subr.mxu0 %v33198_v17  ;;  %24778 = vmatprep.subr.mxu1 %v33198_v17 }
 0x43b   : > { %24774 = vmatpush3.msra.mxu0 %v33268_v55  ;;  %24769 = vmatmul.mubr.msk.f32.vlgmr.msra.gmra.mxu1 %vm2124_vm3, %v2296_v62  ;;  %v33271_v62 = vld [vmem:[#allocation69_spill] sm:$0xff] }
 0x43c   : > { %v26752_v45 = vpop.eup %26751  ;;  %24779 = vmatpush3.msra.mxu1 %v33263_v14  ;;  %24775 = vmatprep.mubr.msk.f32.mxu0 %vm27293_vm1, %v33198_v17 }
 0x43d   : > { %6321 = vrot.lane.b32.xlu0 %v33269_v60, %s27295_s23  ;;  %5317 = vrot.lane.b32.xlu1 %v33270_v59, %s27294_s17  ;;  %v2297_v19 = vmul.f32 %v26752_v45, %v28010_v15  ;;  %v33272_v60 = vld [vmem:[#allocation11_spill] sm:$0xff]  ;;  %v33274_v45 = vld [vmem:[#allocation72_spill] sm:$0xff] }
 0x43e   : > { %24780 = vmatprep.subr.mxu1 %v33198_v17  ;;  %24785 = vmatprep.subr.mxu0 %v33198_v17 }
 0x43f   : > { %24781 = vmatpush3.msra.mxu1 %v33271_v62  ;;  %24776 = vmatmul.mubr.msk.f32.vlgmr.msra.gmra.mxu0 %vm2124_vm3, %v2297_v19 }
 0x440   : > { %v26754_v14 = vpop.eup %26753  ;;  %24786 = vmatpush3.msra.mxu0 %v33265_v56  ;;  %24782 = vmatprep.mubr.msk.f32.mxu1 %vm27293_vm1, %v33198_v17  ;;  %v3830_v56 = vpop.permute.xlu0 %3829 }
 0x441   : > { %6319 = vrot.lane.b32.xlu0 %v33272_v60, %s27295_s23  ;;  %5315 = vrot.lane.b32.xlu1 %v33273_v12, %s27294_s17  ;;  %v2298_v15 = vmul.f32 %v26754_v14, %v28014_v7  ;;  %v33275_v60 = vld [vmem:[#allocation14_spill] sm:$0xff]  ;;  %v33276_v7 = vld [vmem:[#allocation76_spill] sm:$0xff] }
 0x442   : > { %24787 = vmatprep.subr.mxu0 %v33198_v17  ;;  %24792 = vmatprep.subr.mxu1 %v33198_v17 }
 0x443   : > { %24788 = vmatpush3.msra.mxu0 %v33274_v45  ;;  %24783 = vmatmul.mubr.msk.f32.vlgmr.msra.gmra.mxu1 %vm2124_vm3, %v2298_v15  ;;  %v33277_v15 = vld [vmem:[#allocation85_spill] sm:$0xff] }
 0x444   : > { %v26756_v19 = vpop.eup %26755  ;;  %24793 = vmatpush3.msra.mxu1 %v33267_v6  ;;  %24789 = vmatprep.mubr.msk.f32.mxu0 %vm27293_vm1, %v33198_v17  ;;  %v33283_v6 = vld [vmem:[#allocation86_spill] sm:$0xff] }
 0x445   : > { %6317 = vrot.lane.b32.xlu0 %v33275_v60, %s27295_s23  ;;  %5398 = vrot.lane.b32.xlu1 %v33249_v4, %s27294_s17  ;;  %v2299_v14 = vmul.f32 %v26756_v19, %v28018_v61  ;;  %v33278_v60 = vld [vmem:[#allocation17_spill] sm:$0xff]  ;;  %v28264_v61 = vpop.permute.xlu0 %3911  ;;  %v33279_v19 = vld [vmem:[#allocation80_spill] sm:$0xff] }
 0x446   : > { %24794 = vmatprep.subr.mxu1 %v33198_v17  ;;  %24799 = vmatprep.subr.mxu0 %v33198_v17 }
 0x447   : > { %24795 = vmatpush3.msra.mxu1 %v33276_v7  ;;  %24790 = vmatmul.mubr.msk.f32.vlgmr.msra.gmra.mxu0 %vm2124_vm3, %v2299_v14  ;;  %v33280_v14 = vld [vmem:[#allocation16_spill] sm:$0xff] }
 0x448   : > { %24800 = vmatpush3.xpose.msk.msra.mxu0 %vm859_vm2, %v33277_v15  ;;  %24803 = vmatprep.mubr.msk.f32.mxu0 %vm27293_vm1, %v33198_v17  ;;  %v33281_v15 = vld [vmem:[#allocation83_spill] sm:$0xff] }
 0x449   : > { %6399 = vrot.lane.b32.xlu0 %v33278_v60, %s27295_s23  ;;  %5396 = vrot.lane.b32.xlu1 %v33250_v58, %s27294_s17  ;;  %v28279_v60 = vpop.permute.xlu0 %3995 }
 0x44a   : > { %24801 = vmatprep.subr.mxu0 %v33198_v17  ;;  %24796 = vmatprep.mubr.msk.f32.mxu1 %vm27293_vm1, %v33198_v17  ;;  %33282 = vst [vmem:[#allocation48_spill] sm:$0xff] %v28279_v60 }
 0x44b   : > { %24806 = vmatprep.subr.mxu1 %v33198_v17 }
 0x44c   : > { %24802 = vmatpush3.xpose.msk.msra.mxu0 %vm859_vm2, %v33279_v19  ;;  %v33284_v19 = vld [vmem:[#allocation91_spill] sm:$0xff] }
 0x44d   : > { %6483 = vrot.lane.b32.xlu0 %v33280_v14, %s27295_s23  ;;  %5477 = vrot.lane.b32.xlu1 %v33253_v21, %s27294_s17  ;;  %v33285_v14 = vld [vmem:[#allocation89_spill] sm:$0xff] }
 0x44e   : > { %24813 = vmatprep.subr.mxu0 %v33198_v17 }
 0x44f   : > { %24804 = vmatmul.mubr.msk.f32.vlgmr.msra.gmra.mxu0 %vm859_vm2, %v33281_v15  ;;  %v3994_v15 = vpop.permute.xlu0 %3993 }
 0x450   : > { %24814 = vmatpush3.xpose.msk.msra.mxu0 %vm859_vm2, %v33283_v6  ;;  %24817 = vmatprep.mubr.msk.f32.mxu0 %vm27293_vm1, %v33198_v17  ;;  %v33286_v6 = vld [vmem:[#allocation92_spill] sm:$0xff] }
 0x451   : > { %5558 = vrot.lane.b32.xlu1 %v33256_v40, %s27294_s17  ;;  %24815 = vmatprep.subr.mxu0 %v33198_v17  ;;  %v33342_v40 = vld [vmem:[#allocation19_spill] sm:$0xff] }
 0x454   : > { %24816 = vmatpush3.xpose.msk.msra.mxu0 %vm859_vm2, %v33284_v19  ;;  %v28302_v19 = vpop.permute.xlu0 %4075 }
 0x455   : > { %5639 = vrot.lane.b32.xlu1 %v33259_v57, %s27294_s17  ;;  %24827 = vmatprep.subr.mxu0 %v33198_v17 }
 0x457   : > { %24818 = vmatmul.mubr.msk.f32.vlgmr.msra.gmra.mxu0 %vm859_vm2, %v33285_v14  ;;  %v28309_v14 = vpop.permute.xlu1 %3997 }
 0x458   : > { %24828 = vmatpush3.xpose.msk.msra.mxu0 %vm859_vm2, %v33286_v6  ;;  %24831 = vmatprep.mubr.msk.f32.mxu0 %vm27293_vm1, %v33198_v17  ;;  %33287 = vst [vmem:[#allocation83_spill] sm:$0xff] %v28309_v14 }
 0x459   : > { %5720 = vrot.lane.b32.xlu1 %v33262_v0, %s27294_s17  ;;  %24829 = vmatprep.subr.mxu0 %v33198_v17  ;;  %v33296_v0 = vld [vmem:[#allocation84_spill] sm:$0xff] }
 0x45c   : > { %24830 = vmatpush3.xpose.msk.msra.mxu0 %vm859_vm2, %v28091_v9  ;;  %v28319_v9 = vpop.permute.xlu0 %4159 }
 0x45d   : > { %5801 = vrot.lane.b32.xlu1 %v33264_v11, %s27294_s17  ;;  %24841 = vmatprep.subr.mxu0 %v33198_v17  ;;  %33288 = vst [vmem:[#allocation89_spill] sm:$0xff] %v28319_v9 }
 0x45f   : > { %24832 = vmatmul.mubr.msk.f32.vlgmr.msra.gmra.mxu0 %vm859_vm2, %v3830_v56 }
 0x460   : > { %24842 = vmatpush3.xpose.msk.msra.mxu0 %vm859_vm2, %v28309_v14  ;;  %24845 = vmatprep.mubr.msk.f32.mxu0 %vm27293_vm1, %v33198_v17  ;;  %v4158_v14 = vpop.permute.xlu0 %4157 }
 0x461   : > { %5882 = vrot.lane.b32.xlu1 %v33266_v1, %s27294_s17  ;;  %24843 = vmatprep.subr.mxu0 %v33198_v17  ;;  %v33293_v1 = vld [vmem:[#allocation15_spill] sm:$0xff] }
 0x464   : > { %24844 = vmatpush3.xpose.msk.msra.mxu0 %vm859_vm2, %v28279_v60  ;;  %v28335_v60 = vpop.permute.xlu0 %4239 }
 0x465   : > { %5963 = vrot.lane.b32.xlu1 %v33268_v55, %s27294_s17  ;;  %24855 = vmatprep.subr.mxu0 %v33198_v17 }
 0x467   : > { %24846 = vmatmul.mubr.msk.f32.vlgmr.msra.gmra.mxu0 %vm859_vm2, %v3994_v15  ;;  %v2268_v56 = vpop.xlane.xlu1 %2267 }
 0x468   : > { %26757 = vrcp.f32 %v2268_v56  ;;  %24859 = vmatprep.mubr.msk.f32.mxu0 %vm27293_vm1, %v33198_v17  ;;  %v28343_v56 = vpop.permute.xlu0 %4323 }
 0x469   : > { %6044 = vrot.lane.b32.xlu1 %v33271_v62, %s27294_s17  ;;  %33292 = vst [vmem:[#allocation99_spill] sm:$0xff] %v28343_v56 }
 0x46b   : > { %v28331_v6 = vpop.permute.xlu1 %4079 }
 0x46c   : > { %33289 = vst [vmem:[#allocation96_spill] sm:$0xff] %v28331_v6 }
 0x46d   : > { %6125 = vrot.lane.b32.xlu1 %v33274_v45, %s27294_s17 }
 0x46f   : > { %v28337_v55 = vpop.permute.xlu1 %4077 }
 0x470   : > { %33290 = vst [vmem:[#allocation97_spill] sm:$0xff] %v28337_v55 }
 0x471   : > { %6206 = vrot.lane.b32.xlu1 %v33276_v7, %s27294_s17  ;;  %v33295_v7 = vld [vmem:[#allocation13_spill] sm:$0xff] }
 0x473   : > { %v28341_v15 = vpop.permute.xlu1 %4161 }
 0x474   : > { %33291 = vst [vmem:[#allocation98_spill] sm:$0xff] %v28341_v15  ;;  %24856 = vmatpush3.xpose.msk.msra.mxu0 %vm859_vm2, %v28341_v15  ;;  %v4322_v15 = vpop.permute.xlu0 %4321 }
 0x475   : > { %v26758_v62 = vpop.eup %26757  ;;  %6403 = vrot.lane.b32.xlu1 %v33293_v1, %s27295_s23  ;;  %24857 = vmatprep.subr.mxu0 %v33198_v17  ;;  %v33303_v1 = vld [vmem:[#allocation90_spill] sm:$0xff] }
 0x476   : > { %v2300_v45 = vmul.f32 %v26758_v62, %v28041_v51  ;;  %v33298_v62 = vld [vmem:[#allocation18_spill] sm:$0xff] }
 0x477   : > { %v28351_v11 = vpop.permute.xlu1 %4243 }
 0x478   : > { %33294 = vst [vmem:[#allocation100_spill] sm:$0xff] %v28351_v11  ;;  %24797 = vmatmul.mubr.msk.f32.vlgmr.msra.gmra.mxu1 %vm2124_vm3, %v2300_v45  ;;  %24858 = vmatpush3.xpose.msk.msra.mxu0 %vm859_vm2, %v28319_v9  ;;  %v33299_v45 = vld [vmem:[#allocation82_spill] sm:$0xff] }
 0x479   : > { %6401 = vrot.lane.b32.xlu1 %v33295_v7, %s27295_s23  ;;  %24807 = vmatpush3.xpose.msk.msra.mxu1 %vm859_vm2, %v33296_v0  ;;  %v28376_v0 = vpop.permute.xlu0 %4403  ;;  %v33302_v7 = vld [vmem:[#allocation21_spill] sm:$0xff] }
 0x47a   : > { %24808 = vmatprep.subr.mxu1 %v33198_v17  ;;  %24810 = vmatprep.mubr.msk.f32.mxu1 %vm27293_vm1, %v33198_v17 }
 0x47b   : > { %24860 = vmatmul.mubr.msk.f32.vlgmr.msra.gmra.mxu0 %vm859_vm2, %v4158_v14  ;;  %v28364_v51 = vpop.permute.xlu1 %4241  ;;  %24869 = vmatprep.subr.mxu0 %v33198_v17  ;;  %v33301_v14 = vld [vmem:[#allocation87_spill] sm:$0xff] }
 0x47c   : > { %33297 = vst [vmem:[#allocation101_spill] sm:$0xff] %v28364_v51  ;;  %24873 = vmatprep.mubr.msk.f32.mxu0 %vm27293_vm1, %v33198_v17 }
 0x47d   : > { %6485 = vrot.lane.b32.xlu1 %v33298_v62, %s27295_s23  ;;  %24809 = vmatpush3.xpose.msk.msra.mxu1 %vm859_vm2, %v33299_v45 }
 0x47e   : > { %24820 = vmatprep.subr.mxu1 %v33198_v17 }
 0x47f   : > { %v28374_v9 = vpop.permute.xlu1 %4325 }
 0x480   : > { %33300 = vst [vmem:[#allocation102_spill] sm:$0xff] %v28374_v9  ;;  %24811 = vmatmul.mubr.msk.f32.vlgmr.msra.gmra.mxu1 %vm859_vm2, %v33301_v14  ;;  %24870 = vmatpush3.xpose.msk.msra.mxu0 %vm859_vm2, %v28374_v9  ;;  %v33305_v14 = vld [vmem:[#allocation88_spill] sm:$0xff]  ;;  %v28397_v9 = vpop.permute.xlu0 %4487 }
 0x481   : > { %6567 = vrot.lane.b32.xlu1 %v33302_v7, %s27295_s23  ;;  %24821 = vmatpush3.xpose.msk.msra.mxu1 %vm859_vm2, %v33303_v1  ;;  %33306 = vst [vmem:[#allocation103_spill] sm:$0xff] %v28397_v9 }
 0x482   : > { %24822 = vmatprep.subr.mxu1 %v33198_v17  ;;  %24871 = vmatprep.subr.mxu0 %v33198_v17 }
 0x483   : > { %v28388_v45 = vpop.permute.xlu1 %4407  ;;  %24824 = vmatprep.mubr.msk.f32.mxu1 %vm27293_vm1, %v33198_v17 }
 0x484   : > { %33304 = vst [vmem:[#allocation87_spill] sm:$0xff] %v28388_v45  ;;  %24872 = vmatpush3.xpose.msk.msra.mxu0 %vm859_vm2, %v28343_v56  ;;  %v33308_v56 = vld [vmem:[#allocation93_spill] sm:$0xff]  ;;  %v4486_v7 = vpop.permute.xlu0 %4485 }
 0x485   : > { %24823 = vmatpush3.xpose.msk.msra.mxu1 %vm859_vm2, %v33305_v14  ;;  %24883 = vmatprep.subr.mxu0 %v33198_v17 }
 0x486   : > { %24834 = vmatprep.subr.mxu1 %v33198_v17 }
 0x487   : > { %24874 = vmatmul.mubr.msk.f32.vlgmr.msra.gmra.mxu0 %vm859_vm2, %v4322_v15  ;;  %v28401_v1 = vpop.permute.xlu1 %4405 }
 0x488   : > { %33307 = vst [vmem:[#allocation104_spill] sm:$0xff] %v28401_v1  ;;  %24825 = vmatmul.mubr.msk.f32.vlgmr.msra.gmra.mxu1 %vm859_vm2, %v28031_v5  ;;  %24887 = vmatprep.mubr.msk.f32.mxu0 %vm27293_vm1, %v33198_v17  ;;  %v4568_v15 = vpop.permute.xlu0 %4567 }
 0x489   : > { %24835 = vmatpush3.xpose.msk.msra.mxu1 %vm859_vm2, %v33308_v56  ;;  %24838 = vmatprep.mubr.msk.f32.mxu1 %vm27293_vm1, %v33198_v17 }
 0x48a   : > { %24836 = vmatprep.subr.mxu1 %v33198_v17 }
 0x48b   : > { %v28412_v14 = vpop.permute.xlu1 %4489 }
 0x48c   : > { %33309 = vst [vmem:[#allocation105_spill] sm:$0xff] %v28412_v14  ;;  %24884 = vmatpush3.xpose.msk.msra.mxu0 %vm859_vm2, %v28412_v14 }
 0x48d   : > { %24837 = vmatpush3.xpose.msk.msra.mxu1 %vm859_vm2, %v28033_v48  ;;  %24885 = vmatprep.subr.mxu0 %v33198_v17 }
 0x48e   : > { %24848 = vmatprep.subr.mxu1 %v33198_v17 }
 0x48f   : > { %v28420_v5 = vpop.permute.xlu1 %4571 }
 0x490   : > { %33310 = vst [vmem:[#allocation106_spill] sm:$0xff] %v28420_v5  ;;  %24839 = vmatmul.mubr.msk.f32.vlgmr.msra.gmra.mxu1 %vm859_vm2, %v28264_v61  ;;  %24886 = vmatpush3.xpose.msk.msra.mxu0 %vm859_vm2, %v28397_v9  ;;  %v28442_v9 = vpop.permute.xlu0 %4651 }
 0x491   : > { %24849 = vmatpush3.xpose.msk.msra.mxu1 %vm859_vm2, %v28331_v6  ;;  %24852 = vmatprep.mubr.msk.f32.mxu1 %vm27293_vm1, %v33198_v17  ;;  %33313 = vst [vmem:[#allocation109_spill] sm:$0xff] %v28442_v9 }
 0x492   : > { %24850 = vmatprep.subr.mxu1 %v33198_v17  ;;  %24897 = vmatprep.subr.mxu0 %v33198_v17 }
 0x493   : > { %24888 = vmatmul.mubr.msk.f32.vlgmr.msra.gmra.mxu0 %vm859_vm2, %v4486_v7  ;;  %v28433_v14 = vpop.permute.xlu1 %4569 }
 0x494   : > { %33311 = vst [vmem:[#allocation107_spill] sm:$0xff] %v28433_v14  ;;  %24901 = vmatprep.mubr.msk.f32.mxu0 %vm27293_vm1, %v33198_v17 }
 0x495   : > { %24851 = vmatpush3.xpose.msk.msra.mxu1 %vm859_vm2, %v28337_v55 }
 0x496   : > { %24862 = vmatprep.subr.mxu1 %v33198_v17 }
 0x497   : > { %v28440_v61 = vpop.permute.xlu1 %4653 }
 0x498   : > { %33312 = vst [vmem:[#allocation108_spill] sm:$0xff] %v28440_v61  ;;  %24853 = vmatmul.mubr.msk.f32.vlgmr.msra.gmra.mxu1 %vm859_vm2, %v28302_v19  ;;  %24898 = vmatpush3.xpose.msk.msra.mxu0 %vm859_vm2, %v28440_v61  ;;  %v4650_v19 = vpop.permute.xlu0 %4649 }
 0x499   : > { %24863 = vmatpush3.xpose.msk.msra.mxu1 %vm859_vm2, %v28351_v11  ;;  %24899 = vmatprep.subr.mxu0 %v33198_v17 }
 0x49a   : > { %24864 = vmatprep.subr.mxu1 %v33198_v17  ;;  %24866 = vmatprep.mubr.msk.f32.mxu1 %vm27293_vm1, %v33198_v17 }
 0x49b   : > { %v28454_v7 = vpop.permute.xlu1 %4735 }
 0x49c   : > { %33314 = vst [vmem:[#allocation110_spill] sm:$0xff] %v28454_v7  ;;  %24900 = vmatpush3.xpose.msk.msra.mxu0 %vm859_vm2, %v28442_v9  ;;  %v28486_v55 = vpop.permute.xlu0 %4991 }
 0x49d   : > { %24865 = vmatpush3.xpose.msk.msra.mxu1 %vm859_vm2, %v28364_v51  ;;  %24911 = vmatprep.subr.mxu0 %v33198_v17  ;;  %33319 = vst [vmem:[#allocation115_spill] sm:$0xff] %v28486_v55 }
 0x49e   : > { %24876 = vmatprep.subr.mxu1 %v33198_v17 }
 0x49f   : > { %24902 = vmatmul.mubr.msk.f32.vlgmr.msra.gmra.mxu0 %vm859_vm2, %v4650_v19  ;;  %v28463_v61 = vpop.permute.xlu1 %4733 }
 0x4a0   : > { %33315 = vst [vmem:[#allocation111_spill] sm:$0xff] %v28463_v61  ;;  %24867 = vmatmul.mubr.msk.f32.vlgmr.msra.gmra.mxu1 %vm859_vm2, %v28335_v60  ;;  %24915 = vmatprep.mubr.msk.f32.mxu0 %vm27293_vm1, %v33198_v17 }
 0x4a1   : > { %24877 = vmatpush3.xpose.msk.msra.mxu1 %vm859_vm2, %v28388_v45  ;;  %24880 = vmatprep.mubr.msk.f32.mxu1 %vm27293_vm1, %v33198_v17 }
 0x4a2   : > { %v28473_v9 = vpop.f32.mrf.mxu1  ;;  %24878 = vmatprep.subr.mxu1 %v33198_v17 }
 0x4a3   : > { %33316 = vst [vmem:[#allocation112_spill] sm:$0xff] %v28473_v9  ;;  %v4732_v51 = vpop.permute.xlu1 %4731 }
 0x4a4   : > { %v24693_v19 = vpop.f32.mrf.mxu1 }
 0x4a5   : > { %24879 = vmatpush3.xpose.msk.msra.mxu1 %vm859_vm2, %v28401_v1 }
 0x4a6   : > { %v28478_v11 = vpop.f32.mrf.mxu1  ;;  %24890 = vmatprep.subr.mxu1 %v33198_v17 }
 0x4a7   : > { %33317 = vst [vmem:[#allocation113_spill] sm:$0xff] %v28478_v11  ;;  %v28481_v60 = vpop.permute.xlu1 %4993 }
 0x4a8   : > { %33318 = vst [vmem:[#allocation114_spill] sm:$0xff] %v28481_v60  ;;  %24881 = vmatmul.mubr.msk.f32.vlgmr.msra.gmra.mxu1 %vm859_vm2, %v28376_v0  ;;  %v24700_v45 = vpop.f32.mrf.mxu1  ;;  %24912 = vmatpush3.msra.mxu0 %v28481_v60 }
 0x4a9   : > { %24891 = vmatpush3.xpose.msk.msra.mxu1 %vm859_vm2, %v28420_v5  ;;  %24913 = vmatprep.subr.mxu0 %v33198_v17  ;;  %v28514_v45 = vpop.permute.xlu0 %5072 }
 0x4aa   : > { %24914 = vmatpush3.msra.mxu0 %v28486_v55  ;;  %24892 = vmatprep.subr.mxu1 %v33198_v17  ;;  %33321 = vst [vmem:[#allocation117_spill] sm:$0xff] %v28514_v45 }
 0x4ab   : > { %24894 = vmatprep.mubr.msk.f32.mxu1 %vm27293_vm1, %v33198_v17  ;;  %24925 = vmatprep.subr.mxu0 %v33198_v17  ;;  %v28508_v0 = vpop.permute.xlu1 %5074 }
 0x4ac   : > { %33320 = vst [vmem:[#allocation116_spill] sm:$0xff] %v28508_v0 }
 0x4ad   : > { %24893 = vmatpush3.xpose.msk.msra.mxu1 %vm859_vm2, %v28433_v14 }
 0x4ae   : > { %24904 = vmatprep.subr.mxu1 %v33198_v17 }
 0x4b0   : > { %24895 = vmatmul.mubr.msk.f32.vlgmr.msra.gmra.mxu1 %vm859_vm2, %v4568_v15 }
 0x4b1   : > { %24905 = vmatpush3.xpose.msk.msra.mxu1 %vm859_vm2, %v28454_v7  ;;  %24908 = vmatprep.mubr.msk.f32.mxu1 %vm27293_vm1, %v33198_v17 }
 0x4b2   : > { %24906 = vmatprep.subr.mxu1 %v33198_v17 }
 0x4b5   : > { %24907 = vmatpush3.xpose.msk.msra.mxu1 %vm859_vm2, %v28463_v61 }
 0x4b6   : > { %24918 = vmatprep.subr.mxu1 %v33198_v17 }
 0x4b8   : > { %24909 = vmatmul.mubr.msk.f32.vlgmr.msra.gmra.mxu1 %vm859_vm2, %v4732_v51 }
 0x4b9   : > { %24919 = vmatpush3.msra.mxu1 %v28508_v0  ;;  %24922 = vmatprep.mubr.msk.f32.mxu1 %vm27293_vm1, %v33198_v17 }
 0x4ba   : > { %24920 = vmatprep.subr.mxu1 %v33198_v17 }
 0x4bb   : > { %24921 = vmatpush3.msra.mxu1 %v28514_v45 }
 0x4bc   : > { %24932 = vmatprep.subr.mxu1 %v33198_v17 }
 0x4d8   : > { %v28519_v15 = vpop.f32.mrf.mxu1 }
 0x4d9   : > { %33322 = vst [vmem:[#allocation118_spill] sm:$0xff] %v28519_v15 }
 0x4da   : > { %v24707_v19 = vpop.f32.mrf.mxu1 }
 0x4dd   : > { %v28521_v55 = vpop.f32.mrf.mxu1 }
 0x4de   : > { %33323 = vst [vmem:[#allocation119_spill] sm:$0xff] %v28521_v55 }
 0x4df   : > { %v24714_v60 = vpop.f32.mrf.mxu1  ;;  %v28523_v51 = vpop.f32.mrf.mxu0 }
 0x4e0   : > { %33324 = vst [vmem:[#allocation120_spill] sm:$0xff] %v28523_v51 }
 0x4e1   : > { %v24721_v0 = vpop.f32.mrf.mxu0 }
 0x4e3   : > { %v28525_v61 = vpop.f32.mrf.mxu1 }
 0x4e4   : > { %33325 = vst [vmem:[#allocation121_spill] sm:$0xff] %v28525_v61 }
 0x4e5   : > { %v24728_v7 = vpop.f32.mrf.mxu1 }
 0x4e7   : > { %v28527_v14 = vpop.f32.mrf.mxu0 }
 0x4e8   : > { %33326 = vst [vmem:[#allocation122_spill] sm:$0xff] %v28527_v14 }
 0x4e9   : > { %v24735_v5 = vpop.f32.mrf.mxu0 }
 0x4eb   : > { %v28529_v1 = vpop.f32.mrf.mxu1 }
 0x4ec   : > { %33327 = vst [vmem:[#allocation123_spill] sm:$0xff] %v28529_v1 }
 0x4ed   : > { %v24742_v45 = vpop.f32.mrf.mxu1 }
 0x4ef   : > { %v28531_v6 = vpop.f32.mrf.mxu0 }
 0x4f0   : > { %33328 = vst [vmem:[#allocation124_spill] sm:$0xff] %v28531_v6 }
 0x4f1   : > { %v24749_v48 = vpop.f32.mrf.mxu0 }
 0x4f3   : > { %v28533_v56 = vpop.f32.mrf.mxu1 }
 0x4f4   : > { %33329 = vst [vmem:[#allocation125_spill] sm:$0xff] %v28533_v56 }
 0x4f5   : > { %v24756_v19 = vpop.f32.mrf.mxu1 }
 0x4f7   : > { %v28535_v55 = vpop.f32.mrf.mxu0 }
 0x4f8   : > { %33330 = vst [vmem:[#allocation126_spill] sm:$0xff] %v28535_v55 }
 0x4f9   : > { %v24763_v60 = vpop.f32.mrf.mxu0 }
 0x4fb   : > { %v28537_v51 = vpop.f32.mrf.mxu1 }
 0x4fc   : > { %33331 = vst [vmem:[#allocation127_spill] sm:$0xff] %v28537_v51 }
 0x4fd   : > { %v24770_v0 = vpop.f32.mrf.mxu1 }
 0x4ff   : > { %v28539_v61 = vpop.f32.mrf.mxu0 }
 0x500   : > { %33332 = vst [vmem:[#allocation128_spill] sm:$0xff] %v28539_v61 }
 0x501   : > { %v24777_v7 = vpop.f32.mrf.mxu0 }
 0x502   : > { %v33335_v7 = vld [vmem:[#allocation20_spill] sm:$0xff] }
 0x503   : > { %v28541_v14 = vpop.f32.mrf.mxu1 }
 0x504   : > { %33333 = vst [vmem:[#allocation129_spill] sm:$0xff] %v28541_v14 }
 0x505   : > { %v24784_v5 = vpop.f32.mrf.mxu1 }
 0x507   : > { %v28543_v1 = vpop.f32.mrf.mxu0 }
 0x508   : > { %33334 = vst [vmem:[#allocation130_spill] sm:$0xff] %v28543_v1 }
 0x509   : > { %v24791_v45 = vpop.f32.mrf.mxu0 }
 0x50a   : > { %v28557_v45 = vpop.permute.xlu0 %5155 }
 0x50b   : > { %33336 = vst [vmem:[#allocation131_spill] sm:$0xff] %v28557_v45 }
 0x50f   : > { %v28545_v6 = vpop.f32.mrf.mxu0 }
 0x510   : > { %v4813_v48 = vsel %vm2124_vm3, %v28545_v6, -inf }
 0x511   : > { %4814 = vmax.xlane.f32.xlu0 %v4813_v48  ;;  %v24805_v19 = vpop.f32.mrf.mxu0  ;;  %v28563_v48 = vpop.permute.xlu0 %5236 }
 0x512   : > { %33338 = vst [vmem:[#allocation133_spill] sm:$0xff] %v28563_v48 }
 0x515   : > { %v28569_v15 = vpop.permute.xlu0 %5479 }
 0x516   : > { %33339 = vst [vmem:[#allocation134_spill] sm:$0xff] %v28569_v15 }
 0x517   : > { %v28549_v60 = vpop.f32.mrf.mxu0 }
 0x519   : > { %v24819_v51 = vpop.f32.mrf.mxu0 }
 0x51f   : > { %v28551_v0 = vpop.f32.mrf.mxu0 }
 0x521   : > { %v24833_v61 = vpop.f32.mrf.mxu0 }
 0x527   : > { %6481 = vrot.lane.b32.xlu0 %v33335_v7, %s27295_s23  ;;  %v28555_v5 = vpop.f32.mrf.mxu0 }
 0x529   : > { %v24847_v1 = vpop.f32.mrf.mxu0 }
 0x52a   : > { %v4819_v1 = vsel %vm2124_vm3, %v28549_v60, -inf }
 0x538   : > { %v28559_v14 = vpop.f32.mrf.mxu1 }
 0x539   : > { %33337 = vst [vmem:[#allocation132_spill] sm:$0xff] %v28559_v14 }
 0x53a   : > { %v24798_v55 = vpop.f32.mrf.mxu1 }
 0x53b   : > { %v28561_v56 = vpop.f32.mrf.mxu0  ;;  %v28575_v55 = vpop.permute.xlu0 %5560 }
 0x53c   : > { %33340 = vst [vmem:[#allocation135_spill] sm:$0xff] %v28575_v55 }
 0x53d   : > { %v24861_v19 = vpop.f32.mrf.mxu0 }
 0x540   : > { %v28565_v51 = vpop.f32.mrf.mxu1 }
 0x541   : > { %v4816_v61 = vsel %vm2124_vm3, %v28565_v51, -inf }
 0x542   : > { %4817 = vmax.xlane.f32.xlu1 %v4816_v61  ;;  %v24812_v11 = vpop.f32.mrf.mxu1  ;;  %v4825_v61 = vsel %vm2124_vm3, %v28551_v0, -inf }
 0x543   : > { %v28583_v11 = vpop.permute.xlu0 %5641 }
 0x544   : > { %33341 = vst [vmem:[#allocation136_spill] sm:$0xff] %v28583_v11 }
 0x546   : > { %4820 = vmax.xlane.f32.xlu0 %v4819_v1  ;;  %v4831_v1 = vsel %vm2124_vm3, %v28555_v5, -inf }
 0x547   : > { %v28573_v14 = vpop.f32.mrf.mxu0 }
 0x548   : > { %v28577_v9 = vpop.f32.mrf.mxu1 }
 0x549   : > { %v4822_v19 = vsel %vm2124_vm3, %v28577_v9, -inf  ;;  %v24875_v7 = vpop.f32.mrf.mxu0 }
 0x54a   : > { %4823 = vmax.xlane.f32.xlu0 %v4822_v19  ;;  %v24826_v62 = vpop.f32.mrf.mxu1  ;;  %v28593_v7 = vpop.permute.xlu0 %5722  ;;  %v4837_v19 = vsel %vm2124_vm3, %v28561_v56, -inf }
 0x54b   : > { %33343 = vst [vmem:[#allocation137_spill] sm:$0xff] %v28593_v7  ;;  %v28595_v62 = vpop.permute.xlu1 %5153 }
 0x54c   : > { %33344 = vst [vmem:[#allocation138_spill] sm:$0xff] %v28595_v62 }
 0x54e   : > { %4826 = vmax.xlane.f32.xlu0 %v4825_v61 }
 0x550   : > { %v28585_v57 = vpop.f32.mrf.mxu1 }
 0x552   : > { %4832 = vmax.xlane.f32.xlu0 %v4831_v1  ;;  %v24840_v55 = vpop.f32.mrf.mxu1  ;;  %v4843_v1 = vsel %vm2124_vm3, %v28573_v14, -inf }
 0x553   : > { %6565 = vrot.lane.b32.xlu1 %v33342_v40, %s27295_s23  ;;  %v28591_v21 = vpop.f32.mrf.mxu0  ;;  %v28603_v55 = vpop.permute.xlu0 %5803 }
 0x554   : > { %33345 = vst [vmem:[#allocation139_spill] sm:$0xff] %v28603_v55  ;;  %v28605_v40 = vpop.permute.xlu1 %5234  ;;  %v4849_v7 = vsel %vm2124_vm3, %v28591_v21, -inf }
 0x555   : > { %v24889_v61 = vpop.f32.mrf.mxu0  ;;  %33346 = vst [vmem:[#allocation140_spill] sm:$0xff] %v28605_v40 }
 0x556   : > { %4838 = vmax.xlane.f32.xlu0 %v4837_v19 }
 0x557   : > { %v28611_v11 = vpop.permute.xlu0 %5884 }
 0x558   : > { %v28599_v58 = vpop.f32.mrf.mxu1  ;;  %33347 = vst [vmem:[#allocation141_spill] sm:$0xff] %v28611_v11  ;;  %v28617_v15 = vpop.permute.xlu1 %5317 }
 0x559   : > { %33348 = vst [vmem:[#allocation142_spill] sm:$0xff] %v28617_v15 }
 0x55a   : > { %v24854_v4 = vpop.f32.mrf.mxu1  ;;  %4844 = vmax.xlane.f32.xlu0 %v4843_v1 }
 0x55b   : > { %v28619_v1 = vpop.permute.xlu0 %5965 }
 0x55c   : > { %33349 = vst [vmem:[#allocation143_spill] sm:$0xff] %v28619_v1  ;;  %v28621_v59 = vpop.permute.xlu1 %5315 }
 0x55d   : > { %33350 = vst [vmem:[#allocation144_spill] sm:$0xff] %v28621_v59 }
 0x55e   : > { %4850 = vmax.xlane.f32.xlu0 %v4849_v7 }
 0x55f   : > { %v28609_v12 = vpop.f32.mrf.mxu0  ;;  %v28625_v52 = vpop.permute.xlu0 %6046 }
 0x560   : > { %v28613_v19 = vpop.f32.mrf.mxu1  ;;  %v4855_v61 = vsel %vm2124_vm3, %v28609_v12, -inf  ;;  %33351 = vst [vmem:[#allocation145_spill] sm:$0xff] %v28625_v52  ;;  %v28627_v11 = vpop.permute.xlu1 %5398 }
 0x561   : > { %v24903_v55 = vpop.f32.mrf.mxu0  ;;  %33352 = vst [vmem:[#allocation146_spill] sm:$0xff] %v28627_v11 }
 0x562   : > { %v24868_v4 = vpop.f32.mrf.mxu1  ;;  %4856 = vmax.xlane.f32.xlu0 %v4855_v61  ;;  %v4828_v55 = vsel %vm2124_vm3, %v28585_v57, -inf }
 0x563   : > { %v28631_v13 = vpop.permute.xlu0 %6127  ;;  %v33356_v4 = vld [vmem:[#allocation23_spill] sm:$0xff] }
 0x564   : > { %33353 = vst [vmem:[#allocation147_spill] sm:$0xff] %v28631_v13  ;;  %v28633_v15 = vpop.permute.xlu1 %5396  ;;  %v4834_v13 = vsel %vm2124_vm3, %v28599_v58, -inf }
 0x565   : > { %33354 = vst [vmem:[#allocation148_spill] sm:$0xff] %v28633_v15 }
 0x567   : > { %v28637_v61 = vpop.permute.xlu0 %6208 }
 0x568   : > { %v28623_v53 = vpop.f32.mrf.mxu1  ;;  %33355 = vst [vmem:[#allocation149_spill] sm:$0xff] %v28637_v61  ;;  %v28643_v52 = vpop.permute.xlu1 %5477 }
 0x569   : > { %33357 = vst [vmem:[#allocation150_spill] sm:$0xff] %v28643_v52 }
 0x56a   : > { %v24882_v7 = vpop.f32.mrf.mxu1 }
 0x56b   : > { %v28649_v15 = vpop.permute.xlu0 %6321 }
 0x56c   : > { %33359 = vst [vmem:[#allocation151_spill] sm:$0xff] %v28649_v15  ;;  %v28653_v61 = vpop.permute.xlu1 %5558 }
 0x56d   : > { %33360 = vst [vmem:[#allocation152_spill] sm:$0xff] %v28653_v61 }
 0x570   : > { %v28629_v2 = vpop.f32.mrf.mxu1  ;;  %v28659_v52 = vpop.permute.xlu1 %5639 }
 0x571   : > { %33362 = vst [vmem:[#allocation154_spill] sm:$0xff] %v28659_v52 }
 0x572   : > { %v24896_v40 = vpop.f32.mrf.mxu1 }
 0x573   : > { %v33358_v40 = vld [vmem:[#allocation22_spill] sm:$0xff] }
 0x574   : > { %v28667_v11 = vpop.permute.xlu1 %5720 }
 0x575   : > { %33364 = vst [vmem:[#allocation156_spill] sm:$0xff] %v28667_v11  ;;  %v33373_v11 = vld [vmem:[#allocation25_spill] sm:$0xff] }
 0x577   : > { %4829 = vmax.xlane.f32.xlu1 %v4828_v55  ;;  %v4840_v55 = vsel %vm2124_vm3, %v28613_v19, -inf }
 0x578   : > { %6563 = vrot.lane.b32.xlu0 %v33356_v4, %s27295_s23  ;;  %v28641_v7 = vpop.f32.mrf.mxu1  ;;  %v4846_v4 = vsel %vm2124_vm3, %v28623_v53, -inf  ;;  %v28671_v61 = vpop.permute.xlu1 %5801 }
 0x579   : > { %v4858_v15 = vsel %vm2124_vm3, %v28641_v7, -inf  ;;  %33366 = vst [vmem:[#allocation158_spill] sm:$0xff] %v28671_v61 }
 0x57a   : > { %v24910_v1 = vpop.f32.mrf.mxu1 }
 0x57b   : > { %4835 = vmax.xlane.f32.xlu1 %v4834_v13  ;;  %v28657_v1 = vpop.permute.xlu0 %6319  ;;  %v4852_v13 = vsel %vm2124_vm3, %v28629_v2, -inf }
 0x57c   : > { %6647 = vrot.lane.b32.xlu0 %v33358_v40, %s27295_s23  ;;  %33361 = vst [vmem:[#allocation153_spill] sm:$0xff] %v28657_v1  ;;  %v28675_v1 = vpop.permute.xlu1 %5882 }
 0x57d   : > { %33368 = vst [vmem:[#allocation160_spill] sm:$0xff] %v28675_v1 }
 0x57f   : > { %4841 = vmax.xlane.f32.xlu1 %v4840_v55  ;;  %v28663_v40 = vpop.permute.xlu0 %6317 }
 0x580   : > { %33363 = vst [vmem:[#allocation155_spill] sm:$0xff] %v28663_v40  ;;  %v28680_v40 = vpop.permute.xlu1 %5963 }
 0x581   : > { %33370 = vst [vmem:[#allocation161_spill] sm:$0xff] %v28680_v40 }
 0x583   : > { %4847 = vmax.xlane.f32.xlu1 %v4846_v4  ;;  %v28669_v55 = vpop.permute.xlu0 %6399 }
 0x584   : > { %33365 = vst [vmem:[#allocation157_spill] sm:$0xff] %v28669_v55  ;;  %v28684_v55 = vpop.permute.xlu1 %6044 }
 0x585   : > { %33372 = vst [vmem:[#allocation162_spill] sm:$0xff] %v28684_v55 }
 0x587   : > { %4853 = vmax.xlane.f32.xlu1 %v4852_v13  ;;  %v28673_v4 = vpop.permute.xlu0 %6483  ;;  %v33369_v13 = vld [vmem:[#allocation24_spill] sm:$0xff] }
 0x588   : > { %33367 = vst [vmem:[#allocation159_spill] sm:$0xff] %v28673_v4  ;;  %v28688_v4 = vpop.permute.xlu1 %6125 }
 0x589   : > { %33374 = vst [vmem:[#allocation163_spill] sm:$0xff] %v28688_v4 }
 0x58b   : > { %4859 = vmax.xlane.f32.xlu1 %v4858_v15  ;;  %v33371_v15 = vld [vmem:[#allocation26_spill] sm:$0xff] }
 0x59a   : > { %v4815_v52 = vpop.xlane.xlu0 %4814 }
 0x59b   : > { %v4861_v59 = vsub.f32 %v28545_v6, %v4815_v52  ;;  %v28694_v52 = vpop.permute.xlu1 %6206 }
 0x59c   : > { %6649 = vrot.lane.b32.xlu1 %v33369_v13, %s27295_s23  ;;  %33375 = vst [vmem:[#allocation164_spill] sm:$0xff] %v28694_v52 }
 0x59d   : > { %v4877_v54 = vmul.f32 1.442695, %v4861_v59 }
 0x59e   : > { %v28704_v55 = vpop.permute.xlu0 %6481 }
 0x59f   : > { %26759 = vpow2.f32 %v4877_v54  ;;  %v28696_v59 = vpop.permute.xlu1 %6403  ;;  %33380 = vst [vmem:[#allocation169_spill] sm:$0xff] %v28704_v55 }
 0x5a0   : > { %6731 = vrot.lane.b32.xlu1 %v33371_v15, %s27295_s23  ;;  %33376 = vst [vmem:[#allocation165_spill] sm:$0xff] %v28696_v59 }
 0x5a3   : > { %v28698_v54 = vpop.permute.xlu1 %6401 }
 0x5a4   : > { %6729 = vrot.lane.b32.xlu1 %v33373_v11, %s27295_s23  ;;  %33377 = vst [vmem:[#allocation166_spill] sm:$0xff] %v28698_v54 }
 0x5a7   : > { %v28700_v15 = vpop.permute.xlu1 %6485 }
 0x5a8   : > { %33378 = vst [vmem:[#allocation167_spill] sm:$0xff] %v28700_v15 }
 0x5ab   : > { %v28702_v13 = vpop.permute.xlu1 %6567 }
 0x5ac   : > { %v28690_v1 = vpop.eup %26759  ;;  %33379 = vst [vmem:[#allocation168_spill] sm:$0xff] %v28702_v13 }
 0x5ad   : > { %v4909_v6 = vsel %vm2124_vm3, %v28690_v1, 0.0 }
 0x5ae   : > { %4910 = vadd.xlane.f32.xlu0 %v4909_v6 }
 0x5cb   : > { %v4818_v11 = vpop.xlane.xlu1 %4817 }
 0x5cc   : > { %v4862_v4 = vsub.f32 %v28565_v51, %v4818_v11 }
 0x5ce   : > { %v4879_v40 = vmul.f32 1.442695, %v4862_v4 }
 0x5cf   : > { %v4821_v61 = vpop.xlane.xlu0 %4820 }
 0x5d0   : > { %26761 = vpow2.f32 %v4879_v40  ;;  %v4863_v6 = vsub.f32 %v28549_v60, %v4821_v61 }
 0x5d2   : > { %v4881_v48 = vmul.f32 1.442695, %v4863_v6 }
 0x5d3   : > { %v4824_v52 = vpop.xlane.xlu0 %4823 }
 0x5d4   : > { %26763 = vpow2.f32 %v4881_v48  ;;  %v4864_v59 = vsub.f32 %v28577_v9, %v4824_v52 }
 0x5d6   : > { %v4883_v54 = vmul.f32 1.442695, %v4864_v59 }
 0x5d7   : > { %v4827_v18 = vpop.xlane.xlu0 %4826 }
 0x5d8   : > { %26765 = vpow2.f32 %v4883_v54  ;;  %v4865_v13 = vsub.f32 %v28551_v0, %v4827_v18 }
 0x5da   : > { %v4885_v15 = vmul.f32 1.442695, %v4865_v13 }
 0x5db   : > { %v4833_v55 = vpop.xlane.xlu0 %4832 }
 0x5dc   : > { %26767 = vpow2.f32 %v4885_v15  ;;  %v4867_v51 = vsub.f32 %v28555_v5, %v4833_v55 }
 0x5dd   : > { %v28711_v11 = vpop.eup %26761 }
 0x5de   : > { %v4889_v40 = vmul.f32 1.442695, %v4867_v51  ;;  %v4912_v60 = vsel %vm2124_vm3, %v28711_v11, 0.0 }
 0x5df   : > { %v4839_v61 = vpop.xlane.xlu0 %4838  ;;  %4913 = vadd.xlane.f32.xlu1 %v4912_v60 }
 0x5e0   : > { %26769 = vpow2.f32 %v4889_v40  ;;  %v4869_v9 = vsub.f32 %v28561_v56, %v4839_v61 }
 0x5e1   : > { %v28716_v48 = vpop.eup %26763 }
 0x5e2   : > { %v4893_v4 = vmul.f32 1.442695, %v4869_v9  ;;  %v4915_v18 = vsel %vm2124_vm3, %v28716_v48, 0.0 }
 0x5e3   : > { %v4845_v0 = vpop.xlane.xlu0 %4844  ;;  %4916 = vadd.xlane.f32.xlu0 %v4915_v18  ;;  %v28746_v18 = vpop.permute.xlu1 %6565 }
 0x5e4   : > { %26771 = vpow2.f32 %v4893_v4  ;;  %v4871_v5 = vsub.f32 %v28573_v14, %v4845_v0  ;;  %33382 = vst [vmem:[#allocation171_spill] sm:$0xff] %v28746_v18 }
 0x5e5   : > { %v28721_v55 = vpop.eup %26765 }
 0x5e6   : > { %v4897_v13 = vmul.f32 1.442695, %v4871_v5  ;;  %v4918_v15 = vsel %vm2124_vm3, %v28721_v55, 0.0 }
 0x5e7   : > { %v4851_v52 = vpop.xlane.xlu0 %4850  ;;  %4919 = vadd.xlane.f32.xlu1 %v4918_v15 }
 0x5e8   : > { %26773 = vpow2.f32 %v4897_v13  ;;  %v4873_v56 = vsub.f32 %v28591_v21, %v4851_v52 }
 0x5e9   : > { %v28726_v59 = vpop.eup %26767 }
 0x5ea   : > { %v4901_v54 = vmul.f32 1.442695, %v4873_v56  ;;  %v4921_v6 = vsel %vm2124_vm3, %v28726_v59, 0.0 }
 0x5eb   : > { %4922 = vadd.xlane.f32.xlu0 %v4921_v6 }
 0x5ec   : > { %26775 = vpow2.f32 %v4901_v54  ;;  %v4857_v54 = vpop.xlane.xlu0 %4856 }
 0x5ed   : > { %v28730_v14 = vpop.eup %26769 }
 0x5ee   : > { %v4927_v51 = vsel %vm2124_vm3, %v28730_v14, 0.0 }
 0x5ef   : > { %4928 = vadd.xlane.f32.xlu0 %v4927_v51 }
 0x5f1   : > { %v28734_v40 = vpop.eup %26771 }
 0x5f2   : > { %v4933_v60 = vsel %vm2124_vm3, %v28734_v40, 0.0 }
 0x5f3   : > { %4934 = vadd.xlane.f32.xlu0 %v4933_v60  ;;  %v4875_v60 = vsub.f32 %v28609_v12, %v4857_v54 }
 0x5f5   : > { %v28738_v21 = vpop.eup %26773 }
 0x5f6   : > { %v4939_v61 = vsel %vm2124_vm3, %v28738_v21, 0.0 }
 0x5f7   : > { %4940 = vadd.xlane.f32.xlu0 %v4939_v61 }
 0x5f9   : > { %v28742_v9 = vpop.eup %26775 }
 0x5fa   : > { %33381 = vst [vmem:[#allocation170_spill] sm:$0xff] %v28742_v9  ;;  %v4945_v4 = vsel %vm2124_vm3, %v28742_v9, 0.0  ;;  %v4905_v9 = vmul.f32 1.442695, %v4875_v60 }
 0x5fb   : > { %4946 = vadd.xlane.f32.xlu0 %v4945_v4 }
 0x600   : > { %v4830_v0 = vpop.xlane.xlu1 %4829 }
 0x601   : > { %v4866_v5 = vsub.f32 %v28585_v57, %v4830_v0 }
 0x603   : > { %v4887_v13 = vmul.f32 1.442695, %v4866_v5 }
 0x604   : > { %v4836_v15 = vpop.xlane.xlu1 %4835 }
 0x605   : > { %26777 = vpow2.f32 %v4887_v13  ;;  %v4868_v52 = vsub.f32 %v28599_v58, %v4836_v15 }
 0x607   : > { %v4891_v56 = vmul.f32 1.442695, %v4868_v52 }
 0x608   : > { %v4842_v6 = vpop.xlane.xlu1 %4841 }
 0x609   : > { %26779 = vpow2.f32 %v4891_v56  ;;  %v4870_v51 = vsub.f32 %v28613_v19, %v4842_v6 }
 0x60b   : > { %v4895_v61 = vmul.f32 1.442695, %v4870_v51 }
 0x60c   : > { %v4848_v4 = vpop.xlane.xlu1 %4847 }
 0x60d   : > { %26781 = vpow2.f32 %v4895_v61  ;;  %v4872_v18 = vsub.f32 %v28623_v53, %v4848_v4 }
 0x60f   : > { %v4899_v57 = vmul.f32 1.442695, %v4872_v18 }
 0x610   : > { %v4854_v0 = vpop.xlane.xlu1 %4853 }
 0x611   : > { %26783 = vpow2.f32 %v4899_v57  ;;  %v4874_v5 = vsub.f32 %v28629_v2, %v4854_v0  ;;  %v28783_v57 = vpop.permute.xlu0 %6563 }
 0x612   : > { %v28754_v58 = vpop.eup %26777  ;;  %26785 = vpow2.f32 %v4905_v9 }
 0x613   : > { %v4903_v13 = vmul.f32 1.442695, %v4874_v5  ;;  %v4924_v19 = vsel %vm2124_vm3, %v28754_v58, 0.0 }
 0x614   : > { %4925 = vadd.xlane.f32.xlu1 %v4924_v19  ;;  %v4860_v12 = vpop.xlane.xlu1 %4859 }
 0x615   : > { %26787 = vpow2.f32 %v4903_v13  ;;  %v4876_v15 = vsub.f32 %v28641_v7, %v4860_v12  ;;  %v28785_v0 = vpop.permute.xlu0 %6647 }
 0x616   : > { %v28759_v52 = vpop.eup %26779  ;;  %33383 = vst [vmem:[#allocation172_spill] sm:$0xff] %v28785_v0 }
 0x617   : > { %v4907_v53 = vmul.f32 1.442695, %v4876_v15  ;;  %v4930_v18 = vsel %vm2124_vm3, %v28759_v52, 0.0 }
 0x618   : > { %4931 = vadd.xlane.f32.xlu1 %v4930_v18 }
 0x619   : > { %26789 = vpow2.f32 %v4907_v53 }
 0x61a   : > { %v28763_v2 = vpop.eup %26781 }
 0x61b   : > { %v4936_v9 = vsel %vm2124_vm3, %v28763_v2, 0.0 }
 0x61c   : > { %4937 = vadd.xlane.f32.xlu1 %v4936_v9 }
 0x61e   : > { %v28767_v56 = vpop.eup %26783 }
 0x61f   : > { %v4942_v54 = vsel %vm2124_vm3, %v28767_v56, 0.0  ;;  %v28771_v7 = vpop.eup %26785 }
 0x620   : > { %4943 = vadd.xlane.f32.xlu1 %v4942_v54  ;;  %v4951_v51 = vsel %vm2124_vm3, %v28771_v7, 0.0 }
 0x622   : > { %v28773_v6 = vpop.eup %26787 }
 0x623   : > { %v4948_v60 = vsel %vm2124_vm3, %v28773_v6, 0.0 }
 0x624   : > { %4952 = vadd.xlane.f32.xlu1 %v4951_v51  ;;  %4949 = vadd.xlane.f32.xlu0 %v4948_v60 }
 0x626   : > { %v28779_v61 = vpop.eup %26789 }
 0x627   : > { %v4954_v4 = vsel %vm2124_vm3, %v28779_v61, 0.0 }
 0x628   : > { %4955 = vadd.xlane.f32.xlu0 %v4954_v4 }
 0x635   : > { %6813 = vrot.lane.b32.xlu1 %v27585_v24, %s27295_s23 }
 0x637   : > { %v4911_v5 = vpop.xlane.xlu0 %4910 }
 0x638   : > { %26791 = vrcp.f32 %v4911_v5  ;;  %v33387_v5 = vld [vmem:[#allocation52_spill] sm:$0xff] }
 0x639   : > { %6895 = vrot.lane.b32.xlu1 %v27601_v27, %s27295_s23 }
 0x63d   : > { %6893 = vrot.lane.b32.xlu1 %v27594_v25, %s27295_s23 }
 0x63e   : > { %6645 = vrot.lane.b32.xlu0 %v27566_v20, %s27295_s23 }
 0x641   : > { %6977 = vrot.lane.b32.xlu1 %v27617_v30, %s27295_s23 }
 0x642   : > { %6727 = vrot.lane.b32.xlu0 %v27582_v23, %s27295_s23 }
 0x645   : > { %v26792_v13 = vpop.eup %26791  ;;  %7059 = vrot.lane.b32.xlu1 %v27633_v33, %s27295_s23 }
 0x646   : > { %6811 = vrot.lane.b32.xlu0 %v27578_v22, %s27295_s23  ;;  %v4973_v19 = vmul.f32 %v26792_v13, %v28690_v1  ;;  %v28827_v1 = vpop.permute.xlu1 %6649 }
 0x647   : > { %33384 = vst [vmem:[#allocation173_spill] sm:$0xff] %v28827_v1 }
 0x648   : > { %24916 = vmatmul.mubr.msk.f32.vlgmr.msra.gmra.mxu0 %vm2124_vm3, %v4973_v19  ;;  %v33388_v19 = vld [vmem:[#allocation133_spill] sm:$0xff] }
 0x649   : > { %24926 = vmatpush3.msra.mxu0 %v28557_v45  ;;  %7057 = vrot.lane.b32.xlu1 %v27626_v31, %s27295_s23  ;;  %v33409_v45 = vld [vmem:[#allocation77_spill] sm:$0xff] }
 0x64a   : > { %24927 = vmatprep.subr.mxu0 %v33198_v17  ;;  %6809 = vrot.lane.b32.xlu0 %v27598_v26, %s27295_s23  ;;  %v28835_v12 = vpop.permute.xlu1 %6731 }
 0x64b   : > { %24928 = vmatpush3.msra.mxu0 %v28595_v62  ;;  %24929 = vmatprep.mubr.msk.f32.mxu0 %vm27293_vm1, %v33198_v17  ;;  %33385 = vst [vmem:[#allocation174_spill] sm:$0xff] %v28835_v12  ;;  %v33401_v62 = vld [vmem:[#allocation54_spill] sm:$0xff] }
 0x64c   : > { %24939 = vmatprep.subr.mxu0 %v33198_v17 }
 0x64d   : > { %7141 = vrot.lane.b32.xlu1 %v27649_v36, %s27295_s23 }
 0x64e   : > { %6891 = vrot.lane.b32.xlu0 %v27614_v29, %s27295_s23  ;;  %v28843_v15 = vpop.permute.xlu1 %6729 }
 0x64f   : > { %33386 = vst [vmem:[#allocation175_spill] sm:$0xff] %v28843_v15 }
 0x651   : > { %7223 = vrot.lane.b32.xlu1 %v27665_v39, %s27295_s23 }
 0x652   : > { %6975 = vrot.lane.b32.xlu0 %v27610_v28, %s27295_s23 }
 0x655   : > { %7221 = vrot.lane.b32.xlu1 %v27658_v37, %s27295_s23 }
 0x656   : > { %6973 = vrot.lane.b32.xlu0 %v27630_v32, %s27295_s23 }
 0x659   : > { %7305 = vrot.lane.b32.xlu1 %v27681_v44, %s27295_s23 }
 0x65a   : > { %7055 = vrot.lane.b32.xlu0 %v27646_v35, %s27295_s23 }
 0x65d   : > { %7387 = vrot.lane.b32.xlu1 %v27697_v47, %s27295_s23 }
 0x65e   : > { %7139 = vrot.lane.b32.xlu0 %v27642_v34, %s27295_s23 }
 0x661   : > { %7385 = vrot.lane.b32.xlu1 %v33245_v43, %s27295_s23 }
 0x662   : > { %7137 = vrot.lane.b32.xlu0 %v27662_v38, %s27295_s23 }
 0x665   : > { %7469 = vrot.lane.b32.xlu1 %v33248_v16, %s27295_s23 }
 0x666   : > { %7219 = vrot.lane.b32.xlu0 %v27678_v42, %s27295_s23 }
 0x668   : > { %v4914_v53 = vpop.xlane.xlu1 %4913 }
 0x669   : > { %26793 = vrcp.f32 %v4914_v53  ;;  %7551 = vrot.lane.b32.xlu1 %v33252_v3, %s27295_s23  ;;  %v33389_v53 = vld [vmem:[#allocation46_spill] sm:$0xff] }
 0x66a   : > { %7303 = vrot.lane.b32.xlu0 %v27674_v41, %s27295_s23 }
 0x66c   : > { %v4917_v18 = vpop.xlane.xlu0 %4916 }
 0x66d   : > { %26795 = vrcp.f32 %v4917_v18  ;;  %7549 = vrot.lane.b32.xlu1 %v33255_v10, %s27295_s23 }
 0x66e   : > { %7301 = vrot.lane.b32.xlu0 %v27694_v46, %s27295_s23 }
 0x670   : > { %v4920_v9 = vpop.xlane.xlu1 %4919 }
 0x671   : > { %26797 = vrcp.f32 %v4920_v9  ;;  %7547 = vrot.lane.b32.xlu1 %v33258_v63, %s27295_s23 }
 0x672   : > { %7383 = vrot.lane.b32.xlu0 %v27710_v50, %s27295_s23 }
 0x674   : > { %v4923_v54 = vpop.xlane.xlu0 %4922 }
 0x675   : > { %26799 = vrcp.f32 %v4923_v54  ;;  %7807 = vrot.lane.b32.xlu1 %v33261_v8, %s27295_s23  ;;  %v33391_v54 = vld [vmem:[#allocation53_spill] sm:$0xff] }
 0x676   : > { %v26794_v51 = vpop.eup %26793  ;;  %7467 = vrot.lane.b32.xlu0 %v27706_v49, %s27295_s23 }
 0x677   : > { %v4974_v60 = vmul.f32 %v26794_v51, %v28711_v11  ;;  %v33390_v11 = vld [vmem:[#allocation140_spill] sm:$0xff] }
 0x678   : > { %v4929_v4 = vpop.xlane.xlu0 %4928 }
 0x679   : > { %26801 = vrcp.f32 %v4929_v4  ;;  %7886 = vrot.lane.b32.xlu1 %v33387_v5, %s27295_s23  ;;  %24923 = vmatmul.mubr.msk.f32.vlgmr.msra.gmra.mxu1 %vm2124_vm3, %v4974_v60  ;;  %v33392_v60 = vld [vmem:[#allocation142_spill] sm:$0xff]  ;;  %v33393_v4 = vld [vmem:[#allocation49_spill] sm:$0xff] }
 0x67a   : > { %v26796_v13 = vpop.eup %26795  ;;  %24933 = vmatpush3.msra.mxu1 %v33388_v19  ;;  %7465 = vrot.lane.b32.xlu0 %v33389_v53, %s27295_s23  ;;  %v33397_v19 = vld [vmem:[#allocation51_spill] sm:$0xff] }
 0x67b   : > { %24934 = vmatprep.subr.mxu1 %v33198_v17  ;;  %v4975_v18 = vmul.f32 %v26796_v13, %v28716_v48  ;;  %24936 = vmatprep.mubr.msk.f32.mxu1 %vm27293_vm1, %v33198_v17  ;;  %v33394_v13 = vld [vmem:[#allocation144_spill] sm:$0xff] }
 0x67c   : > { %24935 = vmatpush3.msra.mxu1 %v33390_v11  ;;  %v4935_v9 = vpop.xlane.xlu0 %4934  ;;  %v33396_v11 = vld [vmem:[#allocation146_spill] sm:$0xff] }
 0x67d   : > { %26803 = vrcp.f32 %v4935_v9  ;;  %24930 = vmatmul.mubr.msk.f32.vlgmr.msra.gmra.mxu0 %vm2124_vm3, %v4975_v18  ;;  %7963 = vrot.lane.b32.xlu1 %v33391_v54, %s27295_s23  ;;  %v33395_v18 = vld [vmem:[#allocation55_spill] sm:$0xff] }
 0x67e   : > { %v26798_v51 = vpop.eup %26797  ;;  %24940 = vmatpush3.msra.mxu0 %v33392_v60  ;;  %7805 = vrot.lane.b32.xlu0 %v33393_v4, %s27295_s23 }
 0x67f   : > { %24941 = vmatprep.subr.mxu0 %v33198_v17  ;;  %24946 = vmatprep.subr.mxu1 %v33198_v17  ;;  %v4976_v48 = vmul.f32 %v26798_v51, %v28721_v55  ;;  %v33398_v51 = vld [vmem:[#allocation148_spill] sm:$0xff] }
 0x680   : > { %24942 = vmatpush3.msra.mxu0 %v33394_v13  ;;  %v4941_v9 = vpop.xlane.xlu0 %4940  ;;  %24943 = vmatprep.mubr.msk.f32.mxu0 %vm27293_vm1, %v33198_v17  ;;  %v33400_v13 = vld [vmem:[#allocation134_spill] sm:$0xff] }
 0x681   : > { %26805 = vrcp.f32 %v4941_v9  ;;  %8042 = vrot.lane.b32.xlu1 %v33395_v18, %s27295_s23  ;;  %24937 = vmatmul.mubr.msk.f32.vlgmr.msra.gmra.mxu1 %vm2124_vm3, %v4976_v48  ;;  %v33399_v48 = vld [vmem:[#allocation60_spill] sm:$0xff] }
 0x682   : > { %v26800_v60 = vpop.eup %26799  ;;  %24947 = vmatpush3.msra.mxu1 %v33396_v11  ;;  %7884 = vrot.lane.b32.xlu0 %v33397_v19, %s27295_s23 }
 0x683   : > { %24948 = vmatprep.subr.mxu1 %v33198_v17  ;;  %24953 = vmatprep.subr.mxu0 %v33198_v17  ;;  %v4977_v55 = vmul.f32 %v26800_v60, %v28726_v59  ;;  %v33402_v60 = vld [vmem:[#allocation150_spill] sm:$0xff] }
 0x684   : > { %24949 = vmatpush3.msra.mxu1 %v33398_v51  ;;  %v4947_v9 = vpop.xlane.xlu0 %4946  ;;  %24950 = vmatprep.mubr.msk.f32.mxu1 %vm27293_vm1, %v33198_v17  ;;  %v33405_v51 = vld [vmem:[#allocation57_spill] sm:$0xff] }
 0x685   : > { %26807 = vrcp.f32 %v4947_v9  ;;  %24944 = vmatmul.mubr.msk.f32.vlgmr.msra.gmra.mxu0 %vm2124_vm3, %v4977_v55  ;;  %8123 = vrot.lane.b32.xlu1 %v33399_v48, %s27295_s23  ;;  %v33403_v9 = vld [vmem:[#allocation136_spill] sm:$0xff] }
 0x686   : > { %v26802_v11 = vpop.eup %26801  ;;  %24954 = vmatpush3.msra.mxu0 %v33400_v13  ;;  %7965 = vrot.lane.b32.xlu0 %v33401_v62, %s27295_s23  ;;  %v33404_v13 = vld [vmem:[#allocation58_spill] sm:$0xff]  ;;  %v33473_v62 = vld [vmem:[#allocation168_spill] sm:$0xff] }
 0x687   : > { %24955 = vmatprep.subr.mxu0 %v33198_v17  ;;  %24957 = vmatprep.mubr.msk.f32.mxu0 %vm27293_vm1, %v33198_v17  ;;  %v4979_v59 = vmul.f32 %v26802_v11, %v28730_v14  ;;  %v33406_v11 = vld [vmem:[#allocation154_spill] sm:$0xff] }
 0x688   : > { %24956 = vmatpush3.msra.mxu0 %v33402_v60  ;;  %24960 = vmatprep.subr.mxu1 %v33198_v17  ;;  %v33408_v60 = vld [vmem:[#allocation73_spill] sm:$0xff] }
 0x689   : > { %24967 = vmatprep.subr.mxu0 %v33198_v17  ;;  %24958 = vmatmul.mubr.msk.f32.vlgmr.msra.gmra.mxu0 %vm2124_vm3, %v4979_v59 }
 0x68a   : > { %v26804_v55 = vpop.eup %26803  ;;  %24968 = vmatpush3.msra.mxu0 %v33403_v9  ;;  %8121 = vrot.lane.b32.xlu1 %v33404_v13, %s27295_s23  ;;  %v33407_v9 = vld [vmem:[#allocation139_spill] sm:$0xff] }
 0x68b   : > { %24969 = vmatprep.subr.mxu0 %v33198_v17  ;;  %8044 = vrot.lane.b32.xlu0 %v33405_v51, %s27295_s23  ;;  %v4981_v14 = vmul.f32 %v26804_v55, %v28734_v40  ;;  %v33410_v55 = vld [vmem:[#allocation158_spill] sm:$0xff]  ;;  %v33430_v13 = vld [vmem:[#allocation67_spill] sm:$0xff] }
 0x68c   : > { %24970 = vmatpush3.msra.mxu0 %v33406_v11  ;;  %24971 = vmatprep.mubr.msk.f32.mxu0 %vm27293_vm1, %v33198_v17  ;;  %v33412_v11 = vld [vmem:[#allocation71_spill] sm:$0xff] }
 0x68d   : > { %24981 = vmatprep.subr.mxu0 %v33198_v17  ;;  %24972 = vmatmul.mubr.msk.f32.vlgmr.msra.gmra.mxu0 %vm2124_vm3, %v4981_v14 }
 0x68e   : > { %v26806_v59 = vpop.eup %26805  ;;  %24982 = vmatpush3.msra.mxu0 %v33407_v9  ;;  %8202 = vrot.lane.b32.xlu1 %v33408_v60, %s27295_s23  ;;  %v33411_v9 = vld [vmem:[#allocation143_spill] sm:$0xff] }
 0x68f   : > { %24983 = vmatprep.subr.mxu0 %v33198_v17  ;;  %8281 = vrot.lane.b32.xlu0 %v33409_v45, %s27295_s23  ;;  %v4983_v40 = vmul.f32 %v26806_v59, %v28738_v21  ;;  %v33413_v45 = vld [vmem:[#allocation81_spill] sm:$0xff]  ;;  %v33414_v21 = vld [vmem:[#allocation170_spill] sm:$0xff]  ;;  %v33426_v60 = vld [vmem:[#allocation63_spill] sm:$0xff] }
 0x690   : > { %24984 = vmatpush3.msra.mxu0 %v33410_v55  ;;  %24985 = vmatprep.mubr.msk.f32.mxu0 %vm27293_vm1, %v33198_v17  ;;  %v33415_v55 = vld [vmem:[#allocation161_spill] sm:$0xff] }
 0x691   : > { %24995 = vmatprep.subr.mxu0 %v33198_v17  ;;  %24986 = vmatmul.mubr.msk.f32.vlgmr.msra.gmra.mxu0 %vm2124_vm3, %v4983_v40  ;;  %v33416_v40 = vld [vmem:[#allocation147_spill] sm:$0xff] }
 0x692   : > { %v26808_v14 = vpop.eup %26807  ;;  %24996 = vmatpush3.msra.mxu0 %v33411_v9  ;;  %8200 = vrot.lane.b32.xlu1 %v33412_v11, %s27295_s23  ;;  %v33417_v9 = vld [vmem:[#allocation75_spill] sm:$0xff]  ;;  %v33425_v11 = vld [vmem:[#allocation66_spill] sm:$0xff] }
 0x693   : > { %24997 = vmatprep.subr.mxu0 %v33198_v17  ;;  %8360 = vrot.lane.b32.xlu0 %v33413_v45, %s27295_s23  ;;  %v4985_v59 = vmul.f32 %v26808_v14, %v33414_v21  ;;  %v33418_v45 = vld [vmem:[#allocation59_spill] sm:$0xff] }
 0x694   : > { %24998 = vmatpush3.msra.mxu0 %v33415_v55  ;;  %24999 = vmatprep.mubr.msk.f32.mxu0 %vm27293_vm1, %v33198_v17  ;;  %v33419_v14 = vld [vmem:[#allocation163_spill] sm:$0xff]  ;;  %v33422_v55 = vld [vmem:[#allocation56_spill] sm:$0xff] }
 0x695   : > { %25009 = vmatprep.subr.mxu0 %v33198_v17  ;;  %25000 = vmatmul.mubr.msk.f32.vlgmr.msra.gmra.mxu0 %vm2124_vm3, %v4985_v59  ;;  %v33420_v21 = vld [vmem:[#allocation79_spill] sm:$0xff]  ;;  %v33421_v59 = vld [vmem:[#allocation62_spill] sm:$0xff] }
 0x696   : > { %25010 = vmatpush3.msra.mxu0 %v33416_v40  ;;  %8279 = vrot.lane.b32.xlu1 %v33417_v9, %s27295_s23  ;;  %v33424_v9 = vld [vmem:[#allocation61_spill] sm:$0xff] }
 0x697   : > { %25011 = vmatprep.subr.mxu0 %v33198_v17  ;;  %8439 = vrot.lane.b32.xlu0 %v33418_v45, %s27295_s23  ;;  %v33423_v45 = vld [vmem:[#allocation64_spill] sm:$0xff] }
 0x698   : > { %25012 = vmatpush3.msra.mxu0 %v33419_v14  ;;  %25013 = vmatprep.mubr.msk.f32.mxu0 %vm27293_vm1, %v33198_v17 }
 0x699   : > { %25023 = vmatprep.subr.mxu0 %v33198_v17 }
 0x69a   : > { %8358 = vrot.lane.b32.xlu1 %v33420_v21, %s27295_s23 }
 0x69b   : > { %8518 = vrot.lane.b32.xlu0 %v33421_v59, %s27295_s23  ;;  %v33427_v59 = vld [vmem:[#allocation68_spill] sm:$0xff] }
 0x69d   : > { %v4926_v40 = vpop.xlane.xlu1 %4925 }
 0x69e   : > { %8437 = vrot.lane.b32.xlu1 %v33422_v55, %s27295_s23  ;;  %26809 = vrcp.f32 %v4926_v40  ;;  %v33428_v55 = vld [vmem:[#allocation65_spill] sm:$0xff] }
 0x69f   : > { %8597 = vrot.lane.b32.xlu0 %v33423_v45, %s27295_s23 }
 0x6a1   : > { %v4932_v14 = vpop.xlane.xlu1 %4931 }
 0x6a2   : > { %8516 = vrot.lane.b32.xlu1 %v33424_v9, %s27295_s23  ;;  %26811 = vrcp.f32 %v4932_v14  ;;  %v33429_v9 = vld [vmem:[#allocation70_spill] sm:$0xff] }
 0x6a3   : > { %8676 = vrot.lane.b32.xlu0 %v33425_v11, %s27295_s23 }
 0x6a5   : > { %v4938_v21 = vpop.xlane.xlu1 %4937 }
 0x6a6   : > { %8595 = vrot.lane.b32.xlu1 %v33426_v60, %s27295_s23  ;;  %26813 = vrcp.f32 %v4938_v21 }
 0x6a7   : > { %8755 = vrot.lane.b32.xlu0 %v33427_v59, %s27295_s23  ;;  %v33431_v59 = vld [vmem:[#allocation74_spill] sm:$0xff] }
 0x6a9   : > { %v4944_v40 = vpop.xlane.xlu1 %4943 }
 0x6aa   : > { %8674 = vrot.lane.b32.xlu1 %v33428_v55, %s27295_s23  ;;  %26815 = vrcp.f32 %v4944_v40  ;;  %v33432_v40 = vld [vmem:[#allocation135_spill] sm:$0xff] }
 0x6ab   : > { %v26810_v45 = vpop.eup %26809  ;;  %8834 = vrot.lane.b32.xlu0 %v33429_v9, %s27295_s23 }
 0x6ac   : > { %v4978_v14 = vmul.f32 %v26810_v45, %v28754_v58  ;;  %v33433_v58 = vld [vmem:[#allocation152_spill] sm:$0xff] }
 0x6ad   : > { %v4950_v11 = vpop.xlane.xlu0 %4949  ;;  %v4953_v51 = vpop.xlane.xlu1 %4952 }
 0x6ae   : > { %8753 = vrot.lane.b32.xlu1 %v33430_v13, %s27295_s23  ;;  %26817 = vrcp.f32 %v4950_v11  ;;  %24951 = vmatmul.mubr.msk.f32.vlgmr.msra.gmra.mxu1 %vm2124_vm3, %v4978_v14  ;;  %v33435_v14 = vld [vmem:[#allocation69_spill] sm:$0xff] }
 0x6af   : > { %v26812_v21 = vpop.eup %26811  ;;  %26819 = vrcp.f32 %v4953_v51  ;;  %8913 = vrot.lane.b32.xlu0 %v33431_v59, %s27295_s23  ;;  %24961 = vmatpush3.msra.mxu1 %v33432_v40  ;;  %v33436_v40 = vld [vmem:[#allocation78_spill] sm:$0xff]  ;;  %v33437_v59 = vld [vmem:[#allocation137_spill] sm:$0xff] }
 0x6b0   : > { %24962 = vmatprep.subr.mxu1 %v33198_v17  ;;  %24964 = vmatprep.mubr.msk.f32.mxu1 %vm27293_vm1, %v33198_v17  ;;  %v4980_v45 = vmul.f32 %v26812_v21, %v28759_v52 }
 0x6b1   : > { %24963 = vmatpush3.msra.mxu1 %v33433_v58  ;;  %v4956_v9 = vpop.xlane.xlu0 %4955  ;;  %v28993_v11 = vpop.permute.xlu1 %6813  ;;  %v33439_v58 = vld [vmem:[#allocation156_spill] sm:$0xff] }
 0x6b2   : > { %33434 = vst [vmem:[#allocation170_spill] sm:$0xff] %v28993_v11  ;;  %8832 = vrot.lane.b32.xlu1 %v33435_v14, %s27295_s23  ;;  %26821 = vrcp.f32 %v4956_v9  ;;  %24974 = vmatprep.subr.mxu1 %v33198_v17  ;;  %v33440_v14 = vld [vmem:[#allocation72_spill] sm:$0xff] }
 0x6b3   : > { %v26814_v51 = vpop.eup %26813  ;;  %8992 = vrot.lane.b32.xlu0 %v33436_v40, %s27295_s23  ;;  %24965 = vmatmul.mubr.msk.f32.vlgmr.msra.gmra.mxu1 %vm2124_vm3, %v4980_v45  ;;  %v33441_v45 = vld [vmem:[#allocation12_spill] sm:$0xff] }
 0x6b4   : > { %24975 = vmatpush3.msra.mxu1 %v33437_v59  ;;  %24978 = vmatprep.mubr.msk.f32.mxu1 %vm27293_vm1, %v33198_v17  ;;  %v4982_v52 = vmul.f32 %v26814_v51, %v28763_v2  ;;  %v33442_v51 = vld [vmem:[#allocation141_spill] sm:$0xff] }
 0x6b5   : > { %24976 = vmatprep.subr.mxu1 %v33198_v17  ;;  %v29006_v21 = vpop.permute.xlu0 %6645  ;;  %v29008_v9 = vpop.permute.xlu1 %6895 }
 0x6b6   : > { %33438 = vst [vmem:[#allocation176_spill] sm:$0xff] %v29008_v9  ;;  %24977 = vmatpush3.msra.mxu1 %v33439_v58  ;;  %8911 = vrot.lane.b32.xlu1 %v33440_v14, %s27295_s23  ;;  %v33444_v14 = vld [vmem:[#allocation76_spill] sm:$0xff] }
 0x6b7   : > { %v26816_v40 = vpop.eup %26815  ;;  %24988 = vmatprep.subr.mxu1 %v33198_v17  ;;  %9105 = vrot.lane.b32.xlu0 %v33441_v45, %s27296_s25  ;;  %v33445_v45 = vld [vmem:[#allocation160_spill] sm:$0xff] }
 0x6b8   : > { %24979 = vmatmul.mubr.msk.f32.vlgmr.msra.gmra.mxu1 %vm2124_vm3, %v4982_v52  ;;  %v4984_v2 = vmul.f32 %v26816_v40, %v28767_v56  ;;  %v33446_v52 = vld [vmem:[#allocation11_spill] sm:$0xff] }
 0x6b9   : > { %24989 = vmatpush3.msra.mxu1 %v33442_v51  ;;  %v29019_v59 = vpop.permute.xlu0 %6727  ;;  %24992 = vmatprep.mubr.msk.f32.mxu1 %vm27293_vm1, %v33198_v17  ;;  %v29023_v58 = vpop.permute.xlu1 %6893  ;;  %v33447_v51 = vld [vmem:[#allocation145_spill] sm:$0xff] }
 0x6ba   : > { %33443 = vst [vmem:[#allocation177_spill] sm:$0xff] %v29023_v58  ;;  %24990 = vmatprep.subr.mxu1 %v33198_v17  ;;  %8990 = vrot.lane.b32.xlu1 %v33444_v14, %s27295_s23 }
 0x6bb   : > { %v26818_v13 = vpop.eup %26817  ;;  %24991 = vmatpush3.msra.mxu1 %v33445_v45  ;;  %9103 = vrot.lane.b32.xlu0 %v33446_v52, %s27296_s25  ;;  %v33450_v52 = vld [vmem:[#allocation15_spill] sm:$0xff] }
 0x6bc   : > { %v26820_v56 = vpop.eup %26819  ;;  %25002 = vmatprep.subr.mxu1 %v33198_v17  ;;  %24993 = vmatmul.mubr.msk.f32.vlgmr.msra.gmra.mxu1 %vm2124_vm3, %v4984_v2  ;;  %v4986_v40 = vmul.f32 %v26818_v13, %v28773_v6  ;;  %v33451_v2 = vld [vmem:[#allocation162_spill] sm:$0xff]  ;;  %v33453_v13 = vld [vmem:[#allocation149_spill] sm:$0xff] }
 0x6bd   : > { %25003 = vmatpush3.msra.mxu1 %v33447_v51  ;;  %v29035_v55 = vpop.permute.xlu0 %6811  ;;  %25006 = vmatprep.mubr.msk.f32.mxu1 %vm27293_vm1, %v33198_v17  ;;  %v29039_v14 = vpop.permute.xlu1 %6977  ;;  %v4987_v45 = vmul.f32 %v26820_v56, %v28771_v7  ;;  %v33452_v6 = vld [vmem:[#allocation14_spill] sm:$0xff]  ;;  %v33455_v51 = vld [vmem:[#allocation151_spill] sm:$0xff] }
 0x6be   : > { %33448 = vst [vmem:[#allocation178_spill] sm:$0xff] %v29035_v55  ;;  %33449 = vst [vmem:[#allocation179_spill] sm:$0xff] %v29039_v14  ;;  %25004 = vmatprep.subr.mxu1 %v33198_v17  ;;  %9187 = vrot.lane.b32.xlu1 %v33450_v52, %s27296_s25  ;;  %v33457_v52 = vld [vmem:[#allocation13_spill] sm:$0xff] }
 0x6bf   : > { %v26822_v60 = vpop.eup %26821  ;;  %25005 = vmatpush3.msra.mxu1 %v33451_v2  ;;  %9101 = vrot.lane.b32.xlu0 %v33452_v6, %s27296_s25  ;;  %v33456_v6 = vld [vmem:[#allocation164_spill] sm:$0xff] }
 0x6c0   : > { %25016 = vmatprep.subr.mxu1 %v33198_v17  ;;  %25007 = vmatmul.mubr.msk.f32.vlgmr.msra.gmra.mxu1 %vm2124_vm3, %v4986_v40  ;;  %v4988_v2 = vmul.f32 %v26822_v60, %v28779_v61  ;;  %v33460_v61 = vld [vmem:[#allocation153_spill] sm:$0xff] }
 0x6c1   : > { %25014 = vmatmul.mubr.msk.f32.vlgmr.msra.gmra.mxu0 %vm2124_vm3, %v4987_v45  ;;  %25017 = vmatpush3.msra.mxu1 %v33453_v13  ;;  %v29052_v7 = vpop.permute.xlu0 %6809  ;;  %v29054_v56 = vpop.permute.xlu1 %7059  ;;  %v33458_v45 = vld [vmem:[#allocation17_spill] sm:$0xff] }
 0x6c2   : > { %33454 = vst [vmem:[#allocation14_spill] sm:$0xff] %v29054_v56  ;;  %25024 = vmatpush3.xpose.msk.msra.mxu0 %vm859_vm2, %v33455_v51  ;;  %25018 = vmatprep.subr.mxu1 %v33198_v17  ;;  %v33461_v60 = vld [vmem:[#allocation165_spill] sm:$0xff] }
 0x6c3   : > { %25019 = vmatpush3.msra.mxu1 %v33456_v6  ;;  %9185 = vrot.lane.b32.xlu1 %v33457_v52, %s27296_s25  ;;  %v33462_v6 = vld [vmem:[#allocation18_spill] sm:$0xff] }
 0x6c4   : > { %25020 = vmatprep.mubr.msk.f32.mxu1 %vm27293_vm1, %v33198_v17  ;;  %25025 = vmatprep.subr.mxu0 %v33198_v17  ;;  %v33468_v52 = vld [vmem:[#allocation166_spill] sm:$0xff] }
 0x6c5   : > { %25030 = vmatprep.subr.mxu1 %v33198_v17  ;;  %9183 = vrot.lane.b32.xlu0 %v33458_v45, %s27296_s25  ;;  %v29069_v40 = vpop.permute.xlu0 %6891  ;;  %v29071_v51 = vpop.permute.xlu1 %7057  ;;  %v33463_v45 = vld [vmem:[#allocation155_spill] sm:$0xff] }
 0x6c6   : > { %33459 = vst [vmem:[#allocation17_spill] sm:$0xff] %v29071_v51  ;;  %25021 = vmatmul.mubr.msk.f32.vlgmr.msra.gmra.mxu1 %vm2124_vm3, %v4988_v2  ;;  %25026 = vmatpush3.xpose.msk.msra.mxu0 %vm859_vm2, %v33460_v61  ;;  %v33466_v61 = vld [vmem:[#allocation16_spill] sm:$0xff] }
 0x6c7   : > { %25031 = vmatpush3.xpose.msk.msra.mxu1 %vm859_vm2, %v33461_v60  ;;  %25027 = vmatprep.mubr.msk.f32.mxu0 %vm27293_vm1, %v33198_v17  ;;  %v33467_v60 = vld [vmem:[#allocation167_spill] sm:$0xff] }
 0x6c8   : > { %9269 = vrot.lane.b32.xlu1 %v33462_v6, %s27296_s25  ;;  %25032 = vmatprep.subr.mxu1 %v33198_v17 }
 0x6c9   : > { %25028 = vmatmul.mubr.msk.f32.vlgmr.msra.gmra.mxu0 %vm859_vm2, %v33463_v45  ;;  %25037 = vmatprep.subr.mxu0 %v33198_v17  ;;  %v29086_v2 = vpop.permute.xlu0 %6975  ;;  %v29088_v13 = vpop.permute.xlu1 %7141  ;;  %v33469_v45 = vld [vmem:[#allocation21_spill] sm:$0xff] }
 0x6ca   : > { %33464 = vst [vmem:[#allocation155_spill] sm:$0xff] %v29086_v2  ;;  %33465 = vst [vmem:[#allocation180_spill] sm:$0xff] %v29088_v13  ;;  %9267 = vrot.lane.b32.xlu0 %v33466_v61, %s27296_s25  ;;  %25038 = vmatpush3.xpose.msk.msra.mxu0 %vm859_vm2, %v33467_v60  ;;  %v33471_v60 = vld [vmem:[#allocation157_spill] sm:$0xff] }
 0x6cb   : > { %25033 = vmatpush3.xpose.msk.msra.mxu1 %vm859_vm2, %v33468_v52  ;;  %25034 = vmatprep.mubr.msk.f32.mxu1 %vm27293_vm1, %v33198_v17  ;;  %v33472_v52 = vld [vmem:[#allocation159_spill] sm:$0xff] }
 0x6cc   : > { %9351 = vrot.lane.b32.xlu1 %v33469_v45, %s27296_s25  ;;  %25039 = vmatprep.subr.mxu0 %v33198_v17  ;;  %v33474_v45 = vld [vmem:[#allocation169_spill] sm:$0xff] }
 0x6cd   : > { %25044 = vmatprep.subr.mxu1 %v33198_v17  ;;  %25041 = vmatprep.mubr.msk.f32.mxu0 %vm27293_vm1, %v33198_v17  ;;  %v6974_v61 = vpop.permute.xlu0 %6973  ;;  %v29104_v6 = vpop.permute.xlu1 %7223 }
 0x6ce   : > { %33470 = vst [vmem:[#allocation181_spill] sm:$0xff] %v29104_v6  ;;  %25035 = vmatmul.mubr.msk.f32.vlgmr.msra.gmra.mxu1 %vm859_vm2, %v33471_v60  ;;  %25040 = vmatpush3.xpose.msk.msra.mxu0 %vm859_vm2, %v33472_v52  ;;  %v33476_v60 = vld [vmem:[#allocation171_spill] sm:$0xff] }
 0x6cf   : > { %25045 = vmatpush3.xpose.msk.msra.mxu1 %vm859_vm2, %v33473_v62  ;;  %25051 = vmatprep.subr.mxu0 %v33198_v17 }
 0x6d0   : > { %25046 = vmatprep.subr.mxu1 %v33198_v17  ;;  %25048 = vmatprep.mubr.msk.f32.mxu1 %vm27293_vm1, %v33198_v17 }
 0x6d1   : > { %25042 = vmatmul.mubr.msk.f32.vlgmr.msra.gmra.mxu0 %vm859_vm2, %v33474_v45  ;;  %v7056_v48 = vpop.permute.xlu0 %7055  ;;  %v29118_v19 = vpop.permute.xlu1 %7221 }
 0x6d2   : > { %33475 = vst [vmem:[#allocation157_spill] sm:$0xff] %v29118_v19  ;;  %25052 = vmatpush3.xpose.msk.msra.mxu0 %vm859_vm2, %v28827_v1  ;;  %25055 = vmatprep.mubr.msk.f32.mxu0 %vm27293_vm1, %v33198_v17 }
 0x6d3   : > { %25047 = vmatpush3.xpose.msk.msra.mxu1 %vm859_vm2, %v33476_v60  ;;  %25053 = vmatprep.subr.mxu0 %v33198_v17 }
 0x6d4   : > { %25058 = vmatprep.subr.mxu1 %v33198_v17 }
 0x6d5   : > { %v29128_v62 = vpop.permute.xlu0 %7139  ;;  %v29134_v45 = vpop.permute.xlu1 %7305 }
 0x6d6   : > { %33477 = vst [vmem:[#allocation169_spill] sm:$0xff] %v29128_v62  ;;  %25049 = vmatmul.mubr.msk.f32.vlgmr.msra.gmra.mxu1 %vm859_vm2, %v28783_v57  ;;  %25054 = vmatpush3.xpose.msk.msra.mxu0 %vm859_vm2, %v28785_v0  ;;  %33478 = vst [vmem:[#allocation182_spill] sm:$0xff] %v29134_v45 }
 0x6d7   : > { %25059 = vmatpush3.xpose.msk.msra.mxu1 %vm859_vm2, %v28835_v12  ;;  %25065 = vmatprep.subr.mxu0 %v33198_v17 }
 0x6d8   : > { %25060 = vmatprep.subr.mxu1 %v33198_v17  ;;  %25062 = vmatprep.mubr.msk.f32.mxu1 %vm27293_vm1, %v33198_v17 }
 0x6d9   : > { %25056 = vmatmul.mubr.msk.f32.vlgmr.msra.gmra.mxu0 %vm859_vm2, %v29006_v21  ;;  %v7138_v1 = vpop.permute.xlu0 %7137  ;;  %v29152_v57 = vpop.permute.xlu1 %7387 }
 0x6da   : > { %25066 = vmatpush3.xpose.msk.msra.mxu0 %vm859_vm2, %v28993_v11  ;;  %25069 = vmatprep.mubr.msk.f32.mxu0 %vm27293_vm1, %v33198_v17  ;;  %33479 = vst [vmem:[#allocation183_spill] sm:$0xff] %v29152_v57 }
 0x6db   : > { %25061 = vmatpush3.xpose.msk.msra.mxu1 %vm859_vm2, %v28843_v15  ;;  %25067 = vmatprep.subr.mxu0 %v33198_v17 }
 0x6dc   : > { %25072 = vmatprep.subr.mxu1 %v33198_v17 }
 0x6dd   : > { %v7220_v21 = vpop.permute.xlu0 %7219  ;;  %v29166_v11 = vpop.permute.xlu1 %7385 }
 0x6de   : > { %25063 = vmatmul.mubr.msk.f32.vlgmr.msra.gmra.mxu1 %vm859_vm2, %v29019_v59  ;;  %25068 = vmatpush3.xpose.msk.msra.mxu0 %vm859_vm2, %v29035_v55  ;;  %33480 = vst [vmem:[#allocation184_spill] sm:$0xff] %v29166_v11 }
 0x6df   : > { %25073 = vmatpush3.xpose.msk.msra.mxu1 %vm859_vm2, %v29008_v9  ;;  %25079 = vmatprep.subr.mxu0 %v33198_v17 }
 0x6e0   : > { %25074 = vmatprep.subr.mxu1 %v33198_v17  ;;  %25076 = vmatprep.mubr.msk.f32.mxu1 %vm27293_vm1, %v33198_v17 }
 0x6e1   : > { %25070 = vmatmul.mubr.msk.f32.vlgmr.msra.gmra.mxu0 %vm859_vm2, %v29052_v7  ;;  %v29175_v59 = vpop.permute.xlu0 %7303  ;;  %v29185_v7 = vpop.permute.xlu1 %7469 }
 0x6e2   : > { %25080 = vmatpush3.xpose.msk.msra.mxu0 %vm859_vm2, %v29039_v14  ;;  %25083 = vmatprep.mubr.msk.f32.mxu0 %vm27293_vm1, %v33198_v17  ;;  %33481 = vst [vmem:[#allocation185_spill] sm:$0xff] %v29175_v59  ;;  %33482 = vst [vmem:[#allocation186_spill] sm:$0xff] %v29185_v7 }
 0x6e3   : > { %25075 = vmatpush3.xpose.msk.msra.mxu1 %vm859_vm2, %v29023_v58  ;;  %25081 = vmatprep.subr.mxu0 %v33198_v17 }
 0x6e4   : > { %25086 = vmatprep.subr.mxu1 %v33198_v17 }
 0x6e5   : > { %v7302_v14 = vpop.permute.xlu0 %7301 }
 0x6e6   : > { %25077 = vmatmul.mubr.msk.f32.vlgmr.msra.gmra.mxu1 %vm859_vm2, %v29069_v40  ;;  %25082 = vmatpush3.xpose.msk.msra.mxu0 %vm859_vm2, %v29086_v2  ;;  %v29199_v40 = vpop.permute.xlu1 %7551 }
 0x6e7   : > { %25087 = vmatpush3.xpose.msk.msra.mxu1 %vm859_vm2, %v29054_v56  ;;  %25093 = vmatprep.subr.mxu0 %v33198_v17  ;;  %33483 = vst [vmem:[#allocation187_spill] sm:$0xff] %v29199_v40 }
 0x6e8   : > { %25088 = vmatprep.subr.mxu1 %v33198_v17  ;;  %25090 = vmatprep.mubr.msk.f32.mxu1 %vm27293_vm1, %v33198_v17 }
 0x6e9   : > { %25084 = vmatmul.mubr.msk.f32.vlgmr.msra.gmra.mxu0 %vm859_vm2, %v6974_v61  ;;  %v7384_v61 = vpop.permute.xlu0 %7383 }
 0x6ea   : > { %25094 = vmatpush3.xpose.msk.msra.mxu0 %vm859_vm2, %v29088_v13  ;;  %25097 = vmatprep.mubr.msk.f32.mxu0 %vm27293_vm1, %v33198_v17 }
 0x6eb   : > { %25089 = vmatpush3.xpose.msk.msra.mxu1 %vm859_vm2, %v29071_v51  ;;  %25095 = vmatprep.subr.mxu0 %v33198_v17 }
 0x6ec   : > { %25100 = vmatprep.subr.mxu1 %v33198_v17 }
 0x6ee   : > { %25091 = vmatmul.mubr.msk.f32.vlgmr.msra.gmra.mxu1 %vm859_vm2, %v7056_v48  ;;  %25096 = vmatpush3.xpose.msk.msra.mxu0 %vm859_vm2, %v29128_v62  ;;  %v29218_v48 = vpop.permute.xlu1 %7549 }
 0x6ef   : > { %25101 = vmatpush3.xpose.msk.msra.mxu1 %vm859_vm2, %v29104_v6  ;;  %25107 = vmatprep.subr.mxu0 %v33198_v17  ;;  %33484 = vst [vmem:[#allocation188_spill] sm:$0xff] %v29218_v48  ;;  %v29221_v6 = vpop.permute.xlu0 %7467 }
 0x6f0   : > { %25102 = vmatprep.subr.mxu1 %v33198_v17  ;;  %25104 = vmatprep.mubr.msk.f32.mxu1 %vm27293_vm1, %v33198_v17  ;;  %33485 = vst [vmem:[#allocation189_spill] sm:$0xff] %v29221_v6 }
 0x6f1   : > { %25098 = vmatmul.mubr.msk.f32.vlgmr.msra.gmra.mxu0 %vm859_vm2, %v7138_v1 }
 0x6f2   : > { %25108 = vmatpush3.xpose.msk.msra.mxu0 %vm859_vm2, %v29134_v45  ;;  %25111 = vmatprep.mubr.msk.f32.mxu0 %vm27293_vm1, %v33198_v17  ;;  %v7548_v1 = vpop.permute.xlu1 %7547 }
 0x6f3   : > { %25103 = vmatpush3.xpose.msk.msra.mxu1 %vm859_vm2, %v29118_v19  ;;  %25109 = vmatprep.subr.mxu0 %v33198_v17 }
 0x6f4   : > { %25114 = vmatprep.subr.mxu1 %v33198_v17 }
 0x6f6   : > { %25105 = vmatmul.mubr.msk.f32.vlgmr.msra.gmra.mxu1 %vm859_vm2, %v7220_v21  ;;  %25110 = vmatpush3.xpose.msk.msra.mxu0 %vm859_vm2, %v29175_v59  ;;  %v7466_v21 = vpop.permute.xlu0 %7465 }
 0x6f7   : > { %25115 = vmatpush3.xpose.msk.msra.mxu1 %vm859_vm2, %v29152_v57  ;;  %25121 = vmatprep.subr.mxu0 %v33198_v17 }
 0x6f8   : > { %25116 = vmatprep.subr.mxu1 %v33198_v17  ;;  %25118 = vmatprep.mubr.msk.f32.mxu1 %vm27293_vm1, %v33198_v17 }
 0x6f9   : > { %25112 = vmatmul.mubr.msk.f32.vlgmr.msra.gmra.mxu0 %vm859_vm2, %v7302_v14  ;;  %v29247_v14 = vpop.permute.xlu1 %7807 }
 0x6fa   : > { %25122 = vmatpush3.xpose.msk.msra.mxu0 %vm859_vm2, %v29185_v7  ;;  %25125 = vmatprep.mubr.msk.f32.mxu0 %vm27293_vm1, %v33198_v17  ;;  %33486 = vst [vmem:[#allocation190_spill] sm:$0xff] %v29247_v14  ;;  %v29253_v7 = vpop.permute.xlu0 %7805 }
 0x6fb   : > { %25117 = vmatpush3.xpose.msk.msra.mxu1 %vm859_vm2, %v29166_v11  ;;  %25123 = vmatprep.subr.mxu0 %v33198_v17  ;;  %33487 = vst [vmem:[#allocation191_spill] sm:$0xff] %v29253_v7 }
 0x6fc   : > { %25128 = vmatprep.subr.mxu1 %v33198_v17 }
 0x6fe   : > { %25119 = vmatmul.mubr.msk.f32.vlgmr.msra.gmra.mxu1 %vm859_vm2, %v7384_v61  ;;  %25124 = vmatpush3.xpose.msk.msra.mxu0 %vm859_vm2, %v29221_v6  ;;  %v29264_v61 = vpop.permute.xlu1 %7886 }
 0x6ff   : > { %25129 = vmatpush3.xpose.msk.msra.mxu1 %vm859_vm2, %v29199_v40  ;;  %25135 = vmatprep.subr.mxu0 %v33198_v17  ;;  %33488 = vst [vmem:[#allocation192_spill] sm:$0xff] %v29264_v61 }
 0x700   : > { %25130 = vmatprep.subr.mxu1 %v33198_v17  ;;  %25132 = vmatprep.mubr.msk.f32.mxu1 %vm27293_vm1, %v33198_v17 }
 0x701   : > { %25126 = vmatmul.mubr.msk.f32.vlgmr.msra.gmra.mxu0 %vm859_vm2, %v7466_v21  ;;  %v29270_v21 = vpop.permute.xlu0 %7884 }
 0x702   : > { %25136 = vmatpush3.msra.mxu0 %v29247_v14  ;;  %25139 = vmatprep.mubr.msk.f32.mxu0 %vm27293_vm1, %v33198_v17  ;;  %33489 = vst [vmem:[#allocation193_spill] sm:$0xff] %v29270_v21 }
 0x703   : > { %25131 = vmatpush3.xpose.msk.msra.mxu1 %vm859_vm2, %v29218_v48  ;;  %25137 = vmatprep.subr.mxu0 %v33198_v17 }
 0x704   : > { %25138 = vmatpush3.msra.mxu0 %v29253_v7  ;;  %25142 = vmatprep.subr.mxu1 %v33198_v17 }
 0x705   : > { %25149 = vmatprep.subr.mxu0 %v33198_v17 }
 0x706   : > { %25133 = vmatmul.mubr.msk.f32.vlgmr.msra.gmra.mxu1 %vm859_vm2, %v7548_v1 }
 0x707   : > { %25143 = vmatpush3.msra.mxu1 %v29264_v61  ;;  %25146 = vmatprep.mubr.msk.f32.mxu1 %vm27293_vm1, %v33198_v17 }
 0x708   : > { %25144 = vmatprep.subr.mxu1 %v33198_v17  ;;  %v29273_v14 = vpop.f32.mrf.mxu0 }
 0x709   : > { %33490 = vst [vmem:[#allocation194_spill] sm:$0xff] %v29273_v14  ;;  %25145 = vmatpush3.msra.mxu1 %v29270_v21 }
 0x70a   : > { %v24917_v7 = vpop.f32.mrf.mxu0  ;;  %25156 = vmatprep.subr.mxu1 %v33198_v17 }
 0x739   : > { %v29277_v48 = vpop.f32.mrf.mxu1 }
 0x73a   : > { %33491 = vst [vmem:[#allocation195_spill] sm:$0xff] %v29277_v48 }
 0x73b   : > { %v24924_v40 = vpop.f32.mrf.mxu1 }
 0x73d   : > { %v29279_v1 = vpop.f32.mrf.mxu0 }
 0x73e   : > { %33492 = vst [vmem:[#allocation196_spill] sm:$0xff] %v29279_v1 }
 0x73f   : > { %v24931_v61 = vpop.f32.mrf.mxu0 }
 0x741   : > { %v29281_v6 = vpop.f32.mrf.mxu1 }
 0x742   : > { %33493 = vst [vmem:[#allocation197_spill] sm:$0xff] %v29281_v6 }
 0x743   : > { %v24938_v11 = vpop.f32.mrf.mxu1 }
 0x745   : > { %v29283_v57 = vpop.f32.mrf.mxu0 }
 0x746   : > { %33494 = vst [vmem:[#allocation198_spill] sm:$0xff] %v29283_v57 }
 0x747   : > { %v24945_v59 = vpop.f32.mrf.mxu0 }
 0x749   : > { %v29285_v45 = vpop.f32.mrf.mxu0 }
 0x74a   : > { %33495 = vst [vmem:[#allocation199_spill] sm:$0xff] %v29285_v45 }
 0x74b   : > { %v24959_v19 = vpop.f32.mrf.mxu0 }
 0x74d   : > { %v29287_v62 = vpop.f32.mrf.mxu0 }
 0x74e   : > { %33496 = vst [vmem:[#allocation200_spill] sm:$0xff] %v29287_v62 }
 0x74f   : > { %v24973_v7 = vpop.f32.mrf.mxu0 }
 0x751   : > { %v29289_v21 = vpop.f32.mrf.mxu0 }
 0x752   : > { %33497 = vst [vmem:[#allocation201_spill] sm:$0xff] %v29289_v21 }
 0x753   : > { %v24987_v13 = vpop.f32.mrf.mxu0 }
 0x755   : > { %v29291_v51 = vpop.f32.mrf.mxu0 }
 0x756   : > { %33498 = vst [vmem:[#allocation202_spill] sm:$0xff] %v29291_v51  ;;  %v33507_v51 = vld [vmem:[#allocation20_spill] sm:$0xff] }
 0x757   : > { %v25001_v40 = vpop.f32.mrf.mxu0 }
 0x76e   : > { %v29293_v56 = vpop.f32.mrf.mxu1 }
 0x76f   : > { %33499 = vst [vmem:[#allocation203_spill] sm:$0xff] %v29293_v56 }
 0x770   : > { %v24952_v61 = vpop.f32.mrf.mxu1 }
 0x773   : > { %v29295_v2 = vpop.f32.mrf.mxu1 }
 0x774   : > { %33500 = vst [vmem:[#allocation204_spill] sm:$0xff] %v29295_v2 }
 0x775   : > { %v24966_v11 = vpop.f32.mrf.mxu1 }
 0x778   : > { %v29297_v58 = vpop.f32.mrf.mxu1 }
 0x779   : > { %33501 = vst [vmem:[#allocation205_spill] sm:$0xff] %v29297_v58 }
 0x77a   : > { %v24980_v59 = vpop.f32.mrf.mxu1 }
 0x77c   : > { %v29299_v9 = vpop.f32.mrf.mxu1 }
 0x77d   : > { %33502 = vst [vmem:[#allocation206_spill] sm:$0xff] %v29299_v9 }
 0x77e   : > { %v24994_v19 = vpop.f32.mrf.mxu1 }
 0x780   : > { %v29301_v55 = vpop.f32.mrf.mxu1 }
 0x781   : > { %33503 = vst [vmem:[#allocation207_spill] sm:$0xff] %v29301_v55  ;;  %v29303_v7 = vpop.f32.mrf.mxu0 }
 0x782   : > { %33504 = vst [vmem:[#allocation208_spill] sm:$0xff] %v29303_v7  ;;  %v25008_v13 = vpop.f32.mrf.mxu1 }
 0x783   : > { %v25015_v15 = vpop.f32.mrf.mxu0 }
 0x786   : > { %v29305_v12 = vpop.f32.mrf.mxu1 }
 0x787   : > { %33505 = vst [vmem:[#allocation209_spill] sm:$0xff] %v29305_v12 }
 0x788   : > { %v25022_v40 = vpop.f32.mrf.mxu1 }
 0x789   : > { %v29307_v0 = vpop.f32.mrf.mxu0 }
 0x78a   : > { %v7629_v61 = vsel %vm2124_vm3, %v29307_v0, -inf }
 0x78b   : > { %7630 = vmax.xlane.f32.xlu0 %v7629_v61  ;;  %v25029_v11 = vpop.f32.mrf.mxu0 }
 0x78c   : > { %v33506_v11 = vld [vmem:[#allocation19_spill] sm:$0xff] }
 0x78e   : > { %v29311_v59 = vpop.f32.mrf.mxu1 }
 0x78f   : > { %v7632_v19 = vsel %vm2124_vm3, %v29311_v59, -inf }
 0x790   : > { %7633 = vmax.xlane.f32.xlu1 %v7632_v19  ;;  %v25036_v60 = vpop.f32.mrf.mxu1 }
 0x791   : > { %v29315_v52 = vpop.f32.mrf.mxu0  ;;  %v29329_v60 = vpop.permute.xlu1 %7963 }
 0x792   : > { %33508 = vst [vmem:[#allocation20_spill] sm:$0xff] %v29329_v60 }
 0x793   : > { %v25043_v15 = vpop.f32.mrf.mxu0 }
 0x795   : > { %v29333_v21 = vpop.permute.xlu1 %8042 }
 0x796   : > { %v29317_v13 = vpop.f32.mrf.mxu1  ;;  %33509 = vst [vmem:[#allocation210_spill] sm:$0xff] %v29333_v21 }
 0x798   : > { %v25050_v40 = vpop.f32.mrf.mxu1 }
 0x799   : > { %v29319_v12 = vpop.f32.mrf.mxu0  ;;  %v29339_v62 = vpop.permute.xlu1 %8123 }
 0x79a   : > { %33510 = vst [vmem:[#allocation211_spill] sm:$0xff] %v29339_v62 }
 0x79b   : > { %v25057_v7 = vpop.f32.mrf.mxu0 }
 0x79d   : > { %v29345_v56 = vpop.permute.xlu1 %8121 }
 0x79e   : > { %v29321_v55 = vpop.f32.mrf.mxu1  ;;  %33512 = vst [vmem:[#allocation213_spill] sm:$0xff] %v29345_v56 }
 0x7a0   : > { %v25064_v61 = vpop.f32.mrf.mxu1 }
 0x7a1   : > { %9349 = vrot.lane.b32.xlu1 %v33506_v11, %s27296_s25  ;;  %9265 = vrot.lane.b32.xlu0 %v33507_v51, %s27296_s25  ;;  %v29327_v19 = vpop.f32.mrf.mxu0  ;;  %v29341_v11 = vpop.permute.xlu0 %7965 }
 0x7a2   : > { %33511 = vst [vmem:[#allocation212_spill] sm:$0xff] %v29341_v11 }
 0x7a3   : > { %v25071_v15 = vpop.f32.mrf.mxu0 }
 0x7a5   : > { %v29347_v15 = vpop.permute.xlu0 %8044 }
 0x7a6   : > { %v29331_v9 = vpop.f32.mrf.mxu1  ;;  %33513 = vst [vmem:[#allocation214_spill] sm:$0xff] %v29347_v15 }
 0x7a8   : > { %v25078_v40 = vpop.f32.mrf.mxu1 }
 0x7a9   : > { %v29335_v7 = vpop.f32.mrf.mxu0  ;;  %v29355_v48 = vpop.permute.xlu0 %8281 }
 0x7aa   : > { %33515 = vst [vmem:[#allocation216_spill] sm:$0xff] %v29355_v48 }
 0x7ab   : > { %v25085_v58 = vpop.f32.mrf.mxu0 }
 0x7ac   : > { %v29353_v58 = vpop.permute.xlu1 %8202 }
 0x7ad   : > { %33514 = vst [vmem:[#allocation215_spill] sm:$0xff] %v29353_v58  ;;  %v29365_v18 = vpop.permute.xlu0 %8360  ;;  %v7638_v58 = vsel %vm2124_vm3, %v29317_v13, -inf }
 0x7ae   : > { %v29337_v61 = vpop.f32.mrf.mxu1  ;;  %33517 = vst [vmem:[#allocation218_spill] sm:$0xff] %v29365_v18  ;;  %v7647_v18 = vsel %vm2124_vm3, %v29327_v19, -inf }
 0x7b0   : > { %v25092_v51 = vpop.f32.mrf.mxu1  ;;  %v29361_v56 = vpop.permute.xlu1 %8200 }
 0x7b1   : > { %v29343_v2 = vpop.f32.mrf.mxu0  ;;  %v7635_v51 = vsel %vm2124_vm3, %v29315_v52, -inf  ;;  %33516 = vst [vmem:[#allocation217_spill] sm:$0xff] %v29361_v56 }
 0x7b3   : > { %v25099_v45 = vpop.f32.mrf.mxu0 }
 0x7b4   : > { %v29373_v4 = vpop.permute.xlu1 %8279 }
 0x7b5   : > { %33518 = vst [vmem:[#allocation219_spill] sm:$0xff] %v29373_v4 }
 0x7b6   : > { %v29349_v40 = vpop.f32.mrf.mxu1 }
 0x7b8   : > { %v25106_v57 = vpop.f32.mrf.mxu1 }
 0x7b9   : > { %v29351_v6 = vpop.f32.mrf.mxu0 }
 0x7bb   : > { %v25113_v1 = vpop.f32.mrf.mxu0 }
 0x7bc   : > { %v7644_v1 = vsel %vm2124_vm3, %v29321_v55, -inf }
 0x7be   : > { %v29357_v14 = vpop.f32.mrf.mxu1 }
 0x7c0   : > { %v25120_v45 = vpop.f32.mrf.mxu1  ;;  %7636 = vmax.xlane.f32.xlu0 %v7635_v51  ;;  %v7641_v51 = vsel %vm2124_vm3, %v29319_v12, -inf }
 0x7c1   : > { %v29363_v62 = vpop.f32.mrf.mxu0  ;;  %v29377_v45 = vpop.permute.xlu0 %8439 }
 0x7c2   : > { %33519 = vst [vmem:[#allocation220_spill] sm:$0xff] %v29377_v45 }
 0x7c3   : > { %v25127_v57 = vpop.f32.mrf.mxu0 }
 0x7c4   : > { %7639 = vmax.xlane.f32.xlu0 %v7638_v58  ;;  %v7650_v57 = vsel %vm2124_vm3, %v29331_v9, -inf  ;;  %v7656_v58 = vsel %vm2124_vm3, %v29337_v61, -inf }
 0x7c5   : > { %7645 = vmax.xlane.f32.xlu1 %v7644_v1  ;;  %v29385_v1 = vpop.permute.xlu1 %8358  ;;  %v29387_v4 = vpop.permute.xlu0 %8518 }
 0x7c6   : > { %v29371_v48 = vpop.f32.mrf.mxu1  ;;  %33520 = vst [vmem:[#allocation221_spill] sm:$0xff] %v29385_v1  ;;  %33521 = vst [vmem:[#allocation222_spill] sm:$0xff] %v29387_v4  ;;  %v7665_v4 = vsel %vm2124_vm3, %v29351_v6, -inf }
 0x7c8   : > { %v25134_v56 = vpop.f32.mrf.mxu1  ;;  %7642 = vmax.xlane.f32.xlu0 %v7641_v51  ;;  %v7662_v51 = vsel %vm2124_vm3, %v29349_v40, -inf }
 0x7c9   : > { %7651 = vmax.xlane.f32.xlu1 %v7650_v57  ;;  %v7653_v56 = vsel %vm2124_vm3, %v29335_v7, -inf  ;;  %v29393_v57 = vpop.permute.xlu1 %8437  ;;  %v29397_v45 = vpop.permute.xlu0 %8597 }
 0x7ca   : > { %33522 = vst [vmem:[#allocation223_spill] sm:$0xff] %v29393_v57  ;;  %33523 = vst [vmem:[#allocation224_spill] sm:$0xff] %v29397_v45  ;;  %v7671_v45 = vsel %vm2124_vm3, %v29363_v62, -inf }
 0x7cc   : > { %7648 = vmax.xlane.f32.xlu0 %v7647_v18  ;;  %v7659_v18 = vsel %vm2124_vm3, %v29343_v2, -inf }
 0x7cd   : > { %7657 = vmax.xlane.f32.xlu1 %v7656_v58  ;;  %v7668_v58 = vsel %vm2124_vm3, %v29357_v14, -inf  ;;  %v29407_v57 = vpop.permute.xlu0 %8676 }
 0x7ce   : > { %33525 = vst [vmem:[#allocation226_spill] sm:$0xff] %v29407_v57  ;;  %v33533_v57 = vld [vmem:[#allocation26_spill] sm:$0xff] }
 0x7d0   : > { %7654 = vmax.xlane.f32.xlu0 %v7653_v56  ;;  %v7674_v56 = vsel %vm2124_vm3, %v29371_v48, -inf }
 0x7d1   : > { %7663 = vmax.xlane.f32.xlu1 %v7662_v51  ;;  %v29405_v51 = vpop.permute.xlu1 %8516  ;;  %v29413_v1 = vpop.permute.xlu0 %8755 }
 0x7d2   : > { %33524 = vst [vmem:[#allocation225_spill] sm:$0xff] %v29405_v51  ;;  %33527 = vst [vmem:[#allocation228_spill] sm:$0xff] %v29413_v1  ;;  %v33536_v1 = vld [vmem:[#allocation25_spill] sm:$0xff] }
 0x7d4   : > { %7660 = vmax.xlane.f32.xlu0 %v7659_v18 }
 0x7d5   : > { %7669 = vmax.xlane.f32.xlu1 %v7668_v58  ;;  %v29411_v18 = vpop.permute.xlu1 %8595  ;;  %v29417_v54 = vpop.permute.xlu0 %8834 }
 0x7d6   : > { %33526 = vst [vmem:[#allocation227_spill] sm:$0xff] %v29411_v18  ;;  %33529 = vst [vmem:[#allocation230_spill] sm:$0xff] %v29417_v54  ;;  %v33538_v54 = vld [vmem:[#allocation22_spill] sm:$0xff] }
 0x7d8   : > { %7666 = vmax.xlane.f32.xlu0 %v7665_v4  ;;  %v33530_v4 = vld [vmem:[#allocation24_spill] sm:$0xff] }
 0x7d9   : > { %7675 = vmax.xlane.f32.xlu1 %v7674_v56  ;;  %v29415_v58 = vpop.permute.xlu1 %8674  ;;  %v29423_v56 = vpop.permute.xlu0 %8913 }
 0x7da   : > { %33528 = vst [vmem:[#allocation229_spill] sm:$0xff] %v29415_v58  ;;  %33532 = vst [vmem:[#allocation232_spill] sm:$0xff] %v29423_v56  ;;  %v33537_v58 = vld [vmem:[#allocation23_spill] sm:$0xff] }
 0x7dc   : > { %7672 = vmax.xlane.f32.xlu0 %v7671_v45 }
 0x7dd   : > { %v29421_v53 = vpop.permute.xlu1 %8753  ;;  %v29429_v45 = vpop.permute.xlu0 %8992 }
 0x7de   : > { %33531 = vst [vmem:[#allocation231_spill] sm:$0xff] %v29421_v53  ;;  %33535 = vst [vmem:[#allocation234_spill] sm:$0xff] %v29429_v45 }
 0x7e1   : > { %v29427_v51 = vpop.permute.xlu1 %8832  ;;  %v29439_v53 = vpop.permute.xlu0 %9105 }
 0x7e2   : > { %33534 = vst [vmem:[#allocation233_spill] sm:$0xff] %v29427_v51  ;;  %33540 = vst [vmem:[#allocation235_spill] sm:$0xff] %v29439_v53 }
 0x7ea   : > { %9433 = vrot.lane.b32.xlu1 %v33530_v4, %s27296_s25  ;;  %v29437_v4 = vpop.permute.xlu1 %8911 }
 0x7eb   : > { %33539 = vst [vmem:[#allocation23_spill] sm:$0xff] %v29437_v4 }
 0x7ee   : > { %9515 = vrot.lane.b32.xlu1 %v33533_v57, %s27296_s25  ;;  %v29441_v56 = vpop.permute.xlu1 %8990  ;;  %v29443_v57 = vpop.permute.xlu0 %9103 }
 0x7ef   : > { %33541 = vst [vmem:[#allocation236_spill] sm:$0xff] %v29441_v56  ;;  %33542 = vst [vmem:[#allocation237_spill] sm:$0xff] %v29443_v57 }
 0x7f2   : > { %9513 = vrot.lane.b32.xlu1 %v33536_v1, %s27296_s25  ;;  %9347 = vrot.lane.b32.xlu0 %v33537_v58, %s27296_s25  ;;  %v29445_v51 = vpop.permute.xlu1 %9187  ;;  %v29447_v45 = vpop.permute.xlu0 %9101 }
 0x7f3   : > { %33543 = vst [vmem:[#allocation238_spill] sm:$0xff] %v29445_v51  ;;  %33544 = vst [vmem:[#allocation239_spill] sm:$0xff] %v29447_v45 }
 0x7f6   : > { %9431 = vrot.lane.b32.xlu0 %v33538_v54, %s27296_s25  ;;  %v29449_v18 = vpop.permute.xlu1 %9185  ;;  %v29451_v1 = vpop.permute.xlu0 %9183 }
 0x7f7   : > { %33545 = vst [vmem:[#allocation240_spill] sm:$0xff] %v29449_v18  ;;  %33546 = vst [vmem:[#allocation241_spill] sm:$0xff] %v29451_v1 }
 0x7fa   : > { %v29453_v58 = vpop.permute.xlu1 %9269  ;;  %v29455_v5 = vpop.permute.xlu0 %9267 }
 0x7fb   : > { %33547 = vst [vmem:[#allocation242_spill] sm:$0xff] %v29453_v58  ;;  %33548 = vst [vmem:[#allocation243_spill] sm:$0xff] %v29455_v5 }
 0x7fe   : > { %v29457_v4 = vpop.permute.xlu1 %9351 }
 0x7ff   : > { %33549 = vst [vmem:[#allocation244_spill] sm:$0xff] %v29457_v4 }
 0x814   : > { %v7631_v54 = vpop.xlane.xlu0 %7630 }
 0x815   : > { %v7677_v53 = vsub.f32 %v29307_v0, %v7631_v54 }
 0x817   : > { %v7693_v56 = vmul.f32 1.442695, %v7677_v53 }
 0x818   : > { %v29469_v0 = vpop.permute.xlu0 %9265 }
 0x819   : > { %26823 = vpow2.f32 %v7693_v56  ;;  %v7634_v57 = vpop.xlane.xlu1 %7633  ;;  %33550 = vst [vmem:[#allocation245_spill] sm:$0xff] %v29469_v0 }
 0x81a   : > { %v7678_v51 = vsub.f32 %v29311_v59, %v7634_v57 }
 0x81c   : > { %v7695_v49 = vmul.f32 1.442695, %v7678_v51 }
 0x81d   : > { %v29471_v54 = vpop.permute.xlu1 %9349 }
 0x81e   : > { %26825 = vpow2.f32 %v7695_v49  ;;  %33551 = vst [vmem:[#allocation246_spill] sm:$0xff] %v29471_v54 }
 0x826   : > { %v29461_v45 = vpop.eup %26823 }
 0x827   : > { %v7725_v1 = vsel %vm2124_vm3, %v29461_v45, 0.0 }
 0x828   : > { %7726 = vadd.xlane.f32.xlu0 %v7725_v1 }
 0x82b   : > { %v29465_v58 = vpop.eup %26825 }
 0x82c   : > { %v7728_v4 = vsel %vm2124_vm3, %v29465_v58, 0.0 }
 0x82d   : > { %7729 = vadd.xlane.f32.xlu1 %v7728_v4 }
 0x849   : > { %v7637_v53 = vpop.xlane.xlu0 %7636 }
 0x84a   : > { %v7679_v59 = vsub.f32 %v29315_v52, %v7637_v53 }
 0x84c   : > { %v7697_v49 = vmul.f32 1.442695, %v7679_v59 }
 0x84d   : > { %v7640_v57 = vpop.xlane.xlu0 %7639 }
 0x84e   : > { %26827 = vpow2.f32 %v7697_v49  ;;  %v7680_v51 = vsub.f32 %v29317_v13, %v7640_v57  ;;  %v7646_v56 = vpop.xlane.xlu1 %7645 }
 0x84f   : > { %v7682_v1 = vsub.f32 %v29321_v55, %v7646_v56 }
 0x850   : > { %v7699_v5 = vmul.f32 1.442695, %v7680_v51 }
 0x851   : > { %v7703_v18 = vmul.f32 1.442695, %v7682_v1  ;;  %v7643_v8 = vpop.xlane.xlu0 %7642 }
 0x852   : > { %26829 = vpow2.f32 %v7699_v5  ;;  %v7681_v4 = vsub.f32 %v29319_v12, %v7643_v8  ;;  %v7652_v0 = vpop.xlane.xlu1 %7651 }
 0x853   : > { %v7684_v21 = vsub.f32 %v29331_v9, %v7652_v0  ;;  %26831 = vpow2.f32 %v7703_v18 }
 0x854   : > { %v7701_v54 = vmul.f32 1.442695, %v7681_v4 }
 0x855   : > { %v7707_v52 = vmul.f32 1.442695, %v7684_v21  ;;  %v7649_v53 = vpop.xlane.xlu0 %7648 }
 0x856   : > { %26833 = vpow2.f32 %v7701_v54  ;;  %v7683_v59 = vsub.f32 %v29327_v19, %v7649_v53  ;;  %v7658_v13 = vpop.xlane.xlu1 %7657 }
 0x857   : > { %v7686_v49 = vsub.f32 %v29337_v61, %v7658_v13  ;;  %26835 = vpow2.f32 %v7707_v52 }
 0x858   : > { %v7705_v55 = vmul.f32 1.442695, %v7683_v59 }
 0x859   : > { %v7711_v57 = vmul.f32 1.442695, %v7686_v49  ;;  %v7655_v51 = vpop.xlane.xlu0 %7654 }
 0x85a   : > { %26837 = vpow2.f32 %v7705_v55  ;;  %v7685_v8 = vsub.f32 %v29335_v7, %v7655_v51  ;;  %v7664_v12 = vpop.xlane.xlu1 %7663 }
 0x85b   : > { %v29481_v5 = vpop.eup %26827  ;;  %v7688_v9 = vsub.f32 %v29349_v40, %v7664_v12  ;;  %26839 = vpow2.f32 %v7711_v57 }
 0x85c   : > { %v7709_v21 = vmul.f32 1.442695, %v7685_v8  ;;  %v7731_v19 = vsel %vm2124_vm3, %v29481_v5, 0.0 }
 0x85d   : > { %v7715_v18 = vmul.f32 1.442695, %v7688_v9  ;;  %v7661_v0 = vpop.xlane.xlu0 %7660  ;;  %7732 = vadd.xlane.f32.xlu0 %v7731_v19 }
 0x85e   : > { %26841 = vpow2.f32 %v7709_v21  ;;  %v7687_v61 = vsub.f32 %v29343_v2, %v7661_v0  ;;  %v7670_v54 = vpop.xlane.xlu1 %7669 }
 0x85f   : > { %v29487_v56 = vpop.eup %26829  ;;  %v7690_v7 = vsub.f32 %v29357_v14, %v7670_v54  ;;  %26843 = vpow2.f32 %v7715_v18 }
 0x860   : > { %v7713_v1 = vmul.f32 1.442695, %v7687_v61  ;;  %v7734_v40 = vsel %vm2124_vm3, %v29487_v56, 0.0  ;;  %v29492_v4 = vpop.eup %26831 }
 0x861   : > { %v7667_v52 = vpop.xlane.xlu0 %7666  ;;  %7735 = vadd.xlane.f32.xlu1 %v7734_v40  ;;  %v7719_v2 = vmul.f32 1.442695, %v7690_v7  ;;  %v7740_v57 = vsel %vm2124_vm3, %v29492_v4, 0.0 }
 0x862   : > { %26845 = vpow2.f32 %v7713_v1  ;;  %v7689_v53 = vsub.f32 %v29351_v6, %v7667_v52  ;;  %v7676_v59 = vpop.xlane.xlu1 %7675 }
 0x863   : > { %v29495_v13 = vpop.eup %26833  ;;  %v7692_v55 = vsub.f32 %v29371_v48, %v7676_v59 }
 0x864   : > { %v7717_v49 = vmul.f32 1.442695, %v7689_v53  ;;  %v7737_v14 = vsel %vm2124_vm3, %v29495_v13, 0.0  ;;  %v29502_v51 = vpop.eup %26835 }
 0x865   : > { %7738 = vadd.xlane.f32.xlu0 %v7737_v14  ;;  %v7673_v8 = vpop.xlane.xlu0 %7672  ;;  %7741 = vadd.xlane.f32.xlu1 %v7740_v57  ;;  %v7723_v9 = vmul.f32 1.442695, %v7692_v55  ;;  %v7746_v19 = vsel %vm2124_vm3, %v29502_v51, 0.0 }
 0x866   : > { %26847 = vpow2.f32 %v7717_v49  ;;  %v7691_v6 = vsub.f32 %v29363_v62, %v7673_v8 }
 0x867   : > { %v29505_v12 = vpop.eup %26837  ;;  %26849 = vpow2.f32 %v7719_v2 }
 0x868   : > { %v7721_v21 = vmul.f32 1.442695, %v7691_v6  ;;  %v7743_v48 = vsel %vm2124_vm3, %v29505_v12, 0.0  ;;  %v29511_v18 = vpop.eup %26839 }
 0x869   : > { %7744 = vadd.xlane.f32.xlu0 %v7743_v48  ;;  %7747 = vadd.xlane.f32.xlu1 %v7746_v19  ;;  %v7752_v61 = vsel %vm2124_vm3, %v29511_v18, 0.0  ;;  %v33562_v48 = vld [vmem:[#allocation49_spill] sm:$0xff]  ;;  %v33563_v19 = vld [vmem:[#allocation55_spill] sm:$0xff] }
 0x86a   : > { %26851 = vpow2.f32 %v7721_v21  ;;  %v33561_v21 = vld [vmem:[#allocation53_spill] sm:$0xff] }
 0x86b   : > { %v29513_v0 = vpop.eup %26841  ;;  %26853 = vpow2.f32 %v7723_v9 }
 0x86c   : > { %v7749_v62 = vsel %vm2124_vm3, %v29513_v0, 0.0  ;;  %v29519_v54 = vpop.eup %26843 }
 0x86d   : > { %7750 = vadd.xlane.f32.xlu0 %v7749_v62  ;;  %7753 = vadd.xlane.f32.xlu1 %v7752_v61  ;;  %v7758_v40 = vsel %vm2124_vm3, %v29519_v54, 0.0  ;;  %v33564_v62 = vld [vmem:[#allocation51_spill] sm:$0xff]  ;;  %v33565_v61 = vld [vmem:[#allocation60_spill] sm:$0xff] }
 0x86f   : > { %v29521_v7 = vpop.eup %26845 }
 0x870   : > { %v7755_v1 = vsel %vm2124_vm3, %v29521_v7, 0.0 }
 0x871   : > { %7756 = vadd.xlane.f32.xlu0 %v7755_v1  ;;  %7759 = vadd.xlane.f32.xlu1 %v7758_v40  ;;  %v33566_v1 = vld [vmem:[#allocation54_spill] sm:$0xff] }
 0x872   : > { %v33567_v40 = vld [vmem:[#allocation58_spill] sm:$0xff] }
 0x873   : > { %v29527_v52 = vpop.eup %26847 }
 0x874   : > { %v29529_v53 = vpop.eup %26849  ;;  %v7761_v59 = vsel %vm2124_vm3, %v29527_v52, 0.0 }
 0x875   : > { %7762 = vadd.xlane.f32.xlu0 %v7761_v59  ;;  %v7764_v55 = vsel %vm2124_vm3, %v29529_v53, 0.0  ;;  %v33568_v59 = vld [vmem:[#allocation57_spill] sm:$0xff] }
 0x877   : > { %v29533_v2 = vpop.eup %26851 }
 0x878   : > { %v7767_v49 = vsel %vm2124_vm3, %v29533_v2, 0.0  ;;  %v29539_v14 = vpop.eup %26853 }
 0x879   : > { %7768 = vadd.xlane.f32.xlu1 %v7767_v49  ;;  %7765 = vadd.xlane.f32.xlu0 %v7764_v55  ;;  %v7770_v57 = vsel %vm2124_vm3, %v29539_v14, 0.0  ;;  %v33569_v49 = vld [vmem:[#allocation73_spill] sm:$0xff] }
 0x87a   : > { %v33570_v55 = vld [vmem:[#allocation77_spill] sm:$0xff] }
 0x87d   : > { %7771 = vadd.xlane.f32.xlu0 %v7770_v57 }
 0x88a   : > { %9597 = vrot.lane.b32.xlu1 %v27585_v24, %s27296_s25 }
 0x88e   : > { %9679 = vrot.lane.b32.xlu1 %v27601_v27, %s27296_s25 }
 0x892   : > { %9677 = vrot.lane.b32.xlu1 %v27594_v25, %s27296_s25 }
 0x893   : > { %9429 = vrot.lane.b32.xlu0 %v27566_v20, %s27296_s25  ;;  %v29567_v20 = vpop.permute.xlu1 %9433 }
 0x894   : > { %33552 = vst [vmem:[#allocation247_spill] sm:$0xff] %v29567_v20 }
 0x896   : > { %9761 = vrot.lane.b32.xlu1 %v27617_v30, %s27296_s25 }
 0x897   : > { %9511 = vrot.lane.b32.xlu0 %v27582_v23, %s27296_s25  ;;  %v29571_v23 = vpop.permute.xlu0 %9347 }
 0x89a   : > { %9843 = vrot.lane.b32.xlu1 %v27633_v33, %s27296_s25 }
 0x89b   : > { %9595 = vrot.lane.b32.xlu0 %v27578_v22, %s27296_s25  ;;  %v29581_v8 = vpop.permute.xlu0 %9431 }
 0x89c   : > { %33554 = vst [vmem:[#allocation249_spill] sm:$0xff] %v29581_v8 }
 0x89e   : > { %9841 = vrot.lane.b32.xlu1 %v27626_v31, %s27296_s25 }
 0x89f   : > { %9593 = vrot.lane.b32.xlu0 %v27598_v26, %s27296_s25  ;;  %v29579_v26 = vpop.permute.xlu1 %9515 }
 0x8a0   : > { %33553 = vst [vmem:[#allocation248_spill] sm:$0xff] %v29579_v26 }
 0x8a2   : > { %9925 = vrot.lane.b32.xlu1 %v27649_v36, %s27296_s25 }
 0x8a3   : > { %9675 = vrot.lane.b32.xlu0 %v27614_v29, %s27296_s25  ;;  %v29587_v6 = vpop.permute.xlu1 %9513 }
 0x8a4   : > { %33555 = vst [vmem:[#allocation250_spill] sm:$0xff] %v29587_v6 }
 0x8a6   : > { %10007 = vrot.lane.b32.xlu1 %v27665_v39, %s27296_s25 }
 0x8a7   : > { %9759 = vrot.lane.b32.xlu0 %v27610_v28, %s27296_s25 }
 0x8aa   : > { %10005 = vrot.lane.b32.xlu1 %v27658_v37, %s27296_s25 }
 0x8ab   : > { %9757 = vrot.lane.b32.xlu0 %v27630_v32, %s27296_s25 }
 0x8ae   : > { %10089 = vrot.lane.b32.xlu1 %v27681_v44, %s27296_s25 }
 0x8af   : > { %9839 = vrot.lane.b32.xlu0 %v27646_v35, %s27296_s25 }
 0x8b1   : > { %v7727_v29 = vpop.xlane.xlu0 %7726 }
 0x8b2   : > { %26855 = vrcp.f32 %v7727_v29  ;;  %10171 = vrot.lane.b32.xlu1 %v27697_v47, %s27296_s25  ;;  %v33571_v29 = vld [vmem:[#allocation71_spill] sm:$0xff] }
 0x8b3   : > { %9923 = vrot.lane.b32.xlu0 %v27642_v34, %s27296_s25 }
 0x8b6   : > { %v7730_v32 = vpop.xlane.xlu1 %7729  ;;  %10169 = vrot.lane.b32.xlu1 %v33245_v43, %s27296_s25 }
 0x8b7   : > { %26857 = vrcp.f32 %v7730_v32  ;;  %9921 = vrot.lane.b32.xlu0 %v27662_v38, %s27296_s25  ;;  %v33572_v32 = vld [vmem:[#allocation81_spill] sm:$0xff] }
 0x8ba   : > { %10253 = vrot.lane.b32.xlu1 %v33248_v16, %s27296_s25 }
 0x8bb   : > { %10003 = vrot.lane.b32.xlu0 %v27678_v42, %s27296_s25 }
 0x8be   : > { %10335 = vrot.lane.b32.xlu1 %v33252_v3, %s27296_s25  ;;  %v33667_v3 = vld [vmem:[#allocation74_spill] sm:$0xff] }
 0x8bf   : > { %v26856_v35 = vpop.eup %26855  ;;  %10087 = vrot.lane.b32.xlu0 %v27674_v41, %s27296_s25 }
 0x8c0   : > { %v7789_v9 = vmul.f32 %v26856_v35, %v29461_v45  ;;  %v33557_v45 = vld [vmem:[#allocation50_spill] sm:$0xff]  ;;  %v33573_v35 = vld [vmem:[#allocation75_spill] sm:$0xff] }
 0x8c2   : > { %25140 = vmatmul.mubr.msk.f32.vlgmr.msra.gmra.mxu0 %vm2124_vm3, %v7789_v9  ;;  %10333 = vrot.lane.b32.xlu1 %v33255_v10, %s27296_s25 }
 0x8c3   : > { %25150 = vmatpush3.msra.mxu0 %v29341_v11  ;;  %10085 = vrot.lane.b32.xlu0 %v27694_v46, %s27296_s25  ;;  %v33556_v46 = vld [vmem:[#allocation210_spill] sm:$0xff] }
 0x8c4   : > { %v26858_v38 = vpop.eup %26857  ;;  %25151 = vmatprep.subr.mxu0 %v33198_v17  ;;  %25153 = vmatprep.mubr.msk.f32.mxu0 %vm27293_vm1, %v33198_v17 }
 0x8c5   : > { %25152 = vmatpush3.msra.mxu0 %v29329_v60  ;;  %v7790_v42 = vmul.f32 %v26858_v38, %v29465_v58  ;;  %v33559_v58 = vld [vmem:[#allocation52_spill] sm:$0xff]  ;;  %v33574_v38 = vld [vmem:[#allocation59_spill] sm:$0xff] }
 0x8c6   : > { %10331 = vrot.lane.b32.xlu1 %v33258_v63, %s27296_s25  ;;  %25163 = vmatprep.subr.mxu0 %v33198_v17  ;;  %v33558_v63 = vld [vmem:[#allocation43_spill] sm:$0xff]  ;;  %v33577_v60 = vld [vmem:[#allocation56_spill] sm:$0xff] }
 0x8c7   : > { %25147 = vmatmul.mubr.msk.f32.vlgmr.msra.gmra.mxu1 %vm2124_vm3, %v7790_v42  ;;  %10167 = vrot.lane.b32.xlu0 %v27710_v50, %s27296_s25  ;;  %v33560_v50 = vld [vmem:[#allocation46_spill] sm:$0xff] }
 0x8c8   : > { %25157 = vmatpush3.msra.mxu1 %v29347_v15  ;;  %25160 = vmatprep.mubr.msk.f32.mxu1 %vm27293_vm1, %v33198_v17  ;;  %v33576_v15 = vld [vmem:[#allocation62_spill] sm:$0xff] }
 0x8c9   : > { %25158 = vmatprep.subr.mxu1 %v33198_v17 }
 0x8ca   : > { %25159 = vmatpush3.msra.mxu1 %v33556_v46  ;;  %10591 = vrot.lane.b32.xlu1 %v33557_v45, %s27296_s25 }
 0x8cb   : > { %10251 = vrot.lane.b32.xlu0 %v33558_v63, %s27296_s25  ;;  %25170 = vmatprep.subr.mxu1 %v33198_v17 }
 0x8ce   : > { %10670 = vrot.lane.b32.xlu1 %v33559_v58, %s27296_s25 }
 0x8cf   : > { %10249 = vrot.lane.b32.xlu0 %v33560_v50, %s27296_s25  ;;  %v33575_v50 = vld [vmem:[#allocation79_spill] sm:$0xff] }
 0x8d2   : > { %10747 = vrot.lane.b32.xlu1 %v33561_v21, %s27296_s25 }
 0x8d3   : > { %10589 = vrot.lane.b32.xlu0 %v33562_v48, %s27296_s25  ;;  %v33661_v48 = vld [vmem:[#allocation69_spill] sm:$0xff] }
 0x8d6   : > { %10826 = vrot.lane.b32.xlu1 %v33563_v19, %s27296_s25 }
 0x8d7   : > { %10668 = vrot.lane.b32.xlu0 %v33564_v62, %s27296_s25 }
 0x8da   : > { %10907 = vrot.lane.b32.xlu1 %v33565_v61, %s27296_s25 }
 0x8db   : > { %10749 = vrot.lane.b32.xlu0 %v33566_v1, %s27296_s25 }
 0x8de   : > { %10905 = vrot.lane.b32.xlu1 %v33567_v40, %s27296_s25 }
 0x8df   : > { %10828 = vrot.lane.b32.xlu0 %v33568_v59, %s27296_s25 }
 0x8e2   : > { %10986 = vrot.lane.b32.xlu1 %v33569_v49, %s27296_s25 }
 0x8e3   : > { %11065 = vrot.lane.b32.xlu0 %v33570_v55, %s27296_s25 }
 0x8e6   : > { %v7733_v57 = vpop.xlane.xlu0 %7732  ;;  %10984 = vrot.lane.b32.xlu1 %v33571_v29, %s27296_s25 }
 0x8e7   : > { %26859 = vrcp.f32 %v7733_v57  ;;  %11144 = vrot.lane.b32.xlu0 %v33572_v32, %s27296_s25 }
 0x8ea   : > { %11063 = vrot.lane.b32.xlu1 %v33573_v35, %s27296_s25  ;;  %v7736_v9 = vpop.xlane.xlu1 %7735 }
 0x8eb   : > { %26861 = vrcp.f32 %v7736_v9  ;;  %11223 = vrot.lane.b32.xlu0 %v33574_v38, %s27296_s25  ;;  %v33578_v9 = vld [vmem:[#allocation64_spill] sm:$0xff] }
 0x8ee   : > { %v7739_v42 = vpop.xlane.xlu0 %7738  ;;  %11142 = vrot.lane.b32.xlu1 %v33575_v50, %s27296_s25  ;;  %v7742_v46 = vpop.xlane.xlu1 %7741 }
 0x8ef   : > { %26863 = vrcp.f32 %v7739_v42  ;;  %11302 = vrot.lane.b32.xlu0 %v33576_v15, %s27296_s25  ;;  %v33579_v42 = vld [vmem:[#allocation61_spill] sm:$0xff] }
 0x8f0   : > { %26865 = vrcp.f32 %v7742_v46  ;;  %v33580_v46 = vld [vmem:[#allocation66_spill] sm:$0xff] }
 0x8f2   : > { %v7745_v57 = vpop.xlane.xlu0 %7744  ;;  %11221 = vrot.lane.b32.xlu1 %v33577_v60, %s27296_s25  ;;  %v7748_v11 = vpop.xlane.xlu1 %7747  ;;  %v33654_v60 = vld [vmem:[#allocation70_spill] sm:$0xff] }
 0x8f3   : > { %26867 = vrcp.f32 %v7745_v57  ;;  %11381 = vrot.lane.b32.xlu0 %v33578_v9, %s27296_s25  ;;  %v33581_v57 = vld [vmem:[#allocation211_spill] sm:$0xff] }
 0x8f4   : > { %v26860_v38 = vpop.eup %26859  ;;  %26869 = vrcp.f32 %v7748_v11 }
 0x8f5   : > { %v7791_v32 = vmul.f32 %v26860_v38, %v29481_v5  ;;  %v33582_v5 = vld [vmem:[#allocation213_spill] sm:$0xff] }
 0x8f6   : > { %v7751_v50 = vpop.xlane.xlu0 %7750  ;;  %11300 = vrot.lane.b32.xlu1 %v33579_v42, %s27296_s25  ;;  %v7754_v35 = vpop.xlane.xlu1 %7753 }
 0x8f7   : > { %26871 = vrcp.f32 %v7751_v50  ;;  %25154 = vmatmul.mubr.msk.f32.vlgmr.msra.gmra.mxu0 %vm2124_vm3, %v7791_v32  ;;  %11460 = vrot.lane.b32.xlu0 %v33580_v46, %s27296_s25  ;;  %v33583_v50 = vld [vmem:[#allocation63_spill] sm:$0xff]  ;;  %v33584_v46 = vld [vmem:[#allocation68_spill] sm:$0xff] }
 0x8f8   : > { %v26862_v15 = vpop.eup %26861  ;;  %26873 = vrcp.f32 %v7754_v35  ;;  %25164 = vmatpush3.msra.mxu0 %v33581_v57  ;;  %25167 = vmatprep.mubr.msk.f32.mxu0 %vm27293_vm1, %v33198_v17  ;;  %v33585_v57 = vld [vmem:[#allocation215_spill] sm:$0xff] }
 0x8f9   : > { %25165 = vmatprep.subr.mxu0 %v33198_v17  ;;  %v7792_v11 = vmul.f32 %v26862_v15, %v29487_v56  ;;  %v33586_v56 = vld [vmem:[#allocation217_spill] sm:$0xff] }
 0x8fa   : > { %25166 = vmatpush3.msra.mxu0 %v33582_v5  ;;  %v7757_v38 = vpop.xlane.xlu0 %7756  ;;  %11379 = vrot.lane.b32.xlu1 %v33583_v50, %s27296_s25  ;;  %v7760_v32 = vpop.xlane.xlu1 %7759 }
 0x8fb   : > { %11539 = vrot.lane.b32.xlu0 %v33584_v46, %s27296_s25  ;;  %25161 = vmatmul.mubr.msk.f32.vlgmr.msra.gmra.mxu1 %vm2124_vm3, %v7792_v11  ;;  %26875 = vrcp.f32 %v7757_v38  ;;  %v33587_v11 = vld [vmem:[#allocation65_spill] sm:$0xff]  ;;  %v33588_v46 = vld [vmem:[#allocation216_spill] sm:$0xff] }
 0x8fc   : > { %v26864_v35 = vpop.eup %26863  ;;  %25171 = vmatpush3.msra.mxu1 %v33585_v57  ;;  %25177 = vmatprep.subr.mxu0 %v33198_v17  ;;  %26877 = vrcp.f32 %v7760_v32 }
 0x8fd   : > { %v26866_v9 = vpop.eup %26865  ;;  %25172 = vmatprep.subr.mxu1 %v33198_v17  ;;  %25174 = vmatprep.mubr.msk.f32.mxu1 %vm27293_vm1, %v33198_v17  ;;  %v7793_v15 = vmul.f32 %v26864_v35, %v29495_v13  ;;  %v33589_v13 = vld [vmem:[#allocation218_spill] sm:$0xff] }
 0x8fe   : > { %25173 = vmatpush3.msra.mxu1 %v33586_v56  ;;  %v7763_v5 = vpop.xlane.xlu0 %7762  ;;  %11458 = vrot.lane.b32.xlu1 %v33587_v11, %s27296_s25  ;;  %v7794_v57 = vmul.f32 %v26866_v9, %v29492_v4  ;;  %v33590_v4 = vld [vmem:[#allocation219_spill] sm:$0xff]  ;;  %v33591_v56 = vld [vmem:[#allocation221_spill] sm:$0xff] }
 0x8ff   : > { %25184 = vmatprep.subr.mxu1 %v33198_v17  ;;  %25168 = vmatmul.mubr.msk.f32.vlgmr.msra.gmra.mxu0 %vm2124_vm3, %v7793_v15  ;;  %26879 = vrcp.f32 %v7763_v5 }
 0x900   : > { %v26868_v38 = vpop.eup %26867  ;;  %25175 = vmatmul.mubr.msk.f32.vlgmr.msra.gmra.mxu1 %vm2124_vm3, %v7794_v57  ;;  %25178 = vmatpush3.msra.mxu0 %v33588_v46 }
 0x901   : > { %v26870_v50 = vpop.eup %26869  ;;  %25185 = vmatpush3.msra.mxu1 %v33589_v13  ;;  %25179 = vmatprep.subr.mxu0 %v33198_v17  ;;  %v7795_v32 = vmul.f32 %v26868_v38, %v29505_v12  ;;  %v33594_v38 = vld [vmem:[#allocation222_spill] sm:$0xff]  ;;  %v33595_v13 = vld [vmem:[#allocation223_spill] sm:$0xff] }
 0x902   : > { %25186 = vmatprep.subr.mxu1 %v33198_v17  ;;  %25180 = vmatpush3.msra.mxu0 %v33590_v4  ;;  %v7766_v9 = vpop.xlane.xlu0 %7765  ;;  %v7769_v35 = vpop.xlane.xlu1 %7768  ;;  %v7796_v15 = vmul.f32 %v26870_v50, %v29502_v51  ;;  %v33592_v51 = vld [vmem:[#allocation220_spill] sm:$0xff] }
 0x903   : > { %25187 = vmatpush3.msra.mxu1 %v33591_v56  ;;  %25181 = vmatprep.mubr.msk.f32.mxu0 %vm27293_vm1, %v33198_v17  ;;  %26881 = vrcp.f32 %v7766_v9  ;;  %v33596_v9 = vld [vmem:[#allocation225_spill] sm:$0xff]  ;;  %v33626_v4 = vld [vmem:[#allocation244_spill] sm:$0xff] }
 0x904   : > { %v26872_v57 = vpop.eup %26871  ;;  %25191 = vmatprep.subr.mxu0 %v33198_v17  ;;  %25188 = vmatprep.mubr.msk.f32.mxu1 %vm27293_vm1, %v33198_v17  ;;  %26883 = vrcp.f32 %v7769_v35 }
 0x905   : > { %v26874_v12 = vpop.eup %26873  ;;  %25198 = vmatprep.subr.mxu1 %v33198_v17  ;;  %25182 = vmatmul.mubr.msk.f32.vlgmr.msra.gmra.mxu0 %vm2124_vm3, %v7795_v32  ;;  %v7797_v56 = vmul.f32 %v26872_v57, %v29513_v0 }
 0x906   : > { %25189 = vmatmul.mubr.msk.f32.vlgmr.msra.gmra.mxu1 %vm2124_vm3, %v7796_v15  ;;  %25192 = vmatpush3.msra.mxu0 %v33592_v51  ;;  %v7772_v5 = vpop.xlane.xlu0 %7771  ;;  %v29720_v50 = vpop.permute.xlu1 %9597  ;;  %v7798_v32 = vmul.f32 %v26874_v12, %v29511_v18  ;;  %v33598_v18 = vld [vmem:[#allocation224_spill] sm:$0xff]  ;;  %v33599_v12 = vld [vmem:[#allocation226_spill] sm:$0xff] }
 0x907   : > { %33593 = vst [vmem:[#allocation46_spill] sm:$0xff] %v29720_v50  ;;  %25199 = vmatpush3.msra.mxu1 %v33594_v38  ;;  %25193 = vmatprep.subr.mxu0 %v33198_v17  ;;  %26885 = vrcp.f32 %v7772_v5  ;;  %v33600_v38 = vld [vmem:[#allocation227_spill] sm:$0xff] }
 0x908   : > { %25200 = vmatprep.subr.mxu1 %v33198_v17  ;;  %25194 = vmatpush3.msra.mxu0 %v33595_v13  ;;  %v26876_v15 = vpop.eup %26875 }
 0x909   : > { %25201 = vmatpush3.msra.mxu1 %v33596_v9  ;;  %25195 = vmatprep.mubr.msk.f32.mxu0 %vm27293_vm1, %v33198_v17  ;;  %v26878_v57 = vpop.eup %26877  ;;  %v7799_v9 = vmul.f32 %v26876_v15, %v29521_v7 }
 0x90a   : > { %25205 = vmatprep.subr.mxu0 %v33198_v17  ;;  %25202 = vmatprep.mubr.msk.f32.mxu1 %vm27293_vm1, %v33198_v17  ;;  %v29734_v35 = vpop.permute.xlu0 %9429  ;;  %v29736_v0 = vpop.permute.xlu1 %9679  ;;  %v7800_v5 = vmul.f32 %v26878_v57, %v29519_v54  ;;  %v33603_v54 = vld [vmem:[#allocation228_spill] sm:$0xff] }
 0x90b   : > { %33597 = vst [vmem:[#allocation251_spill] sm:$0xff] %v29736_v0  ;;  %25212 = vmatprep.subr.mxu1 %v33198_v17  ;;  %25196 = vmatmul.mubr.msk.f32.vlgmr.msra.gmra.mxu0 %vm2124_vm3, %v7797_v56 }
 0x90c   : > { %25203 = vmatmul.mubr.msk.f32.vlgmr.msra.gmra.mxu1 %vm2124_vm3, %v7798_v32  ;;  %25206 = vmatpush3.msra.mxu0 %v33598_v18  ;;  %v26880_v56 = vpop.eup %26879  ;;  %v33602_v32 = vld [vmem:[#allocation229_spill] sm:$0xff]  ;;  %v33607_v18 = vld [vmem:[#allocation231_spill] sm:$0xff] }
 0x90d   : > { %25213 = vmatpush3.msra.mxu1 %v33599_v12  ;;  %25207 = vmatprep.subr.mxu0 %v33198_v17  ;;  %v7801_v7 = vmul.f32 %v26880_v56, %v29527_v52  ;;  %v33606_v12 = vld [vmem:[#allocation230_spill] sm:$0xff] }
 0x90e   : > { %25214 = vmatprep.subr.mxu1 %v33198_v17  ;;  %25208 = vmatpush3.msra.mxu0 %v33600_v38  ;;  %v29748_v13 = vpop.permute.xlu0 %9511  ;;  %v29750_v51 = vpop.permute.xlu1 %9677 }
 0x90f   : > { %33601 = vst [vmem:[#allocation252_spill] sm:$0xff] %v29750_v51  ;;  %25215 = vmatpush3.msra.mxu1 %v33602_v32  ;;  %25209 = vmatprep.mubr.msk.f32.mxu0 %vm27293_vm1, %v33198_v17 }
 0x910   : > { %25219 = vmatprep.subr.mxu0 %v33198_v17  ;;  %25216 = vmatprep.mubr.msk.f32.mxu1 %vm27293_vm1, %v33198_v17  ;;  %v26882_v32 = vpop.eup %26881 }
 0x911   : > { %25226 = vmatprep.subr.mxu1 %v33198_v17  ;;  %25210 = vmatmul.mubr.msk.f32.vlgmr.msra.gmra.mxu0 %vm2124_vm3, %v7799_v9  ;;  %v26884_v38 = vpop.eup %26883  ;;  %v33608_v9 = vld [vmem:[#allocation233_spill] sm:$0xff]  ;;  %v7802_v52 = vmul.f32 %v26882_v32, %v29529_v53 }
 0x912   : > { %25217 = vmatmul.mubr.msk.f32.vlgmr.msra.gmra.mxu1 %vm2124_vm3, %v7800_v5  ;;  %25220 = vmatpush3.msra.mxu0 %v33603_v54  ;;  %v29763_v15 = vpop.permute.xlu0 %9595  ;;  %v29765_v57 = vpop.permute.xlu1 %9761  ;;  %v33624_v54 = vld [vmem:[#allocation241_spill] sm:$0xff] }
 0x913   : > { %33604 = vst [vmem:[#allocation253_spill] sm:$0xff] %v29763_v15  ;;  %33605 = vst [vmem:[#allocation254_spill] sm:$0xff] %v29765_v57  ;;  %25227 = vmatpush3.msra.mxu1 %v33606_v12  ;;  %25221 = vmatprep.subr.mxu0 %v33198_v17  ;;  %v33610_v12 = vld [vmem:[#allocation232_spill] sm:$0xff] }
 0x914   : > { %25228 = vmatprep.subr.mxu1 %v33198_v17  ;;  %25222 = vmatpush3.msra.mxu0 %v33607_v18  ;;  %v26886_v18 = vpop.eup %26885 }
 0x915   : > { %25229 = vmatpush3.msra.mxu1 %v33608_v9  ;;  %25223 = vmatprep.mubr.msk.f32.mxu0 %vm27293_vm1, %v33198_v17  ;;  %v7803_v9 = vmul.f32 %v26884_v38, %v29533_v2  ;;  %v33613_v2 = vld [vmem:[#allocation234_spill] sm:$0xff]  ;;  %v7804_v38 = vmul.f32 %v26886_v18, %v29539_v14  ;;  %v33618_v14 = vld [vmem:[#allocation237_spill] sm:$0xff] }
 0x916   : > { %25233 = vmatprep.subr.mxu0 %v33198_v17  ;;  %25224 = vmatmul.mubr.msk.f32.vlgmr.msra.gmra.mxu0 %vm2124_vm3, %v7801_v7  ;;  %v29777_v5 = vpop.permute.xlu0 %9593  ;;  %v29779_v56 = vpop.permute.xlu1 %9843  ;;  %v33611_v7 = vld [vmem:[#allocation23_spill] sm:$0xff]  ;;  %v33619_v18 = vld [vmem:[#allocation238_spill] sm:$0xff] }
 0x917   : > { %33609 = vst [vmem:[#allocation255_spill] sm:$0xff] %v29779_v56  ;;  %25234 = vmatpush3.msra.mxu0 %v33610_v12  ;;  %25237 = vmatprep.mubr.msk.f32.mxu0 %vm27293_vm1, %v33198_v17  ;;  %v33614_v12 = vld [vmem:[#allocation235_spill] sm:$0xff] }
 0x918   : > { %25235 = vmatprep.subr.mxu0 %v33198_v17  ;;  %25230 = vmatprep.mubr.msk.f32.mxu1 %vm27293_vm1, %v33198_v17 }
 0x919   : > { %25236 = vmatpush3.msra.mxu0 %v33611_v7  ;;  %25240 = vmatprep.subr.mxu1 %v33198_v17  ;;  %v33615_v7 = vld [vmem:[#allocation236_spill] sm:$0xff] }
 0x91a   : > { %25247 = vmatprep.subr.mxu0 %v33198_v17  ;;  %25231 = vmatmul.mubr.msk.f32.vlgmr.msra.gmra.mxu1 %vm2124_vm3, %v7802_v52  ;;  %v29792_v53 = vpop.permute.xlu0 %9675  ;;  %v29794_v32 = vpop.permute.xlu1 %9841 }
 0x91b   : > { %33612 = vst [vmem:[#allocation256_spill] sm:$0xff] %v29794_v32  ;;  %25238 = vmatmul.mubr.msk.f32.vlgmr.msra.gmra.mxu0 %vm2124_vm3, %v7803_v9  ;;  %25241 = vmatpush3.msra.mxu1 %v33613_v2  ;;  %v33622_v2 = vld [vmem:[#allocation240_spill] sm:$0xff] }
 0x91c   : > { %25248 = vmatpush3.xpose.msk.msra.mxu0 %vm859_vm2, %v33614_v12  ;;  %25242 = vmatprep.subr.mxu1 %v33198_v17 }
 0x91d   : > { %25243 = vmatpush3.msra.mxu1 %v33615_v7  ;;  %25244 = vmatprep.mubr.msk.f32.mxu1 %vm27293_vm1, %v33198_v17  ;;  %v33620_v7 = vld [vmem:[#allocation239_spill] sm:$0xff] }
 0x91e   : > { %25249 = vmatprep.subr.mxu0 %v33198_v17  ;;  %25254 = vmatprep.subr.mxu1 %v33198_v17  ;;  %v29807_v52 = vpop.permute.xlu0 %9759  ;;  %v29809_v9 = vpop.permute.xlu1 %9925 }
 0x91f   : > { %33616 = vst [vmem:[#allocation257_spill] sm:$0xff] %v29807_v52  ;;  %33617 = vst [vmem:[#allocation258_spill] sm:$0xff] %v29809_v9  ;;  %25245 = vmatmul.mubr.msk.f32.vlgmr.msra.gmra.mxu1 %vm2124_vm3, %v7804_v38  ;;  %25251 = vmatprep.mubr.msk.f32.mxu0 %vm27293_vm1, %v33198_v17 }
 0x920   : > { %25250 = vmatpush3.xpose.msk.msra.mxu0 %vm859_vm2, %v33618_v14  ;;  %25255 = vmatpush3.xpose.msk.msra.mxu1 %vm859_vm2, %v33619_v18  ;;  %v33623_v14 = vld [vmem:[#allocation242_spill] sm:$0xff] }
 0x921   : > { %25256 = vmatprep.subr.mxu1 %v33198_v17  ;;  %25261 = vmatprep.subr.mxu0 %v33198_v17 }
 0x922   : > { %25258 = vmatprep.mubr.msk.f32.mxu1 %vm27293_vm1, %v33198_v17  ;;  %v9758_v12 = vpop.permute.xlu0 %9757  ;;  %v29824_v38 = vpop.permute.xlu1 %10007 }
 0x923   : > { %25252 = vmatmul.mubr.msk.f32.vlgmr.msra.gmra.mxu0 %vm859_vm2, %v33620_v7  ;;  %33621 = vst [vmem:[#allocation239_spill] sm:$0xff] %v29824_v38  ;;  %v33625_v7 = vld [vmem:[#allocation243_spill] sm:$0xff] }
 0x924   : > { %25257 = vmatpush3.xpose.msk.msra.mxu1 %vm859_vm2, %v33622_v2  ;;  %25262 = vmatpush3.xpose.msk.msra.mxu0 %vm859_vm2, %v33623_v14  ;;  %v33628_v2 = vld [vmem:[#allocation245_spill] sm:$0xff] }
 0x925   : > { %25263 = vmatprep.subr.mxu0 %v33198_v17  ;;  %25268 = vmatprep.subr.mxu1 %v33198_v17 }
 0x926   : > { %25265 = vmatprep.mubr.msk.f32.mxu0 %vm27293_vm1, %v33198_v17  ;;  %v9840_v18 = vpop.permute.xlu0 %9839  ;;  %v29842_v14 = vpop.permute.xlu1 %10005 }
 0x927   : > { %25259 = vmatmul.mubr.msk.f32.vlgmr.msra.gmra.mxu1 %vm859_vm2, %v33624_v54  ;;  %33627 = vst [vmem:[#allocation241_spill] sm:$0xff] %v29842_v14  ;;  %v33630_v54 = vld [vmem:[#allocation246_spill] sm:$0xff] }
 0x928   : > { %25264 = vmatpush3.xpose.msk.msra.mxu0 %vm859_vm2, %v33625_v7  ;;  %25269 = vmatpush3.xpose.msk.msra.mxu1 %vm859_vm2, %v33626_v4 }
 0x929   : > { %25270 = vmatprep.subr.mxu1 %v33198_v17  ;;  %25275 = vmatprep.subr.mxu0 %v33198_v17 }
 0x92a   : > { %25272 = vmatprep.mubr.msk.f32.mxu1 %vm27293_vm1, %v33198_v17  ;;  %v29848_v46 = vpop.permute.xlu0 %9923  ;;  %v29860_v4 = vpop.permute.xlu1 %10089 }
 0x92b   : > { %25266 = vmatmul.mubr.msk.f32.vlgmr.msra.gmra.mxu0 %vm859_vm2, %v33628_v2  ;;  %33629 = vst [vmem:[#allocation245_spill] sm:$0xff] %v29848_v46  ;;  %33631 = vst [vmem:[#allocation259_spill] sm:$0xff] %v29860_v4 }
 0x92c   : > { %25271 = vmatpush3.xpose.msk.msra.mxu1 %vm859_vm2, %v33630_v54  ;;  %25276 = vmatpush3.xpose.msk.msra.mxu0 %vm859_vm2, %v29567_v20 }
 0x92d   : > { %25277 = vmatprep.subr.mxu0 %v33198_v17  ;;  %25282 = vmatprep.subr.mxu1 %v33198_v17 }
 0x92e   : > { %25279 = vmatprep.mubr.msk.f32.mxu0 %vm27293_vm1, %v33198_v17  ;;  %v9922_v2 = vpop.permute.xlu0 %9921 }
 0x92f   : > { %25273 = vmatmul.mubr.msk.f32.vlgmr.msra.gmra.mxu1 %vm859_vm2, %v29571_v23  ;;  %v29878_v23 = vpop.permute.xlu1 %10171 }
 0x930   : > { %25278 = vmatpush3.xpose.msk.msra.mxu0 %vm859_vm2, %v29581_v8  ;;  %25283 = vmatpush3.xpose.msk.msra.mxu1 %vm859_vm2, %v29579_v26  ;;  %33632 = vst [vmem:[#allocation260_spill] sm:$0xff] %v29878_v23 }
 0x931   : > { %25284 = vmatprep.subr.mxu1 %v33198_v17  ;;  %25289 = vmatprep.subr.mxu0 %v33198_v17 }
 0x932   : > { %25286 = vmatprep.mubr.msk.f32.mxu1 %vm27293_vm1, %v33198_v17  ;;  %v10004_v26 = vpop.permute.xlu0 %10003 }
 0x933   : > { %25280 = vmatmul.mubr.msk.f32.vlgmr.msra.gmra.mxu0 %vm859_vm2, %v29734_v35  ;;  %v29894_v35 = vpop.permute.xlu1 %10169 }
 0x934   : > { %25285 = vmatpush3.xpose.msk.msra.mxu1 %vm859_vm2, %v29587_v6  ;;  %25290 = vmatpush3.xpose.msk.msra.mxu0 %vm859_vm2, %v29720_v50  ;;  %33633 = vst [vmem:[#allocation261_spill] sm:$0xff] %v29894_v35 }
 0x935   : > { %25291 = vmatprep.subr.mxu0 %v33198_v17  ;;  %25296 = vmatprep.subr.mxu1 %v33198_v17 }
 0x936   : > { %25293 = vmatprep.mubr.msk.f32.mxu0 %vm27293_vm1, %v33198_v17 }
 0x937   : > { %25287 = vmatmul.mubr.msk.f32.vlgmr.msra.gmra.mxu1 %vm859_vm2, %v29748_v13  ;;  %v29900_v13 = vpop.permute.xlu0 %10087 }
 0x938   : > { %25292 = vmatpush3.xpose.msk.msra.mxu0 %vm859_vm2, %v29763_v15  ;;  %25297 = vmatpush3.xpose.msk.msra.mxu1 %vm859_vm2, %v29736_v0  ;;  %33634 = vst [vmem:[#allocation262_spill] sm:$0xff] %v29900_v13 }
 0x939   : > { %25298 = vmatprep.subr.mxu1 %v33198_v17  ;;  %25303 = vmatprep.subr.mxu0 %v33198_v17 }
 0x93a   : > { %25300 = vmatprep.mubr.msk.f32.mxu1 %vm27293_vm1, %v33198_v17 }
 0x93b   : > { %25294 = vmatmul.mubr.msk.f32.vlgmr.msra.gmra.mxu0 %vm859_vm2, %v29777_v5  ;;  %v29912_v5 = vpop.permute.xlu1 %10253 }
 0x93c   : > { %25299 = vmatpush3.xpose.msk.msra.mxu1 %vm859_vm2, %v29750_v51  ;;  %25304 = vmatpush3.xpose.msk.msra.mxu0 %vm859_vm2, %v29765_v57  ;;  %33635 = vst [vmem:[#allocation263_spill] sm:$0xff] %v29912_v5  ;;  %v10086_v57 = vpop.permute.xlu0 %10085 }
 0x93d   : > { %25305 = vmatprep.subr.mxu0 %v33198_v17  ;;  %25310 = vmatprep.subr.mxu1 %v33198_v17 }
 0x93e   : > { %25307 = vmatprep.mubr.msk.f32.mxu0 %vm27293_vm1, %v33198_v17 }
 0x93f   : > { %25301 = vmatmul.mubr.msk.f32.vlgmr.msra.gmra.mxu1 %vm859_vm2, %v29792_v53  ;;  %v29927_v53 = vpop.permute.xlu1 %10335 }
 0x940   : > { %25306 = vmatpush3.xpose.msk.msra.mxu0 %vm859_vm2, %v29807_v52  ;;  %25311 = vmatpush3.xpose.msk.msra.mxu1 %vm859_vm2, %v29779_v56  ;;  %33636 = vst [vmem:[#allocation264_spill] sm:$0xff] %v29927_v53 }
 0x941   : > { %25312 = vmatprep.subr.mxu1 %v33198_v17  ;;  %25317 = vmatprep.subr.mxu0 %v33198_v17 }
 0x942   : > { %25314 = vmatprep.mubr.msk.f32.mxu1 %vm27293_vm1, %v33198_v17 }
 0x943   : > { %25308 = vmatmul.mubr.msk.f32.vlgmr.msra.gmra.mxu0 %vm859_vm2, %v9758_v12  ;;  %v10168_v12 = vpop.permute.xlu0 %10167 }
 0x944   : > { %25313 = vmatpush3.xpose.msk.msra.mxu1 %vm859_vm2, %v29794_v32  ;;  %25318 = vmatpush3.xpose.msk.msra.mxu0 %vm859_vm2, %v29809_v9 }
 0x945   : > { %25319 = vmatprep.subr.mxu0 %v33198_v17  ;;  %25324 = vmatprep.subr.mxu1 %v33198_v17 }
 0x946   : > { %25321 = vmatprep.mubr.msk.f32.mxu0 %vm27293_vm1, %v33198_v17 }
 0x947   : > { %25315 = vmatmul.mubr.msk.f32.vlgmr.msra.gmra.mxu1 %vm859_vm2, %v9840_v18  ;;  %v29943_v18 = vpop.permute.xlu1 %10333 }
 0x948   : > { %25320 = vmatpush3.xpose.msk.msra.mxu0 %vm859_vm2, %v29848_v46  ;;  %25325 = vmatpush3.xpose.msk.msra.mxu1 %vm859_vm2, %v29824_v38  ;;  %33637 = vst [vmem:[#allocation265_spill] sm:$0xff] %v29943_v18  ;;  %v29949_v38 = vpop.permute.xlu0 %10251 }
 0x949   : > { %25326 = vmatprep.subr.mxu1 %v33198_v17  ;;  %25331 = vmatprep.subr.mxu0 %v33198_v17  ;;  %33638 = vst [vmem:[#allocation266_spill] sm:$0xff] %v29949_v38 }
 0x94a   : > { %25328 = vmatprep.mubr.msk.f32.mxu1 %vm27293_vm1, %v33198_v17 }
 0x94b   : > { %25322 = vmatmul.mubr.msk.f32.vlgmr.msra.gmra.mxu0 %vm859_vm2, %v9922_v2  ;;  %v10332_v2 = vpop.permute.xlu1 %10331 }
 0x94c   : > { %25327 = vmatpush3.xpose.msk.msra.mxu1 %vm859_vm2, %v29842_v14  ;;  %25332 = vmatpush3.xpose.msk.msra.mxu0 %vm859_vm2, %v29860_v4 }
 0x94d   : > { %25333 = vmatprep.subr.mxu0 %v33198_v17  ;;  %25338 = vmatprep.subr.mxu1 %v33198_v17 }
 0x94e   : > { %25335 = vmatprep.mubr.msk.f32.mxu0 %vm27293_vm1, %v33198_v17 }
 0x94f   : > { %25329 = vmatmul.mubr.msk.f32.vlgmr.msra.gmra.mxu1 %vm859_vm2, %v10004_v26  ;;  %v10250_v26 = vpop.permute.xlu0 %10249 }
 0x950   : > { %25334 = vmatpush3.xpose.msk.msra.mxu0 %vm859_vm2, %v29900_v13  ;;  %25339 = vmatpush3.xpose.msk.msra.mxu1 %vm859_vm2, %v29878_v23 }
 0x951   : > { %25340 = vmatprep.subr.mxu1 %v33198_v17  ;;  %25345 = vmatprep.subr.mxu0 %v33198_v17 }
 0x952   : > { %25342 = vmatprep.mubr.msk.f32.mxu1 %vm27293_vm1, %v33198_v17 }
 0x953   : > { %25336 = vmatmul.mubr.msk.f32.vlgmr.msra.gmra.mxu0 %vm859_vm2, %v10086_v57  ;;  %v29974_v57 = vpop.permute.xlu1 %10591 }
 0x954   : > { %25341 = vmatpush3.xpose.msk.msra.mxu1 %vm859_vm2, %v29894_v35  ;;  %25346 = vmatpush3.xpose.msk.msra.mxu0 %vm859_vm2, %v29912_v5  ;;  %33639 = vst [vmem:[#allocation267_spill] sm:$0xff] %v29974_v57  ;;  %v29980_v5 = vpop.permute.xlu0 %10589 }
 0x955   : > { %25347 = vmatprep.subr.mxu0 %v33198_v17  ;;  %25352 = vmatprep.subr.mxu1 %v33198_v17  ;;  %33640 = vst [vmem:[#allocation268_spill] sm:$0xff] %v29980_v5 }
 0x956   : > { %25349 = vmatprep.mubr.msk.f32.mxu0 %vm27293_vm1, %v33198_v17 }
 0x957   : > { %25343 = vmatmul.mubr.msk.f32.vlgmr.msra.gmra.mxu1 %vm859_vm2, %v10168_v12  ;;  %v29991_v12 = vpop.permute.xlu1 %10670 }
 0x958   : > { %25348 = vmatpush3.xpose.msk.msra.mxu0 %vm859_vm2, %v29949_v38  ;;  %25353 = vmatpush3.xpose.msk.msra.mxu1 %vm859_vm2, %v29927_v53  ;;  %33641 = vst [vmem:[#allocation269_spill] sm:$0xff] %v29991_v12 }
 0x959   : > { %25354 = vmatprep.subr.mxu1 %v33198_v17  ;;  %25359 = vmatprep.subr.mxu0 %v33198_v17 }
 0x95a   : > { %25356 = vmatprep.mubr.msk.f32.mxu1 %vm27293_vm1, %v33198_v17 }
 0x95b   : > { %25350 = vmatmul.mubr.msk.f32.vlgmr.msra.gmra.mxu0 %vm859_vm2, %v10250_v26  ;;  %v29998_v26 = vpop.permute.xlu0 %10668 }
 0x95c   : > { %25355 = vmatpush3.xpose.msk.msra.mxu1 %vm859_vm2, %v29943_v18  ;;  %25360 = vmatpush3.msra.mxu0 %v29974_v57  ;;  %33642 = vst [vmem:[#allocation270_spill] sm:$0xff] %v29998_v26 }
 0x95d   : > { %25361 = vmatprep.subr.mxu0 %v33198_v17  ;;  %25366 = vmatprep.subr.mxu1 %v33198_v17 }
 0x95e   : > { %25362 = vmatpush3.msra.mxu0 %v29980_v5  ;;  %25363 = vmatprep.mubr.msk.f32.mxu0 %vm27293_vm1, %v33198_v17 }
 0x95f   : > { %25357 = vmatmul.mubr.msk.f32.vlgmr.msra.gmra.mxu1 %vm859_vm2, %v10332_v2  ;;  %25373 = vmatprep.subr.mxu0 %v33198_v17  ;;  %v30109_v58 = vpop.permute.xlu0 %10749 }
 0x960   : > { %25367 = vmatpush3.msra.mxu1 %v29991_v12  ;;  %25370 = vmatprep.mubr.msk.f32.mxu1 %vm27293_vm1, %v33198_v17  ;;  %33658 = vst [vmem:[#allocation284_spill] sm:$0xff] %v30109_v58 }
 0x961   : > { %25368 = vmatprep.subr.mxu1 %v33198_v17 }
 0x962   : > { %25369 = vmatpush3.msra.mxu1 %v29998_v26 }
 0x963   : > { %25380 = vmatprep.subr.mxu1 %v33198_v17 }
 0x982   : > { %v30003_v5 = vpop.f32.mrf.mxu0 }
 0x984   : > { %v25141_v57 = vpop.f32.mrf.mxu0 }
 0x987   : > { %v30005_v18 = vpop.f32.mrf.mxu1 }
 0x989   : > { %v25148_v2 = vpop.f32.mrf.mxu1 }
 0x9b7   : > { %v30007_v53 = vpop.f32.mrf.mxu0 }
 0x9b9   : > { %v25155_v12 = vpop.f32.mrf.mxu0 }
 0x9bb   : > { %v30009_v38 = vpop.f32.mrf.mxu1 }
 0x9bd   : > { %v25162_v35 = vpop.f32.mrf.mxu1 }
 0x9bf   : > { %v30011_v23 = vpop.f32.mrf.mxu0 }
 0x9c0   : > { %v30013_v13 = vpop.f32.mrf.mxu1 }
 0x9c1   : > { %v25169_v4 = vpop.f32.mrf.mxu0 }
 0x9c2   : > { %v25176_v26 = vpop.f32.mrf.mxu1 }
 0x9c5   : > { %v30015_v14 = vpop.f32.mrf.mxu0 }
 0x9c6   : > { %33643 = vst [vmem:[#allocation271_spill] sm:$0xff] %v30015_v14  ;;  %v30017_v46 = vpop.f32.mrf.mxu1 }
 0x9c7   : > { %33644 = vst [vmem:[#allocation272_spill] sm:$0xff] %v30017_v46  ;;  %v25183_v57 = vpop.f32.mrf.mxu0 }
 0x9c8   : > { %v25190_v9 = vpop.f32.mrf.mxu1 }
 0x9cb   : > { %v30019_v32 = vpop.f32.mrf.mxu0 }
 0x9cc   : > { %33645 = vst [vmem:[#allocation273_spill] sm:$0xff] %v30019_v32  ;;  %v30021_v2 = vpop.f32.mrf.mxu1  ;;  %v33693_v32 = vld [vmem:[#allocation197_spill] sm:$0xff] }
 0x9cd   : > { %33646 = vst [vmem:[#allocation274_spill] sm:$0xff] %v30021_v2  ;;  %v25197_v12 = vpop.f32.mrf.mxu0  ;;  %v33692_v2 = vld [vmem:[#allocation119_spill] sm:$0xff] }
 0x9ce   : > { %v25204_v56 = vpop.f32.mrf.mxu1  ;;  %v26564_v46 = vpack.i.bf16 %v33693_v32, %v33692_v2  ;;  %v33696_v32 = vld [vmem:[#allocation121_spill] sm:$0xff] }
 0x9d1   : > { %v30023_v52 = vpop.f32.mrf.mxu0 }
 0x9d2   : > { %33647 = vst [vmem:[#allocation275_spill] sm:$0xff] %v30023_v52  ;;  %v30025_v35 = vpop.f32.mrf.mxu1 }
 0x9d3   : > { %33648 = vst [vmem:[#allocation276_spill] sm:$0xff] %v30025_v35  ;;  %v25211_v51 = vpop.f32.mrf.mxu0 }
 0x9d4   : > { %v25218_v0 = vpop.f32.mrf.mxu1 }
 0x9d6   : > { %v30027_v4 = vpop.f32.mrf.mxu0 }
 0x9d7   : > { %33649 = vst [vmem:[#allocation277_spill] sm:$0xff] %v30027_v4 }
 0x9d8   : > { %v25225_v26 = vpop.f32.mrf.mxu0 }
 0x9da   : > { %v30029_v15 = vpop.f32.mrf.mxu1 }
 0x9db   : > { %33650 = vst [vmem:[#allocation278_spill] sm:$0xff] %v30029_v15  ;;  %v30031_v50 = vpop.f32.mrf.mxu0 }
 0x9dc   : > { %33651 = vst [vmem:[#allocation279_spill] sm:$0xff] %v30031_v50  ;;  %v25232_v9 = vpop.f32.mrf.mxu1 }
 0x9dd   : > { %v25239_v57 = vpop.f32.mrf.mxu0 }
 0x9df   : > { %v30033_v6 = vpop.f32.mrf.mxu1 }
 0x9e0   : > { %33652 = vst [vmem:[#allocation280_spill] sm:$0xff] %v30033_v6 }
 0x9e1   : > { %v25246_v8 = vpop.f32.mrf.mxu1 }
 0x9e3   : > { %v30035_v12 = vpop.f32.mrf.mxu0 }
 0x9e4   : > { %v10413_v56 = vsel %vm2124_vm3, %v30035_v12, -inf }
 0x9e5   : > { %10414 = vmax.xlane.f32.xlu0 %v10413_v56  ;;  %v25253_v51 = vpop.f32.mrf.mxu0 }
 0x9e6   : > { %v33653_v51 = vld [vmem:[#allocation67_spill] sm:$0xff] }
 0x9e7   : > { %v30039_v0 = vpop.f32.mrf.mxu1 }
 0x9e8   : > { %v10416_v26 = vsel %vm2124_vm3, %v30039_v0, -inf }
 0x9e9   : > { %10417 = vmax.xlane.f32.xlu1 %v10416_v26  ;;  %v25260_v20 = vpop.f32.mrf.mxu1 }
 0x9eb   : > { %v30043_v54 = vpop.f32.mrf.mxu0 }
 0x9ed   : > { %v25267_v9 = vpop.f32.mrf.mxu0 }
 0x9ef   : > { %v30045_v57 = vpop.f32.mrf.mxu1 }
 0x9f1   : > { %v25274_v8 = vpop.f32.mrf.mxu1 }
 0x9f3   : > { %v30047_v7 = vpop.f32.mrf.mxu0 }
 0x9f5   : > { %v25281_v11 = vpop.f32.mrf.mxu0 }
 0x9f7   : > { %v30049_v42 = vpop.f32.mrf.mxu1 }
 0x9f9   : > { %v25288_v56 = vpop.f32.mrf.mxu1 }
 0x9fa   : > { %11537 = vrot.lane.b32.xlu1 %v33653_v51, %s27296_s25 }
 0x9fb   : > { %11618 = vrot.lane.b32.xlu0 %v33654_v60, %s27296_s25  ;;  %v30055_v26 = vpop.f32.mrf.mxu0 }
 0x9fd   : > { %v25295_v20 = vpop.f32.mrf.mxu0 }
 0x9ff   : > { %v30057_v55 = vpop.f32.mrf.mxu1 }
 0xa01   : > { %v25302_v9 = vpop.f32.mrf.mxu1 }
 0xa02   : > { %v10419_v9 = vsel %vm2124_vm3, %v30043_v54, -inf }
 0xa03   : > { %v30059_v29 = vpop.f32.mrf.mxu0 }
 0xa05   : > { %v25309_v8 = vpop.f32.mrf.mxu0 }
 0xa07   : > { %v30061_v49 = vpop.f32.mrf.mxu1 }
 0xa08   : > { %v10440_v1 = vsel %vm2124_vm3, %v30061_v49, -inf }
 0xa09   : > { %v25316_v11 = vpop.f32.mrf.mxu1 }
 0xa0a   : > { %v10428_v11 = vsel %vm2124_vm3, %v30049_v42, -inf }
 0xa0b   : > { %v30063_v40 = vpop.f32.mrf.mxu0 }
 0xa0d   : > { %v25323_v56 = vpop.f32.mrf.mxu0 }
 0xa0e   : > { %v10422_v56 = vsel %vm2124_vm3, %v30045_v57, -inf }
 0xa0f   : > { %v30065_v61 = vpop.f32.mrf.mxu1 }
 0xa11   : > { %v25330_v51 = vpop.f32.mrf.mxu1 }
 0xa13   : > { %v30067_v19 = vpop.f32.mrf.mxu0 }
 0xa15   : > { %v25337_v60 = vpop.f32.mrf.mxu0 }
 0xa17   : > { %v30069_v59 = vpop.f32.mrf.mxu1 }
 0xa19   : > { %v25344_v20 = vpop.f32.mrf.mxu1 }
 0xa1a   : > { %10420 = vmax.xlane.f32.xlu0 %v10419_v9  ;;  %v10425_v20 = vsel %vm2124_vm3, %v30047_v7, -inf  ;;  %v10434_v9 = vsel %vm2124_vm3, %v30057_v55, -inf }
 0xa1b   : > { %v30073_v8 = vpop.f32.mrf.mxu0 }
 0xa1d   : > { %v25351_v21 = vpop.f32.mrf.mxu0 }
 0xa1e   : > { %10429 = vmax.xlane.f32.xlu1 %v10428_v11  ;;  %10423 = vmax.xlane.f32.xlu0 %v10422_v56  ;;  %v10431_v21 = vsel %vm2124_vm3, %v30055_v26, -inf  ;;  %v10437_v11 = vsel %vm2124_vm3, %v30059_v29, -inf  ;;  %v10446_v56 = vsel %vm2124_vm3, %v30065_v61, -inf }
 0xa1f   : > { %v30079_v51 = vpop.f32.mrf.mxu1 }
 0xa21   : > { %v25358_v60 = vpop.f32.mrf.mxu1 }
 0xa22   : > { %10426 = vmax.xlane.f32.xlu0 %v10425_v20  ;;  %10435 = vmax.xlane.f32.xlu1 %v10434_v9  ;;  %v30093_v60 = vpop.permute.xlu1 %10747  ;;  %v10443_v20 = vsel %vm2124_vm3, %v30063_v40, -inf  ;;  %v10452_v9 = vsel %vm2124_vm3, %v30069_v59, -inf }
 0xa23   : > { %33655 = vst [vmem:[#allocation281_spill] sm:$0xff] %v30093_v60 }
 0xa26   : > { %10432 = vmax.xlane.f32.xlu0 %v10431_v21  ;;  %10441 = vmax.xlane.f32.xlu1 %v10440_v1  ;;  %v10449_v1 = vsel %vm2124_vm3, %v30067_v19, -inf  ;;  %v10458_v21 = vsel %vm2124_vm3, %v30079_v51, -inf  ;;  %v30103_v62 = vpop.permute.xlu1 %10826 }
 0xa27   : > { %33656 = vst [vmem:[#allocation282_spill] sm:$0xff] %v30103_v62 }
 0xa2a   : > { %10438 = vmax.xlane.f32.xlu0 %v10437_v11  ;;  %10447 = vmax.xlane.f32.xlu1 %v10446_v56  ;;  %v10455_v11 = vsel %vm2124_vm3, %v30073_v8, -inf  ;;  %v30107_v56 = vpop.permute.xlu1 %10907 }
 0xa2b   : > { %33657 = vst [vmem:[#allocation283_spill] sm:$0xff] %v30107_v56 }
 0xa2e   : > { %10444 = vmax.xlane.f32.xlu0 %v10443_v20  ;;  %10453 = vmax.xlane.f32.xlu1 %v10452_v9  ;;  %v30111_v20 = vpop.permute.xlu1 %10905  ;;  %v30113_v9 = vpop.permute.xlu0 %10828 }
 0xa2f   : > { %33659 = vst [vmem:[#allocation285_spill] sm:$0xff] %v30111_v20  ;;  %33660 = vst [vmem:[#allocation286_spill] sm:$0xff] %v30113_v9 }
 0xa32   : > { %10450 = vmax.xlane.f32.xlu0 %v10449_v1  ;;  %10459 = vmax.xlane.f32.xlu1 %v10458_v21  ;;  %v30117_v45 = vpop.permute.xlu1 %10986  ;;  %v30119_v10 = vpop.permute.xlu0 %11065  ;;  %v33664_v1 = vld [vmem:[#allocation72_spill] sm:$0xff] }
 0xa33   : > { %33662 = vst [vmem:[#allocation287_spill] sm:$0xff] %v30117_v45  ;;  %33663 = vst [vmem:[#allocation288_spill] sm:$0xff] %v30119_v10 }
 0xa36   : > { %10456 = vmax.xlane.f32.xlu0 %v10455_v11  ;;  %v30123_v21 = vpop.permute.xlu1 %10984  ;;  %v30125_v11 = vpop.permute.xlu0 %11144 }
 0xa37   : > { %33665 = vst [vmem:[#allocation289_spill] sm:$0xff] %v30123_v21  ;;  %33666 = vst [vmem:[#allocation290_spill] sm:$0xff] %v30125_v11 }
 0xa3a   : > { %v30129_v63 = vpop.permute.xlu1 %11063  ;;  %v30131_v16 = vpop.permute.xlu0 %11223 }
 0xa3b   : > { %33668 = vst [vmem:[#allocation291_spill] sm:$0xff] %v30129_v63  ;;  %33669 = vst [vmem:[#allocation292_spill] sm:$0xff] %v30131_v16 }
 0xa3e   : > { %v30133_v43 = vpop.permute.xlu1 %11142 }
 0xa3f   : > { %33670 = vst [vmem:[#allocation293_spill] sm:$0xff] %v30133_v43 }
 0xa42   : > { %v30137_v47 = vpop.permute.xlu1 %11221 }
 0xa43   : > { %11616 = vrot.lane.b32.xlu1 %v33661_v48, %s27296_s25  ;;  %v30135_v48 = vpop.permute.xlu0 %11302  ;;  %33672 = vst [vmem:[#allocation295_spill] sm:$0xff] %v30137_v47 }
 0xa44   : > { %33671 = vst [vmem:[#allocation294_spill] sm:$0xff] %v30135_v48 }
 0xa47   : > { %11695 = vrot.lane.b32.xlu1 %v33664_v1, %s27296_s25  ;;  %v30139_v41 = vpop.permute.xlu0 %11381  ;;  %v30141_v1 = vpop.permute.xlu1 %11300 }
 0xa48   : > { %33673 = vst [vmem:[#allocation296_spill] sm:$0xff] %v30139_v41  ;;  %33674 = vst [vmem:[#allocation297_spill] sm:$0xff] %v30141_v1 }
 0xa4b   : > { %v30143_v44 = vpop.permute.xlu0 %11460  ;;  %v30145_v37 = vpop.permute.xlu1 %11379 }
 0xa4c   : > { %11697 = vrot.lane.b32.xlu0 %v33667_v3, %s27296_s25  ;;  %33675 = vst [vmem:[#allocation298_spill] sm:$0xff] %v30143_v44  ;;  %33676 = vst [vmem:[#allocation299_spill] sm:$0xff] %v30145_v37 }
 0xa4f   : > { %v30147_v39 = vpop.permute.xlu0 %11539  ;;  %v30149_v3 = vpop.permute.xlu1 %11458 }
 0xa50   : > { %33677 = vst [vmem:[#allocation300_spill] sm:$0xff] %v30147_v39  ;;  %33678 = vst [vmem:[#allocation301_spill] sm:$0xff] %v30149_v3 }
 0xa6e   : > { %v10415_v34 = vpop.xlane.xlu0 %10414 }
 0xa6f   : > { %v10461_v36 = vsub.f32 %v30035_v12, %v10415_v34 }
 0xa71   : > { %v10477_v31 = vmul.f32 1.442695, %v10461_v36 }
 0xa72   : > { %v10418_v33 = vpop.xlane.xlu1 %10417  ;;  %v30161_v34 = vpop.permute.xlu0 %11618 }
 0xa73   : > { %26887 = vpow2.f32 %v10477_v31  ;;  %v10462_v28 = vsub.f32 %v30039_v0, %v10418_v33  ;;  %33679 = vst [vmem:[#allocation302_spill] sm:$0xff] %v30161_v34 }
 0xa75   : > { %v10479_v30 = vmul.f32 1.442695, %v10462_v28 }
 0xa76   : > { %v30163_v36 = vpop.permute.xlu1 %11537 }
 0xa77   : > { %26889 = vpow2.f32 %v10479_v30  ;;  %33680 = vst [vmem:[#allocation303_spill] sm:$0xff] %v30163_v36 }
 0xa80   : > { %v30153_v25 = vpop.eup %26887 }
 0xa81   : > { %v10509_v27 = vsel %vm2124_vm3, %v30153_v25, 0.0 }
 0xa82   : > { %10510 = vadd.xlane.f32.xlu0 %v10509_v27 }
 0xa84   : > { %v30157_v22 = vpop.eup %26889 }
 0xa85   : > { %v10512_v24 = vsel %vm2124_vm3, %v30157_v22, 0.0 }
 0xa86   : > { %10513 = vadd.xlane.f32.xlu1 %v10512_v24 }
 0xaa3   : > { %v10421_v31 = vpop.xlane.xlu0 %10420 }
 0xaa4   : > { %v10463_v28 = vsub.f32 %v30043_v54, %v10421_v31 }
 0xaa6   : > { %v10481_v30 = vmul.f32 1.442695, %v10463_v28 }
 0xaa7   : > { %v10424_v33 = vpop.xlane.xlu0 %10423  ;;  %v10430_v12 = vpop.xlane.xlu1 %10429 }
 0xaa8   : > { %26891 = vpow2.f32 %v10481_v30  ;;  %v10464_v0 = vsub.f32 %v30045_v57, %v10424_v33  ;;  %v10466_v27 = vsub.f32 %v30049_v42, %v10430_v12 }
 0xaaa   : > { %v10483_v6 = vmul.f32 1.442695, %v10464_v0  ;;  %v10487_v50 = vmul.f32 1.442695, %v10466_v27 }
 0xaab   : > { %v10427_v15 = vpop.xlane.xlu0 %10426  ;;  %v10436_v4 = vpop.xlane.xlu1 %10435 }
 0xaac   : > { %26893 = vpow2.f32 %v10483_v6  ;;  %v10465_v24 = vsub.f32 %v30047_v7, %v10427_v15  ;;  %v10468_v35 = vsub.f32 %v30057_v55, %v10436_v4 }
 0xaad   : > { %26895 = vpow2.f32 %v10487_v50 }
 0xaae   : > { %v10485_v52 = vmul.f32 1.442695, %v10465_v24  ;;  %v10491_v54 = vmul.f32 1.442695, %v10468_v35 }
 0xaaf   : > { %v10433_v31 = vpop.xlane.xlu0 %10432  ;;  %v10442_v28 = vpop.xlane.xlu1 %10441 }
 0xab0   : > { %26897 = vpow2.f32 %v10485_v52  ;;  %v10467_v30 = vsub.f32 %v30055_v26, %v10433_v31  ;;  %v10470_v57 = vsub.f32 %v30061_v49, %v10442_v28 }
 0xab1   : > { %26899 = vpow2.f32 %v10491_v54 }
 0xab2   : > { %v10489_v42 = vmul.f32 1.442695, %v10467_v30  ;;  %v10495_v33 = vmul.f32 1.442695, %v10470_v57 }
 0xab3   : > { %v10439_v12 = vpop.xlane.xlu0 %10438  ;;  %v10448_v0 = vpop.xlane.xlu1 %10447 }
 0xab4   : > { %26901 = vpow2.f32 %v10489_v42  ;;  %v10469_v6 = vsub.f32 %v30059_v29, %v10439_v12  ;;  %v10472_v55 = vsub.f32 %v30065_v61, %v10448_v0 }
 0xab5   : > { %v30174_v50 = vpop.eup %26891  ;;  %26903 = vpow2.f32 %v10495_v33 }
 0xab6   : > { %v10493_v15 = vmul.f32 1.442695, %v10469_v6  ;;  %v10499_v7 = vmul.f32 1.442695, %v10472_v55  ;;  %v10515_v52 = vsel %vm2124_vm3, %v30174_v50, 0.0 }
 0xab7   : > { %v10445_v35 = vpop.xlane.xlu0 %10444  ;;  %10516 = vadd.xlane.f32.xlu0 %v10515_v52  ;;  %v10454_v49 = vpop.xlane.xlu1 %10453 }
 0xab8   : > { %26905 = vpow2.f32 %v10493_v15  ;;  %v10471_v4 = vsub.f32 %v30063_v40, %v10445_v35  ;;  %v10474_v29 = vsub.f32 %v30069_v59, %v10454_v49 }
 0xab9   : > { %v30179_v26 = vpop.eup %26893  ;;  %26907 = vpow2.f32 %v10499_v7 }
 0xaba   : > { %v10497_v61 = vmul.f32 1.442695, %v10471_v4  ;;  %v10518_v27 = vsel %vm2124_vm3, %v30179_v26, 0.0  ;;  %v30184_v24 = vpop.eup %26895  ;;  %v10503_v40 = vmul.f32 1.442695, %v10474_v29 }
 0xabb   : > { %v10451_v54 = vpop.xlane.xlu0 %10450  ;;  %10519 = vadd.xlane.f32.xlu1 %v10518_v27  ;;  %v10460_v31 = vpop.xlane.xlu1 %10459  ;;  %v10524_v33 = vsel %vm2124_vm3, %v30184_v24, 0.0 }
 0xabc   : > { %26909 = vpow2.f32 %v10497_v61  ;;  %v10473_v28 = vsub.f32 %v30067_v19, %v10451_v54  ;;  %v10476_v42 = vsub.f32 %v30079_v51, %v10460_v31 }
 0xabd   : > { %v30187_v30 = vpop.eup %26897 }
 0xabe   : > { %v10501_v57 = vmul.f32 1.442695, %v10473_v28  ;;  %v10521_v59 = vsel %vm2124_vm3, %v30187_v30, 0.0  ;;  %v30194_v12 = vpop.eup %26899  ;;  %v10507_v55 = vmul.f32 1.442695, %v10476_v42 }
 0xabf   : > { %10522 = vadd.xlane.f32.xlu0 %v10521_v59  ;;  %v10457_v0 = vpop.xlane.xlu0 %10456  ;;  %10525 = vadd.xlane.f32.xlu1 %v10524_v33  ;;  %v10530_v7 = vsel %vm2124_vm3, %v30194_v12, 0.0 }
 0xac0   : > { %26911 = vpow2.f32 %v10501_v57  ;;  %v10475_v19 = vsub.f32 %v30073_v8, %v10457_v0  ;;  %v33681_v0 = vld [vmem:[#allocation76_spill] sm:$0xff] }
 0xac1   : > { %v30197_v6 = vpop.eup %26901  ;;  %26913 = vpow2.f32 %v10503_v40 }
 0xac2   : > { %v10505_v15 = vmul.f32 1.442695, %v10475_v19  ;;  %v10527_v51 = vsel %vm2124_vm3, %v30197_v6, 0.0  ;;  %v30203_v52 = vpop.eup %26903  ;;  %v33682_v19 = vld [vmem:[#allocation78_spill] sm:$0xff] }
 0xac3   : > { %10528 = vadd.xlane.f32.xlu0 %v10527_v51  ;;  %10531 = vadd.xlane.f32.xlu1 %v10530_v7  ;;  %v10536_v49 = vsel %vm2124_vm3, %v30203_v52, 0.0  ;;  %v33685_v51 = vld [vmem:[#allocation112_spill] sm:$0xff]  ;;  %v33686_v7 = vld [vmem:[#allocation194_spill] sm:$0xff] }
 0xac4   : > { %26915 = vpow2.f32 %v10505_v15  ;;  %v30241_v15 = vpop.permute.xlu0 %11697 }
 0xac5   : > { %v30205_v35 = vpop.eup %26905  ;;  %26917 = vpow2.f32 %v10507_v55  ;;  %v30239_v55 = vpop.permute.xlu1 %11616  ;;  %33684 = vst [vmem:[#allocation305_spill] sm:$0xff] %v30241_v15 }
 0xac6   : > { %v10533_v8 = vsel %vm2124_vm3, %v30205_v35, 0.0  ;;  %v30211_v4 = vpop.eup %26907  ;;  %33683 = vst [vmem:[#allocation304_spill] sm:$0xff] %v30239_v55 }
 0xac7   : > { %10534 = vadd.xlane.f32.xlu0 %v10533_v8  ;;  %10537 = vadd.xlane.f32.xlu1 %v10536_v49  ;;  %v10542_v27 = vsel %vm2124_vm3, %v30211_v4, 0.0  ;;  %v26558_v8 = vpack.i.bf16 %v33686_v7, %v33685_v51  ;;  %v33694_v7 = vld [vmem:[#allocation120_spill] sm:$0xff] }
 0xac9   : > { %v30213_v29 = vpop.eup %26909  ;;  %v30245_v49 = vpop.permute.xlu1 %11695 }
 0xaca   : > { %v10539_v61 = vsel %vm2124_vm3, %v30213_v29, 0.0  ;;  %33687 = vst [vmem:[#allocation112_spill] sm:$0xff] %v30245_v49 }
 0xacb   : > { %10540 = vadd.xlane.f32.xlu0 %v10539_v61  ;;  %10543 = vadd.xlane.f32.xlu1 %v10542_v27  ;;  %v33688_v27 = vld [vmem:[#allocation113_spill] sm:$0xff] }
 0xacd   : > { %v30219_v54 = vpop.eup %26911 }
 0xace   : > { %v30221_v31 = vpop.eup %26913  ;;  %v10545_v28 = vsel %vm2124_vm3, %v30219_v54, 0.0 }
 0xacf   : > { %10546 = vadd.xlane.f32.xlu0 %v10545_v28  ;;  %v10548_v42 = vsel %vm2124_vm3, %v30221_v31, 0.0  ;;  %v33689_v28 = vld [vmem:[#allocation195_spill] sm:$0xff] }
 0xad1   : > { %v30225_v40 = vpop.eup %26915 }
 0xad2   : > { %v10551_v57 = vsel %vm2124_vm3, %v30225_v40, 0.0  ;;  %v30231_v59 = vpop.eup %26917 }
 0xad3   : > { %10552 = vadd.xlane.f32.xlu1 %v10551_v57  ;;  %10549 = vadd.xlane.f32.xlu0 %v10548_v42  ;;  %v10554_v33 = vsel %vm2124_vm3, %v30231_v59, 0.0  ;;  %v26560_v57 = vpack.i.bf16 %v33689_v28, %v33688_v27 }
 0xad7   : > { %10555 = vadd.xlane.f32.xlu0 %v10554_v33  ;;  %v33690_v33 = vld [vmem:[#allocation118_spill] sm:$0xff] }
 0xae4   : > { %11774 = vrot.lane.b32.xlu1 %v33681_v0, %s27296_s25  ;;  %v33691_v0 = vld [vmem:[#allocation196_spill] sm:$0xff] }
 0xaed   : > { %11776 = vrot.lane.b32.xlu0 %v33682_v19, %s27296_s25  ;;  %v26562_v19 = vpack.i.bf16 %v33691_v0, %v33690_v33  ;;  %v33700_v0 = vld [vmem:[#allocation123_spill] sm:$0xff]  ;;  %v33703_v33 = vld [vmem:[#allocation200_spill] sm:$0xff] }
 0xb0b   : > { %v10511_v61 = vpop.xlane.xlu0 %10510 }
 0xb0c   : > { %26919 = vrcp.f32 %v10511_v61  ;;  %v33695_v61 = vld [vmem:[#allocation198_spill] sm:$0xff] }
 0xb0d   : > { %26559 = vxpose.xlu1.b32.start [1/16] (narrow) %v26558_v8, 8  ;;  %v26566_v8 = vpack.i.bf16 %v33695_v61, %v33694_v7  ;;  %v33704_v7 = vld [vmem:[#allocation125_spill] sm:$0xff] }
 0xb0e   : > { %v33705_v61 = vld [vmem:[#allocation205_spill] sm:$0xff] }
 0xb0f   : > { %v10514_v42 = vpop.xlane.xlu1 %10513 }
 0xb10   : > { %26921 = vrcp.f32 %v10514_v42  ;;  %v33702_v42 = vld [vmem:[#allocation124_spill] sm:$0xff] }
 0xb11   : > { %26561 = vxpose.xlu1.b32.cont [2/16] (narrow) %v26560_v57, 8 }
 0xb15   : > { %26563 = vxpose.xlu1.b32.cont [3/16] (narrow) %v26562_v19, 8  ;;  %v33701_v19 = vld [vmem:[#allocation204_spill] sm:$0xff] }
 0xb16   : > { %v26572_v57 = vpack.i.bf16 %v33701_v19, %v33700_v0  ;;  %v33712_v19 = vld [vmem:[#allocation129_spill] sm:$0xff] }
 0xb19   : > { %v26920_v14 = vpop.eup %26919  ;;  %26565 = vxpose.xlu1.b32.cont [4/16] (narrow) %v26564_v46, 8  ;;  %v33697_v46 = vld [vmem:[#allocation203_spill] sm:$0xff] }
 0xb1a   : > { %v10573_v51 = vmul.f32 %v26920_v14, %v30153_v25  ;;  %v26568_v2 = vpack.i.bf16 %v33697_v46, %v33696_v32  ;;  %v33699_v25 = vld [vmem:[#allocation199_spill] sm:$0xff] }
 0xb1b   : > { %v33708_v46 = vld [vmem:[#allocation127_spill] sm:$0xff] }
 0xb1c   : > { %25364 = vmatmul.mubr.msk.f32.vlgmr.msra.gmra.mxu0 %vm2124_vm3, %v10573_v51  ;;  %v26574_v51 = vpack.i.bf16 %v33703_v33, %v33702_v42 }
 0xb1d   : > { %v26922_v27 = vpop.eup %26921  ;;  %25374 = vmatpush3.msra.mxu0 %v30109_v58  ;;  %26567 = vxpose.xlu1.b32.cont [5/16] (narrow) %v26566_v8, 8  ;;  %v26576_v8 = vpack.i.bf16 %v33705_v61, %v33704_v7  ;;  %v33715_v7 = vld [vmem:[#allocation208_spill] sm:$0xff] }
 0xb1e   : > { %v10574_v28 = vmul.f32 %v26922_v27, %v30157_v22  ;;  %25375 = vmatprep.subr.mxu0 %v33198_v17  ;;  %25377 = vmatprep.mubr.msk.f32.mxu0 %vm27293_vm1, %v33198_v17  ;;  %v33698_v22 = vld [vmem:[#allocation122_spill] sm:$0xff] }
 0xb1f   : > { %25376 = vmatpush3.msra.mxu0 %v30093_v60  ;;  %v26570_v14 = vpack.i.bf16 %v33699_v25, %v33698_v22  ;;  %v33706_v27 = vld [vmem:[#allocation126_spill] sm:$0xff]  ;;  %v33710_v25 = vld [vmem:[#allocation128_spill] sm:$0xff] }
 0xb20   : > { %25371 = vmatmul.mubr.msk.f32.vlgmr.msra.gmra.mxu1 %vm2124_vm3, %v10574_v28  ;;  %25387 = vmatprep.subr.mxu0 %v33198_v17  ;;  %v33707_v28 = vld [vmem:[#allocation201_spill] sm:$0xff] }
 0xb21   : > { %25381 = vmatpush3.msra.mxu1 %v30113_v9  ;;  %26569 = vxpose.xlu1.b32.cont [6/16] (narrow) %v26568_v2, 8  ;;  %v26578_v32 = vpack.i.bf16 %v33707_v28, %v33706_v27  ;;  %v33709_v2 = vld [vmem:[#allocation206_spill] sm:$0xff]  ;;  %v33716_v27 = vld [vmem:[#allocation132_spill] sm:$0xff]  ;;  %v33717_v28 = vld [vmem:[#allocation209_spill] sm:$0xff] }
 0xb22   : > { %25382 = vmatprep.subr.mxu1 %v33198_v17  ;;  %25384 = vmatprep.mubr.msk.f32.mxu1 %vm27293_vm1, %v33198_v17  ;;  %v26580_v22 = vpack.i.bf16 %v33709_v2, %v33708_v46 }
 0xb23   : > { %25383 = vmatpush3.msra.mxu1 %v30103_v62 }
 0xb24   : > { %25394 = vmatprep.subr.mxu1 %v33198_v17 }
 0xb25   : > { %26571 = vxpose.xlu1.b32.cont [7/16] (narrow) %v26570_v14, 8  ;;  %v33711_v14 = vld [vmem:[#allocation202_spill] sm:$0xff] }
 0xb26   : > { %v26582_v0 = vpack.i.bf16 %v33711_v14, %v33710_v25 }
 0xb29   : > { %26573 = vxpose.xlu1.b32.cont [8/16] (narrow) %v26572_v57, 8  ;;  %v33713_v57 = vld [vmem:[#allocation207_spill] sm:$0xff] }
 0xb2a   : > { %v26584_v42 = vpack.i.bf16 %v33713_v57, %v33712_v19 }
 0xb2d   : > { %26575 = vxpose.xlu1.b32.cont [9/16] (narrow) %v26574_v51, 8  ;;  %v33714_v51 = vld [vmem:[#allocation130_spill] sm:$0xff] }
 0xb2e   : > { %v26586_v61 = vpack.i.bf16 %v33715_v7, %v33714_v51 }
 0xb31   : > { %26577 = vxpose.xlu1.b32.cont [10/16] (narrow) %v26576_v8, 8 }
 0xb35   : > { %26579 = vxpose.xlu1.b32.cont [11/16] (narrow) %v26578_v32, 8  ;;  %v26588_v32 = vpack.i.bf16 %v33717_v28, %v33716_v27 }
 0xb39   : > { %26581 = vxpose.xlu1.b32.cont [12/16] (narrow) %v26580_v22, 8 }
 0xb3d   : > { %26583 = vxpose.xlu1.b32.cont [13/16] (narrow) %v26582_v0, 8 }
 0xb40   : > { %v10517_v33 = vpop.xlane.xlu0 %10516 }
 0xb41   : > { %26923 = vrcp.f32 %v10517_v33  ;;  %26585 = vxpose.xlu1.b32.cont [14/16] (narrow) %v26584_v42, 8 }
 0xb44   : > { %v10520_v8 = vpop.xlane.xlu1 %10519 }
 0xb45   : > { %26925 = vrcp.f32 %v10520_v8  ;;  %26587 = vxpose.xlu1.b32.cont [15/16] (narrow) %v26586_v61, 8 }
 0xb48   : > { %v10523_v46 = vpop.xlane.xlu0 %10522  ;;  %v10526_v2 = vpop.xlane.xlu1 %10525 }
 0xb49   : > { %26927 = vrcp.f32 %v10523_v46  ;;  %26589 = vxpose.xlu1.b32.end [16/16] (narrow) %v26588_v32, 8 }
 0xb4a   : > { %26929 = vrcp.f32 %v10526_v2 }
 0xb4c   : > { %v10529_v22 = vpop.xlane.xlu0 %10528  ;;  %v10532_v25 = vpop.xlane.xlu1 %10531 }
 0xb4d   : > { %26931 = vrcp.f32 %v10529_v22 }
 0xb4e   : > { %v26924_v14 = vpop.eup %26923  ;;  %26933 = vrcp.f32 %v10532_v25 }
 0xb4f   : > { %v10575_v0 = vmul.f32 %v26924_v14, %v30174_v50 }
 0xb50   : > { %v10535_v19 = vpop.xlane.xlu0 %10534  ;;  %v10538_v57 = vpop.xlane.xlu1 %10537 }
 0xb51   : > { %26935 = vrcp.f32 %v10535_v19  ;;  %25378 = vmatmul.mubr.msk.f32.vlgmr.msra.gmra.mxu0 %vm2124_vm3, %v10575_v0 }
 0xb52   : > { %v26926_v42 = vpop.eup %26925  ;;  %26937 = vrcp.f32 %v10538_v57  ;;  %25388 = vmatpush3.msra.mxu0 %v30107_v56  ;;  %25391 = vmatprep.mubr.msk.f32.mxu0 %vm27293_vm1, %v33198_v17 }
 0xb53   : > { %v10576_v33 = vmul.f32 %v26926_v42, %v30179_v26  ;;  %25389 = vmatprep.subr.mxu0 %v33198_v17 }
 0xb54   : > { %25390 = vmatpush3.msra.mxu0 %v30111_v20  ;;  %v10541_v51 = vpop.xlane.xlu0 %10540  ;;  %v10544_v50 = vpop.xlane.xlu1 %10543 }
 0xb55   : > { %25385 = vmatmul.mubr.msk.f32.vlgmr.msra.gmra.mxu1 %vm2124_vm3, %v10576_v33  ;;  %25401 = vmatprep.subr.mxu0 %v33198_v17  ;;  %26939 = vrcp.f32 %v10541_v51 }
 0xb56   : > { %v26928_v7 = vpop.eup %26927  ;;  %25395 = vmatpush3.msra.mxu1 %v30117_v45  ;;  %25398 = vmatprep.mubr.msk.f32.mxu1 %vm27293_vm1, %v33198_v17  ;;  %26941 = vrcp.f32 %v10544_v50 }
 0xb57   : > { %v26930_v61 = vpop.eup %26929  ;;  %v10577_v8 = vmul.f32 %v26928_v7, %v30187_v30  ;;  %25396 = vmatprep.subr.mxu1 %v33198_v17 }
 0xb58   : > { %v10578_v26 = vmul.f32 %v26930_v61, %v30184_v24  ;;  %25397 = vmatpush3.msra.mxu1 %v30123_v21  ;;  %v10547_v27 = vpop.xlane.xlu0 %10546 }
 0xb59   : > { %25408 = vmatprep.subr.mxu1 %v33198_v17  ;;  %25392 = vmatmul.mubr.msk.f32.vlgmr.msra.gmra.mxu0 %vm2124_vm3, %v10577_v8  ;;  %26943 = vrcp.f32 %v10547_v27  ;;  %v425_v27 = vld [vmem:[%s32780_s4 + $0x148] sm:$0xff] }
 0xb5a   : > { %v26932_v28 = vpop.eup %26931  ;;  %25399 = vmatmul.mubr.msk.f32.vlgmr.msra.gmra.mxu1 %vm2124_vm3, %v10578_v26  ;;  %25402 = vmatpush3.msra.mxu0 %v30119_v10  ;;  %v421_v26 = vld [vmem:[%s32780_s4 + $0x128] sm:$0xff] }
 0xb5b   : > { %v26934_v32 = vpop.eup %26933  ;;  %v10579_v30 = vmul.f32 %v26932_v28, %v30197_v6  ;;  %25409 = vmatpush3.msra.mxu1 %v30125_v11  ;;  %25403 = vmatprep.subr.mxu0 %v33198_v17  ;;  %v415_v28 = vld [vmem:[%s32780_s4 + $0xf8] sm:$0xff] }
 0xb5c   : > { %v10580_v24 = vmul.f32 %v26934_v32, %v30194_v12  ;;  %25410 = vmatprep.subr.mxu1 %v33198_v17  ;;  %25404 = vmatpush3.msra.mxu0 %v30129_v63  ;;  %v10550_v46 = vpop.xlane.xlu0 %10549  ;;  %v10553_v6 = vpop.xlane.xlu1 %10552  ;;  %v413_v32 = vld [vmem:[%s32780_s4 + $0xe8] sm:$0xff] }
 0xb5d   : > { %25411 = vmatpush3.msra.mxu1 %v30133_v43  ;;  %25405 = vmatprep.mubr.msk.f32.mxu0 %vm27293_vm1, %v33198_v17  ;;  %26945 = vrcp.f32 %v10550_v46  ;;  %v409_v46 = vld [vmem:[%s32780_s4 + $0xc8] sm:$0xff] }
 0xb5e   : > { %v26936_v2 = vpop.eup %26935  ;;  %25415 = vmatprep.subr.mxu0 %v33198_v17  ;;  %25412 = vmatprep.mubr.msk.f32.mxu1 %vm27293_vm1, %v33198_v17  ;;  %26947 = vrcp.f32 %v10553_v6  ;;  %v405_v6 = vld [vmem:[%s32780_s4 + $0xa8] sm:$0xff] }
 0xb5f   : > { %v26938_v22 = vpop.eup %26937  ;;  %25422 = vmatprep.subr.mxu1 %v33198_v17  ;;  %25406 = vmatmul.mubr.msk.f32.vlgmr.msra.gmra.mxu0 %vm2124_vm3, %v10579_v30  ;;  %v10581_v12 = vmul.f32 %v26936_v2, %v30205_v35  ;;  %v407_v2 = vld [vmem:[%s32780_s4 + $0xb8] sm:$0xff] }
 0xb60   : > { %25413 = vmatmul.mubr.msk.f32.vlgmr.msra.gmra.mxu1 %vm2124_vm3, %v10580_v24  ;;  %25416 = vmatpush3.msra.mxu0 %v30131_v16  ;;  %v10582_v25 = vmul.f32 %v26938_v22, %v30203_v52  ;;  %v10556_v14 = vpop.xlane.xlu0 %10555  ;;  %v30399_v8 = vpop.permute.xlu1 %11774  ;;  %v411_v24 = vld [vmem:[%s32780_s4 + $0xd8] sm:$0xff] }
 0xb61   : > { %25423 = vmatpush3.msra.mxu1 %v30135_v48  ;;  %25417 = vmatprep.subr.mxu0 %v33198_v17  ;;  %26949 = vrcp.f32 %v10556_v14  ;;  %33719 = vst [vmem:[#allocation113_spill] sm:$0xff] %v30399_v8  ;;  %v403_v22 = vld [vmem:[%s32780_s4 + $0x98] sm:$0xff] }
 0xb62   : > { %25424 = vmatprep.subr.mxu1 %v33198_v17  ;;  %25418 = vmatpush3.msra.mxu0 %v30137_v47  ;;  %v26940_v0 = vpop.eup %26939  ;;  %v419_v14 = vld [vmem:[%s32780_s4 + $0x118] sm:$0xff] }
 0xb63   : > { %25425 = vmatpush3.msra.mxu1 %v30141_v1  ;;  %25419 = vmatprep.mubr.msk.f32.mxu0 %vm27293_vm1, %v33198_v17  ;;  %v26942_v35 = vpop.eup %26941  ;;  %v10583_v52 = vmul.f32 %v26940_v0, %v30213_v29 }
 0xb64   : > { %25429 = vmatprep.subr.mxu0 %v33198_v17  ;;  %25426 = vmatprep.mubr.msk.f32.mxu1 %vm27293_vm1, %v33198_v17  ;;  %v10584_v19 = vmul.f32 %v26942_v35, %v30211_v4  ;;  %v397_v4 = vld [vmem:[%s32780_s4 + $0x68] sm:$0xff]  ;;  %v30392_v61 = vpop.permute.xlu0 %11776 }
 0xb65   : > { %25436 = vmatprep.subr.mxu1 %v33198_v17  ;;  %25420 = vmatmul.mubr.msk.f32.vlgmr.msra.gmra.mxu0 %vm2124_vm3, %v10581_v12  ;;  %33718 = vst [vmem:[#allocation194_spill] sm:$0xff] %v30392_v61  ;;  %v401_v12 = vld [vmem:[%s32780_s4 + $0x88] sm:$0xff] }
 0xb66   : > { %25427 = vmatmul.mubr.msk.f32.vlgmr.msra.gmra.mxu1 %vm2124_vm3, %v10582_v25  ;;  %25430 = vmatpush3.msra.mxu0 %v30139_v41  ;;  %v26944_v57 = vpop.eup %26943  ;;  %v417_v25 = vld [vmem:[%s32780_s4 + $0x108] sm:$0xff] }
 0xb67   : > { %25437 = vmatpush3.msra.mxu1 %v30143_v44  ;;  %25431 = vmatprep.subr.mxu0 %v33198_v17  ;;  %v10585_v42 = vmul.f32 %v26944_v57, %v30219_v54  ;;  %v399_v54 = vld [vmem:[%s32780_s4 + $0x78] sm:$0xff] }
 0xb68   : > { %25438 = vmatprep.subr.mxu1 %v33198_v17  ;;  %25432 = vmatpush3.msra.mxu0 %v30145_v37 }
 0xb69   : > { %25439 = vmatpush3.msra.mxu1 %v30149_v3  ;;  %25433 = vmatprep.mubr.msk.f32.mxu0 %vm27293_vm1, %v33198_v17 }
 0xb6a   : > { %25443 = vmatprep.subr.mxu0 %v33198_v17  ;;  %25440 = vmatprep.mubr.msk.f32.mxu1 %vm27293_vm1, %v33198_v17  ;;  %v26946_v29 = vpop.eup %26945 }
 0xb6b   : > { %25450 = vmatprep.subr.mxu1 %v33198_v17  ;;  %25434 = vmatmul.mubr.msk.f32.vlgmr.msra.gmra.mxu0 %vm2124_vm3, %v10583_v52  ;;  %v26948_v33 = vpop.eup %26947  ;;  %v10586_v51 = vmul.f32 %v26946_v29, %v30221_v31  ;;  %v423_v31 = vld [vmem:[%s32780_s4 + $0x138] sm:$0xff] }
 0xb6c   : > { %25441 = vmatmul.mubr.msk.f32.vlgmr.msra.gmra.mxu1 %vm2124_vm3, %v10584_v19  ;;  %25444 = vmatpush3.msra.mxu0 %v30147_v39  ;;  %v10587_v50 = vmul.f32 %v26948_v33, %v30225_v40  ;;  %v26683_v33 = vld [vmem:[%s32778_s2 + $0x30] sm:$0xff]  }
 0xb6d   : > { %25451 = vmatpush3.msra.mxu1 %v30161_v34  ;;  %25445 = vmatprep.subr.mxu0 %v33198_v17 }
 0xb6e   : > { %25452 = vmatprep.subr.mxu1 %v33198_v17  ;;  %25446 = vmatpush3.msra.mxu0 %v30163_v36  ;;  %v26950_v7 = vpop.eup %26949 }
 0xb6f   : > { %11894 = vperm.xlu1 %26520, %v397_v4   ;;  %25453 = vmatpush3.msra.mxu1 %v30239_v55  ;;  %v10588_v40 = vmul.f32 %v26950_v7, %v30231_v59  ;;  %v427_v59 = vld [vmem:[%s32780_s4 + $0x158] sm:$0xff] }
 0xb70   : > { %25447 = vmatprep.mubr.msk.f32.mxu0 %vm27293_vm1, %v33198_v17  ;;  %25457 = vmatprep.subr.mxu0 %v33198_v17 }
 0xb71   : > { %25448 = vmatmul.mubr.msk.f32.vlgmr.msra.gmra.mxu0 %vm2124_vm3, %v10585_v42  ;;  %25454 = vmatprep.mubr.msk.f32.mxu1 %vm27293_vm1, %v33198_v17 }
 0xb72   : > { %25458 = vmatpush3.msra.mxu0 %v30241_v15  ;;  %25461 = vmatprep.mubr.msk.f32.mxu0 %vm27293_vm1, %v33198_v17 }
 0xb73   : > { %25459 = vmatprep.subr.mxu0 %v33198_v17  ;;  %11904 = vperm.xlu1 %26520, %v399_v54  }
 0xb74   : > { %25460 = vmatpush3.msra.mxu0 %v30245_v49  ;;  %25464 = vmatprep.subr.mxu1 %v33198_v17 }
 0xb75   : > { %25455 = vmatmul.mubr.msk.f32.vlgmr.msra.gmra.mxu1 %vm2124_vm3, %v10586_v51  ;;  %25462 = vmatmul.mubr.msk.f32.vlgmr.msra.gmra.mxu0 %vm2124_vm3, %v10587_v50 }
 0xb76   : > { %25465 = vmatpush3.msra.mxu1 %v30392_v61  ;;  %25468 = vmatprep.mubr.msk.f32.mxu1 %vm27293_vm1, %v33198_v17 }
 0xb77   : > { %25466 = vmatprep.subr.mxu1 %v33198_v17  ;;  %12024 = vperm.xlu1 %26520, %v423_v31  }
 0xb78   : > { %25467 = vmatpush3.msra.mxu1 %v30399_v8  ;;  %25475 = vmatprep.mubr.msk.bf16.mxu0 %vm516_vm0, %v26683_v33 }
 0xb79   : > { %25469 = vmatmul.mubr.msk.f32.vlgmr.msra.gmra.mxu1 %vm2124_vm3, %v10588_v40 }
 0xb7b   : > { %12048 = vperm.xlu1 %26520, %v427_v59  }
 0xb7f   : > { %12014 = vperm.xlu1 %26520, %v421_v26  }
 0xb83   : > { %12038 = vperm.xlu1 %26520, %v425_v27  }
 0xb87   : > { %12134 = vperm.xlu1 %26520, %v415_v28  }
 0xb89   : > { %v30419_v30 = vpop.trf.xlu1 }
 0xb8b   : > { %12124 = vperm.xlu1 %26520, %v413_v32   ;;  %v33720_v32 = vld [vmem:[#allocation271_spill] sm:$0xff] }
 0xb8f   : > { %12114 = vperm.xlu1 %26520, %v411_v24  }
 0xb93   : > { %12104 = vperm.xlu1 %26520, %v409_v46  }
 0xb97   : > { %12094 = vperm.xlu1 %26520, %v407_v2   ;;  %v33721_v2 = vld [vmem:[#allocation272_spill] sm:$0xff] }
 0xb9b   : > { %12084 = vperm.xlu1 %26520, %v405_v6  }
 0xb9f   : > { %12074 = vperm.xlu1 %26520, %v403_v22  }
 0xba3   : > { %12064 = vperm.xlu1 %26520, %v401_v12  }
 0xba7   : > { %12329 = vperm.xlu1 %26520, %v417_v25   ;;  %v33722_v25 = vld [vmem:[#allocation273_spill] sm:$0xff] }
 0xbab   : > { %12339 = vperm.xlu1 %26520, %v419_v14  }
 0xbdc   : > { %v10664_v0 = vpop.f32.mrf.mxu0 }
 0xbdd   : > { %v26521_v35 = vpack.i.bf16 %v10664_v0, %v30003_v5 }
 0xbde   : > { %v25365_v52 = vpop.f32.mrf.mxu0 }
 0xbdf   : > { %26522 = vxpose.xlu0.b32.start [1/16] (narrow) %v26521_v35, 8  ;;  %v33723_v52 = vld [vmem:[#allocation274_spill] sm:$0xff] }
 0xbe0   : > { %v10743_v19 = vpop.f32.mrf.mxu1 }
 0xbe1   : > { %v26523_v57 = vpack.i.bf16 %v10743_v19, %v30005_v18 }
 0xbe2   : > { %v25372_v4 = vpop.f32.mrf.mxu1 }
 0xbe3   : > { %26524 = vxpose.xlu0.b32.cont [2/16] (narrow) %v26523_v57, 8 }
 0xc11   : > { %v10822_v29 = vpop.f32.mrf.mxu0 }
 0xc12   : > { %v26525_v42 = vpack.i.bf16 %v10822_v29, %v30007_v53  ;;  %v33724_v29 = vld [vmem:[#allocation275_spill] sm:$0xff] }
 0xc13   : > { %v25379_v54 = vpop.f32.mrf.mxu0 }
 0xc14   : > { %26526 = vxpose.xlu0.b32.cont [3/16] (narrow) %v26525_v42, 8 }
 0xc15   : > { %v10901_v51 = vpop.f32.mrf.mxu1 }
 0xc16   : > { %v26527_v5 = vpack.i.bf16 %v10901_v51, %v30009_v38 }
 0xc17   : > { %v25386_v50 = vpop.f32.mrf.mxu1 }
 0xc18   : > { %26528 = vxpose.xlu0.b32.cont [4/16] (narrow) %v26527_v5, 8  ;;  %v33725_v5 = vld [vmem:[#allocation276_spill] sm:$0xff] }
 0xc19   : > { %v10980_v7 = vpop.f32.mrf.mxu0 }
 0xc1a   : > { %v26529_v18 = vpack.i.bf16 %v10980_v7, %v30011_v23  ;;  %v11059_v31 = vpop.f32.mrf.mxu1 }
 0xc1b   : > { %v25393_v40 = vpop.f32.mrf.mxu0  ;;  %v26531_v53 = vpack.i.bf16 %v11059_v31, %v30013_v13 }
 0xc1c   : > { %v25400_v59 = vpop.f32.mrf.mxu1  ;;  %26530 = vxpose.xlu0.b32.cont [5/16] (narrow) %v26529_v18, 8  ;;  %v33726_v40 = vld [vmem:[#allocation277_spill] sm:$0xff] }
 0xc1f   : > { %v11138_v26 = vpop.f32.mrf.mxu0 }
 0xc20   : > { %v11217_v27 = vpop.f32.mrf.mxu1  ;;  %26532 = vxpose.xlu0.b32.cont [6/16] (narrow) %v26531_v53, 8  ;;  %v26533_v24 = vpack.i.bf16 %v11138_v26, %v33720_v32  ;;  %v33727_v26 = vld [vmem:[#allocation278_spill] sm:$0xff] }
 0xc21   : > { %v25407_v28 = vpop.f32.mrf.mxu0  ;;  %v26535_v6 = vpack.i.bf16 %v11217_v27, %v33721_v2  ;;  %v398_v2 = vld [vmem:[%s32780_s4 + $0x70] sm:$0xff] }
 0xc22   : > { %v25414_v46 = vpop.f32.mrf.mxu1  ;;  %v33728_v28 = vld [vmem:[#allocation279_spill] sm:$0xff] }
 0xc24   : > { %26534 = vxpose.xlu0.b32.cont [7/16] (narrow) %v26533_v24, 8  ;;  %v33729_v24 = vld [vmem:[#allocation280_spill] sm:$0xff] }
 0xc25   : > { %v11296_v38 = vpop.f32.mrf.mxu0 }
 0xc26   : > { %v11375_v22 = vpop.f32.mrf.mxu1  ;;  %v26537_v14 = vpack.i.bf16 %v11296_v38, %v33722_v25  ;;  %v396_v38 = vld [vmem:[%s32780_s4 + $0x60] sm:$0xff]  ;;  %v414_v25 = vld [vmem:[%s32780_s4 + $0xf0] sm:$0xff] }
 0xc27   : > { %v25421_v12 = vpop.f32.mrf.mxu0  ;;  %v26539_v19 = vpack.i.bf16 %v11375_v22, %v33723_v52  ;;  %v426_v22 = vld [vmem:[%s32780_s4 + $0x150] sm:$0xff] }
 0xc28   : > { %v25428_v23 = vpop.f32.mrf.mxu1  ;;  %26536 = vxpose.xlu0.b32.cont [8/16] (narrow) %v26535_v6, 8  ;;  %v422_v6 = vld [vmem:[%s32780_s4 + $0x130] sm:$0xff]  ;;  %v420_v12 = vld [vmem:[%s32780_s4 + $0x120] sm:$0xff] }
 0xc29   : > { %v424_v23 = vld [vmem:[%s32780_s4 + $0x140] sm:$0xff] }
 0xc2b   : > { %v11454_v0 = vpop.f32.mrf.mxu0 }
 0xc2c   : > { %v11533_v35 = vpop.f32.mrf.mxu1  ;;  %26538 = vxpose.xlu0.b32.cont [9/16] (narrow) %v26537_v14, 8  ;;  %v26541_v42 = vpack.i.bf16 %v11454_v0, %v33724_v29  ;;  %v26594_v14 = vunpack.i.h.bf16 %v30419_v30  ;;  %v26591_v0 = vunpack.i.l.bf16 %v30419_v30  ;;  %v410_v29 = vld [vmem:[%s32780_s4 + $0xd0] sm:$0xff]  ;;  %v26684_v30 = vld [vmem:[%s32778_s2 + $0x38] sm:$0xff]  }
 0xc2d   : > { %v25435_v13 = vpop.f32.mrf.mxu0  ;;  %v26543_v50 = vpack.i.bf16 %v11533_v35, %v33725_v5  ;;  %v400_v5 = vld [vmem:[%s32780_s4 + $0x80] sm:$0xff] }
 0xc2e   : > { %v25442_v57 = vpop.f32.mrf.mxu1 }
 0xc30   : > { %26540 = vxpose.xlu0.b32.cont [10/16] (narrow) %v26539_v19, 8  ;;  %v412_v19 = vld [vmem:[%s32780_s4 + $0xe0] sm:$0xff] }
 0xc31   : > { %v11612_v4 = vpop.f32.mrf.mxu0 }
 0xc32   : > { %v26545_v59 = vpack.i.bf16 %v11612_v4, %v33726_v40  ;;  %v11885_v4 = vpack.c.bf16 %v26594_v14, %v26591_v0 }
 0xc33   : > { %v25449_v33 = vpop.f32.mrf.mxu0 }
 0xc34   : > { %26542 = vxpose.xlu0.b32.cont [11/16] (narrow) %v26541_v42, 8  ;;  %v408_v42 = vld [vmem:[%s32780_s4 + $0xc0] sm:$0xff]  ;;  %v406_v33 = vld [vmem:[%s32780_s4 + $0xb0] sm:$0xff] }
 0xc35   : > { %v11691_v54 = vpop.f32.mrf.mxu1  ;;  %v11770_v51 = vpop.f32.mrf.mxu0 }
 0xc36   : > { %v26547_v27 = vpack.i.bf16 %v11691_v54, %v33727_v26  ;;  %v26549_v32 = vpack.i.bf16 %v11770_v51, %v33728_v28  ;;  %v404_v54 = vld [vmem:[%s32780_s4 + $0xa0] sm:$0xff]  ;;  %v402_v51 = vld [vmem:[%s32780_s4 + $0x90] sm:$0xff] }
 0xc37   : > { %v25456_v7 = vpop.f32.mrf.mxu1  ;;  %v25463_v18 = vpop.f32.mrf.mxu0 }
 0xc38   : > { %26544 = vxpose.xlu0.b32.cont [12/16] (narrow) %v26543_v50, 8  ;;  %v416_v50 = vld [vmem:[%s32780_s4 + $0x100] sm:$0xff]  ;;  %v418_v7 = vld [vmem:[%s32780_s4 + $0x110] sm:$0xff] }
 0xc39   : > { %v11849_v31 = vpop.f32.mrf.mxu1  ;;  %v26685_v18 = vld [vmem:[%s32778_s2 + $0x40] sm:$0xff]  }
 0xc3a   : > { %v26551_v46 = vpack.i.bf16 %v11849_v31, %v33729_v24  ;;  %25483 = vmatprep.mubr.msk.bf16.mxu1 %vm516_vm0, %v26685_v18 }
 0xc3b   : > { %v25470_v53 = vpop.f32.mrf.mxu1 }
 0xc3c   : > { %26546 = vxpose.xlu0.b32.cont [13/16] (narrow) %v26545_v59, 8  ;;  %v30525_v53 = vpop.permute.xlu1 %11894 }
 0xc3d   : > { %33731 = vst [vmem:[#allocation118_spill] sm:$0xff] %v30525_v53 }
 0xc40   : > { %26548 = vxpose.xlu0.b32.cont [14/16] (narrow) %v26547_v27, 8 }
 0xc44   : > { %26550 = vxpose.xlu0.b32.cont [15/16] (narrow) %v26549_v32, 8 }
 0xc48   : > { %26552 = vxpose.xlu0.b32.end [16/16] (narrow) %v26551_v46, 8 }
 0xc71   : > { %11889 = vperm.xlu0 %26519, %v396_v38  }
 0xc75   : > { %11899 = vperm.xlu0 %26519, %v398_v2   ;;  %v30532_v2 = vpop.permute.xlu1 %11904 }
 0xc76   : > { %33733 = vst [vmem:[#allocation119_spill] sm:$0xff] %v30532_v2 }
 0xc79   : > { %12019 = vperm.xlu0 %26519, %v422_v6  }
 0xc7d   : > { %12043 = vperm.xlu0 %26519, %v426_v22  }
 0xc81   : > { %12009 = vperm.xlu0 %26519, %v420_v12  }
 0xc85   : > { %12033 = vperm.xlu0 %26519, %v424_v23  }
 0xc88   : > { %v26553_v35 = vpop.trf.xlu0 }
 0xc89   : > { %12129 = vperm.xlu0 %26519, %v414_v25   ;;  %v26557_v13 = vunpack.i.h.bf16 %v26553_v35  ;;  %v26554_v52 = vunpack.i.l.bf16 %v26553_v35 }
 0xc8b   : > { %v11886_v57 = vpack.c.bf16 %v26557_v13, %v26554_v52 }
 0xc8d   : > { %12119 = vperm.xlu0 %26519, %v412_v19   ;;  %25471 = vmatprep.subr.bf16.mxu0 %v11886_v57 }
 0xc8e   : > { %25472 = vmatpush3.bf16.msra.mxu0 %v11886_v57 }
 0xc8f   : > { %25473 = vmatprep.subr.bf16.mxu0 %v11885_v4 }
 0xc91   : > { %12109 = vperm.xlu0 %26519, %v410_v29  }
 0xc92   : > { %25474 = vmatpush3.bf16.msra.mxu0 %v11885_v4 }
 0xc95   : > { %12099 = vperm.xlu0 %26519, %v408_v42   ;;  %25476 = vmatmul.mubr.msk.bf16.vlgmr.msra.gmra.mxu0 %vm516_vm0, %v26684_v30 }
 0xc99   : > { %12089 = vperm.xlu0 %26519, %v406_v33  }
 0xc9d   : > { %12079 = vperm.xlu0 %26519, %v404_v54  }
 0xca1   : > { %12069 = vperm.xlu0 %26519, %v402_v51  }
 0xca5   : > { %12059 = vperm.xlu0 %26519, %v400_v5  }
 0xca9   : > { %12324 = vperm.xlu0 %26519, %v416_v50  }
 0xcad   : > { %12334 = vperm.xlu0 %26519, %v418_v7  }
 0xcec   : > { %v30523_v40 = vpop.permute.xlu0 %11889 }
 0xced   : > { %33730 = vst [vmem:[#allocation195_spill] sm:$0xff] %v30523_v40 }
 0xcf0   : > { %v30529_v24 = vpop.permute.xlu0 %11899 }
 0xcf1   : > { %33732 = vst [vmem:[#allocation196_spill] sm:$0xff] %v30529_v24 }
 0xd55   : > { %v25477_v31 = vpop.f32.mrf.mxu0 }
 0xd56   : > { %v11966_v46 = vadd.f32 %v25477_v31, %v30529_v24 }
 0xd57   : > { %v11957_v59 = vpop.f32.mrf.mxu0 }
 0xd58   : > { %v11958_v28 = vadd.f32 %v11957_v59, %v30523_v40 }
 0xd59   : > { %v25478_v26 = vpop.f32.mrf.mxu0 }
 0xd5a   : > { %v11969_v6 = vadd.f32 %v25478_v26, %v30532_v2 }
 0xd5b   : > { %v11960_v27 = vpop.f32.mrf.mxu0 }
 0xd5c   : > { %v11961_v32 = vadd.f32 %v11960_v27, %v30525_v53 }
 0xd5e   : > { %v11972_v38 = vadd.f32 %v11961_v32, %v11958_v28 }
 0xd60   : > { %v11973_v22 = vadd.f32 %v11972_v38, %v11966_v46 }
 0xd62   : > { %v11974_v12 = vadd.f32 %v11973_v22, %v11969_v6 }
 0xd64   : > { %v11975_v23 = vrot.slane %v11974_v12, 4 }
 0xd66   : > { %v11976_v25 = vadd.f32 %v11975_v23, %v11974_v12  ;;  %v30535_v12 = vpop.permute.xlu1 %12024 }
 0xd67   : > { %33734 = vst [vmem:[#allocation197_spill] sm:$0xff] %v30535_v12 }
 0xd68   : > { %v11977_v14 = vrot.slane %v11976_v25, 2 }
 0xd6a   : > { %v11978_v0 = vadd.f32 %v11977_v14, %v11976_v25 }
 0xd6c   : > { %v11979_v35 = vrot.slane %v11978_v0, 1 }
 0xd6e   : > { %v11980_v13 = vadd.f32 %v11979_v35, %v11978_v0 }
 0xd70   : > { %v11982_v52 = vmul.f32 0.03125, %v11980_v13 }
 0xd72   : > { %v11983_v19 = vsub.f32 %v11958_v28, %v11982_v52  ;;  %v11984_v57 = vsub.f32 %v11961_v32, %v11982_v52  ;;  %v11985_v4 = vsub.f32 %v11966_v46, %v11982_v52  ;;  %v11986_v29 = vsub.f32 %v11969_v6, %v11982_v52  ;;  %v30537_v28 = vpop.permute.xlu0 %12019  ;;  %v30539_v32 = vpop.permute.xlu1 %12048 }
 0xd73   : > { %33735 = vst [vmem:[#allocation120_spill] sm:$0xff] %v30537_v28  ;;  %33736 = vst [vmem:[#allocation198_spill] sm:$0xff] %v30539_v32 }
 0xd74   : > { %v11987_v30 = vmul.f32 %v11983_v19, %v11983_v19  ;;  %v11988_v42 = vmul.f32 %v11984_v57, %v11984_v57  ;;  %v11989_v33 = vmul.f32 %v11985_v4, %v11985_v4  ;;  %v11990_v51 = vmul.f32 %v11986_v29, %v11986_v29 }
 0xd76   : > { %v11991_v54 = vadd.f32 %v11988_v42, %v11987_v30  ;;  %v30541_v46 = vpop.permute.xlu0 %12043  ;;  %v30543_v6 = vpop.permute.xlu1 %12014 }
 0xd77   : > { %33737 = vst [vmem:[#allocation121_spill] sm:$0xff] %v30541_v46  ;;  %33738 = vst [vmem:[#allocation203_spill] sm:$0xff] %v30543_v6 }
 0xd78   : > { %v11992_v5 = vadd.f32 %v11991_v54, %v11989_v33 }
 0xd7a   : > { %v11993_v50 = vadd.f32 %v11992_v5, %v11990_v51  ;;  %v30545_v23 = vpop.permute.xlu0 %12009  ;;  %v30551_v54 = vpop.permute.xlu1 %12038 }
 0xd7b   : > { %33739 = vst [vmem:[#allocation122_spill] sm:$0xff] %v30545_v23  ;;  %33740 = vst [vmem:[#allocation199_spill] sm:$0xff] %v30551_v54 }
 0xd7c   : > { %v11994_v7 = vrot.slane %v11993_v50, 4 }
 0xd7e   : > { %v11995_v18 = vadd.f32 %v11994_v7, %v11993_v50  ;;  %v30553_v51 = vpop.permute.xlu0 %12033  ;;  %v26686_v7 = vld [vmem:[%s32778_s2 + $0x48] sm:$0xff]  }
 0xd7f   : > { %33741 = vst [vmem:[#allocation123_spill] sm:$0xff] %v30553_v51 }
 0xd80   : > { %v11996_v31 = vrot.slane %v11995_v18, 2 }
 0xd82   : > { %v11997_v59 = vadd.f32 %v11996_v31, %v11995_v18  ;;  %v26687_v18 = vld [vmem:[%s32778_s2 + $0x50] sm:$0xff]   ;;  %v26688_v31 = vld [vmem:[%s32778_s2 + $0x58] sm:$0xff]  }
 0xd84   : > { %v11998_v26 = vrot.slane %v11997_v59, 1 }
 0xd86   : > { %v11999_v27 = vadd.f32 %v11998_v26, %v11997_v59  ;;  %v26689_v59 = vld [vmem:[%s32778_s2 + $0x60] sm:$0xff]   ;;  %v26690_v26 = vld [vmem:[%s32778_s2 + $0x68] sm:$0xff]  }
 0xd88   : > { %v12000_v38 = vmul.f32 0.03125, %v11999_v27  ;;  %v26691_v27 = vld [vmem:[%s32778_s2 + $0x70] sm:$0xff]  }
 0xd8a   : > { %v12001_v22 = vadd.f32 1e-05, %v12000_v38  ;;  %v26692_v38 = vld [vmem:[%s32778_s2 + $0x78] sm:$0xff]  }
 0xd8c   : > { %26951 = vrsqrt.f32 %v12001_v22  ;;  %v27215_v22 = vld [vmem:[%s32778_s2] sm:$0xff]  }
 0xd99   : > { %v26952_v25 = vpop.eup %26951 }
 0xd9a   : > { %v12004_v14 = vmul.f32 %v26952_v25, %v11984_v57  ;;  %v12005_v0 = vmul.f32 %v26952_v25, %v11985_v4  ;;  %v12006_v35 = vmul.f32 %v26952_v25, %v11986_v29  ;;  %v12003_v13 = vmul.f32 %v26952_v25, %v11983_v19  ;;  %v26693_v25 = vld [vmem:[%s32779_s3] sm:$0xff]  }
 0xd9b   : > { %25515 = vmatprep.mubr.bf16.mxu0 %v26693_v25 }
 0xd9c   : > { %v12028_v52 = vmul.f32 %v30543_v6, %v12004_v14  ;;  %v12029_v30 = vmul.f32 %v30537_v28, %v12005_v0  ;;  %v12030_v42 = vmul.f32 %v30535_v12, %v12006_v35  ;;  %v12027_v33 = vmul.f32 %v30545_v23, %v12003_v13 }
 0xd9e   : > { %v12053_v5 = vadd.f32 %v30541_v46, %v12029_v30  ;;  %v12054_v50 = vadd.f32 %v30539_v32, %v12030_v42  ;;  %v12051_v57 = vadd.f32 %v30553_v51, %v12027_v33  ;;  %v12052_v19 = vadd.f32 %v30551_v54, %v12028_v52  ;;  %v30600_v52 = vpop.permute.xlu1 %12134  ;;  %v30602_v42 = vpop.permute.xlu0 %12129 }
 0xd9f   : > { %33742 = vst [vmem:[#allocation204_spill] sm:$0xff] %v30600_v52  ;;  %33743 = vst [vmem:[#allocation124_spill] sm:$0xff] %v30602_v42 }
 0xda0   : > { %v12056_v4 = vpack.c.bf16 %v12054_v50, %v12053_v5  ;;  %v12055_v29 = vpack.c.bf16 %v12052_v19, %v12051_v57 }
 0xda2   : > { %25479 = vmatprep.subr.bf16.mxu1 %v12056_v4  ;;  %v30604_v50 = vpop.permute.xlu1 %12124  ;;  %v30606_v19 = vpop.permute.xlu0 %12119 }
 0xda3   : > { %25480 = vmatpush3.bf16.msra.mxu1 %v12056_v4  ;;  %33744 = vst [vmem:[#allocation200_spill] sm:$0xff] %v30604_v50  ;;  %33745 = vst [vmem:[#allocation125_spill] sm:$0xff] %v30606_v19 }
 0xda4   : > { %25481 = vmatprep.subr.bf16.mxu1 %v12055_v29 }
 0xda7   : > { %25482 = vmatpush3.bf16.msra.mxu1 %v12055_v29 }
 0xdaa   : > { %25484 = vmatmul.mubr.msk.bf16.vlgmr.msra.gmra.mxu1 %vm516_vm0, %v26686_v7  ;;  %v30608_v7 = vpop.permute.xlu1 %12114 }
 0xdab   : > { %25487 = vmatprep.mubr.msk.bf16.mxu1 %vm516_vm0, %v26687_v18  ;;  %33746 = vst [vmem:[#allocation205_spill] sm:$0xff] %v30608_v7 }
 0xdb2   : > { %25488 = vmatmul.mubr.msk.bf16.gmra.mxu1 %vm516_vm0, %v26688_v31  ;;  %v30610_v31 = vpop.permute.xlu0 %12109 }
 0xdb3   : > { %25491 = vmatprep.mubr.msk.bf16.mxu1 %vm516_vm0, %v26689_v59  ;;  %33747 = vst [vmem:[#allocation126_spill] sm:$0xff] %v30610_v31 }
 0xdb6   : > { %v30615_v25 = vpop.permute.xlu0 %12099 }
 0xdb7   : > { %33749 = vst [vmem:[#allocation127_spill] sm:$0xff] %v30615_v25 }
 0xdba   : > { %25492 = vmatmul.mubr.msk.bf16.gmra.mxu1 %vm516_vm0, %v26690_v26  ;;  %v30624_v39 = vpop.permute.xlu0 %12089 }
 0xdbb   : > { %25495 = vmatprep.mubr.msk.bf16.mxu1 %vm516_vm0, %v26691_v27  ;;  %v30612_v27 = vpop.permute.xlu1 %12104  ;;  %33751 = vst [vmem:[#allocation128_spill] sm:$0xff] %v30624_v39 }
 0xdbc   : > { %33748 = vst [vmem:[#allocation201_spill] sm:$0xff] %v30612_v27 }
 0xdbf   : > { %v30621_v55 = vpop.permute.xlu1 %12094 }
 0xdc0   : > { %33750 = vst [vmem:[#allocation206_spill] sm:$0xff] %v30621_v55 }
 0xdc2   : > { %25496 = vmatmul.mubr.msk.bf16.gmra.mxu1 %vm516_vm0, %v26692_v38 }
 0xdc3   : > { %25523 = vmatprep.mubr.msk.bf16.mxu1 %vm516_vm0, %v27215_v22 }
 0xe6a   : > { %v30594_v14 = vpop.f32.mrf.mxu1 }
 0xe6c   : > { %v30596_v0 = vpop.f32.mrf.mxu1 }
 0xe6e   : > { %v25486_v35 = vpop.f32.mrf.mxu1 }
 0xe70   : > { %v30598_v13 = vpop.f32.mrf.mxu1 }
 0xe72   : > { %v25489_v30 = vpop.f32.mrf.mxu1 }
 0xe74   : > { %v12251_v33 = vpop.f32.mrf.mxu1 }
 0xe76   : > { %v25490_v5 = vpop.f32.mrf.mxu1 }
 0xe78   : > { %v12254_v57 = vpop.f32.mrf.mxu1 }
 0xe7a   : > { %v25493_v4 = vpop.f32.mrf.mxu1 }
 0xe7b   : > { %v12276_v34 = vadd.f32 %v25493_v4, %v30610_v31 }
 0xe7c   : > { %v12267_v29 = vpop.f32.mrf.mxu1 }
 0xe7e   : > { %v25494_v18 = vpop.f32.mrf.mxu1 }
 0xe7f   : > { %v12279_v8 = vadd.f32 %v25494_v18, %v30608_v7  ;;  %v12308_v18 = vmax.f32 %v12276_v34, 0.0 }
 0xe80   : > { %v12270_v59 = vpop.f32.mrf.mxu1 }
 0xe81   : > { %v12309_v3 = vmax.f32 %v12279_v8, 0.0 }
 0xe82   : > { %v25497_v26 = vpop.f32.mrf.mxu1 }
 0xe83   : > { %v12292_v22 = vadd.f32 %v25497_v26, %v30602_v42  ;;  %v12319_v4 = vpack.c.bf16 %v12309_v3, %v12308_v18 }
 0xe84   : > { %v12283_v38 = vpop.f32.mrf.mxu1 }
 0xe85   : > { %v12284_v24 = vadd.f32 %v12283_v38, %v30606_v19  ;;  %v12312_v61 = vmax.f32 %v12292_v22, 0.0  ;;  %v12271_v38 = vadd.f32 %v12270_v59, %v30612_v27  ;;  %v12263_v22 = vadd.f32 %v25490_v5, %v30621_v55 }
 0xe86   : > { %v25498_v2 = vpop.f32.mrf.mxu1 }
 0xe87   : > { %v12295_v53 = vadd.f32 %v25498_v2, %v30600_v52  ;;  %v12310_v36 = vmax.f32 %v12284_v24, 0.0  ;;  %v12307_v24 = vmax.f32 %v12271_v38, 0.0  ;;  %v12305_v8 = vmax.f32 %v12263_v22, 0.0 }
 0xe88   : > { %v12286_v40 = vpop.f32.mrf.mxu1 }
 0xe89   : > { %v12313_v49 = vmax.f32 %v12295_v53, 0.0  ;;  %v12287_v15 = vadd.f32 %v12286_v40, %v30604_v50  ;;  %v12268_v53 = vadd.f32 %v12267_v29, %v30615_v25  ;;  %v30628_v40 = vpop.permute.xlu1 %12084 }
 0xe8a   : > { %33752 = vst [vmem:[#allocation202_spill] sm:$0xff] %v30628_v40 }
 0xe8b   : > { %v12321_v26 = vpack.c.bf16 %v12313_v49, %v12312_v61  ;;  %v12311_v42 = vmax.f32 %v12287_v15, 0.0  ;;  %v30631_v49 = vpop.permute.xlu0 %12079  ;;  %v12260_v15 = vadd.f32 %v25489_v30, %v30624_v39  ;;  %v12306_v61 = vmax.f32 %v12268_v53, 0.0 }
 0xe8c   : > { %33753 = vst [vmem:[#allocation129_spill] sm:$0xff] %v30631_v49  ;;  %v12252_v59 = vadd.f32 %v12251_v33, %v30631_v49 }
 0xe8d   : > { %25499 = vmatprep.subr.bf16.mxu0 %v12321_v26  ;;  %v12320_v2 = vpack.c.bf16 %v12311_v42, %v12310_v36  ;;  %v12255_v36 = vadd.f32 %v12254_v57, %v30628_v40  ;;  %v12318_v34 = vpack.c.bf16 %v12307_v24, %v12306_v61  ;;  %v30635_v42 = vpop.permute.xlu1 %12074  ;;  %v12304_v29 = vmax.f32 %v12260_v15, 0.0 }
 0xe8e   : > { %25500 = vmatpush3.bf16.msra.mxu0 %v12321_v26  ;;  %33754 = vst [vmem:[#allocation207_spill] sm:$0xff] %v30635_v42  ;;  %v12247_v5 = vadd.f32 %v25486_v35, %v30635_v42 }
 0xe8f   : > { %25501 = vmatprep.subr.bf16.mxu0 %v12320_v2  ;;  %v30638_v3 = vpop.permute.xlu0 %12069  ;;  %v12317_v26 = vpack.c.bf16 %v12305_v8, %v12304_v29  ;;  %v12303_v38 = vmax.f32 %v12255_v36, 0.0  ;;  %v33758_v8 = vld [vmem:[#allocation12_spill] sm:$0xff] }
 0xe90   : > { %33755 = vst [vmem:[#allocation130_spill] sm:$0xff] %v30638_v3  ;;  %v12244_v30 = vadd.f32 %v30594_v14, %v30638_v3  ;;  %v12301_v18 = vmax.f32 %v12247_v5, 0.0 }
 0xe91   : > { %v30643_v57 = vpop.permute.xlu1 %12064 }
 0xe92   : > { %25502 = vmatpush3.bf16.msra.mxu0 %v12320_v2  ;;  %v12302_v2 = vmax.f32 %v12252_v59, 0.0  ;;  %33756 = vst [vmem:[#allocation208_spill] sm:$0xff] %v30643_v57  ;;  %v12239_v53 = vadd.f32 %v30598_v13, %v30643_v57  ;;  %v26694_v13 = vld [vmem:[%s32779_s3 + $0x8] sm:$0xff]  }
 0xe93   : > { %25503 = vmatprep.subr.bf16.mxu0 %v12319_v4  ;;  %v30647_v22 = vpop.permute.xlu0 %12059 }
 0xe94   : > { %v12316_v33 = vpack.c.bf16 %v12303_v38, %v12302_v2  ;;  %33757 = vst [vmem:[#allocation132_spill] sm:$0xff] %v30647_v22  ;;  %v12236_v35 = vadd.f32 %v30596_v0, %v30647_v22  ;;  %v12299_v15 = vmax.f32 %v12239_v53, 0.0  ;;  %v33759_v0 = vld [vmem:[#allocation11_spill] sm:$0xff] }
 0xe95   : > { %v30665_v59 = vpop.permute.xlu1 %12329 }
 0xe96   : > { %25504 = vmatpush3.bf16.msra.mxu0 %v12319_v4  ;;  %v12300_v4 = vmax.f32 %v12244_v30, 0.0  ;;  %v12298_v14 = vmax.f32 %v12236_v35, 0.0  ;;  %33761 = vst [vmem:[#allocation271_spill] sm:$0xff] %v30665_v59 }
 0xe97   : > { %25505 = vmatprep.subr.bf16.mxu0 %v12318_v34 }
 0xe98   : > { %v12315_v24 = vpack.c.bf16 %v12301_v18, %v12300_v4  ;;  %v12314_v61 = vpack.c.bf16 %v12299_v15, %v12298_v14 }
 0xe9a   : > { %25506 = vmatpush3.bf16.msra.mxu0 %v12318_v34  ;;  %v30663_v34 = vpop.permute.xlu0 %12324 }
 0xe9b   : > { %25507 = vmatprep.subr.bf16.mxu0 %v12317_v26  ;;  %33760 = vst [vmem:[#allocation209_spill] sm:$0xff] %v30663_v34 }
 0xe9e   : > { %25508 = vmatpush3.bf16.msra.mxu0 %v12317_v26  ;;  %v30669_v2 = vpop.permute.xlu0 %12334 }
 0xe9f   : > { %25509 = vmatprep.subr.bf16.mxu0 %v12316_v33  ;;  %33762 = vst [vmem:[#allocation272_spill] sm:$0xff] %v30669_v2 }
 0xea2   : > { %25510 = vmatpush3.bf16.msra.mxu0 %v12316_v33  ;;  %v30672_v33 = vpop.permute.xlu1 %12339 }
 0xea3   : > { %25511 = vmatprep.subr.bf16.mxu0 %v12315_v24  ;;  %33763 = vst [vmem:[#allocation273_spill] sm:$0xff] %v30672_v33 }
 0xea6   : > { %25512 = vmatpush3.bf16.msra.mxu0 %v12315_v24 }
 0xea7   : > { %25513 = vmatprep.subr.bf16.mxu0 %v12314_v61 }
 0xeaa   : > { %25514 = vmatpush3.bf16.msra.mxu0 %v12314_v61 }
 0xeab   : > { %25527 = vmatprep.subr.mxu0 %v33198_v17 }
 0xead   : > { %25516 = vmatmul.mubr.bf16.vlgmr.msra.gmra.mxu0 %v26694_v13 }
 0xeae   : > { %25528 = vmatpush3.xpose.msk.msra.mxu0 %vm859_vm2, %v33758_v8  ;;  %25531 = vmatprep.mubr.msk.f32.mxu0 %vm27293_vm1, %v33198_v17 }
 0xeaf   : > { %25529 = vmatprep.subr.mxu0 %v33198_v17 }
 0xeb2   : > { %25530 = vmatpush3.xpose.msk.msra.mxu0 %vm859_vm2, %v33759_v0 }
 0xeb3   : > { %25541 = vmatprep.subr.mxu0 %v33198_v17 }
 0xf6d   : > { %v25517_v36 = vpop.f32.mrf.mxu0 }
 0xf6e   : > { %v12397_v18 = vadd.f32 %v25517_v36, %v30669_v2 }
 0xf6f   : > { %v12388_v29 = vpop.f32.mrf.mxu0 }
 0xf70   : > { %v12389_v38 = vadd.f32 %v12388_v29, %v30663_v34 }
 0xf71   : > { %v25518_v5 = vpop.f32.mrf.mxu0 }
 0xf72   : > { %v12400_v4 = vadd.f32 %v25518_v5, %v30672_v33 }
 0xf73   : > { %v12391_v26 = vpop.f32.mrf.mxu0 }
 0xf74   : > { %v12392_v30 = vadd.f32 %v12391_v26, %v30665_v59 }
 0xf76   : > { %v12403_v53 = vadd.f32 %v12392_v30, %v12389_v38 }
 0xf78   : > { %v12404_v35 = vadd.f32 %v12403_v53, %v12397_v18 }
 0xf7a   : > { %v12405_v24 = vadd.f32 %v12404_v35, %v12400_v4 }
 0xf7c   : > { %v12406_v15 = vrot.slane %v12405_v24, 4 }
 0xf7e   : > { %v12407_v14 = vadd.f32 %v12406_v15, %v12405_v24 }
 0xf80   : > { %v12408_v61 = vrot.slane %v12407_v14, 2 }
 0xf82   : > { %v12409_v13 = vadd.f32 %v12408_v61, %v12407_v14 }
 0xf84   : > { %v12410_v8 = vrot.slane %v12409_v13, 1 }
 0xf86   : > { %v12411_v0 = vadd.f32 %v12410_v8, %v12409_v13 }
 0xf88   : > { %v12412_v29 = vmul.f32 0.03125, %v12411_v0 }
 0xf8a   : > { %v12413_v34 = vsub.f32 %v12389_v38, %v12412_v29  ;;  %v12414_v26 = vsub.f32 %v12392_v30, %v12412_v29  ;;  %v12415_v59 = vsub.f32 %v12397_v18, %v12412_v29  ;;  %v12416_v22 = vsub.f32 %v12400_v4, %v12412_v29 }
 0xf8c   : > { %v12417_v57 = vmul.f32 %v12413_v34, %v12413_v34  ;;  %v12418_v36 = vmul.f32 %v12414_v26, %v12414_v26  ;;  %v12419_v2 = vmul.f32 %v12415_v59, %v12415_v59  ;;  %v12420_v42 = vmul.f32 %v12416_v22, %v12416_v22 }
 0xf8e   : > { %v12421_v3 = vadd.f32 %v12418_v36, %v12417_v57  ;;  %v33765_v36 = vld [vmem:[#allocation13_spill] sm:$0xff] }
 0xf90   : > { %v12422_v49 = vadd.f32 %v12421_v3, %v12419_v2 }
 0xf92   : > { %v12423_v5 = vadd.f32 %v12422_v49, %v12420_v42 }
 0xf94   : > { %v12424_v53 = vrot.slane %v12423_v5, 4 }
 0xf96   : > { %v12425_v35 = vadd.f32 %v12424_v53, %v12423_v5 }
 0xf98   : > { %v12426_v33 = vrot.slane %v12425_v35, 2 }
 0xf9a   : > { %v12427_v24 = vadd.f32 %v12426_v33, %v12425_v35  ;;  %v33766_v35 = vld [vmem:[#allocation7_spill] sm:$0xff] }
 0xf9c   : > { %v12428_v15 = vrot.slane %v12427_v24, 1 }
 0xf9e   : > { %v12429_v14 = vadd.f32 %v12428_v15, %v12427_v24 }
 0xfa0   : > { %v12430_v61 = vmul.f32 0.03125, %v12429_v14 }
 0xfa2   : > { %v12431_v13 = vadd.f32 1e-05, %v12430_v61  ;;  %v33767_v61 = vld [vmem:[#allocation8_spill] sm:$0xff] }
 0xfa4   : > { %26953 = vrsqrt.f32 %v12431_v13 }
 0xfb1   : > { %v26954_v38 = vpop.eup %26953 }
 0xfb2   : > { %v12434_v30 = vmul.f32 %v26954_v38, %v12414_v26  ;;  %v12435_v18 = vmul.f32 %v26954_v38, %v12415_v59  ;;  %v12436_v4 = vmul.f32 %v26954_v38, %v12416_v22  ;;  %v12433_v8 = vmul.f32 %v26954_v38, %v12413_v34  ;;  %v27216_v34 = vld [vmem:[%s32778_s2 + $0x8] sm:$0xff]   ;;  %v33764_v59 = vld [vmem:[#allocation15_spill] sm:$0xff]  ;;  %v33768_v38 = vld [vmem:[#allocation9_spill] sm:$0xff] }
 0xfb4   : > { %v12438_v0 = vmul.f32 %v12434_v30, %v30543_v6  ;;  %v12439_v57 = vmul.f32 %v12435_v18, %v30537_v28  ;;  %v12440_v49 = vmul.f32 %v12436_v4, %v30535_v12  ;;  %v12437_v42 = vmul.f32 %v12433_v8, %v30545_v23  ;;  %v33769_v18 = vld [vmem:[#allocation10_spill] sm:$0xff] }
 0xfb6   : > { %v12443_v3 = vadd.f32 %v12439_v57, %v30541_v46  ;;  %v12444_v2 = vadd.f32 %v12440_v49, %v30539_v32  ;;  %v12441_v33 = vadd.f32 %v12437_v42, %v30553_v51  ;;  %v12442_v29 = vadd.f32 %v12438_v0, %v30551_v54  ;;  %v33770_v0 = vld [vmem:[#allocation18_spill] sm:$0xff]  ;;  %v33771_v49 = vld [vmem:[#allocation16_spill] sm:$0xff]  ;;  %v33772_v42 = vld [vmem:[#allocation21_spill] sm:$0xff] }
 0xfb8   : > { %v12446_v26 = vpack.c.bf16 %v12444_v2, %v12443_v3  ;;  %v12445_v22 = vpack.c.bf16 %v12442_v29, %v12441_v33  ;;  %v33773_v2 = vld [vmem:[#allocation19_spill] sm:$0xff]  ;;  %v33774_v33 = vld [vmem:[#allocation24_spill] sm:$0xff] }
 0xfba   : > { %25519 = vmatprep.subr.bf16.mxu1 %v12446_v26 }
 0xfbb   : > { %25520 = vmatpush3.bf16.msra.mxu1 %v12446_v26  ;;  %v33775_v26 = vld [vmem:[#allocation22_spill] sm:$0xff] }
 0xfbc   : > { %25521 = vmatprep.subr.bf16.mxu1 %v12445_v22 }
 0xfbf   : > { %25522 = vmatpush3.bf16.msra.mxu1 %v12445_v22  ;;  %v33776_v22 = vld [vmem:[#allocation26_spill] sm:$0xff] }
 0xfc0   : > { %25534 = vmatprep.subr.mxu1 %v33198_v17 }
 0xfc2   : > { %25524 = vmatmul.mubr.msk.bf16.vlgmr.msra.gmra.mxu1 %vm516_vm0, %v27216_v34 }
 0xfc3   : > { %25535 = vmatpush3.xpose.msk.msra.mxu1 %vm859_vm2, %v33764_v59  ;;  %25538 = vmatprep.mubr.msk.f32.mxu1 %vm27293_vm1, %v33198_v17  ;;  %v33777_v59 = vld [vmem:[#allocation25_spill] sm:$0xff] }
 0xfc4   : > { %25536 = vmatprep.subr.mxu1 %v33198_v17 }
 0xfc7   : > { %25537 = vmatpush3.xpose.msk.msra.mxu1 %vm859_vm2, %v33765_v36  ;;  %v33778_v36 = vld [vmem:[#allocation28_spill] sm:$0xff] }
 0xfc8   : > { %25548 = vmatprep.subr.mxu1 %v33198_v17 }
0x1082   : > { %v25525_v5 = vpop.f32.mrf.mxu1 }
0x1083   : > { %v12490_v30 = vadd.f32 %v25525_v5, %v33768_v38  ;;  %v33784_v38 = vld [vmem:[#allocation34_spill] sm:$0xff] }
0x1084   : > { %v12481_v53 = vpop.f32.mrf.mxu1 }
0x1085   : > { %v12482_v24 = vadd.f32 %v12481_v53, %v33766_v35  ;;  %v33779_v53 = vld [vmem:[#allocation27_spill] sm:$0xff]  ;;  %v33780_v35 = vld [vmem:[#allocation30_spill] sm:$0xff] }
0x1086   : > { %v25526_v15 = vpop.f32.mrf.mxu1 }
0x1087   : > { %12496 = vxpose.xlu0.b32.start [1/4] (short) %v12482_v24, 128  ;;  %v12493_v4 = vadd.f32 %v25526_v15, %v33769_v18  ;;  %v33781_v15 = vld [vmem:[#allocation29_spill] sm:$0xff] }
0x1088   : > { %v12484_v14 = vpop.f32.mrf.mxu1  ;;  %v33785_v18 = vld [vmem:[#allocation33_spill] sm:$0xff] }
0x1089   : > { %v12485_v13 = vadd.f32 %v12484_v14, %v33767_v61  ;;  %v33782_v14 = vld [vmem:[#allocation32_spill] sm:$0xff] }
0x108b   : > { %12497 = vxpose.xlu0.b32.cont [2/4] (short) %v12485_v13, 128  ;;  %v33783_v13 = vld [vmem:[#allocation31_spill] sm:$0xff] }
0x108f   : > { %12498 = vxpose.xlu0.b32.cont [3/4] (short) %v12490_v30, 128 }
0x1093   : > { %12499 = vxpose.xlu0.b32.end [4/4] (short) %v12493_v4, 128  ;;  %v33786_v4 = vld [vmem:[#allocation36_spill] sm:$0xff] }
0x1103   : > { %v30700_v8 = vpop.trf.xlu0 }
0x1104   : > { %25532 = vmatmul.mubr.msk.f32.vlgmr.msra.gmra.mxu0 %vm859_vm2, %v30700_v8 }
0x1105   : > { %25542 = vmatpush3.xpose.msk.msra.mxu0 %vm859_vm2, %v33770_v0  ;;  %25545 = vmatprep.mubr.msk.f32.mxu0 %vm27293_vm1, %v33198_v17 }
0x1106   : > { %25543 = vmatprep.subr.mxu0 %v33198_v17 }
0x1107   : > { %v30709_v57 = vpop.trf.xlu0 }
0x1108   : > { %25539 = vmatmul.mubr.msk.f32.vlgmr.msra.gmra.mxu1 %vm859_vm2, %v30709_v57 }
0x1109   : > { %25544 = vmatpush3.xpose.msk.msra.mxu0 %vm859_vm2, %v33771_v49  ;;  %25549 = vmatpush3.xpose.msk.msra.mxu1 %vm859_vm2, %v33772_v42  ;;  %v33787_v49 = vld [vmem:[#allocation35_spill] sm:$0xff]  ;;  %v33788_v42 = vld [vmem:[#allocation38_spill] sm:$0xff] }
0x110a   : > { %25550 = vmatprep.subr.mxu1 %v33198_v17  ;;  %25555 = vmatprep.subr.mxu0 %v33198_v17 }
0x110b   : > { %v30719_v3 = vpop.trf.xlu0  ;;  %25552 = vmatprep.mubr.msk.f32.mxu1 %vm27293_vm1, %v33198_v17 }
0x110c   : > { %25546 = vmatmul.mubr.msk.f32.vlgmr.msra.gmra.mxu0 %vm859_vm2, %v30719_v3 }
0x110d   : > { %25551 = vmatpush3.xpose.msk.msra.mxu1 %vm859_vm2, %v33773_v2  ;;  %25556 = vmatpush3.xpose.msk.msra.mxu0 %vm859_vm2, %v33774_v33  ;;  %v33789_v33 = vld [vmem:[#allocation37_spill] sm:$0xff] }
0x110e   : > { %25557 = vmatprep.subr.mxu0 %v33198_v17  ;;  %25562 = vmatprep.subr.mxu1 %v33198_v17 }
0x110f   : > { %v30731_v29 = vpop.trf.xlu0  ;;  %25559 = vmatprep.mubr.msk.f32.mxu0 %vm27293_vm1, %v33198_v17 }
0x1110   : > { %25553 = vmatmul.mubr.msk.f32.vlgmr.msra.gmra.mxu1 %vm859_vm2, %v30731_v29 }
0x1111   : > { %25558 = vmatpush3.xpose.msk.msra.mxu0 %vm859_vm2, %v33775_v26  ;;  %25563 = vmatpush3.xpose.msk.msra.mxu1 %vm859_vm2, %v33776_v22  ;;  %v33790_v26 = vld [vmem:[#allocation40_spill] sm:$0xff] }
0x1112   : > { %25564 = vmatprep.subr.mxu1 %v33198_v17  ;;  %25569 = vmatprep.subr.mxu0 %v33198_v17 }
0x1113   : > { %v30743_v34 = vpop.trf.xlu0  ;;  %25566 = vmatprep.mubr.msk.f32.mxu1 %vm27293_vm1, %v33198_v17 }
0x1114   : > { %25560 = vmatmul.mubr.msk.f32.vlgmr.msra.gmra.mxu0 %vm859_vm2, %v30743_v34 }
0x1115   : > { %25565 = vmatpush3.xpose.msk.msra.mxu1 %vm859_vm2, %v33777_v59  ;;  %25570 = vmatpush3.xpose.msk.msra.mxu0 %vm859_vm2, %v33778_v36  ;;  %v33791_v59 = vld [vmem:[#allocation39_spill] sm:$0xff]  ;;  %v33792_v36 = vld [vmem:[#allocation42_spill] sm:$0xff] }
0x1116   : > { %25571 = vmatprep.subr.mxu0 %v33198_v17  ;;  %25576 = vmatprep.subr.mxu1 %v33198_v17 }
0x1117   : > { %v30755_v5 = vpop.trf.xlu0  ;;  %25573 = vmatprep.mubr.msk.f32.mxu0 %vm27293_vm1, %v33198_v17 }
0x1118   : > { %25567 = vmatmul.mubr.msk.f32.vlgmr.msra.gmra.mxu1 %vm859_vm2, %v30755_v5 }
0x1119   : > { %25572 = vmatpush3.xpose.msk.msra.mxu0 %vm859_vm2, %v33779_v53  ;;  %25577 = vmatpush3.xpose.msk.msra.mxu1 %vm859_vm2, %v33780_v35  ;;  %v33793_v35 = vld [vmem:[#allocation41_spill] sm:$0xff] }
0x111a   : > { %25578 = vmatprep.subr.mxu1 %v33198_v17  ;;  %25583 = vmatprep.subr.mxu0 %v33198_v17 }
0x111b   : > { %v30767_v24 = vpop.trf.xlu0  ;;  %25580 = vmatprep.mubr.msk.f32.mxu1 %vm27293_vm1, %v33198_v17 }
0x111c   : > { %25574 = vmatmul.mubr.msk.f32.vlgmr.msra.gmra.mxu0 %vm859_vm2, %v30767_v24 }
0x111d   : > { %25579 = vmatpush3.xpose.msk.msra.mxu1 %vm859_vm2, %v33781_v15  ;;  %25584 = vmatpush3.xpose.msk.msra.mxu0 %vm859_vm2, %v33782_v14  ;;  %v33794_v15 = vld [vmem:[#allocation44_spill] sm:$0xff] }
0x111e   : > { %25585 = vmatprep.subr.mxu0 %v33198_v17  ;;  %25590 = vmatprep.subr.mxu1 %v33198_v17 }
0x111f   : > { %v30779_v61 = vpop.trf.xlu0  ;;  %25587 = vmatprep.mubr.msk.f32.mxu0 %vm27293_vm1, %v33198_v17 }
0x1120   : > { %25581 = vmatmul.mubr.msk.f32.vlgmr.msra.gmra.mxu1 %vm859_vm2, %v30779_v61 }
0x1121   : > { %25586 = vmatpush3.xpose.msk.msra.mxu0 %vm859_vm2, %v33783_v13  ;;  %25591 = vmatpush3.xpose.msk.msra.mxu1 %vm859_vm2, %v33784_v38  ;;  %v33795_v13 = vld [vmem:[#allocation43_spill] sm:$0xff] }
0x1122   : > { %25592 = vmatprep.subr.mxu1 %v33198_v17  ;;  %25597 = vmatprep.subr.mxu0 %v33198_v17  ;;  %v33796_v38 = vld [vmem:[#allocation47_spill] sm:$0xff] }
0x1123   : > { %v30791_v30 = vpop.trf.xlu0  ;;  %25594 = vmatprep.mubr.msk.f32.mxu1 %vm27293_vm1, %v33198_v17 }
0x1124   : > { %25588 = vmatmul.mubr.msk.f32.vlgmr.msra.gmra.mxu0 %vm859_vm2, %v30791_v30 }
0x1125   : > { %25593 = vmatpush3.xpose.msk.msra.mxu1 %vm859_vm2, %v33785_v18  ;;  %25598 = vmatpush3.xpose.msk.msra.mxu0 %vm859_vm2, %v33786_v4  ;;  %v33797_v4 = vld [vmem:[#allocation45_spill] sm:$0xff] }
0x1126   : > { %25599 = vmatprep.subr.mxu0 %v33198_v17  ;;  %25604 = vmatprep.subr.mxu1 %v33198_v17 }
0x1127   : > { %v30803_v0 = vpop.trf.xlu0  ;;  %25601 = vmatprep.mubr.msk.f32.mxu0 %vm27293_vm1, %v33198_v17 }
0x1128   : > { %25595 = vmatmul.mubr.msk.f32.vlgmr.msra.gmra.mxu1 %vm859_vm2, %v30803_v0 }
0x1129   : > { %25600 = vmatpush3.xpose.msk.msra.mxu0 %vm859_vm2, %v33787_v49  ;;  %25605 = vmatpush3.xpose.msk.msra.mxu1 %vm859_vm2, %v33788_v42  ;;  %v33798_v49 = vld [vmem:[#allocation50_spill] sm:$0xff]  ;;  %v33799_v42 = vld [vmem:[#allocation49_spill] sm:$0xff] }
0x112a   : > { %25606 = vmatprep.subr.mxu1 %v33198_v17  ;;  %25611 = vmatprep.subr.mxu0 %v33198_v17 }
0x112b   : > { %v30815_v2 = vpop.trf.xlu0  ;;  %25608 = vmatprep.mubr.msk.f32.mxu1 %vm27293_vm1, %v33198_v17 }
0x112c   : > { %25602 = vmatmul.mubr.msk.f32.vlgmr.msra.gmra.mxu0 %vm859_vm2, %v30815_v2 }
0x112d   : > { %25607 = vmatpush3.xpose.msk.msra.mxu1 %vm859_vm2, %v33789_v33  ;;  %25612 = vmatpush3.xpose.msk.msra.mxu0 %vm859_vm2, %v33790_v26  ;;  %v33800_v26 = vld [vmem:[#allocation52_spill] sm:$0xff] }
0x112e   : > { %25613 = vmatprep.subr.mxu0 %v33198_v17  ;;  %25618 = vmatprep.subr.mxu1 %v33198_v17 }
0x112f   : > { %v30827_v22 = vpop.trf.xlu0  ;;  %25615 = vmatprep.mubr.msk.f32.mxu0 %vm27293_vm1, %v33198_v17 }
0x1130   : > { %25609 = vmatmul.mubr.msk.f32.vlgmr.msra.gmra.mxu1 %vm859_vm2, %v30827_v22 }
0x1131   : > { %25614 = vmatpush3.xpose.msk.msra.mxu0 %vm859_vm2, %v33791_v59  ;;  %25619 = vmatpush3.xpose.msk.msra.mxu1 %vm859_vm2, %v33792_v36  ;;  %v33801_v59 = vld [vmem:[#allocation51_spill] sm:$0xff] }
0x1132   : > { %25620 = vmatprep.subr.mxu1 %v33198_v17  ;;  %25625 = vmatprep.subr.mxu0 %v33198_v17 }
0x1133   : > { %v30839_v53 = vpop.trf.xlu0  ;;  %25622 = vmatprep.mubr.msk.f32.mxu1 %vm27293_vm1, %v33198_v17 }
0x1134   : > { %25616 = vmatmul.mubr.msk.f32.vlgmr.msra.gmra.mxu0 %vm859_vm2, %v30839_v53 }
0x1135   : > { %25621 = vmatpush3.xpose.msk.msra.mxu1 %vm859_vm2, %v33793_v35  ;;  %25626 = vmatpush3.xpose.msk.msra.mxu0 %vm859_vm2, %v33794_v15 }
0x1136   : > { %25627 = vmatprep.subr.mxu0 %v33198_v17  ;;  %25632 = vmatprep.subr.mxu1 %v33198_v17 }
0x1137   : > { %v30851_v14 = vpop.trf.xlu0  ;;  %25629 = vmatprep.mubr.msk.f32.mxu0 %vm27293_vm1, %v33198_v17 }
0x1138   : > { %25623 = vmatmul.mubr.msk.f32.vlgmr.msra.gmra.mxu1 %vm859_vm2, %v30851_v14 }
0x1139   : > { %25628 = vmatpush3.xpose.msk.msra.mxu0 %vm859_vm2, %v33795_v13  ;;  %25633 = vmatpush3.xpose.msk.msra.mxu1 %vm859_vm2, %v33796_v38 }
0x113a   : > { %25634 = vmatprep.subr.mxu1 %v33198_v17  ;;  %25639 = vmatprep.subr.mxu0 %v33198_v17 }
0x113b   : > { %v30863_v18 = vpop.trf.xlu0  ;;  %25636 = vmatprep.mubr.msk.f32.mxu1 %vm27293_vm1, %v33198_v17 }
0x113c   : > { %25630 = vmatmul.mubr.msk.f32.vlgmr.msra.gmra.mxu0 %vm859_vm2, %v30863_v18 }
0x113d   : > { %25635 = vmatpush3.xpose.msk.msra.mxu1 %vm859_vm2, %v33797_v4  ;;  %25640 = vmatpush3.msra.mxu0 %v33798_v49 }
0x113e   : > { %25641 = vmatprep.subr.mxu0 %v33198_v17  ;;  %25646 = vmatprep.subr.mxu1 %v33198_v17 }
0x113f   : > { %25642 = vmatpush3.msra.mxu0 %v33799_v42  ;;  %v30875_v33 = vpop.trf.xlu0  ;;  %25643 = vmatprep.mubr.msk.f32.mxu0 %vm27293_vm1, %v33198_v17 }
0x1140   : > { %25637 = vmatmul.mubr.msk.f32.vlgmr.msra.gmra.mxu1 %vm859_vm2, %v30875_v33  ;;  %25653 = vmatprep.subr.mxu0 %v33198_v17 }
0x1141   : > { %25647 = vmatpush3.msra.mxu1 %v33800_v26  ;;  %25650 = vmatprep.mubr.msk.f32.mxu1 %vm27293_vm1, %v33198_v17 }
0x1142   : > { %25648 = vmatprep.subr.mxu1 %v33198_v17 }
0x1143   : > { %25649 = vmatpush3.msra.mxu1 %v33801_v59 }
0x1144   : > { %25660 = vmatprep.subr.mxu1 %v33198_v17 }
0x11c4   : > { %v30888_v36 = vpop.f32.mrf.mxu0 }
0x11c5   : > { %v13696_v35 = vsel %vm2124_vm3, %v30888_v36, -inf }
0x11c6   : > { %13697 = vmax.xlane.f32.xlu1 %v13696_v35  ;;  %v25533_v15 = vpop.f32.mrf.mxu0 }
0x11c8   : > { %v30892_v13 = vpop.f32.mrf.mxu1 }
0x11c9   : > { %v13699_v38 = vsel %vm2124_vm3, %v30892_v13, -inf }
0x11ca   : > { %13700 = vmax.xlane.f32.xlu1 %v13699_v38  ;;  %v25540_v4 = vpop.f32.mrf.mxu1 }
0x11cc   : > { %v30896_v49 = vpop.f32.mrf.mxu0 }
0x11cd   : > { %v13702_v42 = vsel %vm2124_vm3, %v30896_v49, -inf }
0x11ce   : > { %13703 = vmax.xlane.f32.xlu0 %v13702_v42  ;;  %v25547_v26 = vpop.f32.mrf.mxu0 }
0x11d0   : > { %v30900_v59 = vpop.f32.mrf.mxu1 }
0x11d1   : > { %v13705_v35 = vsel %vm2124_vm3, %v30900_v59, -inf }
0x11d2   : > { %13706 = vmax.xlane.f32.xlu1 %v13705_v35  ;;  %v25554_v15 = vpop.f32.mrf.mxu1 }
0x11d4   : > { %v30904_v40 = vpop.f32.mrf.mxu0 }
0x11d5   : > { %v13708_v38 = vsel %vm2124_vm3, %v30904_v40, -inf }
0x11d6   : > { %13709 = vmax.xlane.f32.xlu1 %v13708_v38  ;;  %v25561_v4 = vpop.f32.mrf.mxu0 }
0x11d8   : > { %v30908_v39 = vpop.f32.mrf.mxu1 }
0x11d9   : > { %v13711_v42 = vsel %vm2124_vm3, %v30908_v39, -inf }
0x11da   : > { %13712 = vmax.xlane.f32.xlu1 %v13711_v42  ;;  %v25568_v26 = vpop.f32.mrf.mxu1 }
0x11dc   : > { %v30912_v55 = vpop.f32.mrf.mxu0 }
0x11dd   : > { %v13714_v35 = vsel %vm2124_vm3, %v30912_v55, -inf }
0x11de   : > { %13715 = vmax.xlane.f32.xlu1 %v13714_v35  ;;  %v25575_v15 = vpop.f32.mrf.mxu0 }
0x11e0   : > { %v30916_v25 = vpop.f32.mrf.mxu1 }
0x11e1   : > { %v13717_v38 = vsel %vm2124_vm3, %v30916_v25, -inf }
0x11e2   : > { %13718 = vmax.xlane.f32.xlu1 %v13717_v38  ;;  %v25582_v4 = vpop.f32.mrf.mxu1 }
0x11e4   : > { %v30920_v27 = vpop.f32.mrf.mxu0 }
0x11e5   : > { %v13720_v42 = vsel %vm2124_vm3, %v30920_v27, -inf }
0x11e6   : > { %13721 = vmax.xlane.f32.xlu1 %v13720_v42  ;;  %v25589_v26 = vpop.f32.mrf.mxu0 }
0x11e8   : > { %v30924_v31 = vpop.f32.mrf.mxu1 }
0x11e9   : > { %v13723_v35 = vsel %vm2124_vm3, %v30924_v31, -inf }
0x11ea   : > { %13724 = vmax.xlane.f32.xlu1 %v13723_v35  ;;  %v25596_v15 = vpop.f32.mrf.mxu1 }
0x11ec   : > { %v30928_v50 = vpop.f32.mrf.mxu0 }
0x11ed   : > { %v13726_v38 = vsel %vm2124_vm3, %v30928_v50, -inf }
0x11ee   : > { %13727 = vmax.xlane.f32.xlu1 %v13726_v38  ;;  %v25603_v4 = vpop.f32.mrf.mxu0 }
0x11f0   : > { %v30932_v7 = vpop.f32.mrf.mxu1 }
0x11f1   : > { %v13729_v42 = vsel %vm2124_vm3, %v30932_v7, -inf }
0x11f2   : > { %13730 = vmax.xlane.f32.xlu1 %v13729_v42  ;;  %v25610_v26 = vpop.f32.mrf.mxu1 }
0x11f4   : > { %v30936_v52 = vpop.f32.mrf.mxu0 }
0x11f5   : > { %v13732_v35 = vsel %vm2124_vm3, %v30936_v52, -inf }
0x11f6   : > { %13733 = vmax.xlane.f32.xlu1 %v13732_v35  ;;  %v25617_v15 = vpop.f32.mrf.mxu0 }
0x11f8   : > { %v30940_v19 = vpop.f32.mrf.mxu1 }
0x11f9   : > { %v13735_v38 = vsel %vm2124_vm3, %v30940_v19, -inf }
0x11fa   : > { %13736 = vmax.xlane.f32.xlu1 %v13735_v38  ;;  %v25624_v4 = vpop.f32.mrf.mxu1 }
0x11fc   : > { %v30944_v54 = vpop.f32.mrf.mxu0 }
0x11fd   : > { %v13738_v42 = vsel %vm2124_vm3, %v30944_v54, -inf }
0x11fe   : > { %13739 = vmax.xlane.f32.xlu1 %v13738_v42  ;;  %v25631_v26 = vpop.f32.mrf.mxu0 }
0x1200   : > { %v30948_v51 = vpop.f32.mrf.mxu1 }
0x1201   : > { %v13741_v35 = vsel %vm2124_vm3, %v30948_v51, -inf }
0x1202   : > { %13742 = vmax.xlane.f32.xlu1 %v13741_v35  ;;  %v25638_v15 = vpop.f32.mrf.mxu1 }
0x124f   : > { %v13698_v32 = vpop.xlane.xlu1 %13697 }
0x1250   : > { %v13744_v46 = vsub.f32 %v30888_v36, %v13698_v32 }
0x1252   : > { %v13760_v23 = vmul.f32 1.442695, %v13744_v46 }
0x1253   : > { %v13701_v38 = vpop.xlane.xlu1 %13700 }
0x1254   : > { %26955 = vpow2.f32 %v13760_v23  ;;  %v13745_v4 = vsub.f32 %v30892_v13, %v13701_v38 }
0x1256   : > { %v13762_v12 = vmul.f32 1.442695, %v13745_v4 }
0x1257   : > { %v13704_v28 = vpop.xlane.xlu0 %13703 }
0x1258   : > { %26957 = vpow2.f32 %v13762_v12  ;;  %v13746_v42 = vsub.f32 %v30896_v49, %v13704_v28 }
0x125a   : > { %v13764_v26 = vmul.f32 1.442695, %v13746_v42 }
0x125b   : > { %v13707_v6 = vpop.xlane.xlu1 %13706 }
0x125c   : > { %26959 = vpow2.f32 %v13764_v26  ;;  %v13747_v44 = vsub.f32 %v30900_v59, %v13707_v6 }
0x125e   : > { %v13766_v35 = vmul.f32 1.442695, %v13747_v44 }
0x125f   : > { %v13710_v15 = vpop.xlane.xlu1 %13709 }
0x1260   : > { %26961 = vpow2.f32 %v13766_v35  ;;  %v13748_v32 = vsub.f32 %v30904_v40, %v13710_v15 }
0x1261   : > { %v30957_v46 = vpop.eup %26955 }
0x1262   : > { %v13768_v23 = vmul.f32 1.442695, %v13748_v32  ;;  %v13792_v36 = vsel %vm2124_vm3, %v30957_v46, 0.0 }
0x1263   : > { %v13713_v13 = vpop.xlane.xlu1 %13712  ;;  %13793 = vadd.xlane.f32.xlu1 %v13792_v36 }
0x1264   : > { %26963 = vpow2.f32 %v13768_v23  ;;  %v13749_v12 = vsub.f32 %v30908_v39, %v13713_v13 }
0x1265   : > { %v30962_v28 = vpop.eup %26957 }
0x1266   : > { %v13770_v49 = vmul.f32 1.442695, %v13749_v12  ;;  %v13795_v44 = vsel %vm2124_vm3, %v30962_v28, 0.0 }
0x1267   : > { %v13716_v6 = vpop.xlane.xlu1 %13715  ;;  %13796 = vadd.xlane.f32.xlu1 %v13795_v44 }
0x1268   : > { %26965 = vpow2.f32 %v13770_v49  ;;  %v13750_v40 = vsub.f32 %v30912_v55, %v13716_v6 }
0x1269   : > { %v30967_v59 = vpop.eup %26959 }
0x126a   : > { %v13772_v38 = vmul.f32 1.442695, %v13750_v40  ;;  %v13798_v4 = vsel %vm2124_vm3, %v30967_v59, 0.0 }
0x126b   : > { %v13719_v42 = vpop.xlane.xlu1 %13718  ;;  %13799 = vadd.xlane.f32.xlu1 %v13798_v4 }
0x126c   : > { %26967 = vpow2.f32 %v13772_v38  ;;  %v13751_v39 = vsub.f32 %v30916_v25, %v13719_v42 }
0x126d   : > { %v30972_v26 = vpop.eup %26961 }
0x126e   : > { %v13774_v35 = vmul.f32 1.442695, %v13751_v39  ;;  %v13801_v15 = vsel %vm2124_vm3, %v30972_v26, 0.0 }
0x126f   : > { %v13722_v32 = vpop.xlane.xlu1 %13721  ;;  %13802 = vadd.xlane.f32.xlu1 %v13801_v15 }
0x1270   : > { %26969 = vpow2.f32 %v13774_v35  ;;  %v13752_v55 = vsub.f32 %v30920_v27, %v13722_v32 }
0x1271   : > { %v30977_v23 = vpop.eup %26963 }
0x1272   : > { %v13776_v36 = vmul.f32 1.442695, %v13752_v55  ;;  %v13804_v13 = vsel %vm2124_vm3, %v30977_v23, 0.0 }
0x1273   : > { %v13725_v12 = vpop.xlane.xlu1 %13724  ;;  %13805 = vadd.xlane.f32.xlu1 %v13804_v13 }
0x1274   : > { %26971 = vpow2.f32 %v13776_v36  ;;  %v13753_v25 = vsub.f32 %v30924_v31, %v13725_v12 }
0x1275   : > { %v30982_v49 = vpop.eup %26965 }
0x1276   : > { %v13778_v44 = vmul.f32 1.442695, %v13753_v25  ;;  %v13807_v6 = vsel %vm2124_vm3, %v30982_v49, 0.0 }
0x1277   : > { %v13728_v40 = vpop.xlane.xlu1 %13727  ;;  %13808 = vadd.xlane.f32.xlu1 %v13807_v6 }
0x1278   : > { %26973 = vpow2.f32 %v13778_v44  ;;  %v13754_v27 = vsub.f32 %v30928_v50, %v13728_v40 }
0x1279   : > { %v30987_v38 = vpop.eup %26967 }
0x127a   : > { %v13780_v4 = vmul.f32 1.442695, %v13754_v27  ;;  %v13810_v42 = vsel %vm2124_vm3, %v30987_v38, 0.0 }
0x127b   : > { %v13731_v39 = vpop.xlane.xlu1 %13730  ;;  %13811 = vadd.xlane.f32.xlu1 %v13810_v42 }
0x127c   : > { %26975 = vpow2.f32 %v13780_v4  ;;  %v13755_v31 = vsub.f32 %v30932_v7, %v13731_v39 }
0x127d   : > { %v30992_v35 = vpop.eup %26969 }
0x127e   : > { %v13782_v15 = vmul.f32 1.442695, %v13755_v31  ;;  %v13813_v32 = vsel %vm2124_vm3, %v30992_v35, 0.0 }
0x127f   : > { %v13734_v55 = vpop.xlane.xlu1 %13733  ;;  %13814 = vadd.xlane.f32.xlu1 %v13813_v32 }
0x1280   : > { %26977 = vpow2.f32 %v13782_v15  ;;  %v13756_v50 = vsub.f32 %v30936_v52, %v13734_v55 }
0x1281   : > { %v30997_v36 = vpop.eup %26971 }
0x1282   : > { %v13784_v13 = vmul.f32 1.442695, %v13756_v50  ;;  %v13816_v12 = vsel %vm2124_vm3, %v30997_v36, 0.0 }
0x1283   : > { %v13737_v25 = vpop.xlane.xlu1 %13736  ;;  %13817 = vadd.xlane.f32.xlu1 %v13816_v12 }
0x1284   : > { %26979 = vpow2.f32 %v13784_v13  ;;  %v13757_v7 = vsub.f32 %v30940_v19, %v13737_v25 }
0x1285   : > { %v31002_v44 = vpop.eup %26973 }
0x1286   : > { %v13786_v6 = vmul.f32 1.442695, %v13757_v7  ;;  %v13819_v40 = vsel %vm2124_vm3, %v31002_v44, 0.0 }
0x1287   : > { %v13740_v27 = vpop.xlane.xlu1 %13739  ;;  %13820 = vadd.xlane.f32.xlu1 %v13819_v40 }
0x1288   : > { %26981 = vpow2.f32 %v13786_v6  ;;  %v13758_v52 = vsub.f32 %v30944_v54, %v13740_v27 }
0x1289   : > { %v31007_v4 = vpop.eup %26975 }
0x128a   : > { %v13788_v42 = vmul.f32 1.442695, %v13758_v52  ;;  %v13822_v39 = vsel %vm2124_vm3, %v31007_v4, 0.0 }
0x128b   : > { %13823 = vadd.xlane.f32.xlu0 %v13822_v39  ;;  %v13743_v31 = vpop.xlane.xlu1 %13742 }
0x128c   : > { %26983 = vpow2.f32 %v13788_v42  ;;  %v13759_v19 = vsub.f32 %v30948_v51, %v13743_v31 }
0x128d   : > { %v31012_v15 = vpop.eup %26977 }
0x128e   : > { %v13790_v32 = vmul.f32 1.442695, %v13759_v19  ;;  %v13825_v55 = vsel %vm2124_vm3, %v31012_v15, 0.0 }
0x128f   : > { %13826 = vadd.xlane.f32.xlu1 %v13825_v55  ;;  %v33802_v55 = vld [vmem:[#allocation54_spill] sm:$0xff] }
0x1290   : > { %26985 = vpow2.f32 %v13790_v32 }
0x1291   : > { %v31016_v54 = vpop.eup %26979 }
0x1292   : > { %v13828_v50 = vsel %vm2124_vm3, %v31016_v54, 0.0 }
0x1293   : > { %13829 = vadd.xlane.f32.xlu0 %v13828_v50 }
0x1295   : > { %v31020_v13 = vpop.eup %26981 }
0x1296   : > { %v13831_v12 = vsel %vm2124_vm3, %v31020_v13, 0.0 }
0x1297   : > { %13832 = vadd.xlane.f32.xlu1 %v13831_v12  ;;  %v33803_v12 = vld [vmem:[#allocation53_spill] sm:$0xff] }
0x1299   : > { %v31024_v51 = vpop.eup %26983 }
0x129a   : > { %v13834_v25 = vsel %vm2124_vm3, %v31024_v51, 0.0 }
0x129b   : > { %13835 = vadd.xlane.f32.xlu0 %v13834_v25 }
0x129d   : > { %v31028_v7 = vpop.eup %26985 }
0x129e   : > { %v13837_v6 = vsel %vm2124_vm3, %v31028_v7, 0.0 }
0x129f   : > { %13838 = vadd.xlane.f32.xlu1 %v13837_v6  ;;  %v33804_v6 = vld [vmem:[#allocation57_spill] sm:$0xff] }
0x12b0   : > { %15146 = vrot.lane.b32.xlu1 %v30709_v57, %s27294_s17 }
0x12b1   : > { %15072 = vrot.lane.b32.xlu0 %v30700_v8, %s27294_s17 }
0x12b4   : > { %15220 = vrot.lane.b32.xlu1 %v30719_v3, %s27294_s17 }
0x12b5   : > { %15368 = vrot.lane.b32.xlu0 %v30743_v34, %s27294_s17 }
0x12b8   : > { %15294 = vrot.lane.b32.xlu1 %v30731_v29, %s27294_s17 }
0x12b9   : > { %15516 = vrot.lane.b32.xlu0 %v30767_v24, %s27294_s17 }
0x12bc   : > { %15442 = vrot.lane.b32.xlu1 %v30755_v5, %s27294_s17 }
0x12bd   : > { %15664 = vrot.lane.b32.xlu0 %v30791_v30, %s27294_s17 }
0x12c0   : > { %15590 = vrot.lane.b32.xlu1 %v30779_v61, %s27294_s17 }
0x12c1   : > { %15812 = vrot.lane.b32.xlu0 %v30815_v2, %s27294_s17 }
0x12c4   : > { %15738 = vrot.lane.b32.xlu1 %v30803_v0, %s27294_s17 }
0x12c5   : > { %15960 = vrot.lane.b32.xlu0 %v30839_v53, %s27294_s17 }
0x12c8   : > { %15886 = vrot.lane.b32.xlu1 %v30827_v22, %s27294_s17 }
0x12c9   : > { %16108 = vrot.lane.b32.xlu0 %v30863_v18, %s27294_s17 }
0x12cc   : > { %16034 = vrot.lane.b32.xlu1 %v30851_v14, %s27294_s17 }
0x12d0   : > { %16182 = vrot.lane.b32.xlu1 %v30875_v33, %s27294_s17  ;;  %s32729_s17 = scalar_lea.hbm %s32781_s5, %s23739_s8 }
0x12ec   : > { %v13794_v40 = vpop.xlane.xlu1 %13793 }
0x12ed   : > { %26987 = vrcp.f32 %v13794_v40 }
0x12f0   : > { %v13797_v27 = vpop.xlane.xlu1 %13796 }
0x12f1   : > { %26989 = vrcp.f32 %v13797_v27 }
0x12f4   : > { %v13800_v52 = vpop.xlane.xlu1 %13799 }
0x12f5   : > { %26991 = vrcp.f32 %v13800_v52 }
0x12f8   : > { %v13803_v42 = vpop.xlane.xlu1 %13802 }
0x12f9   : > { %26993 = vrcp.f32 %v13803_v42  ;;  %v33806_v42 = vld [vmem:[#allocation60_spill] sm:$0xff] }
0x12fa   : > { %v26988_v39 = vpop.eup %26987 }
0x12fb   : > { %v13856_v31 = vmul.f32 %v26988_v39, %v30957_v46 }
0x12fc   : > { %v13806_v19 = vpop.xlane.xlu1 %13805 }
0x12fd   : > { %26995 = vrcp.f32 %v13806_v19  ;;  %25644 = vmatmul.mubr.msk.f32.vlgmr.msra.gmra.mxu0 %vm2124_vm3, %v13856_v31 }
0x12fe   : > { %v26990_v32 = vpop.eup %26989  ;;  %25654 = vmatpush3.msra.mxu0 %v33802_v55  ;;  %25657 = vmatprep.mubr.msk.f32.mxu0 %vm27293_vm1, %v33198_v17 }
0x12ff   : > { %v13857_v50 = vmul.f32 %v26990_v32, %v30962_v28  ;;  %25655 = vmatprep.subr.mxu0 %v33198_v17  ;;  %v33805_v28 = vld [vmem:[#allocation55_spill] sm:$0xff]  ;;  %v33808_v32 = vld [vmem:[#allocation73_spill] sm:$0xff] }
0x1300   : > { %25656 = vmatpush3.msra.mxu0 %v33803_v12  ;;  %v13809_v25 = vpop.xlane.xlu1 %13808 }
0x1301   : > { %26997 = vrcp.f32 %v13809_v25  ;;  %25651 = vmatmul.mubr.msk.f32.vlgmr.msra.gmra.mxu1 %vm2124_vm3, %v13857_v50  ;;  %25667 = vmatprep.subr.mxu0 %v33198_v17  ;;  %v33810_v25 = vld [vmem:[#allocation77_spill] sm:$0xff] }
0x1302   : > { %v26992_v46 = vpop.eup %26991  ;;  %25661 = vmatpush3.msra.mxu1 %v33804_v6  ;;  %25664 = vmatprep.mubr.msk.f32.mxu1 %vm27293_vm1, %v33198_v17 }
0x1303   : > { %v13858_v40 = vmul.f32 %v26992_v46, %v30967_v59  ;;  %25662 = vmatprep.subr.mxu1 %v33198_v17  ;;  %v33807_v59 = vld [vmem:[#allocation58_spill] sm:$0xff] }
0x1304   : > { %25663 = vmatpush3.msra.mxu1 %v33805_v28  ;;  %v13812_v27 = vpop.xlane.xlu1 %13811  ;;  %v33812_v28 = vld [vmem:[#allocation81_spill] sm:$0xff] }
0x1305   : > { %26999 = vrcp.f32 %v13812_v27  ;;  %25658 = vmatmul.mubr.msk.f32.vlgmr.msra.gmra.mxu0 %vm2124_vm3, %v13858_v40  ;;  %25674 = vmatprep.subr.mxu1 %v33198_v17 }
0x1306   : > { %v26994_v52 = vpop.eup %26993  ;;  %25668 = vmatpush3.msra.mxu0 %v33806_v42  ;;  %25671 = vmatprep.mubr.msk.f32.mxu0 %vm27293_vm1, %v33198_v17 }
0x1307   : > { %v13859_v39 = vmul.f32 %v26994_v52, %v30972_v26  ;;  %25669 = vmatprep.subr.mxu0 %v33198_v17  ;;  %v33809_v26 = vld [vmem:[#allocation71_spill] sm:$0xff] }
0x1308   : > { %25670 = vmatpush3.msra.mxu0 %v33807_v59  ;;  %v13815_v31 = vpop.xlane.xlu1 %13814 }
0x1309   : > { %27001 = vrcp.f32 %v13815_v31  ;;  %25665 = vmatmul.mubr.msk.f32.vlgmr.msra.gmra.mxu1 %vm2124_vm3, %v13859_v39  ;;  %25681 = vmatprep.subr.mxu0 %v33198_v17  ;;  %v33814_v39 = vld [vmem:[#allocation59_spill] sm:$0xff] }
0x130a   : > { %v26996_v19 = vpop.eup %26995  ;;  %25675 = vmatpush3.msra.mxu1 %v33808_v32  ;;  %25678 = vmatprep.mubr.msk.f32.mxu1 %vm27293_vm1, %v33198_v17  ;;  %v33816_v32 = vld [vmem:[#allocation62_spill] sm:$0xff] }
0x130b   : > { %v13860_v55 = vmul.f32 %v26996_v19, %v30977_v23  ;;  %25676 = vmatprep.subr.mxu1 %v33198_v17  ;;  %v33811_v23 = vld [vmem:[#allocation75_spill] sm:$0xff] }
0x130c   : > { %25677 = vmatpush3.msra.mxu1 %v33809_v26  ;;  %v13818_v50 = vpop.xlane.xlu1 %13817 }
0x130d   : > { %27003 = vrcp.f32 %v13818_v50  ;;  %25672 = vmatmul.mubr.msk.f32.vlgmr.msra.gmra.mxu0 %vm2124_vm3, %v13860_v55  ;;  %25688 = vmatprep.subr.mxu1 %v33198_v17 }
0x130e   : > { %v26998_v12 = vpop.eup %26997  ;;  %25682 = vmatpush3.msra.mxu0 %v33810_v25  ;;  %25685 = vmatprep.mubr.msk.f32.mxu0 %vm27293_vm1, %v33198_v17 }
0x130f   : > { %v13861_v46 = vmul.f32 %v26998_v12, %v30982_v49  ;;  %25683 = vmatprep.subr.mxu0 %v33198_v17  ;;  %v33813_v49 = vld [vmem:[#allocation79_spill] sm:$0xff]  ;;  %v33818_v12 = vld [vmem:[#allocation64_spill] sm:$0xff] }
0x1310   : > { %25684 = vmatpush3.msra.mxu0 %v33811_v23  ;;  %v13821_v6 = vpop.xlane.xlu1 %13820 }
0x1311   : > { %27005 = vrcp.f32 %v13821_v6  ;;  %25679 = vmatmul.mubr.msk.f32.vlgmr.msra.gmra.mxu1 %vm2124_vm3, %v13861_v46  ;;  %25695 = vmatprep.subr.mxu0 %v33198_v17  ;;  %v33820_v6 = vld [vmem:[#allocation66_spill] sm:$0xff] }
0x1312   : > { %v27000_v40 = vpop.eup %26999  ;;  %25689 = vmatpush3.msra.mxu1 %v33812_v28  ;;  %25692 = vmatprep.mubr.msk.f32.mxu1 %vm27293_vm1, %v33198_v17 }
0x1313   : > { %v13862_v27 = vmul.f32 %v27000_v40, %v30987_v38  ;;  %25690 = vmatprep.subr.mxu1 %v33198_v17  ;;  %v33815_v38 = vld [vmem:[#allocation56_spill] sm:$0xff] }
0x1314   : > { %25691 = vmatpush3.msra.mxu1 %v33813_v49  ;;  %v13824_v52 = vpop.xlane.xlu0 %13823  ;;  %v33822_v49 = vld [vmem:[#allocation68_spill] sm:$0xff] }
0x1315   : > { %27007 = vrcp.f32 %v13824_v52  ;;  %25686 = vmatmul.mubr.msk.f32.vlgmr.msra.gmra.mxu0 %vm2124_vm3, %v13862_v27  ;;  %25702 = vmatprep.subr.mxu1 %v33198_v17 }
0x1316   : > { %v27002_v42 = vpop.eup %27001  ;;  %25696 = vmatpush3.msra.mxu0 %v33814_v39  ;;  %25699 = vmatprep.mubr.msk.f32.mxu0 %vm27293_vm1, %v33198_v17 }
0x1317   : > { %v13863_v59 = vmul.f32 %v27002_v42, %v30992_v35  ;;  %25697 = vmatprep.subr.mxu0 %v33198_v17  ;;  %v33817_v35 = vld [vmem:[#allocation61_spill] sm:$0xff] }
0x1318   : > { %25698 = vmatpush3.msra.mxu0 %v33815_v38  ;;  %v13827_v31 = vpop.xlane.xlu1 %13826 }
0x1319   : > { %27009 = vrcp.f32 %v13827_v31  ;;  %25693 = vmatmul.mubr.msk.f32.vlgmr.msra.gmra.mxu1 %vm2124_vm3, %v13863_v59  ;;  %25709 = vmatprep.subr.mxu0 %v33198_v17  ;;  %v33824_v59 = vld [vmem:[#allocation70_spill] sm:$0xff] }
0x131a   : > { %v27004_v19 = vpop.eup %27003  ;;  %25703 = vmatpush3.msra.mxu1 %v33816_v32  ;;  %25706 = vmatprep.mubr.msk.f32.mxu1 %vm27293_vm1, %v33198_v17 }
0x131b   : > { %v13864_v55 = vmul.f32 %v27004_v19, %v30997_v36  ;;  %25704 = vmatprep.subr.mxu1 %v33198_v17  ;;  %v33819_v36 = vld [vmem:[#allocation63_spill] sm:$0xff]  ;;  %v33826_v19 = vld [vmem:[#allocation74_spill] sm:$0xff] }
0x131c   : > { %25705 = vmatpush3.msra.mxu1 %v33817_v35  ;;  %v13830_v26 = vpop.xlane.xlu0 %13829  ;;  %v33828_v35 = vld [vmem:[#allocation78_spill] sm:$0xff] }
0x131d   : > { %27011 = vrcp.f32 %v13830_v26  ;;  %25700 = vmatmul.mubr.msk.f32.vlgmr.msra.gmra.mxu0 %vm2124_vm3, %v13864_v55  ;;  %25716 = vmatprep.subr.mxu1 %v33198_v17  ;;  %v33827_v55 = vld [vmem:[#allocation72_spill] sm:$0xff] }
0x131e   : > { %v27006_v50 = vpop.eup %27005  ;;  %25710 = vmatpush3.msra.mxu0 %v33818_v12  ;;  %25713 = vmatprep.mubr.msk.f32.mxu0 %vm27293_vm1, %v33198_v17  ;;  %v33830_v12 = vld [vmem:[#allocation85_spill] sm:$0xff] }
0x131f   : > { %v13865_v25 = vmul.f32 %v27006_v50, %v31002_v44  ;;  %25711 = vmatprep.subr.mxu0 %v33198_v17  ;;  %v33821_v44 = vld [vmem:[#allocation65_spill] sm:$0xff]  ;;  %v33829_v50 = vld [vmem:[#allocation76_spill] sm:$0xff] }
0x1320   : > { %25712 = vmatpush3.msra.mxu0 %v33819_v36  ;;  %v13833_v46 = vpop.xlane.xlu1 %13832  ;;  %v33832_v36 = vld [vmem:[#allocation84_spill] sm:$0xff] }
0x1321   : > { %27013 = vrcp.f32 %v13833_v46  ;;  %25707 = vmatmul.mubr.msk.f32.vlgmr.msra.gmra.mxu1 %vm2124_vm3, %v13865_v25  ;;  %25723 = vmatprep.subr.mxu0 %v33198_v17 }
0x1322   : > { %v27008_v23 = vpop.eup %27007  ;;  %25717 = vmatpush3.msra.mxu1 %v33820_v6  ;;  %25720 = vmatprep.mubr.msk.f32.mxu1 %vm27293_vm1, %v33198_v17  ;;  %v33834_v6 = vld [vmem:[#allocation86_spill] sm:$0xff] }
0x1323   : > { %v13866_v40 = vmul.f32 %v27008_v23, %v31007_v4  ;;  %25718 = vmatprep.subr.mxu1 %v33198_v17  ;;  %v33823_v4 = vld [vmem:[#allocation67_spill] sm:$0xff] }
0x1324   : > { %25719 = vmatpush3.msra.mxu1 %v33821_v44  ;;  %v13836_v28 = vpop.xlane.xlu0 %13835  ;;  %v33835_v44 = vld [vmem:[#allocation91_spill] sm:$0xff] }
0x1325   : > { %27015 = vrcp.f32 %v13836_v28  ;;  %25714 = vmatmul.mubr.msk.f32.vlgmr.msra.gmra.mxu0 %vm2124_vm3, %v13866_v40  ;;  %25730 = vmatprep.subr.mxu1 %v33198_v17  ;;  %v33836_v28 = vld [vmem:[#allocation90_spill] sm:$0xff] }
0x1326   : > { %v27010_v27 = vpop.eup %27009  ;;  %25724 = vmatpush3.msra.mxu0 %v33822_v49  ;;  %25727 = vmatprep.mubr.msk.f32.mxu0 %vm27293_vm1, %v33198_v17  ;;  %v33838_v49 = vld [vmem:[#allocation92_spill] sm:$0xff] }
0x1327   : > { %v13867_v52 = vmul.f32 %v27010_v27, %v31012_v15  ;;  %25725 = vmatprep.subr.mxu0 %v33198_v17  ;;  %v33825_v15 = vld [vmem:[#allocation69_spill] sm:$0xff]  ;;  %v33837_v27 = vld [vmem:[#allocation88_spill] sm:$0xff] }
0x1328   : > { %25726 = vmatpush3.msra.mxu0 %v33823_v4  ;;  %v13839_v42 = vpop.xlane.xlu1 %13838  ;;  %v15073_v46 = vpop.permute.xlu0 %15072  ;;  %v33839_v4 = vld [vmem:[#allocation95_spill] sm:$0xff] }
0x1329   : > { %27017 = vrcp.f32 %v13839_v42  ;;  %25721 = vmatmul.mubr.msk.f32.vlgmr.msra.gmra.mxu1 %vm2124_vm3, %v13867_v52  ;;  %25737 = vmatprep.subr.mxu0 %v33198_v17  ;;  %v33840_v42 = vld [vmem:[#allocation93_spill] sm:$0xff] }
0x132a   : > { %v27012_v39 = vpop.eup %27011  ;;  %25731 = vmatpush3.msra.mxu1 %v33824_v59  ;;  %25734 = vmatprep.mubr.msk.f32.mxu1 %vm27293_vm1, %v33198_v17  ;;  %v33841_v59 = vld [vmem:[#allocation94_spill] sm:$0xff] }
0x132b   : > { %v13868_v38 = vmul.f32 %v27012_v39, %v31016_v54  ;;  %25732 = vmatprep.subr.mxu1 %v33198_v17 }
0x132c   : > { %25733 = vmatpush3.msra.mxu1 %v33825_v15  ;;  %v15147_v23 = vpop.permute.xlu1 %15146  ;;  %v15369_v39 = vpop.permute.xlu0 %15368 }
0x132d   : > { %25728 = vmatmul.mubr.msk.f32.vlgmr.msra.gmra.mxu0 %vm2124_vm3, %v13868_v38  ;;  %25744 = vmatprep.subr.mxu1 %v33198_v17  ;;  %v33842_v38 = vld [vmem:[#allocation83_spill] sm:$0xff] }
0x132e   : > { %v27014_v31 = vpop.eup %27013  ;;  %25738 = vmatpush3.msra.mxu0 %v33826_v19  ;;  %25741 = vmatprep.mubr.msk.f32.mxu0 %vm27293_vm1, %v33198_v17  ;;  %v33844_v19 = vld [vmem:[#allocation96_spill] sm:$0xff] }
0x132f   : > { %v13869_v32 = vmul.f32 %v27014_v31, %v31020_v13  ;;  %25739 = vmatprep.subr.mxu0 %v33198_v17  ;;  %v33843_v31 = vld [vmem:[#allocation48_spill] sm:$0xff] }
0x1330   : > { %25740 = vmatpush3.msra.mxu0 %v33827_v55  ;;  %v15221_v40 = vpop.permute.xlu1 %15220  ;;  %v33845_v55 = vld [vmem:[#allocation97_spill] sm:$0xff] }
0x1331   : > { %25735 = vmatmul.mubr.msk.f32.vlgmr.msra.gmra.mxu1 %vm2124_vm3, %v13869_v32  ;;  %25751 = vmatprep.subr.mxu0 %v33198_v17  ;;  %v15517_v32 = vpop.permute.xlu0 %15516 }
0x1332   : > { %v27016_v54 = vpop.eup %27015  ;;  %25745 = vmatpush3.msra.mxu1 %v33828_v35  ;;  %25748 = vmatprep.mubr.msk.f32.mxu1 %vm27293_vm1, %v33198_v17 }
0x1333   : > { %v13870_v26 = vmul.f32 %v27016_v54, %v31024_v51  ;;  %25746 = vmatprep.subr.mxu1 %v33198_v17  ;;  %v33831_v51 = vld [vmem:[#allocation80_spill] sm:$0xff]  ;;  %v33846_v54 = vld [vmem:[#allocation98_spill] sm:$0xff] }
0x1334   : > { %25747 = vmatpush3.msra.mxu1 %v33829_v50  ;;  %v15295_v52 = vpop.permute.xlu1 %15294  ;;  %v33848_v50 = vld [vmem:[#allocation100_spill] sm:$0xff] }
0x1335   : > { %25742 = vmatmul.mubr.msk.f32.vlgmr.msra.gmra.mxu0 %vm2124_vm3, %v13870_v26  ;;  %25758 = vmatprep.subr.mxu1 %v33198_v17  ;;  %v33847_v26 = vld [vmem:[#allocation89_spill] sm:$0xff] }
0x1336   : > { %v27018_v13 = vpop.eup %27017  ;;  %25752 = vmatpush3.xpose.msk.msra.mxu0 %vm859_vm2, %v33830_v12  ;;  %25755 = vmatprep.mubr.msk.f32.mxu0 %vm27293_vm1, %v33198_v17  ;;  %v33849_v12 = vld [vmem:[#allocation101_spill] sm:$0xff] }
0x1337   : > { %v13871_v25 = vmul.f32 %v27018_v13, %v31028_v7  ;;  %25753 = vmatprep.subr.mxu0 %v33198_v17  ;;  %v33833_v7 = vld [vmem:[#allocation82_spill] sm:$0xff]  ;;  %v15665_v13 = vpop.permute.xlu0 %15664 }
0x1338   : > { %v15443_v15 = vpop.permute.xlu1 %15442 }
0x1339   : > { %25749 = vmatmul.mubr.msk.f32.vlgmr.msra.gmra.mxu1 %vm2124_vm3, %v13871_v25  ;;  %v33850_v25 = vld [vmem:[#allocation102_spill] sm:$0xff] }
0x133a   : > { %25754 = vmatpush3.xpose.msk.msra.mxu0 %vm859_vm2, %v33831_v51  ;;  %25759 = vmatpush3.xpose.msk.msra.mxu1 %vm859_vm2, %v33832_v36  ;;  %v33851_v36 = vld [vmem:[#allocation99_spill] sm:$0xff] }
0x133b   : > { %25760 = vmatprep.subr.mxu1 %v33198_v17  ;;  %25765 = vmatprep.subr.mxu0 %v33198_v17 }
0x133c   : > { %25762 = vmatprep.mubr.msk.f32.mxu1 %vm27293_vm1, %v33198_v17  ;;  %v15591_v35 = vpop.permute.xlu1 %15590 }
0x133d   : > { %25756 = vmatmul.mubr.msk.f32.vlgmr.msra.gmra.mxu0 %vm859_vm2, %v15073_v46  ;;  %v33852_v46 = vld [vmem:[#allocation87_spill] sm:$0xff] }
0x133e   : > { %25761 = vmatpush3.xpose.msk.msra.mxu1 %vm859_vm2, %v33833_v7  ;;  %25766 = vmatpush3.xpose.msk.msra.mxu0 %vm859_vm2, %v33834_v6  ;;  %v33853_v7 = vld [vmem:[#allocation104_spill] sm:$0xff]  ;;  %v33854_v6 = vld [vmem:[#allocation105_spill] sm:$0xff] }
0x133f   : > { %25772 = vmatprep.subr.mxu1 %v33198_v17  ;;  %25767 = vmatprep.subr.mxu0 %v33198_v17 }
0x1340   : > { %25769 = vmatprep.mubr.msk.f32.mxu0 %vm27293_vm1, %v33198_v17  ;;  %v15739_v51 = vpop.permute.xlu1 %15738 }
0x1341   : > { %25763 = vmatmul.mubr.msk.f32.vlgmr.msra.gmra.mxu1 %vm859_vm2, %v15147_v23  ;;  %v15813_v23 = vpop.permute.xlu0 %15812 }
0x1342   : > { %25768 = vmatpush3.xpose.msk.msra.mxu0 %vm859_vm2, %v33835_v44  ;;  %25773 = vmatpush3.xpose.msk.msra.mxu1 %vm859_vm2, %v33836_v28  ;;  %v33855_v44 = vld [vmem:[#allocation103_spill] sm:$0xff]  ;;  %v33856_v28 = vld [vmem:[#allocation106_spill] sm:$0xff] }
0x1343   : > { %25774 = vmatprep.subr.mxu1 %v33198_v17  ;;  %25779 = vmatprep.subr.mxu0 %v33198_v17 }
0x1344   : > { %25776 = vmatprep.mubr.msk.f32.mxu1 %vm27293_vm1, %v33198_v17 }
0x1345   : > { %25770 = vmatmul.mubr.msk.f32.vlgmr.msra.gmra.mxu0 %vm859_vm2, %v15221_v40  ;;  %v15887_v40 = vpop.permute.xlu1 %15886 }
0x1346   : > { %25775 = vmatpush3.xpose.msk.msra.mxu1 %vm859_vm2, %v33837_v27  ;;  %25780 = vmatpush3.xpose.msk.msra.mxu0 %vm859_vm2, %v33838_v49  ;;  %v15961_v27 = vpop.permute.xlu0 %15960  ;;  %v33857_v49 = vld [vmem:[#allocation107_spill] sm:$0xff] }
0x1347   : > { %25786 = vmatprep.subr.mxu1 %v33198_v17  ;;  %25781 = vmatprep.subr.mxu0 %v33198_v17 }
0x1348   : > { %25783 = vmatprep.mubr.msk.f32.mxu0 %vm27293_vm1, %v33198_v17 }
0x1349   : > { %25777 = vmatmul.mubr.msk.f32.vlgmr.msra.gmra.mxu1 %vm859_vm2, %v15295_v52  ;;  %v33858_v52 = vld [vmem:[#allocation108_spill] sm:$0xff] }
0x134a   : > { %25782 = vmatpush3.xpose.msk.msra.mxu0 %vm859_vm2, %v33839_v4  ;;  %25787 = vmatpush3.xpose.msk.msra.mxu1 %vm859_vm2, %v33840_v42  ;;  %v16035_v4 = vpop.permute.xlu1 %16034  ;;  %v33859_v42 = vld [vmem:[#allocation109_spill] sm:$0xff] }
0x134b   : > { %25788 = vmatprep.subr.mxu1 %v33198_v17  ;;  %25793 = vmatprep.subr.mxu0 %v33198_v17 }
0x134c   : > { %25790 = vmatprep.mubr.msk.f32.mxu1 %vm27293_vm1, %v33198_v17 }
0x134d   : > { %25784 = vmatmul.mubr.msk.f32.vlgmr.msra.gmra.mxu0 %vm859_vm2, %v15369_v39  ;;  %v33860_v39 = vld [vmem:[#allocation110_spill] sm:$0xff] }
0x134e   : > { %25789 = vmatpush3.xpose.msk.msra.mxu1 %vm859_vm2, %v33841_v59  ;;  %25794 = vmatpush3.xpose.msk.msra.mxu0 %vm859_vm2, %v33842_v38  ;;  %v16109_v59 = vpop.permute.xlu0 %16108  ;;  %v33861_v38 = vld [vmem:[#allocation111_spill] sm:$0xff] }
0x134f   : > { %25795 = vmatprep.subr.mxu0 %v33198_v17  ;;  %25800 = vmatprep.subr.mxu1 %v33198_v17 }
0x1350   : > { %25797 = vmatprep.mubr.msk.f32.mxu0 %vm27293_vm1, %v33198_v17 }
0x1351   : > { %25791 = vmatmul.mubr.msk.f32.vlgmr.msra.gmra.mxu1 %vm859_vm2, %v15443_v15  ;;  %v33862_v15 = vld [vmem:[#allocation114_spill] sm:$0xff] }
0x1352   : > { %25796 = vmatpush3.xpose.msk.msra.mxu0 %vm859_vm2, %v33843_v31  ;;  %25801 = vmatpush3.xpose.msk.msra.mxu1 %vm859_vm2, %v33844_v19  ;;  %v16183_v31 = vpop.permute.xlu1 %16182  ;;  %v33863_v19 = vld [vmem:[#allocation115_spill] sm:$0xff] }
0x1353   : > { %25802 = vmatprep.subr.mxu1 %v33198_v17  ;;  %25807 = vmatprep.subr.mxu0 %v33198_v17 }
0x1354   : > { %25804 = vmatprep.mubr.msk.f32.mxu1 %vm27293_vm1, %v33198_v17 }
0x1355   : > { %25798 = vmatmul.mubr.msk.f32.vlgmr.msra.gmra.mxu0 %vm859_vm2, %v15517_v32  ;;  %v33864_v32 = vld [vmem:[#allocation116_spill] sm:$0xff] }
0x1356   : > { %25803 = vmatpush3.xpose.msk.msra.mxu1 %vm859_vm2, %v33845_v55  ;;  %25808 = vmatpush3.xpose.msk.msra.mxu0 %vm859_vm2, %v33846_v54  ;;  %v33865_v55 = vld [vmem:[#allocation117_spill] sm:$0xff] }
0x1357   : > { %25809 = vmatprep.subr.mxu0 %v33198_v17  ;;  %25814 = vmatprep.subr.mxu1 %v33198_v17 }
0x1358   : > { %25811 = vmatprep.mubr.msk.f32.mxu0 %vm27293_vm1, %v33198_v17 }
0x1359   : > { %25805 = vmatmul.mubr.msk.f32.vlgmr.msra.gmra.mxu1 %vm859_vm2, %v15591_v35 }
0x135a   : > { %25810 = vmatpush3.xpose.msk.msra.mxu0 %vm859_vm2, %v33847_v26  ;;  %25815 = vmatpush3.xpose.msk.msra.mxu1 %vm859_vm2, %v33848_v50 }
0x135b   : > { %25816 = vmatprep.subr.mxu1 %v33198_v17  ;;  %25821 = vmatprep.subr.mxu0 %v33198_v17 }
0x135c   : > { %25818 = vmatprep.mubr.msk.f32.mxu1 %vm27293_vm1, %v33198_v17 }
0x135d   : > { %25812 = vmatmul.mubr.msk.f32.vlgmr.msra.gmra.mxu0 %vm859_vm2, %v15665_v13 }
0x135e   : > { %25817 = vmatpush3.xpose.msk.msra.mxu1 %vm859_vm2, %v33849_v12  ;;  %25822 = vmatpush3.xpose.msk.msra.mxu0 %vm859_vm2, %v33850_v25 }
0x135f   : > { %25823 = vmatprep.subr.mxu0 %v33198_v17  ;;  %25828 = vmatprep.subr.mxu1 %v33198_v17 }
0x1360   : > { %25825 = vmatprep.mubr.msk.f32.mxu0 %vm27293_vm1, %v33198_v17 }
0x1361   : > { %25819 = vmatmul.mubr.msk.f32.vlgmr.msra.gmra.mxu1 %vm859_vm2, %v15739_v51 }
0x1362   : > { %25824 = vmatpush3.xpose.msk.msra.mxu0 %vm859_vm2, %v33851_v36  ;;  %25829 = vmatpush3.xpose.msk.msra.mxu1 %vm859_vm2, %v33852_v46 }
0x1363   : > { %25830 = vmatprep.subr.mxu1 %v33198_v17  ;;  %25835 = vmatprep.subr.mxu0 %v33198_v17 }
0x1364   : > { %25832 = vmatprep.mubr.msk.f32.mxu1 %vm27293_vm1, %v33198_v17 }
0x1365   : > { %25826 = vmatmul.mubr.msk.f32.vlgmr.msra.gmra.mxu0 %vm859_vm2, %v15813_v23 }
0x1366   : > { %25831 = vmatpush3.xpose.msk.msra.mxu1 %vm859_vm2, %v33853_v7  ;;  %25836 = vmatpush3.xpose.msk.msra.mxu0 %vm859_vm2, %v33854_v6 }
0x1367   : > { %25837 = vmatprep.subr.mxu0 %v33198_v17  ;;  %25842 = vmatprep.subr.mxu1 %v33198_v17 }
0x1368   : > { %25839 = vmatprep.mubr.msk.f32.mxu0 %vm27293_vm1, %v33198_v17 }
0x1369   : > { %25833 = vmatmul.mubr.msk.f32.vlgmr.msra.gmra.mxu1 %vm859_vm2, %v15887_v40 }
0x136a   : > { %25838 = vmatpush3.xpose.msk.msra.mxu0 %vm859_vm2, %v33855_v44  ;;  %25843 = vmatpush3.xpose.msk.msra.mxu1 %vm859_vm2, %v33856_v28 }
0x136b   : > { %25844 = vmatprep.subr.mxu1 %v33198_v17  ;;  %25849 = vmatprep.subr.mxu0 %v33198_v17 }
0x136c   : > { %25846 = vmatprep.mubr.msk.f32.mxu1 %vm27293_vm1, %v33198_v17 }
0x136d   : > { %25840 = vmatmul.mubr.msk.f32.vlgmr.msra.gmra.mxu0 %vm859_vm2, %v15961_v27 }
0x136e   : > { %25845 = vmatpush3.xpose.msk.msra.mxu1 %vm859_vm2, %v33857_v49  ;;  %25850 = vmatpush3.xpose.msk.msra.mxu0 %vm859_vm2, %v33858_v52 }
0x136f   : > { %25851 = vmatprep.subr.mxu0 %v33198_v17  ;;  %25856 = vmatprep.subr.mxu1 %v33198_v17 }
0x1370   : > { %25853 = vmatprep.mubr.msk.f32.mxu0 %vm27293_vm1, %v33198_v17 }
0x1371   : > { %25847 = vmatmul.mubr.msk.f32.vlgmr.msra.gmra.mxu1 %vm859_vm2, %v16035_v4 }
0x1372   : > { %25852 = vmatpush3.xpose.msk.msra.mxu0 %vm859_vm2, %v33859_v42  ;;  %25857 = vmatpush3.xpose.msk.msra.mxu1 %vm859_vm2, %v33860_v39 }
0x1373   : > { %25858 = vmatprep.subr.mxu1 %v33198_v17  ;;  %25863 = vmatprep.subr.mxu0 %v33198_v17 }
0x1374   : > { %25860 = vmatprep.mubr.msk.f32.mxu1 %vm27293_vm1, %v33198_v17 }
0x1375   : > { %25854 = vmatmul.mubr.msk.f32.vlgmr.msra.gmra.mxu0 %vm859_vm2, %v16109_v59 }
0x1376   : > { %25859 = vmatpush3.xpose.msk.msra.mxu1 %vm859_vm2, %v33861_v38  ;;  %25864 = vmatpush3.msra.mxu0 %v33862_v15 }
0x1377   : > { %25865 = vmatprep.subr.mxu0 %v33198_v17  ;;  %25870 = vmatprep.subr.mxu1 %v33198_v17 }
0x1378   : > { %25866 = vmatpush3.msra.mxu0 %v33863_v19  ;;  %25867 = vmatprep.mubr.msk.f32.mxu0 %vm27293_vm1, %v33198_v17 }
0x1379   : > { %25861 = vmatmul.mubr.msk.f32.vlgmr.msra.gmra.mxu1 %vm859_vm2, %v16183_v31  ;;  %25877 = vmatprep.subr.mxu0 %v33198_v17 }
0x137a   : > { %25871 = vmatpush3.msra.mxu1 %v33864_v32  ;;  %25874 = vmatprep.mubr.msk.f32.mxu1 %vm27293_vm1, %v33198_v17 }
0x137b   : > { %25872 = vmatprep.subr.mxu1 %v33198_v17 }
0x137c   : > { %25873 = vmatpush3.msra.mxu1 %v33865_v55 }
0x137d   : > { %25884 = vmatprep.subr.mxu1 %v33198_v17 }
0x13bd   : > { %v31336_v54 = vpop.f32.mrf.mxu0 }
0x13bf   : > { %v25645_v35 = vpop.f32.mrf.mxu0 }
0x13c1   : > { %v31338_v26 = vpop.f32.mrf.mxu1 }
0x13c3   : > { %v25652_v50 = vpop.f32.mrf.mxu1 }
0x13c5   : > { %v31340_v13 = vpop.f32.mrf.mxu0 }
0x13c7   : > { %v25659_v12 = vpop.f32.mrf.mxu0 }
0x13c9   : > { %v31342_v25 = vpop.f32.mrf.mxu1 }
0x13cb   : > { %v25666_v51 = vpop.f32.mrf.mxu1 }
0x13cd   : > { %v31344_v36 = vpop.f32.mrf.mxu0 }
0x13cf   : > { %v25673_v46 = vpop.f32.mrf.mxu0 }
0x13d1   : > { %v31346_v23 = vpop.f32.mrf.mxu1 }
0x13d3   : > { %v25680_v7 = vpop.f32.mrf.mxu1 }
0x13d5   : > { %v31348_v6 = vpop.f32.mrf.mxu0 }
0x13d7   : > { %v25687_v40 = vpop.f32.mrf.mxu0 }
0x13d9   : > { %v31350_v44 = vpop.f32.mrf.mxu1 }
0x13db   : > { %v25694_v28 = vpop.f32.mrf.mxu1 }
0x13dd   : > { %v31352_v27 = vpop.f32.mrf.mxu0 }
0x13df   : > { %v25701_v49 = vpop.f32.mrf.mxu0 }
0x13e1   : > { %v31354_v52 = vpop.f32.mrf.mxu1 }
0x13e2   : > { %33866 = vst [vmem:[#allocation274_spill] sm:$0xff] %v31354_v52 }
0x13e3   : > { %v25708_v4 = vpop.f32.mrf.mxu1 }
0x13e5   : > { %v31356_v42 = vpop.f32.mrf.mxu0 }
0x13e6   : > { %33867 = vst [vmem:[#allocation275_spill] sm:$0xff] %v31356_v42 }
0x13e7   : > { %v25715_v39 = vpop.f32.mrf.mxu0 }
0x13e9   : > { %v31358_v59 = vpop.f32.mrf.mxu1 }
0x13ea   : > { %33868 = vst [vmem:[#allocation276_spill] sm:$0xff] %v31358_v59 }
0x13eb   : > { %v25722_v38 = vpop.f32.mrf.mxu1 }
0x13ed   : > { %v31360_v15 = vpop.f32.mrf.mxu0 }
0x13ee   : > { %33869 = vst [vmem:[#allocation277_spill] sm:$0xff] %v31360_v15 }
0x13ef   : > { %v25729_v31 = vpop.f32.mrf.mxu0 }
0x13f1   : > { %v31362_v19 = vpop.f32.mrf.mxu1 }
0x13f2   : > { %33870 = vst [vmem:[#allocation278_spill] sm:$0xff] %v31362_v19 }
0x13f3   : > { %v25736_v32 = vpop.f32.mrf.mxu1 }
0x13f5   : > { %v31364_v55 = vpop.f32.mrf.mxu0 }
0x13f6   : > { %33871 = vst [vmem:[#allocation279_spill] sm:$0xff] %v31364_v55 }
0x13f7   : > { %v25743_v35 = vpop.f32.mrf.mxu0 }
0x13f9   : > { %v31366_v50 = vpop.f32.mrf.mxu1 }
0x13fa   : > { %33872 = vst [vmem:[#allocation280_spill] sm:$0xff] %v31366_v50 }
0x13fb   : > { %v25750_v12 = vpop.f32.mrf.mxu1 }
0x13fd   : > { %v31368_v51 = vpop.f32.mrf.mxu0 }
0x13fe   : > { %v16256_v46 = vsel %vm2124_vm3, %v31368_v51, -inf }
0x13ff   : > { %16257 = vmax.xlane.f32.xlu0 %v16256_v46  ;;  %v25757_v7 = vpop.f32.mrf.mxu0 }
0x1401   : > { %v31372_v40 = vpop.f32.mrf.mxu1 }
0x1402   : > { %v16259_v28 = vsel %vm2124_vm3, %v31372_v40, -inf }
0x1403   : > { %16260 = vmax.xlane.f32.xlu1 %v16259_v28  ;;  %v25764_v49 = vpop.f32.mrf.mxu1 }
0x1405   : > { %v31376_v4 = vpop.f32.mrf.mxu0 }
0x1406   : > { %v16262_v39 = vsel %vm2124_vm3, %v31376_v4, -inf }
0x1407   : > { %16263 = vmax.xlane.f32.xlu0 %v16262_v39  ;;  %v25771_v38 = vpop.f32.mrf.mxu0 }
0x1409   : > { %v31380_v31 = vpop.f32.mrf.mxu1 }
0x140a   : > { %v16265_v32 = vsel %vm2124_vm3, %v31380_v31, -inf }
0x140b   : > { %v25778_v35 = vpop.f32.mrf.mxu1  ;;  %16266 = vmax.xlane.f32.xlu0 %v16265_v32 }
0x140d   : > { %v31384_v12 = vpop.f32.mrf.mxu0 }
0x140e   : > { %v16268_v46 = vsel %vm2124_vm3, %v31384_v12, -inf }
0x140f   : > { %16269 = vmax.xlane.f32.xlu0 %v16268_v46  ;;  %v25785_v7 = vpop.f32.mrf.mxu0 }
0x1411   : > { %v31388_v28 = vpop.f32.mrf.mxu1 }
0x1412   : > { %v16271_v49 = vsel %vm2124_vm3, %v31388_v28, -inf }
0x1413   : > { %16272 = vmax.xlane.f32.xlu1 %v16271_v49  ;;  %v25792_v39 = vpop.f32.mrf.mxu1 }
0x1415   : > { %v31392_v38 = vpop.f32.mrf.mxu0 }
0x1416   : > { %v16274_v35 = vsel %vm2124_vm3, %v31392_v38, -inf }
0x1417   : > { %16275 = vmax.xlane.f32.xlu0 %v16274_v35  ;;  %v25799_v32 = vpop.f32.mrf.mxu0 }
0x1419   : > { %v31396_v37 = vpop.f32.mrf.mxu1 }
0x141a   : > { %v16277_v46 = vsel %vm2124_vm3, %v31396_v37, -inf }
0x141b   : > { %16278 = vmax.xlane.f32.xlu1 %v16277_v46  ;;  %v25806_v7 = vpop.f32.mrf.mxu1 }
0x141d   : > { %v31400_v41 = vpop.f32.mrf.mxu0 }
0x141e   : > { %v16280_v49 = vsel %vm2124_vm3, %v31400_v41, -inf }
0x141f   : > { %16281 = vmax.xlane.f32.xlu0 %v16280_v49  ;;  %v25813_v39 = vpop.f32.mrf.mxu0 }
0x1421   : > { %v31404_v1 = vpop.f32.mrf.mxu1 }
0x1422   : > { %v16283_v35 = vsel %vm2124_vm3, %v31404_v1, -inf }
0x1423   : > { %16284 = vmax.xlane.f32.xlu1 %v16283_v35  ;;  %v25820_v32 = vpop.f32.mrf.mxu1 }
0x1425   : > { %v31408_v48 = vpop.f32.mrf.mxu0 }
0x1426   : > { %v16286_v46 = vsel %vm2124_vm3, %v31408_v48, -inf }
0x1427   : > { %16287 = vmax.xlane.f32.xlu0 %v16286_v46  ;;  %v25827_v7 = vpop.f32.mrf.mxu0 }
0x1429   : > { %v31412_v47 = vpop.f32.mrf.mxu1 }
0x142a   : > { %v16289_v49 = vsel %vm2124_vm3, %v31412_v47, -inf }
0x142b   : > { %16290 = vmax.xlane.f32.xlu1 %v16289_v49  ;;  %v25834_v39 = vpop.f32.mrf.mxu1 }
0x142d   : > { %v31416_v16 = vpop.f32.mrf.mxu0 }
0x142e   : > { %v16292_v35 = vsel %vm2124_vm3, %v31416_v16, -inf }
0x142f   : > { %16293 = vmax.xlane.f32.xlu0 %v16292_v35  ;;  %v25841_v32 = vpop.f32.mrf.mxu0 }
0x1431   : > { %v31420_v43 = vpop.f32.mrf.mxu1 }
0x1432   : > { %v16295_v46 = vsel %vm2124_vm3, %v31420_v43, -inf }
0x1433   : > { %16296 = vmax.xlane.f32.xlu1 %v16295_v46  ;;  %v25848_v7 = vpop.f32.mrf.mxu1 }
0x1435   : > { %v31424_v11 = vpop.f32.mrf.mxu0 }
0x1436   : > { %v16298_v49 = vsel %vm2124_vm3, %v31424_v11, -inf }
0x1437   : > { %16299 = vmax.xlane.f32.xlu0 %v16298_v49  ;;  %v25855_v39 = vpop.f32.mrf.mxu0 }
0x1439   : > { %v31428_v63 = vpop.f32.mrf.mxu1 }
0x143a   : > { %v16301_v35 = vsel %vm2124_vm3, %v31428_v63, -inf }
0x143b   : > { %16302 = vmax.xlane.f32.xlu1 %v16301_v35  ;;  %v25862_v32 = vpop.f32.mrf.mxu1 }
0x1488   : > { %v16258_v10 = vpop.xlane.xlu0 %16257 }
0x1489   : > { %v16304_v21 = vsub.f32 %v31368_v51, %v16258_v10 }
0x148b   : > { %v16320_v50 = vmul.f32 1.442695, %v16304_v21 }
0x148c   : > { %v16261_v46 = vpop.xlane.xlu1 %16260 }
0x148d   : > { %27019 = vpow2.f32 %v16320_v50  ;;  %v16305_v7 = vsub.f32 %v31372_v40, %v16261_v46 }
0x148f   : > { %v16322_v45 = vmul.f32 1.442695, %v16305_v7 }
0x1490   : > { %v16264_v20 = vpop.xlane.xlu0 %16263 }
0x1491   : > { %27021 = vpow2.f32 %v16322_v45  ;;  %v16306_v49 = vsub.f32 %v31376_v4, %v16264_v20 }
0x1493   : > { %v16324_v39 = vmul.f32 1.442695, %v16306_v49 }
0x1494   : > { %v16267_v55 = vpop.xlane.xlu0 %16266 }
0x1495   : > { %27023 = vpow2.f32 %v16324_v39  ;;  %v16307_v56 = vsub.f32 %v31380_v31, %v16267_v55 }
0x1497   : > { %v16326_v35 = vmul.f32 1.442695, %v16307_v56 }
0x1498   : > { %v16270_v32 = vpop.xlane.xlu0 %16269 }
0x1499   : > { %27025 = vpow2.f32 %v16326_v35  ;;  %v16308_v10 = vsub.f32 %v31384_v12, %v16270_v32 }
0x149a   : > { %v31437_v21 = vpop.eup %27019 }
0x149b   : > { %v16328_v50 = vmul.f32 1.442695, %v16308_v10  ;;  %v16352_v51 = vsel %vm2124_vm3, %v31437_v21, 0.0 }
0x149c   : > { %v16273_v40 = vpop.xlane.xlu1 %16272  ;;  %16353 = vadd.xlane.f32.xlu0 %v16352_v51 }
0x149d   : > { %27027 = vpow2.f32 %v16328_v50  ;;  %v16309_v45 = vsub.f32 %v31388_v28, %v16273_v40 }
0x149e   : > { %v31442_v20 = vpop.eup %27021 }
0x149f   : > { %v16330_v4 = vmul.f32 1.442695, %v16309_v45  ;;  %v16355_v56 = vsel %vm2124_vm3, %v31442_v20, 0.0 }
0x14a0   : > { %16356 = vadd.xlane.f32.xlu1 %v16355_v56  ;;  %v16276_v55 = vpop.xlane.xlu0 %16275 }
0x14a1   : > { %27029 = vpow2.f32 %v16330_v4  ;;  %v16310_v31 = vsub.f32 %v31392_v38, %v16276_v55 }
0x14a2   : > { %v31447_v12 = vpop.eup %27023 }
0x14a3   : > { %v16332_v46 = vmul.f32 1.442695, %v16310_v31  ;;  %v16358_v7 = vsel %vm2124_vm3, %v31447_v12, 0.0 }
0x14a4   : > { %v16279_v49 = vpop.xlane.xlu1 %16278  ;;  %16359 = vadd.xlane.f32.xlu0 %v16358_v7 }
0x14a5   : > { %27031 = vpow2.f32 %v16332_v46  ;;  %v16311_v28 = vsub.f32 %v31396_v37, %v16279_v49 }
0x14a6   : > { %v31452_v39 = vpop.eup %27025 }
0x14a7   : > { %v16334_v35 = vmul.f32 1.442695, %v16311_v28  ;;  %v16361_v32 = vsel %vm2124_vm3, %v31452_v39, 0.0 }
0x14a8   : > { %16362 = vadd.xlane.f32.xlu1 %v16361_v32  ;;  %v16282_v10 = vpop.xlane.xlu0 %16281 }
0x14a9   : > { %27033 = vpow2.f32 %v16334_v35  ;;  %v16312_v38 = vsub.f32 %v31400_v41, %v16282_v10 }
0x14aa   : > { %v31457_v50 = vpop.eup %27027 }
0x14ab   : > { %v16336_v51 = vmul.f32 1.442695, %v16312_v38  ;;  %v16364_v40 = vsel %vm2124_vm3, %v31457_v50, 0.0 }
0x14ac   : > { %v16285_v45 = vpop.xlane.xlu1 %16284  ;;  %16365 = vadd.xlane.f32.xlu0 %v16364_v40 }
0x14ad   : > { %27035 = vpow2.f32 %v16336_v51  ;;  %v16313_v37 = vsub.f32 %v31404_v1, %v16285_v45 }
0x14ae   : > { %v31462_v4 = vpop.eup %27029 }
0x14af   : > { %v16338_v56 = vmul.f32 1.442695, %v16313_v37  ;;  %v16367_v55 = vsel %vm2124_vm3, %v31462_v4, 0.0 }
0x14b0   : > { %16368 = vadd.xlane.f32.xlu1 %v16367_v55  ;;  %v16288_v31 = vpop.xlane.xlu0 %16287 }
0x14b1   : > { %27037 = vpow2.f32 %v16338_v56  ;;  %v16314_v41 = vsub.f32 %v31408_v48, %v16288_v31 }
0x14b2   : > { %v31467_v46 = vpop.eup %27031 }
0x14b3   : > { %v16340_v7 = vmul.f32 1.442695, %v16314_v41  ;;  %v16370_v49 = vsel %vm2124_vm3, %v31467_v46, 0.0 }
0x14b4   : > { %v16291_v28 = vpop.xlane.xlu1 %16290  ;;  %16371 = vadd.xlane.f32.xlu0 %v16370_v49 }
0x14b5   : > { %27039 = vpow2.f32 %v16340_v7  ;;  %v16315_v1 = vsub.f32 %v31412_v47, %v16291_v28 }
0x14b6   : > { %v31472_v35 = vpop.eup %27033 }
0x14b7   : > { %v16342_v32 = vmul.f32 1.442695, %v16315_v1  ;;  %v16373_v10 = vsel %vm2124_vm3, %v31472_v35, 0.0 }
0x14b8   : > { %16374 = vadd.xlane.f32.xlu1 %v16373_v10  ;;  %v16294_v38 = vpop.xlane.xlu0 %16293 }
0x14b9   : > { %27041 = vpow2.f32 %v16342_v32  ;;  %v16316_v48 = vsub.f32 %v31416_v16, %v16294_v38 }
0x14ba   : > { %v31477_v51 = vpop.eup %27035 }
0x14bb   : > { %v16344_v40 = vmul.f32 1.442695, %v16316_v48  ;;  %v16376_v45 = vsel %vm2124_vm3, %v31477_v51, 0.0 }
0x14bc   : > { %v16297_v37 = vpop.xlane.xlu1 %16296  ;;  %16377 = vadd.xlane.f32.xlu0 %v16376_v45 }
0x14bd   : > { %27043 = vpow2.f32 %v16344_v40  ;;  %v16317_v47 = vsub.f32 %v31420_v43, %v16297_v37 }
0x14be   : > { %v31482_v56 = vpop.eup %27037 }
0x14bf   : > { %v16346_v55 = vmul.f32 1.442695, %v16317_v47  ;;  %v16379_v31 = vsel %vm2124_vm3, %v31482_v56, 0.0 }
0x14c0   : > { %16380 = vadd.xlane.f32.xlu1 %v16379_v31  ;;  %v16300_v41 = vpop.xlane.xlu0 %16299 }
0x14c1   : > { %27045 = vpow2.f32 %v16346_v55  ;;  %v16318_v16 = vsub.f32 %v31424_v11, %v16300_v41 }
0x14c2   : > { %v31487_v7 = vpop.eup %27039 }
0x14c3   : > { %v16348_v49 = vmul.f32 1.442695, %v16318_v16  ;;  %v16382_v28 = vsel %vm2124_vm3, %v31487_v7, 0.0 }
0x14c4   : > { %v16303_v1 = vpop.xlane.xlu1 %16302  ;;  %16383 = vadd.xlane.f32.xlu0 %v16382_v28 }
0x14c5   : > { %27047 = vpow2.f32 %v16348_v49  ;;  %v16319_v43 = vsub.f32 %v31428_v63, %v16303_v1 }
0x14c6   : > { %v31492_v32 = vpop.eup %27041 }
0x14c7   : > { %v16350_v10 = vmul.f32 1.442695, %v16319_v43  ;;  %v16385_v38 = vsel %vm2124_vm3, %v31492_v32, 0.0 }
0x14c8   : > { %16386 = vadd.xlane.f32.xlu1 %v16385_v38  ;;  %v33873_v38 = vld [vmem:[#allocation131_spill] sm:$0xff] }
0x14c9   : > { %27049 = vpow2.f32 %v16350_v10 }
0x14ca   : > { %v31496_v11 = vpop.eup %27043 }
0x14cb   : > { %v16388_v48 = vsel %vm2124_vm3, %v31496_v11, 0.0 }
0x14cc   : > { %16389 = vadd.xlane.f32.xlu0 %v16388_v48 }
0x14ce   : > { %v31500_v40 = vpop.eup %27045 }
0x14cf   : > { %v16391_v45 = vsel %vm2124_vm3, %v31500_v40, 0.0 }
0x14d0   : > { %16392 = vadd.xlane.f32.xlu1 %v16391_v45  ;;  %v33874_v45 = vld [vmem:[#allocation138_spill] sm:$0xff] }
0x14d2   : > { %v31504_v63 = vpop.eup %27047 }
0x14d3   : > { %v16394_v37 = vsel %vm2124_vm3, %v31504_v63, 0.0 }
0x14d4   : > { %16395 = vadd.xlane.f32.xlu0 %v16394_v37 }
0x14d6   : > { %v31508_v47 = vpop.eup %27049 }
0x14d7   : > { %v16397_v55 = vsel %vm2124_vm3, %v31508_v47, 0.0 }
0x14d8   : > { %16398 = vadd.xlane.f32.xlu1 %v16397_v55  ;;  %v33875_v55 = vld [vmem:[#allocation133_spill] sm:$0xff] }
0x14e9   : > { %17706 = vrot.lane.b32.xlu1 %v30709_v57, %s27295_s23 }
0x14ea   : > { %17632 = vrot.lane.b32.xlu0 %v30700_v8, %s27295_s23 }
0x14ed   : > { %17780 = vrot.lane.b32.xlu1 %v30719_v3, %s27295_s23 }
0x14ee   : > { %17928 = vrot.lane.b32.xlu0 %v30743_v34, %s27295_s23 }
0x14f1   : > { %17854 = vrot.lane.b32.xlu1 %v30731_v29, %s27295_s23 }
0x14f2   : > { %18076 = vrot.lane.b32.xlu0 %v30767_v24, %s27295_s23 }
0x14f5   : > { %18002 = vrot.lane.b32.xlu1 %v30755_v5, %s27295_s23 }
0x14f6   : > { %18224 = vrot.lane.b32.xlu0 %v30791_v30, %s27295_s23 }
0x14f9   : > { %18150 = vrot.lane.b32.xlu1 %v30779_v61, %s27295_s23 }
0x14fa   : > { %18372 = vrot.lane.b32.xlu0 %v30815_v2, %s27295_s23 }
0x14fd   : > { %18298 = vrot.lane.b32.xlu1 %v30803_v0, %s27295_s23 }
0x14fe   : > { %18520 = vrot.lane.b32.xlu0 %v30839_v53, %s27295_s23 }
0x1501   : > { %18446 = vrot.lane.b32.xlu1 %v30827_v22, %s27295_s23 }
0x1502   : > { %18668 = vrot.lane.b32.xlu0 %v30863_v18, %s27295_s23 }
0x1505   : > { %18594 = vrot.lane.b32.xlu1 %v30851_v14, %s27295_s23 }
0x1509   : > { %18742 = vrot.lane.b32.xlu1 %v30875_v33, %s27295_s23  ;;  %s27229_s23 = scalar_lea.vmem %s32720_s7, 512 }
0x150a   : > { %p27230_p13 = scmp.ne.s32.totalorder %s32720_s7, %s27229_s23 }
0x150c   : > { %p27231_p0 = pnand %p27230_p13, %p27373_p6 }
0x150e   : > { %p27232_p1 = pneg %p27231_p0 }
0x1525   : > { %v16354_v31 = vpop.xlane.xlu0 %16353 }
0x1526   : > { %27051 = vrcp.f32 %v16354_v31 }
0x1529   : > { %v16357_v41 = vpop.xlane.xlu1 %16356 }
0x152a   : > { %27053 = vrcp.f32 %v16357_v41 }
0x152d   : > { %v16360_v16 = vpop.xlane.xlu0 %16359 }
0x152e   : > { %27055 = vrcp.f32 %v16360_v16 }
0x1531   : > { %v16363_v49 = vpop.xlane.xlu1 %16362 }
0x1532   : > { %27057 = vrcp.f32 %v16363_v49  ;;  %v33877_v49 = vld [vmem:[#allocation142_spill] sm:$0xff] }
0x1533   : > { %v27052_v28 = vpop.eup %27051 }
0x1534   : > { %v16416_v1 = vmul.f32 %v27052_v28, %v31437_v21 }
0x1535   : > { %v16366_v43 = vpop.xlane.xlu0 %16365 }
0x1536   : > { %27059 = vrcp.f32 %v16366_v43  ;;  %25868 = vmatmul.mubr.msk.f32.vlgmr.msra.gmra.mxu0 %vm2124_vm3, %v16416_v1 }
0x1537   : > { %v27054_v10 = vpop.eup %27053  ;;  %25878 = vmatpush3.msra.mxu0 %v33873_v38  ;;  %25881 = vmatprep.mubr.msk.f32.mxu0 %vm27293_vm1, %v33198_v17 }
0x1538   : > { %v16417_v48 = vmul.f32 %v27054_v10, %v31442_v20  ;;  %25879 = vmatprep.subr.mxu0 %v33198_v17  ;;  %v33876_v20 = vld [vmem:[#allocation140_spill] sm:$0xff]  ;;  %v33879_v10 = vld [vmem:[#allocation146_spill] sm:$0xff] }
0x1539   : > { %25880 = vmatpush3.msra.mxu0 %v33874_v45  ;;  %v16369_v37 = vpop.xlane.xlu1 %16368 }
0x153a   : > { %27061 = vrcp.f32 %v16369_v37  ;;  %25875 = vmatmul.mubr.msk.f32.vlgmr.msra.gmra.mxu1 %vm2124_vm3, %v16417_v48  ;;  %25891 = vmatprep.subr.mxu0 %v33198_v17  ;;  %v33881_v37 = vld [vmem:[#allocation134_spill] sm:$0xff] }
0x153b   : > { %v27056_v21 = vpop.eup %27055  ;;  %25885 = vmatpush3.msra.mxu1 %v33875_v55  ;;  %25888 = vmatprep.mubr.msk.f32.mxu1 %vm27293_vm1, %v33198_v17 }
0x153c   : > { %v16418_v31 = vmul.f32 %v27056_v21, %v31447_v12  ;;  %25886 = vmatprep.subr.mxu1 %v33198_v17  ;;  %v33878_v12 = vld [vmem:[#allocation144_spill] sm:$0xff] }
0x153d   : > { %25887 = vmatpush3.msra.mxu1 %v33876_v20  ;;  %v16372_v41 = vpop.xlane.xlu0 %16371  ;;  %v33883_v20 = vld [vmem:[#allocation135_spill] sm:$0xff] }
0x153e   : > { %27063 = vrcp.f32 %v16372_v41  ;;  %25882 = vmatmul.mubr.msk.f32.vlgmr.msra.gmra.mxu0 %vm2124_vm3, %v16418_v31  ;;  %25898 = vmatprep.subr.mxu1 %v33198_v17 }
0x153f   : > { %v27058_v16 = vpop.eup %27057  ;;  %25892 = vmatpush3.msra.mxu0 %v33877_v49  ;;  %25895 = vmatprep.mubr.msk.f32.mxu0 %vm27293_vm1, %v33198_v17 }
0x1540   : > { %v16419_v28 = vmul.f32 %v27058_v16, %v31452_v39  ;;  %25893 = vmatprep.subr.mxu0 %v33198_v17  ;;  %v33880_v39 = vld [vmem:[#allocation148_spill] sm:$0xff] }
0x1541   : > { %25894 = vmatpush3.msra.mxu0 %v33878_v12  ;;  %v16375_v1 = vpop.xlane.xlu1 %16374 }
0x1542   : > { %27065 = vrcp.f32 %v16375_v1  ;;  %25889 = vmatmul.mubr.msk.f32.vlgmr.msra.gmra.mxu1 %vm2124_vm3, %v16419_v28  ;;  %25905 = vmatprep.subr.mxu0 %v33198_v17  ;;  %v33885_v28 = vld [vmem:[#allocation136_spill] sm:$0xff] }
0x1543   : > { %v27060_v43 = vpop.eup %27059  ;;  %25899 = vmatpush3.msra.mxu1 %v33879_v10  ;;  %25902 = vmatprep.mubr.msk.f32.mxu1 %vm27293_vm1, %v33198_v17  ;;  %v33887_v10 = vld [vmem:[#allocation137_spill] sm:$0xff] }
0x1544   : > { %v16420_v38 = vmul.f32 %v27060_v43, %v31457_v50  ;;  %25900 = vmatprep.subr.mxu1 %v33198_v17  ;;  %v33882_v50 = vld [vmem:[#allocation150_spill] sm:$0xff] }
0x1545   : > { %25901 = vmatpush3.msra.mxu1 %v33880_v39  ;;  %v16378_v48 = vpop.xlane.xlu0 %16377 }
0x1546   : > { %27067 = vrcp.f32 %v16378_v48  ;;  %25896 = vmatmul.mubr.msk.f32.vlgmr.msra.gmra.mxu0 %vm2124_vm3, %v16420_v38  ;;  %25912 = vmatprep.subr.mxu1 %v33198_v17 }
0x1547   : > { %v27062_v45 = vpop.eup %27061  ;;  %25906 = vmatpush3.msra.mxu0 %v33881_v37  ;;  %25909 = vmatprep.mubr.msk.f32.mxu0 %vm27293_vm1, %v33198_v17 }
0x1548   : > { %v16421_v21 = vmul.f32 %v27062_v45, %v31462_v4  ;;  %25907 = vmatprep.subr.mxu0 %v33198_v17  ;;  %v33884_v4 = vld [vmem:[#allocation152_spill] sm:$0xff]  ;;  %v33889_v45 = vld [vmem:[#allocation139_spill] sm:$0xff] }
0x1549   : > { %25908 = vmatpush3.msra.mxu0 %v33882_v50  ;;  %v16381_v55 = vpop.xlane.xlu1 %16380 }
0x154a   : > { %27069 = vrcp.f32 %v16381_v55  ;;  %25903 = vmatmul.mubr.msk.f32.vlgmr.msra.gmra.mxu1 %vm2124_vm3, %v16421_v21  ;;  %25919 = vmatprep.subr.mxu0 %v33198_v17  ;;  %v33891_v55 = vld [vmem:[#allocation141_spill] sm:$0xff] }
0x154b   : > { %v27064_v31 = vpop.eup %27063  ;;  %25913 = vmatpush3.msra.mxu1 %v33883_v20  ;;  %25916 = vmatprep.mubr.msk.f32.mxu1 %vm27293_vm1, %v33198_v17 }
0x154c   : > { %v16422_v41 = vmul.f32 %v27064_v31, %v31467_v46  ;;  %25914 = vmatprep.subr.mxu1 %v33198_v17  ;;  %v33886_v46 = vld [vmem:[#allocation154_spill] sm:$0xff] }
0x154d   : > { %25915 = vmatpush3.msra.mxu1 %v33884_v4  ;;  %v16384_v16 = vpop.xlane.xlu0 %16383  ;;  %v33893_v4 = vld [vmem:[#allocation143_spill] sm:$0xff] }
0x154e   : > { %27071 = vrcp.f32 %v16384_v16  ;;  %25910 = vmatmul.mubr.msk.f32.vlgmr.msra.gmra.mxu0 %vm2124_vm3, %v16422_v41  ;;  %25926 = vmatprep.subr.mxu1 %v33198_v17 }
0x154f   : > { %v27066_v49 = vpop.eup %27065  ;;  %25920 = vmatpush3.msra.mxu0 %v33885_v28  ;;  %25923 = vmatprep.mubr.msk.f32.mxu0 %vm27293_vm1, %v33198_v17 }
0x1550   : > { %v16423_v12 = vmul.f32 %v27066_v49, %v31472_v35  ;;  %25921 = vmatprep.subr.mxu0 %v33198_v17  ;;  %v33888_v35 = vld [vmem:[#allocation156_spill] sm:$0xff] }
0x1551   : > { %25922 = vmatpush3.msra.mxu0 %v33886_v46  ;;  %v16387_v1 = vpop.xlane.xlu1 %16386 }
0x1552   : > { %27073 = vrcp.f32 %v16387_v1  ;;  %25917 = vmatmul.mubr.msk.f32.vlgmr.msra.gmra.mxu1 %vm2124_vm3, %v16423_v12  ;;  %25933 = vmatprep.subr.mxu0 %v33198_v17  ;;  %v33895_v12 = vld [vmem:[#allocation145_spill] sm:$0xff] }
0x1553   : > { %v27068_v43 = vpop.eup %27067  ;;  %25927 = vmatpush3.msra.mxu1 %v33887_v10  ;;  %25930 = vmatprep.mubr.msk.f32.mxu1 %vm27293_vm1, %v33198_v17 }
0x1554   : > { %v16424_v38 = vmul.f32 %v27068_v43, %v31477_v51  ;;  %25928 = vmatprep.subr.mxu1 %v33198_v17  ;;  %v33890_v51 = vld [vmem:[#allocation158_spill] sm:$0xff]  ;;  %v33897_v43 = vld [vmem:[#allocation147_spill] sm:$0xff] }
0x1555   : > { %25929 = vmatpush3.msra.mxu1 %v33888_v35  ;;  %v16390_v39 = vpop.xlane.xlu0 %16389  ;;  %v33899_v35 = vld [vmem:[#allocation149_spill] sm:$0xff] }
0x1556   : > { %27075 = vrcp.f32 %v16390_v39  ;;  %25924 = vmatmul.mubr.msk.f32.vlgmr.msra.gmra.mxu0 %vm2124_vm3, %v16424_v38  ;;  %25940 = vmatprep.subr.mxu1 %v33198_v17  ;;  %v33898_v38 = vld [vmem:[#allocation163_spill] sm:$0xff] }
0x1557   : > { %v27070_v48 = vpop.eup %27069  ;;  %25934 = vmatpush3.msra.mxu0 %v33889_v45  ;;  %25937 = vmatprep.mubr.msk.f32.mxu0 %vm27293_vm1, %v33198_v17  ;;  %v33901_v45 = vld [vmem:[#allocation151_spill] sm:$0xff] }
0x1558   : > { %v16425_v37 = vmul.f32 %v27070_v48, %v31482_v56  ;;  %25935 = vmatprep.subr.mxu0 %v33198_v17  ;;  %v33892_v56 = vld [vmem:[#allocation160_spill] sm:$0xff] }
0x1559   : > { %25936 = vmatpush3.msra.mxu0 %v33890_v51  ;;  %v16393_v21 = vpop.xlane.xlu1 %16392  ;;  %v33900_v48 = vld [vmem:[#allocation164_spill] sm:$0xff]  ;;  %v33903_v51 = vld [vmem:[#allocation165_spill] sm:$0xff] }
0x155a   : > { %27077 = vrcp.f32 %v16393_v21  ;;  %25931 = vmatmul.mubr.msk.f32.vlgmr.msra.gmra.mxu1 %vm2124_vm3, %v16425_v37  ;;  %25947 = vmatprep.subr.mxu0 %v33198_v17 }
0x155b   : > { %v27072_v50 = vpop.eup %27071  ;;  %25941 = vmatpush3.msra.mxu1 %v33891_v55  ;;  %25944 = vmatprep.mubr.msk.f32.mxu1 %vm27293_vm1, %v33198_v17  ;;  %v33905_v55 = vld [vmem:[#allocation167_spill] sm:$0xff] }
0x155c   : > { %v16426_v31 = vmul.f32 %v27072_v50, %v31487_v7  ;;  %25942 = vmatprep.subr.mxu1 %v33198_v17  ;;  %v33894_v7 = vld [vmem:[#allocation161_spill] sm:$0xff] }
0x155d   : > { %25943 = vmatpush3.msra.mxu1 %v33892_v56  ;;  %v16396_v20 = vpop.xlane.xlu0 %16395  ;;  %v33906_v56 = vld [vmem:[#allocation159_spill] sm:$0xff] }
0x155e   : > { %27079 = vrcp.f32 %v16396_v20  ;;  %25938 = vmatmul.mubr.msk.f32.vlgmr.msra.gmra.mxu0 %vm2124_vm3, %v16426_v31  ;;  %25954 = vmatprep.subr.mxu1 %v33198_v17  ;;  %v33907_v20 = vld [vmem:[#allocation168_spill] sm:$0xff] }
0x155f   : > { %v27074_v41 = vpop.eup %27073  ;;  %25948 = vmatpush3.msra.mxu0 %v33893_v4  ;;  %25951 = vmatprep.mubr.msk.f32.mxu0 %vm27293_vm1, %v33198_v17  ;;  %v33909_v4 = vld [vmem:[#allocation173_spill] sm:$0xff] }
0x1560   : > { %v16427_v16 = vmul.f32 %v27074_v41, %v31492_v32  ;;  %25949 = vmatprep.subr.mxu0 %v33198_v17  ;;  %v33896_v32 = vld [vmem:[#allocation162_spill] sm:$0xff]  ;;  %v33908_v41 = vld [vmem:[#allocation171_spill] sm:$0xff] }
0x1561   : > { %25950 = vmatpush3.msra.mxu0 %v33894_v7  ;;  %v16399_v49 = vpop.xlane.xlu1 %16398  ;;  %v17633_v21 = vpop.permute.xlu0 %17632  ;;  %v33910_v7 = vld [vmem:[#allocation172_spill] sm:$0xff] }
0x1562   : > { %27081 = vrcp.f32 %v16399_v49  ;;  %25945 = vmatmul.mubr.msk.f32.vlgmr.msra.gmra.mxu1 %vm2124_vm3, %v16427_v16  ;;  %25961 = vmatprep.subr.mxu0 %v33198_v17  ;;  %v33911_v49 = vld [vmem:[#allocation174_spill] sm:$0xff] }
0x1563   : > { %v27076_v28 = vpop.eup %27075  ;;  %25955 = vmatpush3.msra.mxu1 %v33895_v12  ;;  %25958 = vmatprep.mubr.msk.f32.mxu1 %vm27293_vm1, %v33198_v17  ;;  %v33912_v12 = vld [vmem:[#allocation175_spill] sm:$0xff] }
0x1564   : > { %v16428_v46 = vmul.f32 %v27076_v28, %v31496_v11  ;;  %25956 = vmatprep.subr.mxu1 %v33198_v17 }
0x1565   : > { %25957 = vmatpush3.msra.mxu1 %v33896_v32  ;;  %v17707_v50 = vpop.permute.xlu1 %17706  ;;  %v17929_v28 = vpop.permute.xlu0 %17928 }
0x1566   : > { %25952 = vmatmul.mubr.msk.f32.vlgmr.msra.gmra.mxu0 %vm2124_vm3, %v16428_v46  ;;  %25968 = vmatprep.subr.mxu1 %v33198_v17  ;;  %v33913_v46 = vld [vmem:[#allocation170_spill] sm:$0xff] }
0x1567   : > { %v27078_v1 = vpop.eup %27077  ;;  %25962 = vmatpush3.msra.mxu0 %v33897_v43  ;;  %25965 = vmatprep.mubr.msk.f32.mxu0 %vm27293_vm1, %v33198_v17  ;;  %v33915_v43 = vld [vmem:[#allocation176_spill] sm:$0xff] }
0x1568   : > { %v16429_v10 = vmul.f32 %v27078_v1, %v31500_v40  ;;  %25963 = vmatprep.subr.mxu0 %v33198_v17  ;;  %v33914_v1 = vld [vmem:[#allocation178_spill] sm:$0xff] }
0x1569   : > { %25964 = vmatpush3.msra.mxu0 %v33898_v38  ;;  %v17781_v31 = vpop.permute.xlu1 %17780  ;;  %v33916_v38 = vld [vmem:[#allocation177_spill] sm:$0xff] }
0x156a   : > { %25959 = vmatmul.mubr.msk.f32.vlgmr.msra.gmra.mxu1 %vm2124_vm3, %v16429_v10  ;;  %25975 = vmatprep.subr.mxu0 %v33198_v17  ;;  %v18077_v10 = vpop.permute.xlu0 %18076 }
0x156b   : > { %v27080_v11 = vpop.eup %27079  ;;  %25969 = vmatpush3.msra.mxu1 %v33899_v35  ;;  %25972 = vmatprep.mubr.msk.f32.mxu1 %vm27293_vm1, %v33198_v17 }
0x156c   : > { %v16430_v39 = vmul.f32 %v27080_v11, %v31504_v63  ;;  %25970 = vmatprep.subr.mxu1 %v33198_v17  ;;  %v33902_v63 = vld [vmem:[#allocation153_spill] sm:$0xff]  ;;  %v33917_v11 = vld [vmem:[#allocation179_spill] sm:$0xff] }
0x156d   : > { %25971 = vmatpush3.msra.mxu1 %v33900_v48  ;;  %v17855_v16 = vpop.permute.xlu1 %17854  ;;  %v33919_v48 = vld [vmem:[#allocation14_spill] sm:$0xff] }
0x156e   : > { %25966 = vmatmul.mubr.msk.f32.vlgmr.msra.gmra.mxu0 %vm2124_vm3, %v16430_v39  ;;  %25982 = vmatprep.subr.mxu1 %v33198_v17  ;;  %v33918_v39 = vld [vmem:[#allocation155_spill] sm:$0xff] }
0x156f   : > { %v27082_v40 = vpop.eup %27081  ;;  %25976 = vmatpush3.xpose.msk.msra.mxu0 %vm859_vm2, %v33901_v45  ;;  %25979 = vmatprep.mubr.msk.f32.mxu0 %vm27293_vm1, %v33198_v17  ;;  %v33920_v45 = vld [vmem:[#allocation17_spill] sm:$0xff] }
0x1570   : > { %v16431_v37 = vmul.f32 %v27082_v40, %v31508_v47  ;;  %25977 = vmatprep.subr.mxu0 %v33198_v17  ;;  %v33904_v47 = vld [vmem:[#allocation166_spill] sm:$0xff]  ;;  %v18225_v40 = vpop.permute.xlu0 %18224 }
0x1571   : > { %v18003_v32 = vpop.permute.xlu1 %18002 }
0x1572   : > { %25973 = vmatmul.mubr.msk.f32.vlgmr.msra.gmra.mxu1 %vm2124_vm3, %v16431_v37  ;;  %v33921_v37 = vld [vmem:[#allocation180_spill] sm:$0xff] }
0x1573   : > { %25978 = vmatpush3.xpose.msk.msra.mxu0 %vm859_vm2, %v33902_v63  ;;  %25983 = vmatpush3.xpose.msk.msra.mxu1 %vm859_vm2, %v33903_v51  ;;  %v33922_v51 = vld [vmem:[#allocation169_spill] sm:$0xff] }
0x1574   : > { %25984 = vmatprep.subr.mxu1 %v33198_v17  ;;  %25989 = vmatprep.subr.mxu0 %v33198_v17 }
0x1575   : > { %25986 = vmatprep.mubr.msk.f32.mxu1 %vm27293_vm1, %v33198_v17  ;;  %v18151_v35 = vpop.permute.xlu1 %18150 }
0x1576   : > { %25980 = vmatmul.mubr.msk.f32.vlgmr.msra.gmra.mxu0 %vm859_vm2, %v17633_v21  ;;  %v33923_v21 = vld [vmem:[#allocation181_spill] sm:$0xff] }
0x1577   : > { %25985 = vmatpush3.xpose.msk.msra.mxu1 %vm859_vm2, %v33904_v47  ;;  %25990 = vmatpush3.xpose.msk.msra.mxu0 %vm859_vm2, %v33905_v55  ;;  %v33924_v47 = vld [vmem:[#allocation157_spill] sm:$0xff]  ;;  %v33925_v55 = vld [vmem:[#allocation182_spill] sm:$0xff] }
0x1578   : > { %25996 = vmatprep.subr.mxu1 %v33198_v17  ;;  %25991 = vmatprep.subr.mxu0 %v33198_v17 }
0x1579   : > { %25993 = vmatprep.mubr.msk.f32.mxu0 %vm27293_vm1, %v33198_v17  ;;  %v18299_v63 = vpop.permute.xlu1 %18298 }
0x157a   : > { %25987 = vmatmul.mubr.msk.f32.vlgmr.msra.gmra.mxu1 %vm859_vm2, %v17707_v50  ;;  %v18373_v50 = vpop.permute.xlu0 %18372 }
0x157b   : > { %25992 = vmatpush3.xpose.msk.msra.mxu0 %vm859_vm2, %v33906_v56  ;;  %25997 = vmatpush3.xpose.msk.msra.mxu1 %vm859_vm2, %v33907_v20  ;;  %v33926_v56 = vld [vmem:[#allocation185_spill] sm:$0xff]  ;;  %v33927_v20 = vld [vmem:[#allocation183_spill] sm:$0xff] }
0x157c   : > { %25998 = vmatprep.subr.mxu1 %v33198_v17  ;;  %26003 = vmatprep.subr.mxu0 %v33198_v17 }
0x157d   : > { %26000 = vmatprep.mubr.msk.f32.mxu1 %vm27293_vm1, %v33198_v17 }
0x157e   : > { %25994 = vmatmul.mubr.msk.f32.vlgmr.msra.gmra.mxu0 %vm859_vm2, %v17781_v31  ;;  %v18447_v31 = vpop.permute.xlu1 %18446 }
0x157f   : > { %25999 = vmatpush3.xpose.msk.msra.mxu1 %vm859_vm2, %v33908_v41  ;;  %26004 = vmatpush3.xpose.msk.msra.mxu0 %vm859_vm2, %v33909_v4  ;;  %v18521_v41 = vpop.permute.xlu0 %18520  ;;  %v33928_v4 = vld [vmem:[#allocation184_spill] sm:$0xff] }
0x1580   : > { %26010 = vmatprep.subr.mxu1 %v33198_v17  ;;  %26005 = vmatprep.subr.mxu0 %v33198_v17 }
0x1581   : > { %26007 = vmatprep.mubr.msk.f32.mxu0 %vm27293_vm1, %v33198_v17 }
0x1582   : > { %26001 = vmatmul.mubr.msk.f32.vlgmr.msra.gmra.mxu1 %vm859_vm2, %v17855_v16  ;;  %v33929_v16 = vld [vmem:[#allocation186_spill] sm:$0xff] }
0x1583   : > { %26006 = vmatpush3.xpose.msk.msra.mxu0 %vm859_vm2, %v33910_v7  ;;  %26011 = vmatpush3.xpose.msk.msra.mxu1 %vm859_vm2, %v33911_v49  ;;  %v18595_v7 = vpop.permute.xlu1 %18594  ;;  %v33930_v49 = vld [vmem:[#allocation189_spill] sm:$0xff] }
0x1584   : > { %26012 = vmatprep.subr.mxu1 %v33198_v17  ;;  %26017 = vmatprep.subr.mxu0 %v33198_v17 }
0x1585   : > { %26014 = vmatprep.mubr.msk.f32.mxu1 %vm27293_vm1, %v33198_v17 }
0x1586   : > { %26008 = vmatmul.mubr.msk.f32.vlgmr.msra.gmra.mxu0 %vm859_vm2, %v17929_v28  ;;  %v33931_v28 = vld [vmem:[#allocation187_spill] sm:$0xff] }
0x1587   : > { %26013 = vmatpush3.xpose.msk.msra.mxu1 %vm859_vm2, %v33912_v12  ;;  %26018 = vmatpush3.xpose.msk.msra.mxu0 %vm859_vm2, %v33913_v46  ;;  %v18669_v12 = vpop.permute.xlu0 %18668  ;;  %v33932_v46 = vld [vmem:[#allocation188_spill] sm:$0xff] }
0x1588   : > { %26019 = vmatprep.subr.mxu0 %v33198_v17  ;;  %26024 = vmatprep.subr.mxu1 %v33198_v17 }
0x1589   : > { %26021 = vmatprep.mubr.msk.f32.mxu0 %vm27293_vm1, %v33198_v17 }
0x158a   : > { %26015 = vmatmul.mubr.msk.f32.vlgmr.msra.gmra.mxu1 %vm859_vm2, %v18003_v32  ;;  %v33933_v32 = vld [vmem:[#allocation190_spill] sm:$0xff] }
0x158b   : > { %26020 = vmatpush3.xpose.msk.msra.mxu0 %vm859_vm2, %v33914_v1  ;;  %26025 = vmatpush3.xpose.msk.msra.mxu1 %vm859_vm2, %v33915_v43  ;;  %v18743_v1 = vpop.permute.xlu1 %18742  ;;  %v33934_v43 = vld [vmem:[#allocation191_spill] sm:$0xff] }
0x158c   : > { %26026 = vmatprep.subr.mxu1 %v33198_v17  ;;  %26031 = vmatprep.subr.mxu0 %v33198_v17 }
0x158d   : > { %26028 = vmatprep.mubr.msk.f32.mxu1 %vm27293_vm1, %v33198_v17 }
0x158e   : > { %26022 = vmatmul.mubr.msk.f32.vlgmr.msra.gmra.mxu0 %vm859_vm2, %v18077_v10  ;;  %v33935_v10 = vld [vmem:[#allocation192_spill] sm:$0xff] }
0x158f   : > { %26027 = vmatpush3.xpose.msk.msra.mxu1 %vm859_vm2, %v33916_v38  ;;  %26032 = vmatpush3.xpose.msk.msra.mxu0 %vm859_vm2, %v33917_v11  ;;  %v33936_v38 = vld [vmem:[#allocation193_spill] sm:$0xff] }
0x1590   : > { %26033 = vmatprep.subr.mxu0 %v33198_v17  ;;  %26038 = vmatprep.subr.mxu1 %v33198_v17 }
0x1591   : > { %26035 = vmatprep.mubr.msk.f32.mxu0 %vm27293_vm1, %v33198_v17 }
0x1592   : > { %26029 = vmatmul.mubr.msk.f32.vlgmr.msra.gmra.mxu1 %vm859_vm2, %v18151_v35 }
0x1593   : > { %26034 = vmatpush3.xpose.msk.msra.mxu0 %vm859_vm2, %v33918_v39  ;;  %26039 = vmatpush3.xpose.msk.msra.mxu1 %vm859_vm2, %v33919_v48 }
0x1594   : > { %26040 = vmatprep.subr.mxu1 %v33198_v17  ;;  %26045 = vmatprep.subr.mxu0 %v33198_v17 }
0x1595   : > { %26042 = vmatprep.mubr.msk.f32.mxu1 %vm27293_vm1, %v33198_v17 }
0x1596   : > { %26036 = vmatmul.mubr.msk.f32.vlgmr.msra.gmra.mxu0 %vm859_vm2, %v18225_v40 }
0x1597   : > { %26041 = vmatpush3.xpose.msk.msra.mxu1 %vm859_vm2, %v33920_v45  ;;  %26046 = vmatpush3.xpose.msk.msra.mxu0 %vm859_vm2, %v33921_v37 }
0x1598   : > { %26047 = vmatprep.subr.mxu0 %v33198_v17  ;;  %26052 = vmatprep.subr.mxu1 %v33198_v17 }
0x1599   : > { %26049 = vmatprep.mubr.msk.f32.mxu0 %vm27293_vm1, %v33198_v17 }
0x159a   : > { %26043 = vmatmul.mubr.msk.f32.vlgmr.msra.gmra.mxu1 %vm859_vm2, %v18299_v63 }
0x159b   : > { %26048 = vmatpush3.xpose.msk.msra.mxu0 %vm859_vm2, %v33922_v51  ;;  %26053 = vmatpush3.xpose.msk.msra.mxu1 %vm859_vm2, %v33923_v21 }
0x159c   : > { %26054 = vmatprep.subr.mxu1 %v33198_v17  ;;  %26059 = vmatprep.subr.mxu0 %v33198_v17 }
0x159d   : > { %26056 = vmatprep.mubr.msk.f32.mxu1 %vm27293_vm1, %v33198_v17 }
0x159e   : > { %26050 = vmatmul.mubr.msk.f32.vlgmr.msra.gmra.mxu0 %vm859_vm2, %v18373_v50 }
0x159f   : > { %26055 = vmatpush3.xpose.msk.msra.mxu1 %vm859_vm2, %v33924_v47  ;;  %26060 = vmatpush3.xpose.msk.msra.mxu0 %vm859_vm2, %v33925_v55 }
0x15a0   : > { %26061 = vmatprep.subr.mxu0 %v33198_v17  ;;  %26066 = vmatprep.subr.mxu1 %v33198_v17 }
0x15a1   : > { %26063 = vmatprep.mubr.msk.f32.mxu0 %vm27293_vm1, %v33198_v17 }
0x15a2   : > { %26057 = vmatmul.mubr.msk.f32.vlgmr.msra.gmra.mxu1 %vm859_vm2, %v18447_v31 }
0x15a3   : > { %26062 = vmatpush3.xpose.msk.msra.mxu0 %vm859_vm2, %v33926_v56  ;;  %26067 = vmatpush3.xpose.msk.msra.mxu1 %vm859_vm2, %v33927_v20 }
0x15a4   : > { %26068 = vmatprep.subr.mxu1 %v33198_v17  ;;  %26073 = vmatprep.subr.mxu0 %v33198_v17 }
0x15a5   : > { %26070 = vmatprep.mubr.msk.f32.mxu1 %vm27293_vm1, %v33198_v17 }
0x15a6   : > { %26064 = vmatmul.mubr.msk.f32.vlgmr.msra.gmra.mxu0 %vm859_vm2, %v18521_v41 }
0x15a7   : > { %26069 = vmatpush3.xpose.msk.msra.mxu1 %vm859_vm2, %v33928_v4  ;;  %26074 = vmatpush3.xpose.msk.msra.mxu0 %vm859_vm2, %v33929_v16 }
0x15a8   : > { %26075 = vmatprep.subr.mxu0 %v33198_v17  ;;  %26080 = vmatprep.subr.mxu1 %v33198_v17 }
0x15a9   : > { %26077 = vmatprep.mubr.msk.f32.mxu0 %vm27293_vm1, %v33198_v17 }
0x15aa   : > { %26071 = vmatmul.mubr.msk.f32.vlgmr.msra.gmra.mxu1 %vm859_vm2, %v18595_v7 }
0x15ab   : > { %26076 = vmatpush3.xpose.msk.msra.mxu0 %vm859_vm2, %v33930_v49  ;;  %26081 = vmatpush3.xpose.msk.msra.mxu1 %vm859_vm2, %v33931_v28 }
0x15ac   : > { %26082 = vmatprep.subr.mxu1 %v33198_v17  ;;  %26087 = vmatprep.subr.mxu0 %v33198_v17 }
0x15ad   : > { %26084 = vmatprep.mubr.msk.f32.mxu1 %vm27293_vm1, %v33198_v17 }
0x15ae   : > { %26078 = vmatmul.mubr.msk.f32.vlgmr.msra.gmra.mxu0 %vm859_vm2, %v18669_v12 }
0x15af   : > { %26083 = vmatpush3.xpose.msk.msra.mxu1 %vm859_vm2, %v33932_v46  ;;  %26088 = vmatpush3.msra.mxu0 %v33933_v32 }
0x15b0   : > { %26089 = vmatprep.subr.mxu0 %v33198_v17  ;;  %26094 = vmatprep.subr.mxu1 %v33198_v17 }
0x15b1   : > { %26090 = vmatpush3.msra.mxu0 %v33934_v43  ;;  %26091 = vmatprep.mubr.msk.f32.mxu0 %vm27293_vm1, %v33198_v17 }
0x15b2   : > { %26085 = vmatmul.mubr.msk.f32.vlgmr.msra.gmra.mxu1 %vm859_vm2, %v18743_v1  ;;  %26101 = vmatprep.subr.mxu0 %v33198_v17 }
0x15b3   : > { %26095 = vmatpush3.msra.mxu1 %v33935_v10  ;;  %26098 = vmatprep.mubr.msk.f32.mxu1 %vm27293_vm1, %v33198_v17 }
0x15b4   : > { %26096 = vmatprep.subr.mxu1 %v33198_v17 }
0x15b5   : > { %26097 = vmatpush3.msra.mxu1 %v33936_v38 }
0x15b6   : > { %26108 = vmatprep.subr.mxu1 %v33198_v17 }
0x15f6   : > { %v31816_v11 = vpop.f32.mrf.mxu0 }
0x15f8   : > { %v25869_v35 = vpop.f32.mrf.mxu0 }
0x15fa   : > { %v31818_v39 = vpop.f32.mrf.mxu1 }
0x15fc   : > { %v25876_v48 = vpop.f32.mrf.mxu1 }
0x15fe   : > { %v31820_v40 = vpop.f32.mrf.mxu0 }
0x1600   : > { %v25883_v45 = vpop.f32.mrf.mxu0 }
0x1602   : > { %v31822_v37 = vpop.f32.mrf.mxu1 }
0x1604   : > { %v25890_v63 = vpop.f32.mrf.mxu1 }
0x1606   : > { %v31824_v51 = vpop.f32.mrf.mxu0 }
0x1608   : > { %v25897_v21 = vpop.f32.mrf.mxu0 }
0x160a   : > { %v31826_v50 = vpop.f32.mrf.mxu1 }
0x160c   : > { %v25904_v47 = vpop.f32.mrf.mxu1 }
0x160e   : > { %v31828_v55 = vpop.f32.mrf.mxu0 }
0x1610   : > { %v25911_v31 = vpop.f32.mrf.mxu0 }
0x1612   : > { %v31830_v56 = vpop.f32.mrf.mxu1 }
0x1614   : > { %v25918_v20 = vpop.f32.mrf.mxu1 }
0x1616   : > { %v31832_v41 = vpop.f32.mrf.mxu0 }
0x1618   : > { %v25925_v4 = vpop.f32.mrf.mxu0 }
0x161a   : > { %v31834_v16 = vpop.f32.mrf.mxu1 }
0x161b   : > { %33937 = vst [vmem:[#allocation12_spill] sm:$0xff] %v31834_v16 }
0x161c   : > { %v25932_v7 = vpop.f32.mrf.mxu1 }
0x161e   : > { %v31836_v49 = vpop.f32.mrf.mxu0 }
0x161f   : > { %33938 = vst [vmem:[#allocation11_spill] sm:$0xff] %v31836_v49 }
0x1620   : > { %v25939_v28 = vpop.f32.mrf.mxu0 }
0x1622   : > { %v31838_v12 = vpop.f32.mrf.mxu1 }
0x1623   : > { %33939 = vst [vmem:[#allocation15_spill] sm:$0xff] %v31838_v12 }
0x1624   : > { %v25946_v46 = vpop.f32.mrf.mxu1 }
0x1626   : > { %v31840_v32 = vpop.f32.mrf.mxu0 }
0x1627   : > { %33940 = vst [vmem:[#allocation13_spill] sm:$0xff] %v31840_v32 }
0x1628   : > { %v25953_v1 = vpop.f32.mrf.mxu0 }
0x162a   : > { %v31842_v43 = vpop.f32.mrf.mxu1 }
0x162b   : > { %33941 = vst [vmem:[#allocation7_spill] sm:$0xff] %v31842_v43 }
0x162c   : > { %v25960_v10 = vpop.f32.mrf.mxu1 }
0x162e   : > { %v31844_v38 = vpop.f32.mrf.mxu0 }
0x162f   : > { %33942 = vst [vmem:[#allocation8_spill] sm:$0xff] %v31844_v38 }
0x1630   : > { %v25967_v35 = vpop.f32.mrf.mxu0 }
0x1632   : > { %v31846_v48 = vpop.f32.mrf.mxu1 }
0x1633   : > { %33943 = vst [vmem:[#allocation9_spill] sm:$0xff] %v31846_v48 }
0x1634   : > { %v25974_v45 = vpop.f32.mrf.mxu1 }
0x1636   : > { %v31848_v63 = vpop.f32.mrf.mxu0 }
0x1637   : > { %v18816_v21 = vsel %vm2124_vm3, %v31848_v63, -inf }
0x1638   : > { %18817 = vmax.xlane.f32.xlu0 %v18816_v21  ;;  %v25981_v47 = vpop.f32.mrf.mxu0 }
0x163a   : > { %v31852_v31 = vpop.f32.mrf.mxu1 }
0x163b   : > { %v18819_v20 = vsel %vm2124_vm3, %v31852_v31, -inf }
0x163c   : > { %18820 = vmax.xlane.f32.xlu1 %v18819_v20  ;;  %v25988_v4 = vpop.f32.mrf.mxu1 }
0x163e   : > { %v31856_v7 = vpop.f32.mrf.mxu0 }
0x163f   : > { %v18822_v28 = vsel %vm2124_vm3, %v31856_v7, -inf }
0x1640   : > { %18823 = vmax.xlane.f32.xlu0 %v18822_v28  ;;  %v25995_v46 = vpop.f32.mrf.mxu0 }
0x1642   : > { %v31860_v1 = vpop.f32.mrf.mxu1 }
0x1643   : > { %v18825_v10 = vsel %vm2124_vm3, %v31860_v1, -inf }
0x1644   : > { %v26002_v35 = vpop.f32.mrf.mxu1  ;;  %18826 = vmax.xlane.f32.xlu0 %v18825_v10 }
0x1646   : > { %v31864_v45 = vpop.f32.mrf.mxu0 }
0x1647   : > { %v18828_v21 = vsel %vm2124_vm3, %v31864_v45, -inf }
0x1648   : > { %18829 = vmax.xlane.f32.xlu0 %v18828_v21  ;;  %v26009_v47 = vpop.f32.mrf.mxu0 }
0x164a   : > { %v31868_v20 = vpop.f32.mrf.mxu1 }
0x164b   : > { %v18831_v4 = vsel %vm2124_vm3, %v31868_v20, -inf }
0x164c   : > { %18832 = vmax.xlane.f32.xlu1 %v18831_v4  ;;  %v26016_v28 = vpop.f32.mrf.mxu1 }
0x164e   : > { %v31872_v46 = vpop.f32.mrf.mxu0 }
0x164f   : > { %v18834_v35 = vsel %vm2124_vm3, %v31872_v46, -inf }
0x1650   : > { %18835 = vmax.xlane.f32.xlu0 %v18834_v35  ;;  %v26023_v10 = vpop.f32.mrf.mxu0 }
0x1652   : > { %v31876_v48 = vpop.f32.mrf.mxu1 }
0x1653   : > { %v18837_v21 = vsel %vm2124_vm3, %v31876_v48, -inf }
0x1654   : > { %18838 = vmax.xlane.f32.xlu1 %v18837_v21  ;;  %v26030_v47 = vpop.f32.mrf.mxu1 }
0x1656   : > { %v31880_v38 = vpop.f32.mrf.mxu0 }
0x1657   : > { %v18840_v4 = vsel %vm2124_vm3, %v31880_v38, -inf }
0x1658   : > { %18841 = vmax.xlane.f32.xlu0 %v18840_v4  ;;  %v26037_v28 = vpop.f32.mrf.mxu0 }
0x165a   : > { %v31884_v62 = vpop.f32.mrf.mxu1 }
0x165b   : > { %v18843_v35 = vsel %vm2124_vm3, %v31884_v62, -inf }
0x165c   : > { %18844 = vmax.xlane.f32.xlu1 %v18843_v35  ;;  %v26044_v10 = vpop.f32.mrf.mxu1 }
0x165e   : > { %v31888_v43 = vpop.f32.mrf.mxu0 }
0x165f   : > { %v18846_v21 = vsel %vm2124_vm3, %v31888_v43, -inf }
0x1660   : > { %18847 = vmax.xlane.f32.xlu0 %v18846_v21  ;;  %v26051_v47 = vpop.f32.mrf.mxu0 }
0x1662   : > { %v31892_v19 = vpop.f32.mrf.mxu1 }
0x1663   : > { %v18849_v4 = vsel %vm2124_vm3, %v31892_v19, -inf }
0x1664   : > { %18850 = vmax.xlane.f32.xlu1 %v18849_v4  ;;  %v26058_v28 = vpop.f32.mrf.mxu1 }
0x1666   : > { %v31896_v9 = vpop.f32.mrf.mxu0 }
0x1667   : > { %v18852_v35 = vsel %vm2124_vm3, %v31896_v9, -inf }
0x1668   : > { %18853 = vmax.xlane.f32.xlu0 %v18852_v35  ;;  %v26065_v10 = vpop.f32.mrf.mxu0 }
0x166a   : > { %v31900_v60 = vpop.f32.mrf.mxu1 }
0x166b   : > { %v18855_v21 = vsel %vm2124_vm3, %v31900_v60, -inf }
0x166c   : > { %18856 = vmax.xlane.f32.xlu1 %v18855_v21  ;;  %v26072_v47 = vpop.f32.mrf.mxu1 }
0x166e   : > { %v31904_v32 = vpop.f32.mrf.mxu0 }
0x166f   : > { %v18858_v4 = vsel %vm2124_vm3, %v31904_v32, -inf }
0x1670   : > { %18859 = vmax.xlane.f32.xlu0 %v18858_v4  ;;  %v26079_v28 = vpop.f32.mrf.mxu0 }
0x1672   : > { %v31908_v15 = vpop.f32.mrf.mxu1 }
0x1673   : > { %v18861_v35 = vsel %vm2124_vm3, %v31908_v15, -inf }
0x1674   : > { %18862 = vmax.xlane.f32.xlu1 %v18861_v35  ;;  %v26086_v10 = vpop.f32.mrf.mxu1 }
0x16c1   : > { %v18818_v58 = vpop.xlane.xlu0 %18817 }
0x16c2   : > { %v18864_v12 = vsub.f32 %v31848_v63, %v18818_v58 }
0x16c4   : > { %v18880_v59 = vmul.f32 1.442695, %v18864_v12 }
0x16c5   : > { %v18821_v21 = vpop.xlane.xlu1 %18820 }
0x16c6   : > { %27083 = vpow2.f32 %v18880_v59  ;;  %v18865_v47 = vsub.f32 %v31852_v31, %v18821_v21 }
0x16c8   : > { %v18882_v49 = vmul.f32 1.442695, %v18865_v47 }
0x16c9   : > { %v18824_v42 = vpop.xlane.xlu0 %18823 }
0x16ca   : > { %27085 = vpow2.f32 %v18882_v49  ;;  %v18866_v4 = vsub.f32 %v31856_v7, %v18824_v42 }
0x16cc   : > { %v18884_v28 = vmul.f32 1.442695, %v18866_v4 }
0x16cd   : > { %v18827_v16 = vpop.xlane.xlu0 %18826 }
0x16ce   : > { %27087 = vpow2.f32 %v18884_v28  ;;  %v18867_v52 = vsub.f32 %v31860_v1, %v18827_v16 }
0x16d0   : > { %v18886_v35 = vmul.f32 1.442695, %v18867_v52 }
0x16d1   : > { %v18830_v10 = vpop.xlane.xlu0 %18829 }
0x16d2   : > { %27089 = vpow2.f32 %v18886_v35  ;;  %v18868_v58 = vsub.f32 %v31864_v45, %v18830_v10 }
0x16d3   : > { %v31917_v12 = vpop.eup %27083 }
0x16d4   : > { %v18888_v59 = vmul.f32 1.442695, %v18868_v58  ;;  %v18912_v63 = vsel %vm2124_vm3, %v31917_v12, 0.0 }
0x16d5   : > { %v18833_v31 = vpop.xlane.xlu1 %18832  ;;  %18913 = vadd.xlane.f32.xlu0 %v18912_v63 }
0x16d6   : > { %27091 = vpow2.f32 %v18888_v59  ;;  %v18869_v42 = vsub.f32 %v31868_v20, %v18833_v31 }
0x16d7   : > { %v31922_v49 = vpop.eup %27085 }
0x16d8   : > { %v18890_v7 = vmul.f32 1.442695, %v18869_v42  ;;  %v18915_v52 = vsel %vm2124_vm3, %v31922_v49, 0.0 }
0x16d9   : > { %18916 = vadd.xlane.f32.xlu1 %v18915_v52  ;;  %v18836_v16 = vpop.xlane.xlu0 %18835 }
0x16da   : > { %27093 = vpow2.f32 %v18890_v7  ;;  %v18870_v1 = vsub.f32 %v31872_v46, %v18836_v16 }
0x16db   : > { %v31927_v45 = vpop.eup %27087 }
0x16dc   : > { %v18892_v21 = vmul.f32 1.442695, %v18870_v1  ;;  %v18918_v47 = vsel %vm2124_vm3, %v31927_v45, 0.0 }
0x16dd   : > { %v18839_v4 = vpop.xlane.xlu1 %18838  ;;  %18919 = vadd.xlane.f32.xlu0 %v18918_v47 }
0x16de   : > { %27095 = vpow2.f32 %v18892_v21  ;;  %v18871_v20 = vsub.f32 %v31876_v48, %v18839_v4 }
0x16df   : > { %v31932_v28 = vpop.eup %27089 }
0x16e0   : > { %v18894_v35 = vmul.f32 1.442695, %v18871_v20  ;;  %v18921_v10 = vsel %vm2124_vm3, %v31932_v28, 0.0 }
0x16e1   : > { %18922 = vadd.xlane.f32.xlu1 %v18921_v10  ;;  %v18842_v58 = vpop.xlane.xlu0 %18841 }
0x16e2   : > { %27097 = vpow2.f32 %v18894_v35  ;;  %v18872_v46 = vsub.f32 %v31880_v38, %v18842_v58 }
0x16e3   : > { %v31937_v59 = vpop.eup %27091 }
0x16e4   : > { %v18896_v63 = vmul.f32 1.442695, %v18872_v46  ;;  %v18924_v31 = vsel %vm2124_vm3, %v31937_v59, 0.0 }
0x16e5   : > { %v18845_v42 = vpop.xlane.xlu1 %18844  ;;  %18925 = vadd.xlane.f32.xlu0 %v18924_v31 }
0x16e6   : > { %27099 = vpow2.f32 %v18896_v63  ;;  %v18873_v48 = vsub.f32 %v31884_v62, %v18845_v42 }
0x16e7   : > { %v31942_v7 = vpop.eup %27093 }
0x16e8   : > { %v18898_v52 = vmul.f32 1.442695, %v18873_v48  ;;  %v18927_v16 = vsel %vm2124_vm3, %v31942_v7, 0.0 }
0x16e9   : > { %18928 = vadd.xlane.f32.xlu1 %v18927_v16  ;;  %v18848_v1 = vpop.xlane.xlu0 %18847 }
0x16ea   : > { %27101 = vpow2.f32 %v18898_v52  ;;  %v18874_v38 = vsub.f32 %v31888_v43, %v18848_v1 }
0x16eb   : > { %v31947_v21 = vpop.eup %27095 }
0x16ec   : > { %v18900_v47 = vmul.f32 1.442695, %v18874_v38  ;;  %v18930_v4 = vsel %vm2124_vm3, %v31947_v21, 0.0 }
0x16ed   : > { %v18851_v20 = vpop.xlane.xlu1 %18850  ;;  %18931 = vadd.xlane.f32.xlu0 %v18930_v4 }
0x16ee   : > { %27103 = vpow2.f32 %v18900_v47  ;;  %v18875_v62 = vsub.f32 %v31892_v19, %v18851_v20 }
0x16ef   : > { %v31952_v35 = vpop.eup %27097 }
0x16f0   : > { %v18902_v10 = vmul.f32 1.442695, %v18875_v62  ;;  %v18933_v58 = vsel %vm2124_vm3, %v31952_v35, 0.0 }
0x16f1   : > { %18934 = vadd.xlane.f32.xlu1 %v18933_v58  ;;  %v18854_v46 = vpop.xlane.xlu0 %18853 }
0x16f2   : > { %27105 = vpow2.f32 %v18902_v10  ;;  %v18876_v43 = vsub.f32 %v31896_v9, %v18854_v46 }
0x16f3   : > { %v31957_v63 = vpop.eup %27099 }
0x16f4   : > { %v18904_v31 = vmul.f32 1.442695, %v18876_v43  ;;  %v18936_v42 = vsel %vm2124_vm3, %v31957_v63, 0.0 }
0x16f5   : > { %v18857_v48 = vpop.xlane.xlu1 %18856  ;;  %18937 = vadd.xlane.f32.xlu0 %v18936_v42 }
0x16f6   : > { %27107 = vpow2.f32 %v18904_v31  ;;  %v18877_v19 = vsub.f32 %v31900_v60, %v18857_v48 }
0x16f7   : > { %v31962_v52 = vpop.eup %27101 }
0x16f8   : > { %v18906_v16 = vmul.f32 1.442695, %v18877_v19  ;;  %v18939_v1 = vsel %vm2124_vm3, %v31962_v52, 0.0 }
0x16f9   : > { %18940 = vadd.xlane.f32.xlu1 %v18939_v1  ;;  %v18860_v38 = vpop.xlane.xlu0 %18859  ;;  %v33948_v1 = vld [vmem:[#allocation211_spill] sm:$0xff] }
0x16fa   : > { %27109 = vpow2.f32 %v18906_v16  ;;  %v18878_v9 = vsub.f32 %v31904_v32, %v18860_v38 }
0x16fb   : > { %v31967_v47 = vpop.eup %27103 }
0x16fc   : > { %v18908_v4 = vmul.f32 1.442695, %v18878_v9  ;;  %v18942_v20 = vsel %vm2124_vm3, %v31967_v47, 0.0 }
0x16fd   : > { %v18863_v62 = vpop.xlane.xlu1 %18862  ;;  %18943 = vadd.xlane.f32.xlu0 %v18942_v20  ;;  %v33950_v20 = vld [vmem:[#allocation215_spill] sm:$0xff] }
0x16fe   : > { %27111 = vpow2.f32 %v18908_v4  ;;  %v18879_v60 = vsub.f32 %v31908_v15, %v18863_v62 }
0x16ff   : > { %v31972_v10 = vpop.eup %27105 }
0x1700   : > { %v18910_v58 = vmul.f32 1.442695, %v18879_v60  ;;  %v18945_v46 = vsel %vm2124_vm3, %v31972_v10, 0.0 }
0x1701   : > { %18946 = vadd.xlane.f32.xlu1 %v18945_v46  ;;  %v33952_v46 = vld [vmem:[#allocation216_spill] sm:$0xff] }
0x1702   : > { %27113 = vpow2.f32 %v18910_v58 }
0x1703   : > { %v31976_v32 = vpop.eup %27107 }
0x1704   : > { %v18948_v43 = vsel %vm2124_vm3, %v31976_v32, 0.0 }
0x1705   : > { %18949 = vadd.xlane.f32.xlu0 %v18948_v43 }
0x1707   : > { %v31980_v31 = vpop.eup %27109 }
0x1708   : > { %v18951_v42 = vsel %vm2124_vm3, %v31980_v31, 0.0 }
0x1709   : > { %18952 = vadd.xlane.f32.xlu1 %v18951_v42 }
0x170b   : > { %v31984_v15 = vpop.eup %27111 }
0x170c   : > { %v18954_v48 = vsel %vm2124_vm3, %v31984_v15, 0.0 }
0x170d   : > { %18955 = vadd.xlane.f32.xlu0 %v18954_v48 }
0x170f   : > { %v31988_v19 = vpop.eup %27113 }
0x1710   : > { %v18957_v16 = vsel %vm2124_vm3, %v31988_v19, 0.0 }
0x1711   : > { %18958 = vadd.xlane.f32.xlu1 %v18957_v16  ;;  %v33954_v16 = vld [vmem:[#allocation218_spill] sm:$0xff] }
0x1722   : > { %20266 = vrot.lane.b32.xlu1 %v30709_v57, %s27296_s25 }
0x1723   : > { %20192 = vrot.lane.b32.xlu0 %v30700_v8, %s27296_s25 }
0x1726   : > { %20340 = vrot.lane.b32.xlu1 %v30719_v3, %s27296_s25 }
0x1727   : > { %20488 = vrot.lane.b32.xlu0 %v30743_v34, %s27296_s25 }
0x172a   : > { %20414 = vrot.lane.b32.xlu1 %v30731_v29, %s27296_s25 }
0x172b   : > { %20636 = vrot.lane.b32.xlu0 %v30767_v24, %s27296_s25 }
0x172e   : > { %20562 = vrot.lane.b32.xlu1 %v30755_v5, %s27296_s25 }
0x172f   : > { %20784 = vrot.lane.b32.xlu0 %v30791_v30, %s27296_s25  ;;  %v33944_v30 = vld [vmem:[#allocation212_spill] sm:$0xff] }
0x1732   : > { %20710 = vrot.lane.b32.xlu1 %v30779_v61, %s27296_s25 }
0x1733   : > { %20932 = vrot.lane.b32.xlu0 %v30815_v2, %s27296_s25  ;;  %v33945_v2 = vld [vmem:[#allocation20_spill] sm:$0xff] }
0x1736   : > { %20858 = vrot.lane.b32.xlu1 %v30803_v0, %s27296_s25 }
0x1737   : > { %21080 = vrot.lane.b32.xlu0 %v30839_v53, %s27296_s25 }
0x173a   : > { %21006 = vrot.lane.b32.xlu1 %v30827_v22, %s27296_s25 }
0x173b   : > { %21228 = vrot.lane.b32.xlu0 %v30863_v18, %s27296_s25 }
0x173e   : > { %21154 = vrot.lane.b32.xlu1 %v30851_v14, %s27296_s25  ;;  %v33946_v14 = vld [vmem:[#allocation214_spill] sm:$0xff] }
0x1742   : > { %21302 = vrot.lane.b32.xlu1 %v30875_v33, %s27296_s25  ;;  %v33947_v33 = vld [vmem:[#allocation210_spill] sm:$0xff]  ;;  %s27297_s25 = smov [#allocation4]  }
0x1743   : > { %s27233_s10 = sshll.u32 %s27297_s25, 4  ;;  %s27234_s10 = int_to_ptr.vmem [resolvable:$false] %s27233_s10 }
0x1744   : > { %s27235_s11 = scalar_lea.vmem %s27234_s10, 1024  ;;  %p27236_p2 = scmp.lt.s32.totalorder %s32720_s7, %s27234_s10 }
0x1745   : > { %p27237_p3 = scmp.lt.s32.totalorder %s27235_s11, %s27229_s23 }
0x1747   : > { %p27238_p4 = por %p27237_p3, %p27236_p2 }
0x1749   : > { %p27239_p5 = pnand %p27238_p4, %p27232_p1 }
0x175e   : > { %v18914_v8 = vpop.xlane.xlu0 %18913 }
0x175f   : > { %27115 = vrcp.f32 %v18914_v8 }
0x1762   : > { %v18917_v57 = vpop.xlane.xlu1 %18916 }
0x1763   : > { %27117 = vrcp.f32 %v18917_v57 }
0x1766   : > { %v18920_v3 = vpop.xlane.xlu0 %18919 }
0x1767   : > { %27119 = vrcp.f32 %v18920_v3 }
0x176a   : > { %v18923_v29 = vpop.xlane.xlu1 %18922 }
0x176b   : > { %27121 = vrcp.f32 %v18923_v29  ;;  %v33956_v29 = vld [vmem:[#allocation220_spill] sm:$0xff] }
0x176c   : > { %v27116_v34 = vpop.eup %27115 }
0x176d   : > { %v18976_v5 = vmul.f32 %v27116_v34, %v31917_v12 }
0x176e   : > { %v18926_v24 = vpop.xlane.xlu0 %18925 }
0x176f   : > { %27123 = vrcp.f32 %v18926_v24  ;;  %26092 = vmatmul.mubr.msk.f32.vlgmr.msra.gmra.mxu0 %vm2124_vm3, %v18976_v5 }
0x1770   : > { %v27118_v61 = vpop.eup %27117  ;;  %26102 = vmatpush3.msra.mxu0 %v33944_v30  ;;  %26105 = vmatprep.mubr.msk.f32.mxu0 %vm27293_vm1, %v33198_v17 }
0x1771   : > { %v18977_v0 = vmul.f32 %v27118_v61, %v31922_v49  ;;  %26103 = vmatprep.subr.mxu0 %v33198_v17  ;;  %v33958_v61 = vld [vmem:[#allocation222_spill] sm:$0xff] }
0x1772   : > { %26104 = vmatpush3.msra.mxu0 %v33945_v2  ;;  %v18929_v22 = vpop.xlane.xlu1 %18928 }
0x1773   : > { %27125 = vrcp.f32 %v18929_v22  ;;  %26099 = vmatmul.mubr.msk.f32.vlgmr.msra.gmra.mxu1 %vm2124_vm3, %v18977_v0  ;;  %26115 = vmatprep.subr.mxu0 %v33198_v17  ;;  %v33960_v22 = vld [vmem:[#allocation224_spill] sm:$0xff] }
0x1774   : > { %v27120_v53 = vpop.eup %27119  ;;  %26109 = vmatpush3.msra.mxu1 %v33946_v14  ;;  %26112 = vmatprep.mubr.msk.f32.mxu1 %vm27293_vm1, %v33198_v17 }
0x1775   : > { %v18978_v18 = vmul.f32 %v27120_v53, %v31927_v45  ;;  %26110 = vmatprep.subr.mxu1 %v33198_v17  ;;  %v33949_v45 = vld [vmem:[#allocation213_spill] sm:$0xff] }
0x1776   : > { %26111 = vmatpush3.msra.mxu1 %v33947_v33  ;;  %v18932_v12 = vpop.xlane.xlu0 %18931  ;;  %v33962_v33 = vld [vmem:[#allocation226_spill] sm:$0xff] }
0x1777   : > { %27127 = vrcp.f32 %v18932_v12  ;;  %26106 = vmatmul.mubr.msk.f32.vlgmr.msra.gmra.mxu0 %vm2124_vm3, %v18978_v18  ;;  %26122 = vmatprep.subr.mxu1 %v33198_v17 }
0x1778   : > { %v27122_v49 = vpop.eup %27121  ;;  %26116 = vmatpush3.msra.mxu0 %v33948_v1  ;;  %26119 = vmatprep.mubr.msk.f32.mxu0 %vm27293_vm1, %v33198_v17 }
0x1779   : > { %v18979_v38 = vmul.f32 %v27122_v49, %v31932_v28  ;;  %26117 = vmatprep.subr.mxu0 %v33198_v17  ;;  %v33951_v28 = vld [vmem:[#allocation217_spill] sm:$0xff] }
0x177a   : > { %26118 = vmatpush3.msra.mxu0 %v33949_v45  ;;  %v18935_v9 = vpop.xlane.xlu1 %18934 }
0x177b   : > { %27129 = vrcp.f32 %v18935_v9  ;;  %26113 = vmatmul.mubr.msk.f32.vlgmr.msra.gmra.mxu1 %vm2124_vm3, %v18979_v38  ;;  %26129 = vmatprep.subr.mxu0 %v33198_v17  ;;  %v33964_v38 = vld [vmem:[#allocation228_spill] sm:$0xff] }
0x177c   : > { %v27124_v4 = vpop.eup %27123  ;;  %26123 = vmatpush3.msra.mxu1 %v33950_v20  ;;  %26126 = vmatprep.mubr.msk.f32.mxu1 %vm27293_vm1, %v33198_v17  ;;  %v33966_v20 = vld [vmem:[#allocation230_spill] sm:$0xff] }
0x177d   : > { %v18980_v62 = vmul.f32 %v27124_v4, %v31937_v59  ;;  %26124 = vmatprep.subr.mxu1 %v33198_v17  ;;  %v33953_v59 = vld [vmem:[#allocation219_spill] sm:$0xff] }
0x177e   : > { %26125 = vmatpush3.msra.mxu1 %v33951_v28  ;;  %v18938_v60 = vpop.xlane.xlu0 %18937 }
0x177f   : > { %27131 = vrcp.f32 %v18938_v60  ;;  %26120 = vmatmul.mubr.msk.f32.vlgmr.msra.gmra.mxu0 %vm2124_vm3, %v18980_v62  ;;  %26136 = vmatprep.subr.mxu1 %v33198_v17  ;;  %v33968_v60 = vld [vmem:[#allocation232_spill] sm:$0xff] }
0x1780   : > { %v27126_v58 = vpop.eup %27125  ;;  %26130 = vmatpush3.msra.mxu0 %v33952_v46  ;;  %26133 = vmatprep.mubr.msk.f32.mxu0 %vm27293_vm1, %v33198_v17  ;;  %v33969_v46 = vld [vmem:[#allocation23_spill] sm:$0xff] }
0x1781   : > { %v18981_v43 = vmul.f32 %v27126_v58, %v31942_v7  ;;  %26131 = vmatprep.subr.mxu0 %v33198_v17  ;;  %v33955_v7 = vld [vmem:[#allocation221_spill] sm:$0xff] }
0x1782   : > { %26132 = vmatpush3.msra.mxu0 %v33953_v59  ;;  %v18941_v42 = vpop.xlane.xlu1 %18940 }
0x1783   : > { %27133 = vrcp.f32 %v18941_v42  ;;  %26127 = vmatmul.mubr.msk.f32.vlgmr.msra.gmra.mxu1 %vm2124_vm3, %v18981_v43  ;;  %26143 = vmatprep.subr.mxu0 %v33198_v17  ;;  %v33970_v43 = vld [vmem:[#allocation234_spill] sm:$0xff]  ;;  %v33971_v42 = vld [vmem:[#allocation236_spill] sm:$0xff] }
0x1784   : > { %v27128_v48 = vpop.eup %27127  ;;  %26137 = vmatpush3.msra.mxu1 %v33954_v16  ;;  %26140 = vmatprep.mubr.msk.f32.mxu1 %vm27293_vm1, %v33198_v17 }
0x1785   : > { %v18982_v8 = vmul.f32 %v27128_v48, %v31947_v21  ;;  %26138 = vmatprep.subr.mxu1 %v33198_v17  ;;  %v33957_v21 = vld [vmem:[#allocation223_spill] sm:$0xff] }
0x1786   : > { %26139 = vmatpush3.msra.mxu1 %v33955_v7  ;;  %v18944_v57 = vpop.xlane.xlu0 %18943  ;;  %v33972_v48 = vld [vmem:[#allocation235_spill] sm:$0xff] }
0x1787   : > { %27135 = vrcp.f32 %v18944_v57  ;;  %26134 = vmatmul.mubr.msk.f32.vlgmr.msra.gmra.mxu0 %vm2124_vm3, %v18982_v8  ;;  %26150 = vmatprep.subr.mxu1 %v33198_v17  ;;  %v33974_v8 = vld [vmem:[#allocation238_spill] sm:$0xff] }
0x1788   : > { %v27130_v3 = vpop.eup %27129  ;;  %26144 = vmatpush3.msra.mxu0 %v33956_v29  ;;  %26147 = vmatprep.mubr.msk.f32.mxu0 %vm27293_vm1, %v33198_v17 }
0x1789   : > { %v18983_v34 = vmul.f32 %v27130_v3, %v31952_v35  ;;  %26145 = vmatprep.subr.mxu0 %v33198_v17  ;;  %v33959_v35 = vld [vmem:[#allocation225_spill] sm:$0xff]  ;;  %v33976_v3 = vld [vmem:[#allocation242_spill] sm:$0xff] }
0x178a   : > { %26146 = vmatpush3.msra.mxu0 %v33957_v21  ;;  %v18947_v5 = vpop.xlane.xlu1 %18946  ;;  %v33978_v21 = vld [vmem:[#allocation244_spill] sm:$0xff] }
0x178b   : > { %27137 = vrcp.f32 %v18947_v5  ;;  %26141 = vmatmul.mubr.msk.f32.vlgmr.msra.gmra.mxu1 %vm2124_vm3, %v18983_v34  ;;  %26157 = vmatprep.subr.mxu0 %v33198_v17  ;;  %v33977_v34 = vld [vmem:[#allocation243_spill] sm:$0xff]  ;;  %v33979_v5 = vld [vmem:[#allocation246_spill] sm:$0xff] }
0x178c   : > { %v27132_v24 = vpop.eup %27131  ;;  %26151 = vmatpush3.msra.mxu1 %v33958_v61  ;;  %26154 = vmatprep.mubr.msk.f32.mxu1 %vm27293_vm1, %v33198_v17 }
0x178d   : > { %v18984_v30 = vmul.f32 %v27132_v24, %v31957_v63  ;;  %26152 = vmatprep.subr.mxu1 %v33198_v17  ;;  %v33961_v63 = vld [vmem:[#allocation227_spill] sm:$0xff] }
0x178e   : > { %26153 = vmatpush3.msra.mxu1 %v33959_v35  ;;  %v18950_v0 = vpop.xlane.xlu0 %18949  ;;  %v33980_v24 = vld [vmem:[#allocation247_spill] sm:$0xff]  ;;  %v33982_v35 = vld [vmem:[#allocation248_spill] sm:$0xff] }
0x178f   : > { %27139 = vrcp.f32 %v18950_v0  ;;  %26148 = vmatmul.mubr.msk.f32.vlgmr.msra.gmra.mxu0 %vm2124_vm3, %v18984_v30  ;;  %26164 = vmatprep.subr.mxu1 %v33198_v17  ;;  %v33981_v30 = vld [vmem:[#allocation249_spill] sm:$0xff] }
0x1790   : > { %v27134_v2 = vpop.eup %27133  ;;  %26158 = vmatpush3.msra.mxu0 %v33960_v22  ;;  %26161 = vmatprep.mubr.msk.f32.mxu0 %vm27293_vm1, %v33198_v17  ;;  %v33984_v22 = vld [vmem:[#allocation46_spill] sm:$0xff] }
0x1791   : > { %v18985_v53 = vmul.f32 %v27134_v2, %v31962_v52  ;;  %26159 = vmatprep.subr.mxu0 %v33198_v17  ;;  %v33963_v52 = vld [vmem:[#allocation229_spill] sm:$0xff]  ;;  %v33983_v2 = vld [vmem:[#allocation250_spill] sm:$0xff] }
0x1792   : > { %26160 = vmatpush3.msra.mxu0 %v33961_v63  ;;  %v18953_v14 = vpop.xlane.xlu1 %18952  ;;  %v33985_v63 = vld [vmem:[#allocation253_spill] sm:$0xff] }
0x1793   : > { %27141 = vrcp.f32 %v18953_v14  ;;  %26155 = vmatmul.mubr.msk.f32.vlgmr.msra.gmra.mxu1 %vm2124_vm3, %v18985_v53  ;;  %26171 = vmatprep.subr.mxu0 %v33198_v17  ;;  %v33986_v14 = vld [vmem:[#allocation251_spill] sm:$0xff] }
0x1794   : > { %v27136_v18 = vpop.eup %27135  ;;  %26165 = vmatpush3.msra.mxu1 %v33962_v33  ;;  %26168 = vmatprep.mubr.msk.f32.mxu1 %vm27293_vm1, %v33198_v17  ;;  %v33987_v33 = vld [vmem:[#allocation252_spill] sm:$0xff] }
0x1795   : > { %v18986_v12 = vmul.f32 %v27136_v18, %v31967_v47  ;;  %26166 = vmatprep.subr.mxu1 %v33198_v17  ;;  %v33965_v47 = vld [vmem:[#allocation231_spill] sm:$0xff] }
0x1796   : > { %26167 = vmatpush3.msra.mxu1 %v33963_v52  ;;  %v18956_v49 = vpop.xlane.xlu0 %18955 }
0x1797   : > { %27143 = vrcp.f32 %v18956_v49  ;;  %26162 = vmatmul.mubr.msk.f32.vlgmr.msra.gmra.mxu0 %vm2124_vm3, %v18986_v12  ;;  %26178 = vmatprep.subr.mxu1 %v33198_v17  ;;  %v33988_v12 = vld [vmem:[#allocation254_spill] sm:$0xff]  ;;  %v33989_v49 = vld [vmem:[#allocation257_spill] sm:$0xff] }
0x1798   : > { %v27138_v1 = vpop.eup %27137  ;;  %26172 = vmatpush3.msra.mxu0 %v33964_v38  ;;  %26175 = vmatprep.mubr.msk.f32.mxu0 %vm27293_vm1, %v33198_v17 }
0x1799   : > { %v18987_v45 = vmul.f32 %v27138_v1, %v31972_v10  ;;  %26173 = vmatprep.subr.mxu0 %v33198_v17  ;;  %v33967_v10 = vld [vmem:[#allocation233_spill] sm:$0xff]  ;;  %v33990_v1 = vld [vmem:[#allocation255_spill] sm:$0xff] }
0x179a   : > { %26174 = vmatpush3.msra.mxu0 %v33965_v47  ;;  %v18959_v9 = vpop.xlane.xlu1 %18958  ;;  %v20193_v7 = vpop.permute.xlu0 %20192  ;;  %v33992_v47 = vld [vmem:[#allocation258_spill] sm:$0xff] }
0x179b   : > { %27145 = vrcp.f32 %v18959_v9  ;;  %26169 = vmatmul.mubr.msk.f32.vlgmr.msra.gmra.mxu1 %vm2124_vm3, %v18987_v45  ;;  %26185 = vmatprep.subr.mxu0 %v33198_v17  ;;  %v33991_v45 = vld [vmem:[#allocation256_spill] sm:$0xff] }
0x179c   : > { %v27140_v4 = vpop.eup %27139  ;;  %26179 = vmatpush3.msra.mxu1 %v33966_v20  ;;  %26182 = vmatprep.mubr.msk.f32.mxu1 %vm27293_vm1, %v33198_v17  ;;  %v33994_v20 = vld [vmem:[#allocation239_spill] sm:$0xff] }
0x179d   : > { %v18988_v62 = vmul.f32 %v27140_v4, %v31976_v32  ;;  %26180 = vmatprep.subr.mxu1 %v33198_v17  ;;  %v33993_v4 = vld [vmem:[#allocation245_spill] sm:$0xff] }
0x179e   : > { %26181 = vmatpush3.msra.mxu1 %v33967_v10  ;;  %v20267_v57 = vpop.permute.xlu1 %20266  ;;  %v20489_v0 = vpop.permute.xlu0 %20488  ;;  %v33995_v10 = vld [vmem:[#allocation241_spill] sm:$0xff] }
0x179f   : > { %26176 = vmatmul.mubr.msk.f32.vlgmr.msra.gmra.mxu0 %vm2124_vm3, %v18988_v62  ;;  %26192 = vmatprep.subr.mxu1 %v33198_v17 }
0x17a0   : > { %v27142_v28 = vpop.eup %27141  ;;  %26186 = vmatpush3.msra.mxu0 %v33968_v60  ;;  %26189 = vmatprep.mubr.msk.f32.mxu0 %vm27293_vm1, %v33198_v17 }
0x17a1   : > { %v18989_v58 = vmul.f32 %v27142_v28, %v31980_v31  ;;  %26187 = vmatprep.subr.mxu0 %v33198_v17  ;;  %v33996_v28 = vld [vmem:[#allocation259_spill] sm:$0xff] }
0x17a2   : > { %26188 = vmatpush3.msra.mxu0 %v33969_v46  ;;  %v20341_v29 = vpop.permute.xlu1 %20340  ;;  %v20637_v18 = vpop.permute.xlu0 %20636  ;;  %v33998_v46 = vld [vmem:[#allocation260_spill] sm:$0xff] }
0x17a3   : > { %26183 = vmatmul.mubr.msk.f32.vlgmr.msra.gmra.mxu1 %vm2124_vm3, %v18989_v58  ;;  %26199 = vmatprep.subr.mxu0 %v33198_v17  ;;  %v33997_v58 = vld [vmem:[#allocation262_spill] sm:$0xff] }
0x17a4   : > { %v27144_v32 = vpop.eup %27143  ;;  %26193 = vmatpush3.msra.mxu1 %v33970_v43  ;;  %26196 = vmatprep.mubr.msk.f32.mxu1 %vm27293_vm1, %v33198_v17  ;;  %v33999_v43 = vld [vmem:[#allocation261_spill] sm:$0xff] }
0x17a5   : > { %v18990_v59 = vmul.f32 %v27144_v32, %v31984_v15  ;;  %26194 = vmatprep.subr.mxu1 %v33198_v17  ;;  %v33973_v15 = vld [vmem:[#allocation237_spill] sm:$0xff] }
0x17a6   : > { %26195 = vmatpush3.msra.mxu1 %v33971_v42  ;;  %v20415_v61 = vpop.permute.xlu1 %20414  ;;  %v20785_v38 = vpop.permute.xlu0 %20784 }
0x17a7   : > { %26190 = vmatmul.mubr.msk.f32.vlgmr.msra.gmra.mxu0 %vm2124_vm3, %v18990_v59  ;;  %26206 = vmatprep.subr.mxu1 %v33198_v17  ;;  %v34000_v59 = vld [vmem:[#allocation263_spill] sm:$0xff] }
0x17a8   : > { %v27146_v31 = vpop.eup %27145  ;;  %26200 = vmatpush3.xpose.msk.msra.mxu0 %vm859_vm2, %v33972_v48  ;;  %26203 = vmatprep.mubr.msk.f32.mxu0 %vm27293_vm1, %v33198_v17  ;;  %v34002_v48 = vld [vmem:[#allocation264_spill] sm:$0xff] }
0x17a9   : > { %v18991_v16 = vmul.f32 %v27146_v31, %v31988_v19  ;;  %26201 = vmatprep.subr.mxu0 %v33198_v17  ;;  %v33975_v19 = vld [vmem:[#allocation240_spill] sm:$0xff]  ;;  %v34001_v31 = vld [vmem:[#allocation266_spill] sm:$0xff] }
0x17aa   : > { %v20563_v53 = vpop.permute.xlu1 %20562  ;;  %v20933_v62 = vpop.permute.xlu0 %20932 }
0x17ab   : > { %26197 = vmatmul.mubr.msk.f32.vlgmr.msra.gmra.mxu1 %vm2124_vm3, %v18991_v16 }
0x17ac   : > { %26202 = vmatpush3.xpose.msk.msra.mxu0 %vm859_vm2, %v33973_v15  ;;  %26207 = vmatpush3.xpose.msk.msra.mxu1 %vm859_vm2, %v33974_v8  ;;  %v34003_v15 = vld [vmem:[#allocation265_spill] sm:$0xff]  ;;  %v34004_v8 = vld [vmem:[#allocation267_spill] sm:$0xff] }
0x17ad   : > { %26208 = vmatprep.subr.mxu1 %v33198_v17  ;;  %26213 = vmatprep.subr.mxu0 %v33198_v17 }
0x17ae   : > { %26210 = vmatprep.mubr.msk.f32.mxu1 %vm27293_vm1, %v33198_v17  ;;  %v20711_v52 = vpop.permute.xlu1 %20710  ;;  %v21081_v32 = vpop.permute.xlu0 %21080 }
0x17af   : > { %26204 = vmatmul.mubr.msk.f32.vlgmr.msra.gmra.mxu0 %vm859_vm2, %v20193_v7 }
0x17b0   : > { %26209 = vmatpush3.xpose.msk.msra.mxu1 %vm859_vm2, %v33975_v19  ;;  %26214 = vmatpush3.xpose.msk.msra.mxu0 %vm859_vm2, %v33976_v3  ;;  %v34006_v19 = vld [vmem:[#allocation269_spill] sm:$0xff]  ;;  %v34007_v3 = vld [vmem:[#allocation270_spill] sm:$0xff] }
0x17b1   : > { %26220 = vmatprep.subr.mxu1 %v33198_v17  ;;  %26215 = vmatprep.subr.mxu0 %v33198_v17 }
0x17b2   : > { %26217 = vmatprep.mubr.msk.f32.mxu0 %vm27293_vm1, %v33198_v17  ;;  %v20859_v9 = vpop.permute.xlu1 %20858  ;;  %v21229_v16 = vpop.permute.xlu0 %21228 }
0x17b3   : > { %26211 = vmatmul.mubr.msk.f32.vlgmr.msra.gmra.mxu1 %vm859_vm2, %v20267_v57  ;;  %v34005_v57 = vld [vmem:[#allocation268_spill] sm:$0xff] }
0x17b4   : > { %26216 = vmatpush3.xpose.msk.msra.mxu0 %vm859_vm2, %v33977_v34  ;;  %26221 = vmatpush3.xpose.msk.msra.mxu1 %vm859_vm2, %v33978_v21 }
0x17b5   : > { %26222 = vmatprep.subr.mxu1 %v33198_v17  ;;  %26227 = vmatprep.subr.mxu0 %v33198_v17 }
0x17b6   : > { %26224 = vmatprep.mubr.msk.f32.mxu1 %vm27293_vm1, %v33198_v17  ;;  %v21007_v60 = vpop.permute.xlu1 %21006 }
0x17b7   : > { %26218 = vmatmul.mubr.msk.f32.vlgmr.msra.gmra.mxu0 %vm859_vm2, %v20341_v29 }
0x17b8   : > { %26223 = vmatpush3.xpose.msk.msra.mxu1 %vm859_vm2, %v33979_v5  ;;  %26228 = vmatpush3.xpose.msk.msra.mxu0 %vm859_vm2, %v33980_v24 }
0x17b9   : > { %26234 = vmatprep.subr.mxu1 %v33198_v17  ;;  %26229 = vmatprep.subr.mxu0 %v33198_v17 }
0x17ba   : > { %26231 = vmatprep.mubr.msk.f32.mxu0 %vm27293_vm1, %v33198_v17  ;;  %v21155_v42 = vpop.permute.xlu1 %21154 }
0x17bb   : > { %26225 = vmatmul.mubr.msk.f32.vlgmr.msra.gmra.mxu1 %vm859_vm2, %v20415_v61 }
0x17bc   : > { %26230 = vmatpush3.xpose.msk.msra.mxu0 %vm859_vm2, %v33981_v30  ;;  %26235 = vmatpush3.xpose.msk.msra.mxu1 %vm859_vm2, %v33982_v35 }
0x17bd   : > { %26236 = vmatprep.subr.mxu1 %v33198_v17  ;;  %26241 = vmatprep.subr.mxu0 %v33198_v17 }
0x17be   : > { %26238 = vmatprep.mubr.msk.f32.mxu1 %vm27293_vm1, %v33198_v17  ;;  %v21303_v7 = vpop.permute.xlu1 %21302 }
0x17bf   : > { %26232 = vmatmul.mubr.msk.f32.vlgmr.msra.gmra.mxu0 %vm859_vm2, %v20489_v0 }
0x17c0   : > { %26237 = vmatpush3.xpose.msk.msra.mxu1 %vm859_vm2, %v33983_v2  ;;  %26242 = vmatpush3.xpose.msk.msra.mxu0 %vm859_vm2, %v33984_v22 }
0x17c1   : > { %26243 = vmatprep.subr.mxu0 %v33198_v17  ;;  %26248 = vmatprep.subr.mxu1 %v33198_v17 }
0x17c2   : > { %26245 = vmatprep.mubr.msk.f32.mxu0 %vm27293_vm1, %v33198_v17 }
0x17c3   : > { %26239 = vmatmul.mubr.msk.f32.vlgmr.msra.gmra.mxu1 %vm859_vm2, %v20563_v53 }
0x17c4   : > { %26244 = vmatpush3.xpose.msk.msra.mxu0 %vm859_vm2, %v33985_v63  ;;  %26249 = vmatpush3.xpose.msk.msra.mxu1 %vm859_vm2, %v33986_v14 }
0x17c5   : > { %26250 = vmatprep.subr.mxu1 %v33198_v17  ;;  %26255 = vmatprep.subr.mxu0 %v33198_v17 }
0x17c6   : > { %26252 = vmatprep.mubr.msk.f32.mxu1 %vm27293_vm1, %v33198_v17 }
0x17c7   : > { %26246 = vmatmul.mubr.msk.f32.vlgmr.msra.gmra.mxu0 %vm859_vm2, %v20637_v18 }
0x17c8   : > { %26251 = vmatpush3.xpose.msk.msra.mxu1 %vm859_vm2, %v33987_v33  ;;  %26256 = vmatpush3.xpose.msk.msra.mxu0 %vm859_vm2, %v33988_v12 }
0x17c9   : > { %26257 = vmatprep.subr.mxu0 %v33198_v17  ;;  %26262 = vmatprep.subr.mxu1 %v33198_v17 }
0x17ca   : > { %26259 = vmatprep.mubr.msk.f32.mxu0 %vm27293_vm1, %v33198_v17 }
0x17cb   : > { %26253 = vmatmul.mubr.msk.f32.vlgmr.msra.gmra.mxu1 %vm859_vm2, %v20711_v52 }
0x17cc   : > { %26258 = vmatpush3.xpose.msk.msra.mxu0 %vm859_vm2, %v33989_v49  ;;  %26263 = vmatpush3.xpose.msk.msra.mxu1 %vm859_vm2, %v33990_v1 }
0x17cd   : > { %26264 = vmatprep.subr.mxu1 %v33198_v17  ;;  %26269 = vmatprep.subr.mxu0 %v33198_v17 }
0x17ce   : > { %26266 = vmatprep.mubr.msk.f32.mxu1 %vm27293_vm1, %v33198_v17 }
0x17cf   : > { %26260 = vmatmul.mubr.msk.f32.vlgmr.msra.gmra.mxu0 %vm859_vm2, %v20785_v38 }
0x17d0   : > { %26265 = vmatpush3.xpose.msk.msra.mxu1 %vm859_vm2, %v33991_v45  ;;  %26270 = vmatpush3.xpose.msk.msra.mxu0 %vm859_vm2, %v33992_v47 }
0x17d1   : > { %26271 = vmatprep.subr.mxu0 %v33198_v17  ;;  %26276 = vmatprep.subr.mxu1 %v33198_v17 }
0x17d2   : > { %26273 = vmatprep.mubr.msk.f32.mxu0 %vm27293_vm1, %v33198_v17 }
0x17d3   : > { %26267 = vmatmul.mubr.msk.f32.vlgmr.msra.gmra.mxu1 %vm859_vm2, %v20859_v9 }
0x17d4   : > { %26272 = vmatpush3.xpose.msk.msra.mxu0 %vm859_vm2, %v33993_v4  ;;  %26277 = vmatpush3.xpose.msk.msra.mxu1 %vm859_vm2, %v33994_v20 }
0x17d5   : > { %26278 = vmatprep.subr.mxu1 %v33198_v17  ;;  %26283 = vmatprep.subr.mxu0 %v33198_v17 }
0x17d6   : > { %26280 = vmatprep.mubr.msk.f32.mxu1 %vm27293_vm1, %v33198_v17 }
0x17d7   : > { %26274 = vmatmul.mubr.msk.f32.vlgmr.msra.gmra.mxu0 %vm859_vm2, %v20933_v62 }
0x17d8   : > { %26279 = vmatpush3.xpose.msk.msra.mxu1 %vm859_vm2, %v33995_v10  ;;  %26284 = vmatpush3.xpose.msk.msra.mxu0 %vm859_vm2, %v33996_v28 }
0x17d9   : > { %26285 = vmatprep.subr.mxu0 %v33198_v17  ;;  %26290 = vmatprep.subr.mxu1 %v33198_v17 }
0x17da   : > { %26287 = vmatprep.mubr.msk.f32.mxu0 %vm27293_vm1, %v33198_v17 }
0x17db   : > { %26281 = vmatmul.mubr.msk.f32.vlgmr.msra.gmra.mxu1 %vm859_vm2, %v21007_v60 }
0x17dc   : > { %26286 = vmatpush3.xpose.msk.msra.mxu0 %vm859_vm2, %v33997_v58  ;;  %26291 = vmatpush3.xpose.msk.msra.mxu1 %vm859_vm2, %v33998_v46 }
0x17dd   : > { %26292 = vmatprep.subr.mxu1 %v33198_v17  ;;  %26297 = vmatprep.subr.mxu0 %v33198_v17 }
0x17de   : > { %26294 = vmatprep.mubr.msk.f32.mxu1 %vm27293_vm1, %v33198_v17 }
0x17df   : > { %26288 = vmatmul.mubr.msk.f32.vlgmr.msra.gmra.mxu0 %vm859_vm2, %v21081_v32 }
0x17e0   : > { %26293 = vmatpush3.xpose.msk.msra.mxu1 %vm859_vm2, %v33999_v43  ;;  %26298 = vmatpush3.xpose.msk.msra.mxu0 %vm859_vm2, %v34000_v59 }
0x17e1   : > { %26299 = vmatprep.subr.mxu0 %v33198_v17  ;;  %26304 = vmatprep.subr.mxu1 %v33198_v17 }
0x17e2   : > { %26301 = vmatprep.mubr.msk.f32.mxu0 %vm27293_vm1, %v33198_v17 }
0x17e3   : > { %26295 = vmatmul.mubr.msk.f32.vlgmr.msra.gmra.mxu1 %vm859_vm2, %v21155_v42 }
0x17e4   : > { %26300 = vmatpush3.xpose.msk.msra.mxu0 %vm859_vm2, %v34001_v31  ;;  %26305 = vmatpush3.xpose.msk.msra.mxu1 %vm859_vm2, %v34002_v48 }
0x17e5   : > { %26306 = vmatprep.subr.mxu1 %v33198_v17  ;;  %26311 = vmatprep.subr.mxu0 %v33198_v17 }
0x17e6   : > { %26308 = vmatprep.mubr.msk.f32.mxu1 %vm27293_vm1, %v33198_v17 }
0x17e7   : > { %26302 = vmatmul.mubr.msk.f32.vlgmr.msra.gmra.mxu0 %vm859_vm2, %v21229_v16 }
0x17e8   : > { %26307 = vmatpush3.xpose.msk.msra.mxu1 %vm859_vm2, %v34003_v15  ;;  %26312 = vmatpush3.msra.mxu0 %v34004_v8 }
0x17e9   : > { %26313 = vmatprep.subr.mxu0 %v33198_v17  ;;  %26318 = vmatprep.subr.mxu1 %v33198_v17 }
0x17ea   : > { %26314 = vmatpush3.msra.mxu0 %v34005_v57  ;;  %26315 = vmatprep.mubr.msk.f32.mxu0 %vm27293_vm1, %v33198_v17 }
0x17eb   : > { %26309 = vmatmul.mubr.msk.f32.vlgmr.msra.gmra.mxu1 %vm859_vm2, %v21303_v7  ;;  %26325 = vmatprep.subr.mxu0 %v33198_v17 }
0x17ec   : > { %26319 = vmatpush3.msra.mxu1 %v34006_v19  ;;  %26322 = vmatprep.mubr.msk.f32.mxu1 %vm27293_vm1, %v33198_v17 }
0x17ed   : > { %26320 = vmatprep.subr.mxu1 %v33198_v17 }
0x17ee   : > { %26321 = vmatpush3.msra.mxu1 %v34007_v3 }
0x17ef   : > { %26332 = vmatprep.subr.mxu1 %v33198_v17 }
0x182f   : > { %v32296_v29 = vpop.f32.mrf.mxu0 }
0x1831   : > { %v26093_v34 = vpop.f32.mrf.mxu0 }
0x1833   : > { %v32298_v21 = vpop.f32.mrf.mxu1 }
0x1835   : > { %v26100_v5 = vpop.f32.mrf.mxu1 }
0x1837   : > { %v32300_v24 = vpop.f32.mrf.mxu0 }
0x1839   : > { %v26107_v61 = vpop.f32.mrf.mxu0 }
0x183b   : > { %v32302_v30 = vpop.f32.mrf.mxu1 }
0x183d   : > { %v26114_v35 = vpop.f32.mrf.mxu1 }
0x183f   : > { %v32304_v0 = vpop.f32.mrf.mxu0 }
0x1841   : > { %v26121_v2 = vpop.f32.mrf.mxu0 }
0x1843   : > { %v32306_v22 = vpop.f32.mrf.mxu1 }
0x1845   : > { %v26128_v53 = vpop.f32.mrf.mxu1 }
0x1847   : > { %v32308_v63 = vpop.f32.mrf.mxu0 }
0x1849   : > { %v26135_v14 = vpop.f32.mrf.mxu0 }
0x184b   : > { %v32310_v18 = vpop.f32.mrf.mxu1 }
0x184d   : > { %v26142_v33 = vpop.f32.mrf.mxu1 }
0x184f   : > { %v32312_v12 = vpop.f32.mrf.mxu0 }
0x1851   : > { %v26149_v52 = vpop.f32.mrf.mxu0 }
0x1853   : > { %v32314_v49 = vpop.f32.mrf.mxu1 }
0x1855   : > { %v26156_v1 = vpop.f32.mrf.mxu1 }
0x1857   : > { %v32316_v38 = vpop.f32.mrf.mxu0 }
0x1859   : > { %v26163_v45 = vpop.f32.mrf.mxu0 }
0x185b   : > { %v32318_v47 = vpop.f32.mrf.mxu1 }
0x185d   : > { %v26170_v9 = vpop.f32.mrf.mxu1 }
0x185f   : > { %v32320_v4 = vpop.f32.mrf.mxu0 }
0x1861   : > { %v26177_v20 = vpop.f32.mrf.mxu0 }
0x1863   : > { %v32322_v62 = vpop.f32.mrf.mxu1 }
0x1865   : > { %v26184_v10 = vpop.f32.mrf.mxu1 }
0x1867   : > { %v32324_v28 = vpop.f32.mrf.mxu0 }
0x1869   : > { %v26191_v60 = vpop.f32.mrf.mxu0 }
0x186b   : > { %v32326_v58 = vpop.f32.mrf.mxu1 }
0x186d   : > { %v26198_v46 = vpop.f32.mrf.mxu1 }
0x186f   : > { %v32328_v32 = vpop.f32.mrf.mxu0 }
0x1870   : > { %v21376_v43 = vsel %vm2124_vm3, %v32328_v32, -inf }
0x1871   : > { %21377 = vmax.xlane.f32.xlu0 %v21376_v43  ;;  %v26205_v59 = vpop.f32.mrf.mxu0 }
0x1873   : > { %v32332_v42 = vpop.f32.mrf.mxu1 }
0x1874   : > { %v21379_v31 = vsel %vm2124_vm3, %v32332_v42, -inf }
0x1875   : > { %21380 = vmax.xlane.f32.xlu1 %v21379_v31  ;;  %v26212_v48 = vpop.f32.mrf.mxu1 }
0x1877   : > { %v32336_v16 = vpop.f32.mrf.mxu0 }
0x1878   : > { %v21382_v15 = vsel %vm2124_vm3, %v32336_v16, -inf }
0x1879   : > { %21383 = vmax.xlane.f32.xlu0 %v21382_v15  ;;  %v26219_v8 = vpop.f32.mrf.mxu0 }
0x187b   : > { %v32340_v7 = vpop.f32.mrf.mxu1 }
0x187c   : > { %v21385_v57 = vsel %vm2124_vm3, %v32340_v7, -inf }
0x187d   : > { %v26226_v19 = vpop.f32.mrf.mxu1  ;;  %21386 = vmax.xlane.f32.xlu0 %v21385_v57 }
0x187f   : > { %v32344_v3 = vpop.f32.mrf.mxu0 }
0x1880   : > { %v21388_v34 = vsel %vm2124_vm3, %v32344_v3, -inf }
0x1881   : > { %21389 = vmax.xlane.f32.xlu0 %v21388_v34  ;;  %v26233_v5 = vpop.f32.mrf.mxu0 }
0x1883   : > { %v32348_v61 = vpop.f32.mrf.mxu1 }
0x1884   : > { %v21391_v35 = vsel %vm2124_vm3, %v32348_v61, -inf }
0x1885   : > { %21392 = vmax.xlane.f32.xlu1 %v21391_v35  ;;  %v26240_v2 = vpop.f32.mrf.mxu1 }
0x1887   : > { %v32352_v53 = vpop.f32.mrf.mxu0 }
0x1888   : > { %v21394_v14 = vsel %vm2124_vm3, %v32352_v53, -inf }
0x1889   : > { %21395 = vmax.xlane.f32.xlu0 %v21394_v14  ;;  %v26247_v33 = vpop.f32.mrf.mxu0 }
0x188b   : > { %v32356_v52 = vpop.f32.mrf.mxu1 }
0x188c   : > { %v21397_v1 = vsel %vm2124_vm3, %v32356_v52, -inf }
0x188d   : > { %21398 = vmax.xlane.f32.xlu1 %v21397_v1  ;;  %v26254_v45 = vpop.f32.mrf.mxu1 }
0x188f   : > { %v32360_v9 = vpop.f32.mrf.mxu0 }
0x1890   : > { %v21400_v20 = vsel %vm2124_vm3, %v32360_v9, -inf }
0x1891   : > { %21401 = vmax.xlane.f32.xlu0 %v21400_v20  ;;  %v26261_v10 = vpop.f32.mrf.mxu0 }
0x1893   : > { %v32364_v60 = vpop.f32.mrf.mxu1 }
0x1894   : > { %v21403_v46 = vsel %vm2124_vm3, %v32364_v60, -inf }
0x1895   : > { %21404 = vmax.xlane.f32.xlu1 %v21403_v46  ;;  %v26268_v43 = vpop.f32.mrf.mxu1 }
0x1897   : > { %v32368_v59 = vpop.f32.mrf.mxu0 }
0x1898   : > { %v21406_v31 = vsel %vm2124_vm3, %v32368_v59, -inf }
0x1899   : > { %21407 = vmax.xlane.f32.xlu0 %v21406_v31  ;;  %v26275_v48 = vpop.f32.mrf.mxu0 }
0x189b   : > { %v32372_v15 = vpop.f32.mrf.mxu1 }
0x189c   : > { %v21409_v8 = vsel %vm2124_vm3, %v32372_v15, -inf }
0x189d   : > { %21410 = vmax.xlane.f32.xlu1 %v21409_v8  ;;  %v26282_v57 = vpop.f32.mrf.mxu1 }
0x189f   : > { %v32376_v19 = vpop.f32.mrf.mxu0 }
0x18a0   : > { %v21412_v34 = vsel %vm2124_vm3, %v32376_v19, -inf }
0x18a1   : > { %21413 = vmax.xlane.f32.xlu0 %v21412_v34  ;;  %v26289_v5 = vpop.f32.mrf.mxu0 }
0x18a3   : > { %v32380_v35 = vpop.f32.mrf.mxu1 }
0x18a4   : > { %v21415_v2 = vsel %vm2124_vm3, %v32380_v35, -inf }
0x18a5   : > { %21416 = vmax.xlane.f32.xlu1 %v21415_v2  ;;  %v26296_v14 = vpop.f32.mrf.mxu1 }
0x18a7   : > { %v32384_v33 = vpop.f32.mrf.mxu0 }
0x18a8   : > { %v21418_v1 = vsel %vm2124_vm3, %v32384_v33, -inf }
0x18a9   : > { %21419 = vmax.xlane.f32.xlu0 %v21418_v1  ;;  %v26303_v45 = vpop.f32.mrf.mxu0 }
0x18ab   : > { %v32388_v20 = vpop.f32.mrf.mxu1 }
0x18ac   : > { %v21421_v10 = vsel %vm2124_vm3, %v32388_v20, -inf }
0x18ad   : > { %21422 = vmax.xlane.f32.xlu1 %v21421_v10  ;;  %v26310_v46 = vpop.f32.mrf.mxu1 }
0x18fa   : > { %v21378_v43 = vpop.xlane.xlu0 %21377 }
0x18fb   : > { %v21424_v31 = vsub.f32 %v32328_v32, %v21378_v43 }
0x18fd   : > { %v21440_v48 = vmul.f32 1.442695, %v21424_v31 }
0x18fe   : > { %v21381_v8 = vpop.xlane.xlu1 %21380 }
0x18ff   : > { %27147 = vpow2.f32 %v21440_v48  ;;  %v21425_v57 = vsub.f32 %v32332_v42, %v21381_v8 }
0x1901   : > { %v21442_v34 = vmul.f32 1.442695, %v21425_v57 }
0x1902   : > { %v21384_v5 = vpop.xlane.xlu0 %21383 }
0x1903   : > { %27149 = vpow2.f32 %v21442_v34  ;;  %v21426_v2 = vsub.f32 %v32336_v16, %v21384_v5 }
0x1905   : > { %v21444_v14 = vmul.f32 1.442695, %v21426_v2 }
0x1906   : > { %v21387_v1 = vpop.xlane.xlu0 %21386 }
0x1907   : > { %27151 = vpow2.f32 %v21444_v14  ;;  %v21427_v45 = vsub.f32 %v32340_v7, %v21387_v1 }
0x1909   : > { %v21446_v10 = vmul.f32 1.442695, %v21427_v45 }
0x190a   : > { %v21390_v46 = vpop.xlane.xlu0 %21389 }
0x190b   : > { %27153 = vpow2.f32 %v21446_v10  ;;  %v21428_v32 = vsub.f32 %v32344_v3, %v21390_v46 }
0x190c   : > { %v32397_v43 = vpop.eup %27147 }
0x190d   : > { %v21448_v31 = vmul.f32 1.442695, %v21428_v32  ;;  %v21472_v42 = vsel %vm2124_vm3, %v32397_v43, 0.0 }
0x190e   : > { %v21393_v48 = vpop.xlane.xlu1 %21392  ;;  %21473 = vadd.xlane.f32.xlu0 %v21472_v42 }
0x190f   : > { %27155 = vpow2.f32 %v21448_v31  ;;  %v21429_v16 = vsub.f32 %v32348_v61, %v21393_v48 }
0x1910   : > { %v32402_v8 = vpop.eup %27149 }
0x1911   : > { %v21450_v57 = vmul.f32 1.442695, %v21429_v16  ;;  %v21475_v7 = vsel %vm2124_vm3, %v32402_v8, 0.0 }
0x1912   : > { %21476 = vadd.xlane.f32.xlu1 %v21475_v7  ;;  %v21396_v34 = vpop.xlane.xlu0 %21395 }
0x1913   : > { %27157 = vpow2.f32 %v21450_v57  ;;  %v21430_v3 = vsub.f32 %v32352_v53, %v21396_v34 }
0x1914   : > { %v32407_v5 = vpop.eup %27151 }
0x1915   : > { %v21452_v2 = vmul.f32 1.442695, %v21430_v3  ;;  %v21478_v14 = vsel %vm2124_vm3, %v32407_v5, 0.0 }
0x1916   : > { %v21399_v1 = vpop.xlane.xlu1 %21398  ;;  %21479 = vadd.xlane.f32.xlu0 %v21478_v14 }
0x1917   : > { %27159 = vpow2.f32 %v21452_v2  ;;  %v21431_v61 = vsub.f32 %v32356_v52, %v21399_v1 }
0x1918   : > { %v32412_v45 = vpop.eup %27153 }
0x1919   : > { %v21454_v10 = vmul.f32 1.442695, %v21431_v61  ;;  %v21481_v46 = vsel %vm2124_vm3, %v32412_v45, 0.0 }
0x191a   : > { %21482 = vadd.xlane.f32.xlu1 %v21481_v46  ;;  %v21402_v32 = vpop.xlane.xlu0 %21401 }
0x191b   : > { %27161 = vpow2.f32 %v21454_v10  ;;  %v21432_v53 = vsub.f32 %v32360_v9, %v21402_v32 }
0x191c   : > { %v32417_v31 = vpop.eup %27155 }
0x191d   : > { %v21456_v42 = vmul.f32 1.442695, %v21432_v53  ;;  %v21484_v48 = vsel %vm2124_vm3, %v32417_v31, 0.0 }
0x191e   : > { %v21405_v16 = vpop.xlane.xlu1 %21404  ;;  %21485 = vadd.xlane.f32.xlu0 %v21484_v48 }
0x191f   : > { %27163 = vpow2.f32 %v21456_v42  ;;  %v21433_v52 = vsub.f32 %v32364_v60, %v21405_v16 }
0x1920   : > { %v32422_v57 = vpop.eup %27157 }
0x1921   : > { %v21458_v7 = vmul.f32 1.442695, %v21433_v52  ;;  %v21487_v34 = vsel %vm2124_vm3, %v32422_v57, 0.0 }
0x1922   : > { %21488 = vadd.xlane.f32.xlu1 %v21487_v34  ;;  %v21408_v3 = vpop.xlane.xlu0 %21407 }
0x1923   : > { %27165 = vpow2.f32 %v21458_v7  ;;  %v21434_v9 = vsub.f32 %v32368_v59, %v21408_v3 }
0x1924   : > { %v32427_v2 = vpop.eup %27159 }
0x1925   : > { %v21460_v14 = vmul.f32 1.442695, %v21434_v9  ;;  %v21490_v1 = vsel %vm2124_vm3, %v32427_v2, 0.0 }
0x1926   : > { %v21411_v61 = vpop.xlane.xlu1 %21410  ;;  %21491 = vadd.xlane.f32.xlu0 %v21490_v1 }
0x1927   : > { %27167 = vpow2.f32 %v21460_v14  ;;  %v21435_v60 = vsub.f32 %v32372_v15, %v21411_v61 }
0x1928   : > { %v32432_v10 = vpop.eup %27161 }
0x1929   : > { %v21462_v46 = vmul.f32 1.442695, %v21435_v60  ;;  %v21493_v32 = vsel %vm2124_vm3, %v32432_v10, 0.0 }
0x192a   : > { %21494 = vadd.xlane.f32.xlu1 %v21493_v32  ;;  %v21414_v53 = vpop.xlane.xlu0 %21413 }
0x192b   : > { %27169 = vpow2.f32 %v21462_v46  ;;  %v21436_v59 = vsub.f32 %v32376_v19, %v21414_v53 }
0x192c   : > { %v32437_v42 = vpop.eup %27163 }
0x192d   : > { %v21464_v48 = vmul.f32 1.442695, %v21436_v59  ;;  %v21496_v16 = vsel %vm2124_vm3, %v32437_v42, 0.0 }
0x192e   : > { %v21417_v52 = vpop.xlane.xlu1 %21416  ;;  %21497 = vadd.xlane.f32.xlu0 %v21496_v16 }
0x192f   : > { %27171 = vpow2.f32 %v21464_v48  ;;  %v21437_v15 = vsub.f32 %v32380_v35, %v21417_v52 }
0x1930   : > { %v32442_v7 = vpop.eup %27165 }
0x1931   : > { %v21466_v34 = vmul.f32 1.442695, %v21437_v15  ;;  %v21499_v3 = vsel %vm2124_vm3, %v32442_v7, 0.0 }
0x1932   : > { %21500 = vadd.xlane.f32.xlu1 %v21499_v3  ;;  %v21420_v9 = vpop.xlane.xlu0 %21419  ;;  %v26632_v3 = vpack.i.bf16 %v31816_v11, %v31336_v54  ;;  %v26642_v54 = vpack.i.bf16 %v31826_v50, %v31346_v23 }
0x1933   : > { %27173 = vpow2.f32 %v21466_v34  ;;  %v21438_v19 = vsub.f32 %v32384_v33, %v21420_v9  ;;  %v26634_v9 = vpack.i.bf16 %v31818_v39, %v31338_v26  ;;  %v26644_v26 = vpack.i.bf16 %v31828_v55, %v31348_v6  ;;  %v34010_v6 = vld [vmem:[#allocation275_spill] sm:$0xff] }
0x1934   : > { %v32447_v14 = vpop.eup %27167 }
0x1935   : > { %v21468_v1 = vmul.f32 1.442695, %v21438_v19  ;;  %v21502_v61 = vsel %vm2124_vm3, %v32447_v14, 0.0  ;;  %v26636_v19 = vpack.i.bf16 %v31820_v40, %v31340_v13  ;;  %v26646_v13 = vpack.i.bf16 %v31830_v56, %v31350_v44  ;;  %v34009_v40 = vld [vmem:[#allocation12_spill] sm:$0xff] }
0x1936   : > { %v21423_v60 = vpop.xlane.xlu1 %21422  ;;  %21503 = vadd.xlane.f32.xlu0 %v21502_v61  ;;  %v26640_v61 = vpack.i.bf16 %v31824_v51, %v31344_v36  ;;  %v34008_v36 = vld [vmem:[#allocation274_spill] sm:$0xff]  ;;  %v34011_v51 = vld [vmem:[#allocation11_spill] sm:$0xff] }
0x1937   : > { %27175 = vpow2.f32 %v21468_v1  ;;  %v21439_v35 = vsub.f32 %v32388_v20, %v21423_v60  ;;  %v26638_v1 = vpack.i.bf16 %v31822_v37, %v31342_v25  ;;  %v26648_v25 = vpack.i.bf16 %v31832_v41, %v31352_v27  ;;  %v34012_v60 = vld [vmem:[#allocation276_spill] sm:$0xff]  ;;  %v34013_v27 = vld [vmem:[#allocation15_spill] sm:$0xff] }
0x1938   : > { %v32452_v46 = vpop.eup %27169  ;;  %v26650_v23 = vpack.i.bf16 %v34009_v40, %v34008_v36  ;;  %v26652_v50 = vpack.i.bf16 %v34011_v51, %v34010_v6  ;;  %v26654_v41 = vpack.i.bf16 %v34013_v27, %v34012_v60  ;;  %v34024_v36 = vld [vmem:[#allocation8_spill] sm:$0xff]  ;;  %v34026_v51 = vld [vmem:[#allocation287_spill] sm:$0xff] }
0x1939   : > { %v21470_v32 = vmul.f32 1.442695, %v21439_v35  ;;  %v21505_v53 = vsel %vm2124_vm3, %v32452_v46, 0.0 }
0x193a   : > { %21506 = vadd.xlane.f32.xlu1 %v21505_v53  ;;  %v34014_v53 = vld [vmem:[#allocation284_spill] sm:$0xff] }
0x193b   : > { %27177 = vpow2.f32 %v21470_v32 }
0x193c   : > { %v32456_v33 = vpop.eup %27171 }
0x193d   : > { %v21508_v59 = vsel %vm2124_vm3, %v32456_v33, 0.0 }
0x193e   : > { %21509 = vadd.xlane.f32.xlu0 %v21508_v59 }
0x1940   : > { %v32460_v48 = vpop.eup %27173 }
0x1941   : > { %v21511_v16 = vsel %vm2124_vm3, %v32460_v48, 0.0 }
0x1942   : > { %21512 = vadd.xlane.f32.xlu1 %v21511_v16  ;;  %v34015_v16 = vld [vmem:[#allocation277_spill] sm:$0xff] }
0x1944   : > { %v32464_v20 = vpop.eup %27175 }
0x1945   : > { %v21514_v52 = vsel %vm2124_vm3, %v32464_v20, 0.0 }
0x1946   : > { %21515 = vadd.xlane.f32.xlu0 %v21514_v52 }
0x1948   : > { %v32468_v15 = vpop.eup %27177 }
0x1949   : > { %v21517_v34 = vsel %vm2124_vm3, %v32468_v15, 0.0 }
0x194a   : > { %21518 = vadd.xlane.f32.xlu1 %v21517_v34  ;;  %v34017_v34 = vld [vmem:[#allocation281_spill] sm:$0xff] }
0x197d   : > { %26633 = vxpose.xlu1.b32.start [1/16] (narrow) %v26632_v3, 8 }
0x1981   : > { %26635 = vxpose.xlu1.b32.cont [2/16] (narrow) %v26634_v9, 8 }
0x1985   : > { %26637 = vxpose.xlu1.b32.cont [3/16] (narrow) %v26636_v19, 8  ;;  %v34018_v19 = vld [vmem:[#allocation286_spill] sm:$0xff] }
0x1989   : > { %26639 = vxpose.xlu1.b32.cont [4/16] (narrow) %v26638_v1, 8  ;;  %v34019_v1 = vld [vmem:[#allocation278_spill] sm:$0xff] }
0x198d   : > { %26641 = vxpose.xlu1.b32.cont [5/16] (narrow) %v26640_v61, 8  ;;  %v34020_v61 = vld [vmem:[#allocation7_spill] sm:$0xff] }
0x1991   : > { %26643 = vxpose.xlu1.b32.cont [6/16] (narrow) %v26642_v54, 8  ;;  %v26658_v54 = vpack.i.bf16 %v34020_v61, %v34019_v1 }
0x1995   : > { %26645 = vxpose.xlu1.b32.cont [7/16] (narrow) %v26644_v26, 8  ;;  %v34021_v26 = vld [vmem:[#allocation282_spill] sm:$0xff] }
0x1997   : > { %v21474_v11 = vpop.xlane.xlu0 %21473 }
0x1998   : > { %27179 = vrcp.f32 %v21474_v11 }
0x1999   : > { %26647 = vxpose.xlu1.b32.cont [8/16] (narrow) %v26646_v13, 8 }
0x199b   : > { %v21477_v39 = vpop.xlane.xlu1 %21476 }
0x199c   : > { %27181 = vrcp.f32 %v21477_v39  ;;  %v34023_v39 = vld [vmem:[#allocation279_spill] sm:$0xff] }
0x199d   : > { %26649 = vxpose.xlu1.b32.cont [9/16] (narrow) %v26648_v25, 8  ;;  %v34022_v25 = vld [vmem:[#allocation283_spill] sm:$0xff]  ;;  %v26660_v40 = vpack.i.bf16 %v34024_v36, %v34023_v39 }
0x199f   : > { %v21480_v37 = vpop.xlane.xlu0 %21479 }
0x19a0   : > { %27183 = vrcp.f32 %v21480_v37 }
0x19a1   : > { %26651 = vxpose.xlu1.b32.cont [10/16] (narrow) %v26650_v23, 8  ;;  %v34025_v23 = vld [vmem:[#allocation285_spill] sm:$0xff] }
0x19a3   : > { %v21483_v55 = vpop.xlane.xlu1 %21482 }
0x19a4   : > { %27185 = vrcp.f32 %v21483_v55  ;;  %v34028_v55 = vld [vmem:[#allocation9_spill] sm:$0xff] }
0x19a5   : > { %v27180_v44 = vpop.eup %27179  ;;  %26653 = vxpose.xlu1.b32.cont [11/16] (narrow) %v26652_v50, 8  ;;  %v34027_v50 = vld [vmem:[#allocation280_spill] sm:$0xff] }
0x19a6   : > { %v21536_v56 = vmul.f32 %v27180_v44, %v32397_v43  ;;  %v34016_v43 = vld [vmem:[#allocation13_spill] sm:$0xff]  ;;  %v26662_v44 = vpack.i.bf16 %v34028_v55, %v34027_v50 }
0x19a7   : > { %v21486_v35 = vpop.xlane.xlu0 %21485  ;;  %v26656_v52 = vpack.i.bf16 %v34016_v43, %v34015_v16  ;;  %v34033_v16 = vld [vmem:[#allocation293_spill] sm:$0xff] }
0x19a8   : > { %27187 = vrcp.f32 %v21486_v35  ;;  %26316 = vmatmul.mubr.msk.f32.vlgmr.msra.gmra.mxu0 %vm2124_vm3, %v21536_v56  ;;  %v34029_v56 = vld [vmem:[#allocation289_spill] sm:$0xff]  ;;  %v34031_v35 = vld [vmem:[#allocation291_spill] sm:$0xff] }
0x19a9   : > { %v27182_v32 = vpop.eup %27181  ;;  %26326 = vmatpush3.msra.mxu0 %v34014_v53  ;;  %26655 = vxpose.xlu1.b32.cont [12/16] (narrow) %v26654_v41, 8  ;;  %v34030_v41 = vld [vmem:[#allocation288_spill] sm:$0xff] }
0x19aa   : > { %v21537_v59 = vmul.f32 %v27182_v32, %v32402_v8  ;;  %26327 = vmatprep.subr.mxu0 %v33198_v17  ;;  %26329 = vmatprep.mubr.msk.f32.mxu0 %vm27293_vm1, %v33198_v17 }
0x19ab   : > { %26328 = vmatpush3.msra.mxu0 %v34017_v34  ;;  %v21489_v3 = vpop.xlane.xlu1 %21488  ;;  %v34034_v34 = vld [vmem:[#allocation292_spill] sm:$0xff] }
0x19ac   : > { %27189 = vrcp.f32 %v21489_v3  ;;  %26323 = vmatmul.mubr.msk.f32.vlgmr.msra.gmra.mxu1 %vm2124_vm3, %v21537_v59  ;;  %26339 = vmatprep.subr.mxu0 %v33198_v17  ;;  %v34032_v59 = vld [vmem:[#allocation290_spill] sm:$0xff] }
0x19ad   : > { %v27184_v9 = vpop.eup %27183  ;;  %26333 = vmatpush3.msra.mxu1 %v34018_v19  ;;  %26657 = vxpose.xlu1.b32.cont [13/16] (narrow) %v26656_v52, 8 }
0x19ae   : > { %v21538_v8 = vmul.f32 %v27184_v9, %v32407_v5  ;;  %26334 = vmatprep.subr.mxu1 %v33198_v17  ;;  %26336 = vmatprep.mubr.msk.f32.mxu1 %vm27293_vm1, %v33198_v17 }
0x19af   : > { %26335 = vmatpush3.msra.mxu1 %v34021_v26  ;;  %v21492_v13 = vpop.xlane.xlu0 %21491  ;;  %v34038_v26 = vld [vmem:[#allocation296_spill] sm:$0xff] }
0x19b0   : > { %27191 = vrcp.f32 %v21492_v13  ;;  %26330 = vmatmul.mubr.msk.f32.vlgmr.msra.gmra.mxu0 %vm2124_vm3, %v21538_v8  ;;  %26346 = vmatprep.subr.mxu1 %v33198_v17  ;;  %v34036_v8 = vld [vmem:[#allocation294_spill] sm:$0xff] }
0x19b1   : > { %v27186_v11 = vpop.eup %27185  ;;  %26340 = vmatpush3.msra.mxu0 %v34022_v25  ;;  %26659 = vxpose.xlu1.b32.cont [14/16] (narrow) %v26658_v54, 8 }
0x19b2   : > { %v21539_v5 = vmul.f32 %v27186_v11, %v32412_v45  ;;  %26341 = vmatprep.subr.mxu0 %v33198_v17  ;;  %26343 = vmatprep.mubr.msk.f32.mxu0 %vm27293_vm1, %v33198_v17 }
0x19b3   : > { %26342 = vmatpush3.msra.mxu0 %v34025_v23  ;;  %v21495_v37 = vpop.xlane.xlu1 %21494  ;;  %v34042_v23 = vld [vmem:[#allocation300_spill] sm:$0xff] }
0x19b4   : > { %27193 = vrcp.f32 %v21495_v37  ;;  %26337 = vmatmul.mubr.msk.f32.vlgmr.msra.gmra.mxu1 %vm2124_vm3, %v21539_v5  ;;  %26353 = vmatprep.subr.mxu0 %v33198_v17  ;;  %v34040_v5 = vld [vmem:[#allocation298_spill] sm:$0xff] }
0x19b5   : > { %v27188_v6 = vpop.eup %27187  ;;  %26347 = vmatpush3.msra.mxu1 %v34026_v51  ;;  %26661 = vxpose.xlu1.b32.cont [15/16] (narrow) %v26660_v40, 8 }
0x19b6   : > { %v21540_v45 = vmul.f32 %v27188_v6, %v32417_v31  ;;  %26348 = vmatprep.subr.mxu1 %v33198_v17  ;;  %26350 = vmatprep.mubr.msk.f32.mxu1 %vm27293_vm1, %v33198_v17 }
0x19b7   : > { %26349 = vmatpush3.msra.mxu1 %v34029_v56  ;;  %v21498_v60 = vpop.xlane.xlu0 %21497 }
0x19b8   : > { %27195 = vrcp.f32 %v21498_v60  ;;  %26344 = vmatmul.mubr.msk.f32.vlgmr.msra.gmra.mxu0 %vm2124_vm3, %v21540_v45  ;;  %26360 = vmatprep.subr.mxu1 %v33198_v17  ;;  %v34044_v45 = vld [vmem:[#allocation302_spill] sm:$0xff]  ;;  %v34047_v60 = vld [vmem:[#allocation112_spill] sm:$0xff] }
0x19b9   : > { %v27190_v27 = vpop.eup %27189  ;;  %26354 = vmatpush3.msra.mxu0 %v34030_v41  ;;  %26663 = vxpose.xlu1.b32.end [16/16] (narrow) %v26662_v44, 8  ;;  %v34046_v44 = vld [vmem:[#allocation305_spill] sm:$0xff] }
0x19ba   : > { %v21541_v31 = vmul.f32 %v27190_v27, %v32422_v57  ;;  %26355 = vmatprep.subr.mxu0 %v33198_v17  ;;  %26357 = vmatprep.mubr.msk.f32.mxu0 %vm27293_vm1, %v33198_v17  ;;  %v34048_v27 = vld [vmem:[#allocation194_spill] sm:$0xff] }
0x19bb   : > { %26356 = vmatpush3.msra.mxu0 %v34031_v35  ;;  %v21501_v32 = vpop.xlane.xlu1 %21500  ;;  %v27217_v35 = vld [vmem:[%s32778_s2 + $0x30] sm:$0xff]  }
0x19bc   : > { %27197 = vrcp.f32 %v21501_v32  ;;  %26351 = vmatmul.mubr.msk.f32.vlgmr.msra.gmra.mxu1 %vm2124_vm3, %v21541_v31  ;;  %26367 = vmatprep.subr.mxu0 %v33198_v17  ;;  %v34049_v31 = vld [vmem:[#allocation113_spill] sm:$0xff] }
0x19bd   : > { %v27192_v53 = vpop.eup %27191  ;;  %26361 = vmatpush3.msra.mxu1 %v34032_v59  ;;  %26364 = vmatprep.mubr.msk.f32.mxu1 %vm27293_vm1, %v33198_v17 }
0x19be   : > { %v21542_v57 = vmul.f32 %v27192_v53, %v32427_v2  ;;  %26362 = vmatprep.subr.mxu1 %v33198_v17  ;;  %v34035_v2 = vld [vmem:[#allocation295_spill] sm:$0xff] }
0x19bf   : > { %26363 = vmatpush3.msra.mxu1 %v34033_v16  ;;  %v21504_v43 = vpop.xlane.xlu0 %21503 }
0x19c0   : > { %27199 = vrcp.f32 %v21504_v43  ;;  %26358 = vmatmul.mubr.msk.f32.vlgmr.msra.gmra.mxu0 %vm2124_vm3, %v21542_v57  ;;  %26374 = vmatprep.subr.mxu1 %v33198_v17 }
0x19c1   : > { %v27194_v52 = vpop.eup %27193  ;;  %26368 = vmatpush3.msra.mxu0 %v34034_v34  ;;  %26371 = vmatprep.mubr.msk.f32.mxu0 %vm27293_vm1, %v33198_v17 }
0x19c2   : > { %v21543_v3 = vmul.f32 %v27194_v52, %v32432_v10  ;;  %26369 = vmatprep.subr.mxu0 %v33198_v17  ;;  %v34037_v10 = vld [vmem:[#allocation297_spill] sm:$0xff] }
0x19c3   : > { %26370 = vmatpush3.msra.mxu0 %v34035_v2  ;;  %v21507_v9 = vpop.xlane.xlu1 %21506 }
0x19c4   : > { %27201 = vrcp.f32 %v21507_v9  ;;  %26365 = vmatmul.mubr.msk.f32.vlgmr.msra.gmra.mxu1 %vm2124_vm3, %v21543_v3  ;;  %26381 = vmatprep.subr.mxu0 %v33198_v17 }
0x19c5   : > { %v27196_v19 = vpop.eup %27195  ;;  %26375 = vmatpush3.msra.mxu1 %v34036_v8  ;;  %26378 = vmatprep.mubr.msk.f32.mxu1 %vm27293_vm1, %v33198_v17 }
0x19c6   : > { %v21544_v1 = vmul.f32 %v27196_v19, %v32437_v42  ;;  %26376 = vmatprep.subr.mxu1 %v33198_v17  ;;  %v34039_v42 = vld [vmem:[#allocation299_spill] sm:$0xff] }
0x19c7   : > { %26377 = vmatpush3.msra.mxu1 %v34037_v10  ;;  %v21510_v61 = vpop.xlane.xlu0 %21509 }
0x19c8   : > { %27203 = vrcp.f32 %v21510_v61  ;;  %26372 = vmatmul.mubr.msk.f32.vlgmr.msra.gmra.mxu0 %vm2124_vm3, %v21544_v1  ;;  %26388 = vmatprep.subr.mxu1 %v33198_v17 }
0x19c9   : > { %v27198_v54 = vpop.eup %27197  ;;  %26382 = vmatpush3.msra.mxu0 %v34038_v26  ;;  %26385 = vmatprep.mubr.msk.f32.mxu0 %vm27293_vm1, %v33198_v17 }
0x19ca   : > { %v21545_v13 = vmul.f32 %v27198_v54, %v32442_v7  ;;  %26383 = vmatprep.subr.mxu0 %v33198_v17  ;;  %v34041_v7 = vld [vmem:[#allocation301_spill] sm:$0xff] }
0x19cb   : > { %26384 = vmatpush3.msra.mxu0 %v34039_v42  ;;  %v21513_v11 = vpop.xlane.xlu1 %21512 }
0x19cc   : > { %27205 = vrcp.f32 %v21513_v11  ;;  %26379 = vmatmul.mubr.msk.f32.vlgmr.msra.gmra.mxu1 %vm2124_vm3, %v21545_v13  ;;  %26395 = vmatprep.subr.mxu0 %v33198_v17 }
0x19cd   : > { %v27200_v25 = vpop.eup %27199  ;;  %26389 = vmatpush3.msra.mxu1 %v34040_v5  ;;  %26392 = vmatprep.mubr.msk.f32.mxu1 %vm27293_vm1, %v33198_v17 }
0x19ce   : > { %v21546_v39 = vmul.f32 %v27200_v25, %v32447_v14  ;;  %26390 = vmatprep.subr.mxu1 %v33198_v17  ;;  %v34043_v14 = vld [vmem:[#allocation303_spill] sm:$0xff] }
0x19cf   : > { %26391 = vmatpush3.msra.mxu1 %v34041_v7  ;;  %v21516_v36 = vpop.xlane.xlu0 %21515 }
0x19d0   : > { %27207 = vrcp.f32 %v21516_v36  ;;  %26386 = vmatmul.mubr.msk.f32.vlgmr.msra.gmra.mxu0 %vm2124_vm3, %v21546_v39  ;;  %26402 = vmatprep.subr.mxu1 %v33198_v17 }
0x19d1   : > { %v27202_v40 = vpop.eup %27201  ;;  %26396 = vmatpush3.msra.mxu0 %v34042_v23  ;;  %26399 = vmatprep.mubr.msk.f32.mxu0 %vm27293_vm1, %v33198_v17 }
0x19d2   : > { %v21547_v37 = vmul.f32 %v27202_v40, %v32452_v46  ;;  %26397 = vmatprep.subr.mxu0 %v33198_v17  ;;  %v34045_v46 = vld [vmem:[#allocation304_spill] sm:$0xff] }
0x19d3   : > { %26398 = vmatpush3.msra.mxu0 %v34043_v14  ;;  %v21519_v6 = vpop.xlane.xlu1 %21518 }
0x19d4   : > { %27209 = vrcp.f32 %v21519_v6  ;;  %26393 = vmatmul.mubr.msk.f32.vlgmr.msra.gmra.mxu1 %vm2124_vm3, %v21547_v37  ;;  %26409 = vmatprep.subr.mxu0 %v33198_v17 }
0x19d5   : > { %v27204_v51 = vpop.eup %27203  ;;  %26403 = vmatpush3.msra.mxu1 %v34044_v45  ;;  %26406 = vmatprep.mubr.msk.f32.mxu1 %vm27293_vm1, %v33198_v17 }
0x19d6   : > { %v21548_v50 = vmul.f32 %v27204_v51, %v32456_v33  ;;  %26404 = vmatprep.subr.mxu1 %v33198_v17 }
0x19d7   : > { %26405 = vmatpush3.msra.mxu1 %v34045_v46 }
0x19d8   : > { %26400 = vmatmul.mubr.msk.f32.vlgmr.msra.gmra.mxu0 %vm2124_vm3, %v21548_v50  ;;  %26416 = vmatprep.subr.mxu1 %v33198_v17 }
0x19d9   : > { %v27206_v55 = vpop.eup %27205  ;;  %26410 = vmatpush3.msra.mxu0 %v34046_v44  ;;  %26413 = vmatprep.mubr.msk.f32.mxu0 %vm27293_vm1, %v33198_v17 }
0x19da   : > { %v21549_v56 = vmul.f32 %v27206_v55, %v32460_v48  ;;  %26411 = vmatprep.subr.mxu0 %v33198_v17 }
0x19db   : > { %26412 = vmatpush3.msra.mxu0 %v34047_v60 }
0x19dc   : > { %26407 = vmatmul.mubr.msk.f32.vlgmr.msra.gmra.mxu1 %vm2124_vm3, %v21549_v56 }
0x19dd   : > { %v27208_v33 = vpop.eup %27207  ;;  %26417 = vmatpush3.msra.mxu1 %v34048_v27  ;;  %26420 = vmatprep.mubr.msk.f32.mxu1 %vm27293_vm1, %v33198_v17 }
0x19de   : > { %v21550_v41 = vmul.f32 %v27208_v33, %v32464_v20  ;;  %26418 = vmatprep.subr.mxu1 %v33198_v17  ;;  %v27218_v20 = vld [vmem:[%s32778_s2 + $0x40] sm:$0xff]  }
0x19df   : > { %26419 = vmatpush3.msra.mxu1 %v34049_v31 }
0x19e0   : > { %26414 = vmatmul.mubr.msk.f32.vlgmr.msra.gmra.mxu0 %vm2124_vm3, %v21550_v41 }
0x19e1   : > { %v27210_v48 = vpop.eup %27209  ;;  %26427 = vmatprep.mubr.msk.bf16.mxu0 %vm516_vm0, %v27217_v35 }
0x19e2   : > { %v21551_v32 = vmul.f32 %v27210_v48, %v32468_v15 }
0x19e4   : > { %26421 = vmatmul.mubr.msk.f32.vlgmr.msra.gmra.mxu1 %vm2124_vm3, %v21551_v32  ;;  %v34050_v32 = vld [vmem:[#allocation195_spill] sm:$0xff] }
0x19e5   : > { %26435 = vmatprep.mubr.msk.bf16.mxu1 %vm516_vm0, %v27218_v20 }
0x19f9   : > { %v32626_v53 = vpop.trf.xlu1 }
0x19fa   : > { %v26668_v44 = vunpack.i.h.bf16 %v32626_v53 }
0x1a68   : > { %v21621_v17 = vpop.f32.mrf.mxu0 }
0x1a69   : > { %v26595_v59 = vpack.i.bf16 %v21621_v17, %v32296_v29  ;;  %v34051_v17 = vld [vmem:[#allocation118_spill] sm:$0xff] }
0x1a6a   : > { %v26317_v57 = vpop.f32.mrf.mxu0 }
0x1a6b   : > { %26596 = vxpose.xlu0.b32.start [1/16] (narrow) %v26595_v59, 8  ;;  %v34052_v59 = vld [vmem:[#allocation196_spill] sm:$0xff] }
0x1a6c   : > { %v21694_v16 = vpop.f32.mrf.mxu1 }
0x1a6d   : > { %v26597_v43 = vpack.i.bf16 %v21694_v16, %v32298_v21 }
0x1a6e   : > { %v26324_v52 = vpop.f32.mrf.mxu1 }
0x1a6f   : > { %26598 = vxpose.xlu0.b32.cont [2/16] (narrow) %v26597_v43, 8  ;;  %v34053_v43 = vld [vmem:[#allocation119_spill] sm:$0xff] }
0x1a70   : > { %v21767_v15 = vpop.f32.mrf.mxu0 }
0x1a71   : > { %v26599_v34 = vpack.i.bf16 %v21767_v15, %v32300_v24 }
0x1a72   : > { %v26331_v3 = vpop.f32.mrf.mxu0 }
0x1a73   : > { %26600 = vxpose.xlu0.b32.cont [3/16] (narrow) %v26599_v34, 8 }
0x1a74   : > { %v21840_v2 = vpop.f32.mrf.mxu1 }
0x1a75   : > { %v26601_v9 = vpack.i.bf16 %v21840_v2, %v32302_v30 }
0x1a76   : > { %v26338_v19 = vpop.f32.mrf.mxu1 }
0x1a77   : > { %26602 = vxpose.xlu0.b32.cont [4/16] (narrow) %v26601_v9, 8 }
0x1a78   : > { %v21913_v8 = vpop.f32.mrf.mxu0 }
0x1a79   : > { %v26603_v29 = vpack.i.bf16 %v21913_v8, %v32304_v0 }
0x1a7a   : > { %v26345_v1 = vpop.f32.mrf.mxu0 }
0x1a7b   : > { %26604 = vxpose.xlu0.b32.cont [5/16] (narrow) %v26603_v29, 8 }
0x1a7c   : > { %v21986_v10 = vpop.f32.mrf.mxu1 }
0x1a7d   : > { %v26605_v21 = vpack.i.bf16 %v21986_v10, %v32306_v22 }
0x1a7e   : > { %v26352_v61 = vpop.f32.mrf.mxu1 }
0x1a7f   : > { %26606 = vxpose.xlu0.b32.cont [6/16] (narrow) %v26605_v21, 8 }
0x1a80   : > { %v22059_v54 = vpop.f32.mrf.mxu0 }
0x1a81   : > { %v26607_v24 = vpack.i.bf16 %v22059_v54, %v32308_v63 }
0x1a82   : > { %v26359_v26 = vpop.f32.mrf.mxu0 }
0x1a83   : > { %26608 = vxpose.xlu0.b32.cont [7/16] (narrow) %v26607_v24, 8 }
0x1a84   : > { %v22132_v13 = vpop.f32.mrf.mxu1 }
0x1a85   : > { %v26609_v30 = vpack.i.bf16 %v22132_v13, %v32310_v18 }
0x1a86   : > { %v26366_v42 = vpop.f32.mrf.mxu1 }
0x1a87   : > { %26610 = vxpose.xlu0.b32.cont [8/16] (narrow) %v26609_v30, 8 }
0x1a88   : > { %v22205_v11 = vpop.f32.mrf.mxu0 }
0x1a89   : > { %v26611_v0 = vpack.i.bf16 %v22205_v11, %v32312_v12 }
0x1a8a   : > { %v26373_v25 = vpop.f32.mrf.mxu0 }
0x1a8b   : > { %26612 = vxpose.xlu0.b32.cont [9/16] (narrow) %v26611_v0, 8 }
0x1a8c   : > { %v22278_v5 = vpop.f32.mrf.mxu1 }
0x1a8d   : > { %v26613_v22 = vpack.i.bf16 %v22278_v5, %v32314_v49 }
0x1a8e   : > { %v26380_v39 = vpop.f32.mrf.mxu1 }
0x1a8f   : > { %26614 = vxpose.xlu0.b32.cont [10/16] (narrow) %v26613_v22, 8 }
0x1a90   : > { %v22351_v7 = vpop.f32.mrf.mxu0 }
0x1a91   : > { %v26615_v63 = vpack.i.bf16 %v22351_v7, %v32316_v38 }
0x1a92   : > { %v26387_v36 = vpop.f32.mrf.mxu0 }
0x1a93   : > { %26616 = vxpose.xlu0.b32.cont [11/16] (narrow) %v26615_v63, 8 }
0x1a94   : > { %v22424_v40 = vpop.f32.mrf.mxu1 }
0x1a95   : > { %v26617_v18 = vpack.i.bf16 %v22424_v40, %v32318_v47 }
0x1a96   : > { %v26394_v23 = vpop.f32.mrf.mxu1 }
0x1a97   : > { %26618 = vxpose.xlu0.b32.cont [12/16] (narrow) %v26617_v18, 8 }
0x1a98   : > { %v22497_v37 = vpop.f32.mrf.mxu0 }
0x1a99   : > { %v26619_v12 = vpack.i.bf16 %v22497_v37, %v32320_v4  ;;  %v26665_v4 = vunpack.i.l.bf16 %v32626_v53 }
0x1a9a   : > { %v26401_v14 = vpop.f32.mrf.mxu0 }
0x1a9b   : > { %26620 = vxpose.xlu0.b32.cont [13/16] (narrow) %v26619_v12, 8  ;;  %v22752_v27 = vpack.c.bf16 %v26668_v44, %v26665_v4  ;;  %v34059_v4 = vld [vmem:[#allocation198_spill] sm:$0xff] }
0x1a9c   : > { %v22570_v6 = vpop.f32.mrf.mxu1 }
0x1a9d   : > { %v26621_v49 = vpack.i.bf16 %v22570_v6, %v32322_v62  ;;  %v34054_v6 = vld [vmem:[#allocation203_spill] sm:$0xff] }
0x1a9e   : > { %v26408_v51 = vpop.f32.mrf.mxu1 }
0x1a9f   : > { %26622 = vxpose.xlu0.b32.cont [14/16] (narrow) %v26621_v49, 8  ;;  %v34055_v51 = vld [vmem:[#allocation120_spill] sm:$0xff] }
0x1aa0   : > { %v22643_v45 = vpop.f32.mrf.mxu0 }
0x1aa1   : > { %v26623_v38 = vpack.i.bf16 %v22643_v45, %v32324_v28  ;;  %v27219_v28 = vld [vmem:[%s32778_s2 + $0x38] sm:$0xff]  }
0x1aa2   : > { %v26415_v50 = vpop.f32.mrf.mxu0 }
0x1aa3   : > { %26624 = vxpose.xlu0.b32.cont [15/16] (narrow) %v26623_v38, 8  ;;  %v34056_v38 = vld [vmem:[#allocation197_spill] sm:$0xff] }
0x1aa4   : > { %v22716_v46 = vpop.f32.mrf.mxu1 }
0x1aa5   : > { %v26625_v47 = vpack.i.bf16 %v22716_v46, %v32326_v58  ;;  %v27220_v58 = vld [vmem:[%s32779_s3] sm:$0xff]   ;;  %v34057_v46 = vld [vmem:[#allocation122_spill] sm:$0xff] }
0x1aa6   : > { %v26422_v55 = vpop.f32.mrf.mxu1 }
0x1aa7   : > { %26626 = vxpose.xlu0.b32.end [16/16] (narrow) %v26625_v47, 8  ;;  %v34058_v55 = vld [vmem:[#allocation121_spill] sm:$0xff] }
0x1ae7   : > { %v26627_v56 = vpop.trf.xlu0 }
0x1ae8   : > { %v26631_v60 = vunpack.i.h.bf16 %v26627_v56  ;;  %v26628_v33 = vunpack.i.l.bf16 %v26627_v56 }
0x1aea   : > { %v22753_v62 = vpack.c.bf16 %v26631_v60, %v26628_v33  ;;  %v34060_v60 = vld [vmem:[#allocation123_spill] sm:$0xff] }
0x1aec   : > { %26423 = vmatprep.subr.bf16.mxu0 %v22753_v62 }
0x1aed   : > { %26424 = vmatpush3.bf16.msra.mxu0 %v22753_v62  ;;  %v34061_v62 = vld [vmem:[#allocation199_spill] sm:$0xff] }
0x1aee   : > { %26425 = vmatprep.subr.bf16.mxu0 %v22752_v27 }
0x1af1   : > { %26426 = vmatpush3.bf16.msra.mxu0 %v22752_v27 }
0x1af4   : > { %26428 = vmatmul.mubr.msk.bf16.vlgmr.msra.gmra.mxu0 %vm516_vm0, %v27219_v28 }
0x1af5   : > { %26467 = vmatprep.mubr.bf16.mxu0 %v27220_v58 }
0x1bb4   : > { %v26429_v41 = vpop.f32.mrf.mxu0 }
0x1bb5   : > { %v22797_v57 = vadd.f32 %v26429_v41, %v34052_v59  ;;  %v27221_v41 = vld [vmem:[%s32778_s2 + $0x48] sm:$0xff]  }
0x1bb6   : > { %v22788_v31 = vpop.f32.mrf.mxu0 }
0x1bb7   : > { %v22789_v20 = vadd.f32 %v22788_v31, %v34050_v32  ;;  %v27222_v31 = vld [vmem:[%s32778_s2 + $0x50] sm:$0xff]   ;;  %v27225_v32 = vld [vmem:[%s32778_s2 + $0x68] sm:$0xff]  }
0x1bb8   : > { %v26430_v48 = vpop.f32.mrf.mxu0 }
0x1bb9   : > { %v22800_v52 = vadd.f32 %v26430_v48, %v34053_v43  ;;  %v27223_v48 = vld [vmem:[%s32778_s2 + $0x58] sm:$0xff]  }
0x1bba   : > { %v22791_v35 = vpop.f32.mrf.mxu0 }
0x1bbb   : > { %v22792_v53 = vadd.f32 %v22791_v35, %v34051_v17  ;;  %v27224_v35 = vld [vmem:[%s32778_s2 + $0x60] sm:$0xff]   ;;  %v27227_v17 = vld [vmem:[%s32778_s2 + $0x78] sm:$0xff]  }
0x1bbd   : > { %v22803_v16 = vadd.f32 %v22792_v53, %v22789_v20 }
0x1bbf   : > { %v22804_v15 = vadd.f32 %v22803_v16, %v22797_v57 }
0x1bc1   : > { %v22805_v34 = vadd.f32 %v22804_v15, %v22800_v52 }
0x1bc3   : > { %v22806_v3 = vrot.slane %v22805_v34, 4 }
0x1bc5   : > { %v22807_v2 = vadd.f32 %v22806_v3, %v22805_v34 }
0x1bc7   : > { %v22808_v9 = vrot.slane %v22807_v2, 2 }
0x1bc9   : > { %v22809_v19 = vadd.f32 %v22808_v9, %v22807_v2 }
0x1bcb   : > { %v22810_v8 = vrot.slane %v22809_v19, 1 }
0x1bcd   : > { %v22811_v29 = vadd.f32 %v22810_v8, %v22809_v19 }
0x1bcf   : > { %v22812_v1 = vmul.f32 0.03125, %v22811_v29 }
0x1bd1   : > { %v22813_v10 = vsub.f32 %v22789_v20, %v22812_v1  ;;  %v22814_v21 = vsub.f32 %v22792_v53, %v22812_v1  ;;  %v22815_v61 = vsub.f32 %v22797_v57, %v22812_v1  ;;  %v22816_v54 = vsub.f32 %v22800_v52, %v22812_v1  ;;  %v27226_v20 = vld [vmem:[%s32778_s2 + $0x70] sm:$0xff]   ;;  %v34062_v1 = vld [vmem:[#allocation124_spill] sm:$0xff] }
0x1bd3   : > { %v22817_v24 = vmul.f32 %v22813_v10, %v22813_v10  ;;  %v22818_v26 = vmul.f32 %v22814_v21, %v22814_v21  ;;  %v22819_v13 = vmul.f32 %v22815_v61, %v22815_v61  ;;  %v22820_v42 = vmul.f32 %v22816_v54, %v22816_v54 }
0x1bd5   : > { %v22821_v30 = vadd.f32 %v22818_v26, %v22817_v24  ;;  %v34064_v24 = vld [vmem:[#allocation204_spill] sm:$0xff] }
0x1bd7   : > { %v22822_v11 = vadd.f32 %v22821_v30, %v22819_v13  ;;  %v34065_v30 = vld [vmem:[#allocation205_spill] sm:$0xff] }
0x1bd9   : > { %v22823_v0 = vadd.f32 %v22822_v11, %v22820_v42 }
0x1bdb   : > { %v22824_v25 = vrot.slane %v22823_v0, 4 }
0x1bdd   : > { %v22825_v5 = vadd.f32 %v22824_v25, %v22823_v0  ;;  %v34066_v25 = vld [vmem:[#allocation200_spill] sm:$0xff] }
0x1bdf   : > { %v22826_v22 = vrot.slane %v22825_v5, 2 }
0x1be1   : > { %v22827_v39 = vadd.f32 %v22826_v22, %v22825_v5  ;;  %v34067_v22 = vld [vmem:[#allocation126_spill] sm:$0xff] }
0x1be3   : > { %v22828_v7 = vrot.slane %v22827_v39, 1 }
0x1be5   : > { %v22829_v63 = vadd.f32 %v22828_v7, %v22827_v39 }
0x1be7   : > { %v22830_v36 = vmul.f32 0.03125, %v22829_v63 }
0x1be9   : > { %v22831_v40 = vadd.f32 1e-05, %v22830_v36 }
0x1beb   : > { %27211 = vrsqrt.f32 %v22831_v40 }
0x1bf8   : > { %v27212_v18 = vpop.eup %27211 }
0x1bf9   : > { %v22834_v23 = vmul.f32 %v27212_v18, %v22814_v21  ;;  %v22835_v37 = vmul.f32 %v27212_v18, %v22815_v61  ;;  %v22836_v12 = vmul.f32 %v27212_v18, %v22816_v54  ;;  %v22833_v14 = vmul.f32 %v27212_v18, %v22813_v10  ;;  %v34063_v61 = vld [vmem:[#allocation125_spill] sm:$0xff] }
0x1bfa   : > { %v34068_v18 = vld [vmem:[#allocation201_spill] sm:$0xff] }
0x1bfb   : > { %v22838_v49 = vmul.f32 %v22834_v23, %v34054_v6  ;;  %v22839_v45 = vmul.f32 %v22835_v37, %v34055_v51  ;;  %v22840_v50 = vmul.f32 %v22836_v12, %v34056_v38  ;;  %v22837_v47 = vmul.f32 %v22833_v14, %v34057_v46  ;;  %v34069_v14 = vld [vmem:[#allocation127_spill] sm:$0xff] }
0x1bfd   : > { %v22843_v44 = vadd.f32 %v22839_v45, %v34058_v55  ;;  %v22844_v56 = vadd.f32 %v22840_v50, %v34059_v4  ;;  %v22841_v33 = vadd.f32 %v22837_v47, %v34060_v60  ;;  %v22842_v27 = vadd.f32 %v22838_v49, %v34061_v62  ;;  %v34070_v45 = vld [vmem:[#allocation206_spill] sm:$0xff] }
0x1bff   : > { %v22846_v28 = vpack.c.bf16 %v22844_v56, %v22843_v44  ;;  %v22845_v58 = vpack.c.bf16 %v22842_v27, %v22841_v33  ;;  %v34071_v56 = vld [vmem:[#allocation128_spill] sm:$0xff] }
0x1c01   : > { %26431 = vmatprep.subr.bf16.mxu1 %v22846_v28 }
0x1c02   : > { %26432 = vmatpush3.bf16.msra.mxu1 %v22846_v28 }
0x1c03   : > { %26433 = vmatprep.subr.bf16.mxu1 %v22845_v58 }
0x1c06   : > { %26434 = vmatpush3.bf16.msra.mxu1 %v22845_v58  ;;  %v34072_v58 = vld [vmem:[#allocation202_spill] sm:$0xff] }
0x1c09   : > { %26436 = vmatmul.mubr.msk.bf16.vlgmr.msra.gmra.mxu1 %vm516_vm0, %v27221_v41 }
0x1c0a   : > { %26439 = vmatprep.mubr.msk.bf16.mxu1 %vm516_vm0, %v27222_v31 }
0x1c11   : > { %26440 = vmatmul.mubr.msk.bf16.gmra.mxu1 %vm516_vm0, %v27223_v48 }
0x1c12   : > { %26443 = vmatprep.mubr.msk.bf16.mxu1 %vm516_vm0, %v27224_v35  ;;  %v34073_v35 = vld [vmem:[#allocation129_spill] sm:$0xff] }
0x1c19   : > { %26444 = vmatmul.mubr.msk.bf16.gmra.mxu1 %vm516_vm0, %v27225_v32 }
0x1c1a   : > { %26447 = vmatprep.mubr.msk.bf16.mxu1 %vm516_vm0, %v27226_v20  ;;  %v34074_v20 = vld [vmem:[#allocation207_spill] sm:$0xff] }
0x1c21   : > { %26448 = vmatmul.mubr.msk.bf16.gmra.mxu1 %vm516_vm0, %v27227_v17 }
0x1cc9   : > { %v26437_v53 = vpop.f32.mrf.mxu1 }
0x1ccb   : > { %v22881_v59 = vpop.f32.mrf.mxu1 }
0x1ccd   : > { %v26438_v57 = vpop.f32.mrf.mxu1 }
0x1cce   : > { %v22893_v17 = vadd.f32 %v26438_v57, %v34074_v20 }
0x1ccf   : > { %v22884_v16 = vpop.f32.mrf.mxu1 }
0x1cd1   : > { %v26441_v43 = vpop.f32.mrf.mxu1 }
0x1cd2   : > { %v22906_v33 = vadd.f32 %v26441_v43, %v34071_v56  ;;  %v22947_v43 = vmax.f32 %v22893_v17, 0.0 }
0x1cd3   : > { %v22897_v52 = vpop.f32.mrf.mxu1 }
0x1cd4   : > { %v22950_v48 = vmax.f32 %v22906_v33, 0.0  ;;  %v22898_v32 = vadd.f32 %v22897_v52, %v34073_v35 }
0x1cd5   : > { %v26442_v15 = vpop.f32.mrf.mxu1 }
0x1cd6   : > { %v22909_v50 = vadd.f32 %v26442_v15, %v34070_v45 }
0x1cd7   : > { %v22900_v34 = vpop.f32.mrf.mxu1 }
0x1cd8   : > { %v22951_v28 = vmax.f32 %v22909_v50, 0.0  ;;  %v22901_v41 = vadd.f32 %v22900_v34, %v34072_v58 }
0x1cd9   : > { %v26445_v3 = vpop.f32.mrf.mxu1 }
0x1cda   : > { %v22922_v39 = vadd.f32 %v26445_v3, %v34067_v22  ;;  %v22963_v3 = vpack.c.bf16 %v22951_v28, %v22950_v48  ;;  %v22949_v15 = vmax.f32 %v22901_v41, 0.0  ;;  %v34081_v22 = vld [vmem:[#allocation273_spill] sm:$0xff] }
0x1cdb   : > { %v22913_v2 = vpop.f32.mrf.mxu1 }
0x1cdc   : > { %v22954_v12 = vmax.f32 %v22922_v39, 0.0  ;;  %v22914_v49 = vadd.f32 %v22913_v2, %v34069_v14  ;;  %v34075_v2 = vld [vmem:[#allocation130_spill] sm:$0xff] }
0x1cdd   : > { %v26446_v9 = vpop.f32.mrf.mxu1 }
0x1cde   : > { %v22925_v42 = vadd.f32 %v26446_v9, %v34065_v30  ;;  %v22952_v27 = vmax.f32 %v22914_v49, 0.0  ;;  %v22890_v9 = vadd.f32 %v26437_v53, %v34075_v2  ;;  %v27228_v53 = vld [vmem:[%s32779_s3 + $0x8] sm:$0xff]  }
0x1cdf   : > { %v22916_v19 = vpop.f32.mrf.mxu1 }
0x1ce0   : > { %v22955_v40 = vmax.f32 %v22925_v42, 0.0  ;;  %v22917_v23 = vadd.f32 %v22916_v19, %v34068_v18  ;;  %v22948_v19 = vmax.f32 %v22898_v32, 0.0  ;;  %v22946_v34 = vmax.f32 %v22890_v9, 0.0  ;;  %v34079_v42 = vld [vmem:[#allocation271_spill] sm:$0xff] }
0x1ce1   : > { %v26449_v8 = vpop.f32.mrf.mxu1 }
0x1ce2   : > { %v22938_v10 = vadd.f32 %v26449_v8, %v34062_v1  ;;  %v22965_v47 = vpack.c.bf16 %v22955_v40, %v22954_v12  ;;  %v22953_v44 = vmax.f32 %v22917_v23, 0.0  ;;  %v34076_v8 = vld [vmem:[#allocation208_spill] sm:$0xff]  ;;  %v22962_v1 = vpack.c.bf16 %v22949_v15, %v22948_v19 }
0x1ce3   : > { %v22929_v29 = vpop.f32.mrf.mxu1  ;;  %v22961_v52 = vpack.c.bf16 %v22947_v43, %v22946_v34 }
0x1ce4   : > { %v22930_v54 = vadd.f32 %v22929_v29, %v34063_v61  ;;  %v22958_v11 = vmax.f32 %v22938_v10, 0.0  ;;  %v22964_v31 = vpack.c.bf16 %v22953_v44, %v22952_v27  ;;  %v22885_v29 = vadd.f32 %v22884_v16, %v34076_v8  ;;  %v34077_v10 = vld [vmem:[#allocation132_spill] sm:$0xff] }
0x1ce5   : > { %v26450_v21 = vpop.f32.mrf.mxu1 }
0x1ce6   : > { %v22941_v26 = vadd.f32 %v26450_v21, %v34064_v24  ;;  %v22956_v7 = vmax.f32 %v22930_v54, 0.0  ;;  %v22882_v21 = vadd.f32 %v22881_v59, %v34077_v10  ;;  %v22945_v61 = vmax.f32 %v22885_v29, 0.0  ;;  %v34078_v59 = vld [vmem:[#allocation209_spill] sm:$0xff] }
0x1ce7   : > { %v22932_v13 = vpop.f32.mrf.mxu1 }
0x1ce8   : > { %v22959_v0 = vmax.f32 %v22941_v26, 0.0  ;;  %v22933_v5 = vadd.f32 %v22932_v13, %v34066_v25  ;;  %v22944_v57 = vmax.f32 %v22882_v21, 0.0 }
0x1cea   : > { %v22967_v63 = vpack.c.bf16 %v22959_v0, %v22958_v11  ;;  %v22957_v36 = vmax.f32 %v22933_v5, 0.0  ;;  %v22960_v54 = vpack.c.bf16 %v22945_v61, %v22944_v57  ;;  %v34080_v0 = vld [vmem:[#allocation272_spill] sm:$0xff] }
0x1cec   : > { %v22966_v37 = vpack.c.bf16 %v22957_v36, %v22956_v7  ;;  %26451 = vmatprep.subr.bf16.mxu0 %v22967_v63 }
0x1ced   : > { %26452 = vmatpush3.bf16.msra.mxu0 %v22967_v63 }
0x1cee   : > { %26453 = vmatprep.subr.bf16.mxu0 %v22966_v37 }
0x1cf1   : > { %26454 = vmatpush3.bf16.msra.mxu0 %v22966_v37 }
0x1cf2   : > { %26455 = vmatprep.subr.bf16.mxu0 %v22965_v47 }
0x1cf5   : > { %26456 = vmatpush3.bf16.msra.mxu0 %v22965_v47 }
0x1cf6   : > { %26457 = vmatprep.subr.bf16.mxu0 %v22964_v31 }
0x1cf9   : > { %26458 = vmatpush3.bf16.msra.mxu0 %v22964_v31 }
0x1cfa   : > { %26459 = vmatprep.subr.bf16.mxu0 %v22963_v3 }
0x1cfd   : > { %26460 = vmatpush3.bf16.msra.mxu0 %v22963_v3 }
0x1cfe   : > { %26461 = vmatprep.subr.bf16.mxu0 %v22962_v1 }
0x1d01   : > { %26462 = vmatpush3.bf16.msra.mxu0 %v22962_v1 }
0x1d02   : > { %26463 = vmatprep.subr.bf16.mxu0 %v22961_v52 }
0x1d05   : > { %26464 = vmatpush3.bf16.msra.mxu0 %v22961_v52 }
0x1d06   : > { %26465 = vmatprep.subr.bf16.mxu0 %v22960_v54 }
0x1d09   : > { %26466 = vmatpush3.bf16.msra.mxu0 %v22960_v54 }
0x1d0c   : > { %26468 = vmatmul.mubr.bf16.vlgmr.msra.gmra.mxu0 %v27228_v53 }
0x1dcc   : > { %v26469_v16 = vpop.f32.mrf.mxu0 }
0x1dcd   : > { %v23011_v25 = vadd.f32 %v26469_v16, %v34080_v0 }
0x1dce   : > { %v23002_v24 = vpop.f32.mrf.mxu0 }
0x1dcf   : > { %v23003_v30 = vadd.f32 %v23002_v24, %v34078_v59 }
0x1dd0   : > { %v26470_v26 = vpop.f32.mrf.mxu0 }
0x1dd1   : > { %v23014_v39 = vadd.f32 %v26470_v26, %v34081_v22 }
0x1dd2   : > { %v23005_v13 = vpop.f32.mrf.mxu0 }
0x1dd3   : > { %v23006_v11 = vadd.f32 %v23005_v13, %v34079_v42 }
0x1dd5   : > { %v23017_v5 = vadd.f32 %v23006_v11, %v23003_v30 }
0x1dd7   : > { %v23018_v7 = vadd.f32 %v23017_v5, %v23011_v25 }
0x1dd9   : > { %v23019_v63 = vadd.f32 %v23018_v7, %v23014_v39 }
0x1ddb   : > { %v23020_v36 = vrot.slane %v23019_v63, 4 }
0x1ddd   : > { %v23021_v40 = vadd.f32 %v23020_v36, %v23019_v63 }
0x1ddf   : > { %v23022_v18 = vrot.slane %v23021_v40, 2 }
0x1de1   : > { %v23023_v23 = vadd.f32 %v23022_v18, %v23021_v40 }
0x1de3   : > { %v23024_v37 = vrot.slane %v23023_v23, 1 }
0x1de5   : > { %v23025_v12 = vadd.f32 %v23024_v37, %v23023_v23 }
0x1de7   : > { %v23026_v14 = vmul.f32 0.03125, %v23025_v12 }
0x1de9   : > { %v23027_v49 = vsub.f32 %v23003_v30, %v23026_v14  ;;  %v23028_v45 = vsub.f32 %v23006_v11, %v23026_v14  ;;  %v23029_v50 = vsub.f32 %v23011_v25, %v23026_v14  ;;  %v23030_v47 = vsub.f32 %v23014_v39, %v23026_v14 }
0x1deb   : > { %v23031_v44 = vmul.f32 %v23027_v49, %v23027_v49  ;;  %v23032_v56 = vmul.f32 %v23028_v45, %v23028_v45  ;;  %v23033_v33 = vmul.f32 %v23029_v50, %v23029_v50  ;;  %v23034_v28 = vmul.f32 %v23030_v47, %v23030_v47 }
0x1ded   : > { %v23035_v27 = vadd.f32 %v23032_v56, %v23031_v44 }
0x1def   : > { %v23036_v58 = vadd.f32 %v23035_v27, %v23033_v33 }
0x1df1   : > { %v23037_v41 = vadd.f32 %v23036_v58, %v23034_v28 }
0x1df3   : > { %v23038_v31 = vrot.slane %v23037_v41, 4 }
0x1df5   : > { %v23039_v48 = vadd.f32 %v23038_v31, %v23037_v41 }
0x1df7   : > { %v23040_v35 = vrot.slane %v23039_v48, 2 }
0x1df9   : > { %v23041_v32 = vadd.f32 %v23040_v35, %v23039_v48 }
0x1dfb   : > { %v23042_v20 = vrot.slane %v23041_v32, 1 }
0x1dfd   : > { %v23043_v17 = vadd.f32 %v23042_v20, %v23041_v32 }
0x1dff   : > { %v23044_v3 = vmul.f32 0.03125, %v23043_v17 }
0x1e01   : > { %v23045_v15 = vadd.f32 1e-05, %v23044_v3 }
0x1e03   : > { %27213 = vrsqrt.f32 %v23045_v15 }
0x1e10   : > { %v27214_v2 = vpop.eup %27213 }
0x1e11   : > { %v23047_v9 = vmul.f32 %v27214_v2, %v23027_v49  ;;  %v23048_v19 = vmul.f32 %v27214_v2, %v23028_v45  ;;  %v23049_v43 = vmul.f32 %v27214_v2, %v23029_v50  ;;  %v23050_v8 = vmul.f32 %v27214_v2, %v23030_v47 }
0x1e13   : > { %v23051_v29 = vmul.f32 %v23047_v9, %v34057_v46  ;;  %v23052_v1 = vmul.f32 %v23048_v19, %v34054_v6  ;;  %v23053_v34 = vmul.f32 %v23049_v43, %v34055_v51  ;;  %v23054_v10 = vmul.f32 %v23050_v8, %v34056_v38 }
0x1e15   : > { %v23055_v21 = vadd.f32 %v23051_v29, %v34060_v60  ;;  %v23056_v52 = vadd.f32 %v23052_v1, %v34061_v62  ;;  %v23057_v61 = vadd.f32 %v23053_v34, %v34058_v55  ;;  %v23058_v46 = vadd.f32 %v23054_v10, %v34059_v4 }
0x1e17   : > { %23059 = vst [vmem:[%s345_s6] sm:$0xff] %v23055_v21  ;;  %23060 = vst [vmem:[%s345_s6 + $0x8] sm:$0xff] %v23056_v52 }
0x1e18   : > { %23061 = vst [vmem:[%s345_s6 + $0x10] sm:$0xff] %v23057_v61  ;;  %23062 = vst [vmem:[%s345_s6 + $0x18] sm:$0xff] %v23058_v46 }
0x1e19   : > { %27242 = shalt.err (!%p27239_p5)
}
0x1e1a   : > { %s27243_s12 = scalar_lea.hbm %s32729_s17, 512  ;;  %s27247_s15 = scalar_lea.hbm %s32781_s5, 1024 }
0x1e1b   : > { %p27244_p7 = scmp.ne.s32.totalorder %s32729_s17, %s27243_s12  ;;  %p27248_p12 = scmp.lt.s32.totalorder %s32729_s17, %s32781_s5 }
0x1e1c   : > { %p27249_p13 = scmp.lt.s32.totalorder %s27247_s15, %s27243_s12 }
0x1e1d   : > { %p27245_p10 = pnand %p27244_p7, %p27373_p6 }
0x1e1e   : > { %p27250_p0 = por %p27249_p13, %p27248_p12 }
0x1e1f   : > { %p27246_p11 = pneg %p27245_p10 }
0x1e21   : > { %p27251_p1 = pnand %p27250_p0, %p27246_p11 }
0x1e23   : > { %27254 = shalt.err (!%p27251_p1)
}
0x1e24   : > { %s27298_s8 = smov 128   ;;  %s27299_s28 = smov 256  }
0x1e25   : > { %s27300_s9 = smov 8  }
0x1e26   : > { %26471 = dma.vmem_to_hbm [thread:$0]  (%p27373_p6), %s32720_s7, 512, %s32729_s17, %s23064_s22, %s27298_s8, %s27299_s28, %s27300_s9  }
0x1e27 PF: > { %s23091_s23 = sand.u32 1, %s27277_s18   ;;  %p26474_p2 = pnand %p23164_p9, %p27377_p8 }
0x1e28   : > { %s23092_s25 = scalar_lea.sflag [#allocation5], %s23091_s23 }
0x1e29   : > { %p26475_p3 = pneg %p26474_p2 }
0x1e2b   : > { %27272 = dma.done.wait (%p26475_p3), %s23092_s25, 512  }
0x1e2c   : > { %27274 = vsyncadd (%p26475_p3), %s23092_s25, 4294966784  ;;  %p15_p4 = scmp.ge.s32.totalorder %s27354_s24, 4   ;;  %s34082_s18 = smov %s27281_s19 }
0x1e2d   : > { %s34083_s19 = smov %s27285_s20  ;;  %s34084_s20 = smov %s27367_s27 }
0x1e2e   : > { %s34085_s21 = smov %s27354_s24  ;;  %17 = sbr.rel (!%p15_p4) target bundleno = 3 (0x3), region = 167 }
0x1e33   :  { %23097 = vsyncpa [#allocation5], 1 }
0x1e34   :  { %23099 = vsyncpa [#allocation5 + $0x1], 1 }

</bundles_post_ra>
